<compile_context>
chip_gen: v5e
topology: v5e:2x2
jax: 0.10.0
libtpu: 0.0.40
codegen_flags: <defaults>
</compile_context>

<pallas_src>
import math

import jax
import jax.numpy as jnp
from jax.experimental import pallas as pl
from jax.experimental.pallas import tpu as pltpu

NH = 256         # hidden width hard-coded in the torch module
NZ = 64          # opt.nz
BN_EPS = 1e-5
LANE = 128
TM_MAX = 512     # rows per grid step; sized for v7x (64 MiB VMEM) headroom
NEG_BIG = -1e30  # masks padded logits columns inside the fused head kernel


# ---------------------------------------------------------------------------
# Pallas kernels
# ---------------------------------------------------------------------------

def _stn_kernel(x_ref, w1_ref, t1_ref, w2_ref, t2_ref, w3_ref, t3_ref, o_ref):
    """Fused fc_stn: Leaky(x@W1+t1) -> Leaky(h@W2'+t2') -> h@W3+t3 (BN folded)."""
    h = jnp.dot(x_ref[...], w1_ref[...],
                preferred_element_type=jnp.float32) + t1_ref[...]
    h = jnp.where(h > 0.0, h, 0.2 * h)                      # LeakyReLU(0.2)
    h = jnp.dot(h.astype(jnp.bfloat16), w2_ref[...],
                preferred_element_type=jnp.float32) + t2_ref[...]
    h = jnp.where(h > 0.0, h, 0.2 * h)
    o_ref[...] = jnp.dot(h.astype(jnp.bfloat16), w3_ref[...],
                         preferred_element_type=jnp.float32) + t3_ref[...]


def _conv_mm_kernel(x_ref, w_ref, t_ref, o_ref):
    """relu(cols @ W' + t') -- conv (im2col) + folded eval-mode BN + ReLU."""
    y = jnp.dot(x_ref[...], w_ref[...], preferred_element_type=jnp.float32)
    o_ref[...] = jnp.maximum(y + t_ref[...], 0.0).astype(o_ref.dtype)


def _head_kernel(x_ref, wz_ref, tz_ref, w1_ref, t1_ref, w2_ref, t2_ref,
                 wf_ref, tf_ref, logp_ref, z_ref):
    """conv4 (full 4x4 window) -> fc_pred (1x1 convs + Linear) -> log_softmax."""
    z = jnp.maximum(jnp.dot(x_ref[...], wz_ref[...],
                            preferred_element_type=jnp.float32) + tz_ref[...], 0.0)
    z_ref[...] = z
    h = jnp.maximum(jnp.dot(z.astype(jnp.bfloat16), w1_ref[...],
                            preferred_element_type=jnp.float32) + t1_ref[...], 0.0)
    h = jnp.maximum(jnp.dot(h.astype(jnp.bfloat16), w2_ref[...],
                            preferred_element_type=jnp.float32) + t2_ref[...], 0.0)
    y = jnp.dot(h.astype(jnp.bfloat16), wf_ref[...],
                preferred_element_type=jnp.float32) + tf_ref[...]
    # padded logit columns carry a -1e30 bias -> exp() == 0, so the reduction
    # below is exactly a 10-way log_softmax.
    m = jnp.max(y, axis=-1, keepdims=True)
    s = y - m
    lse = jnp.log(jnp.sum(jnp.exp(s), axis=-1, keepdims=True))
    logp_ref[...] = s - lse


# ---------------------------------------------------------------------------
# pallas_call wrappers
# ---------------------------------------------------------------------------

def _round_up(n, m):
    return ((n + m - 1) // m) * m


def _m_tiling(m):
    """Pad rows to bf16 sublane granularity; tile at TM_MAX for large batch."""
    mp = _round_up(max(m, 1), 16)
    if mp <= TM_MAX:
        return mp, mp
    return _round_up(mp, TM_MAX), TM_MAX


def _pad2d(a, rows, cols):
    return jnp.pad(a, ((0, rows - a.shape[0]), (0, cols - a.shape[1])))


def conv_matmul(cols, w, t):
    """M-tiled fused matmul: relu(cols @ w + t). cols bf16 (M,K), w bf16 (K,N)."""
    m, k = cols.shape
    n = w.shape[1]
    mp, tm = _m_tiling(m)
    xp = jnp.pad(cols, ((0, mp - m), (0, 0)))
    cost = pl.CostEstimate(flops=2 * mp * k * n, transcendentals=0,
                           bytes_accessed=2 * (mp * k + k * n + mp * n))
    out = pl.pallas_call(
        _conv_mm_kernel,
        out_shape=jax.ShapeDtypeStruct((mp, n), jnp.bfloat16),
        grid=(mp // tm,),
        in_specs=[pl.BlockSpec((tm, k), lambda i: (i, 0)),
                  pl.BlockSpec((k, n), lambda i: (0, 0)),
                  pl.BlockSpec((1, n), lambda i: (0, 0))],
        out_specs=pl.BlockSpec((tm, n), lambda i: (i, 0)),
        compiler_params=pltpu.CompilerParams(dimension_semantics=("parallel",)),
        cost_estimate=cost,
    )(xp, w, t)
    return out[:m]


def stn_fused(feat, p):
    """feat: (B, 785) f32 -> A_vec (B, 3) f32 with one fused pallas_call."""
    b = feat.shape[0]
    kp = p["stn_w1"].shape[0]
    mp, tm = _m_tiling(b)
    xp = jnp.zeros((mp, kp), jnp.bfloat16).at[:b, :feat.shape[1]].set(
        feat.astype(jnp.bfloat16))
    out = pl.pallas_call(
        _stn_kernel,
        out_shape=jax.ShapeDtypeStruct((mp, LANE), jnp.float32),
        grid=(mp // tm,),
        in_specs=[pl.BlockSpec((tm, kp), lambda i: (i, 0)),
                  pl.BlockSpec((kp, NH), lambda i: (0, 0)),
                  pl.BlockSpec((1, NH), lambda i: (0, 0)),
                  pl.BlockSpec((NH, NH), lambda i: (0, 0)),
                  pl.BlockSpec((1, NH), lambda i: (0, 0)),
                  pl.BlockSpec((NH, LANE), lambda i: (0, 0)),
                  pl.BlockSpec((1, LANE), lambda i: (0, 0))],
        out_specs=pl.BlockSpec((tm, LANE), lambda i: (i, 0)),
        compiler_params=pltpu.CompilerParams(dimension_semantics=("parallel",)),
    )(xp, p["stn_w1"], p["stn_t1"], p["stn_w2"], p["stn_t2"],
      p["stn_w3"], p["stn_t3"])
    return out[:b, :3]


def head_fused(zc, p):
    """zc: (B, 4096) bf16 -> (log_softmax(y) (B,10) f32, z (B,64) f32)."""
    b, k = zc.shape
    mp, tm = _m_tiling(b)
    xp = jnp.pad(zc, ((0, mp - b), (0, 0)))
    cost = pl.CostEstimate(
        flops=2 * mp * (k * LANE + LANE * NH + NH * NH + NH * LANE),
        transcendentals=mp * LANE,
        bytes_accessed=2 * (mp * k + k * LANE + LANE * NH + NH * NH + NH * LANE)
        + 8 * mp * LANE)
    logp, z = pl.pallas_call(
        _head_kernel,
        out_shape=(jax.ShapeDtypeStruct((mp, LANE), jnp.float32),
                   jax.ShapeDtypeStruct((mp, LANE), jnp.float32)),
        grid=(mp // tm,),
        in_specs=[pl.BlockSpec((tm, k), lambda i: (i, 0)),
                  pl.BlockSpec((k, LANE), lambda i: (0, 0)),
                  pl.BlockSpec((1, LANE), lambda i: (0, 0)),
                  pl.BlockSpec((LANE, NH), lambda i: (0, 0)),
                  pl.BlockSpec((1, NH), lambda i: (0, 0)),
                  pl.BlockSpec((NH, NH), lambda i: (0, 0)),
                  pl.BlockSpec((1, NH), lambda i: (0, 0)),
                  pl.BlockSpec((NH, LANE), lambda i: (0, 0)),
                  pl.BlockSpec((1, LANE), lambda i: (0, 0))],
        out_specs=(pl.BlockSpec((tm, LANE), lambda i: (i, 0)),
                   pl.BlockSpec((tm, LANE), lambda i: (i, 0))),
        compiler_params=pltpu.CompilerParams(dimension_semantics=("parallel",)),
        cost_estimate=cost,
    )(xp, p["c4_w"], p["c4_t"], p["p1_w"], p["p1_t"],
      p["p2_w"], p["p2_t"], p["fc_w"], p["fc_t"])
    return logp[:b, :10], z[:b, :NZ]


# ---------------------------------------------------------------------------
# Plain-JAX glue: im2col, STN eigenvector / affine grid sample
# ---------------------------------------------------------------------------

def im2col(x, k, stride, pad):
    """x: (B, H, W, C) NHWC -> ((B, Ho, Wo, k*k*C), Ho, Wo); patch order (kh, kw, c)."""
    B, H, W, C = x.shape
    xpad = jnp.pad(x, ((0, 0), (pad, pad), (pad, pad), (0, 0)))
    Ho = (H + 2 * pad - k) // stride + 1
    Wo = (W + 2 * pad - k) // stride + 1
    chunks = []
    for di in range(k):
        for dj in range(k):
            chunks.append(
                xpad[:, di:di + (Ho - 1) * stride + 1:stride,
                        dj:dj + (Wo - 1) * stride + 1:stride, :])
    return jnp.concatenate(chunks, axis=-1), Ho, Wo


def _smallest_eigvec_2x2(A_vec):
    """Unit eigenvector of [[a,b],[b,c]] for the smallest eigenvalue (torch.symeig
    convention: ascending eigenvalues, eigenvectors as columns, sign arbitrary)."""
    a, b, c = A_vec[:, 0], A_vec[:, 1], A_vec[:, 2]
    lam = 0.5 * (a + c) - jnp.sqrt(0.25 * (a - c) ** 2 + b * b)
    v0, v1 = b, lam - a
    degenerate = jnp.abs(b) < 1e-12
    v0 = jnp.where(degenerate, jnp.where(a <= c, 1.0, 0.0), v0)
    v1 = jnp.where(degenerate, jnp.where(a <= c, 0.0, 1.0), v1)
    norm = jnp.maximum(jnp.sqrt(v0 * v0 + v1 * v1), 1e-20)
    return v0 / norm, v1 / norm


def _affine_grid_sample(x, tcos, tsin):
    """F.affine_grid + F.grid_sample (bilinear, zero pad, align_corners=False)
    for theta = [[cos, sin, 0], [-sin, cos, 0]].  x: (B, 1, H, W) NCHW."""
    # TODO(synk): data-dependent bilinear gather kept in plain JAX (no clean Pallas gather).
    B, C, H, W = x.shape
    ys = (2.0 * jnp.arange(H, dtype=jnp.float32) + 1.0) / H - 1.0
    xs = (2.0 * jnp.arange(W, dtype=jnp.float32) + 1.0) / W - 1.0
    xt, yt = jnp.meshgrid(xs, ys)
    cos = tcos[:, None, None]
    sin = tsin[:, None, None]
    xsrc = cos * xt[None] + sin * yt[None]
    ysrc = -sin * xt[None] + cos * yt[None]
    ix = ((xsrc + 1.0) * W - 1.0) / 2.0
    iy = ((ysrc + 1.0) * H - 1.0) / 2.0
    ix0 = jnp.floor(ix)
    iy0 = jnp.floor(iy)
    wx1 = ix - ix0
    wy1 = iy - iy0
    wx0 = 1.0 - wx1
    wy0 = 1.0 - wy1
    img = x[:, 0]

    def gather(yy, xx):
        valid = (yy >= 0) & (yy < H) & (xx >= 0) & (xx < W)
        yyc = jnp.clip(yy, 0, H - 1)
        xxc = jnp.clip(xx, 0, W - 1)
        idx = (yyc * W + xxc).reshape(B, H * W)
        vals = jnp.take_along_axis(img.reshape(B, H * W), idx, axis=1).reshape(B, H, W)
        return jnp.where(valid, vals, 0.0)

    ix0i = ix0.astype(jnp.int32)
    iy0i = iy0.astype(jnp.int32)
    out = (gather(iy0i, ix0i) * (wy0 * wx0) +
           gather(iy0i, ix0i + 1) * (wy0 * wx1) +
           gather(iy0i + 1, ix0i) * (wy1 * wx0) +
           gather(iy0i + 1, ix0i + 1) * (wy1 * wx1))
    return out[:, None]


# ---------------------------------------------------------------------------
# Parameters: synthetic, BN folded + pre-padded to kernel layout at init time
# ---------------------------------------------------------------------------

def _linear_init(key, fan_in, fan_out):
    kw, kb = jax.random.split(key)
    bound = 1.0 / math.sqrt(fan_in)
    w = jax.random.uniform(kw, (fan_in, fan_out), jnp.float32, -bound, bound)
    b = jax.random.uniform(kb, (fan_out,), jnp.float32, -bound, bound)
    return w, b


def _bn_fold(key, n):
    """Synthetic deterministic eval-mode BatchNorm -> (scale, shift)."""
    k1, k2, k3, k4 = jax.random.split(key, 4)
    gamma = 1.0 + 0.1 * jax.random.normal(k1, (n,), jnp.float32)
    beta = 0.1 * jax.random.normal(k2, (n,), jnp.float32)
    mean = 0.1 * jax.random.normal(k3, (n,), jnp.float32)
    var = 0.5 + jax.random.uniform(k4, (n,), jnp.float32)
    scale = gamma / jnp.sqrt(var + BN_EPS)
    shift = beta - mean * scale
    return scale, shift


def init_params(key):
    keys = jax.random.split(key, 16)
    p = {}

    def fold(w, b, scale=None, shift=None):
        if scale is not None:
            w = w * scale[None, :]          # BN scale folded into weight columns
            b = b * scale + shift           # bias folded into the shift
        return w, b

    # fc_stn: Linear(785,256) -> LReLU -> Linear(256,256) -> BN -> LReLU -> Linear(256,3)
    w, b = _linear_init(keys[0], 1 + 28 * 28, NH)
    p["stn_w1"] = _pad2d(w, _round_up(1 + 28 * 28, LANE), NH).astype(jnp.bfloat16)
    p["stn_t1"] = b.reshape(1, NH)
    w, b = fold(*_linear_init(keys[1], NH, NH), *_bn_fold(keys[2], NH))
    p["stn_w2"] = w.astype(jnp.bfloat16)
    p["stn_t2"] = b.reshape(1, NH)
    w, b = _linear_init(keys[3], NH, 3)
    p["stn_w3"] = _pad2d(w, NH, LANE).astype(jnp.bfloat16)
    p["stn_t3"] = _pad2d(b.reshape(1, 3), 1, LANE)
    # conv stack; weights stored in im2col matmul layout (kh*kw*Cin, Cout), BN folded
    w, b = fold(*_linear_init(keys[4], 3 * 3 * 1, NH), *_bn_fold(keys[5], NH))
    p["c1_w"] = _pad2d(w, LANE, NH).astype(jnp.bfloat16)
    p["c1_t"] = b.reshape(1, NH)
    w, b = fold(*_linear_init(keys[6], 3 * 3 * NH, NH), *_bn_fold(keys[7], NH))
    p["c2_w"] = w.astype(jnp.bfloat16)
    p["c2_t"] = b.reshape(1, NH)
    w, b = fold(*_linear_init(keys[8], 3 * 3 * NH, NH), *_bn_fold(keys[9], NH))
    p["c3_w"] = w.astype(jnp.bfloat16)
    p["c3_t"] = b.reshape(1, NH)
    # head: conv4 (4x4 full window) + fc_pred (1x1 nz->nh, 1x1 nh->nh, Linear nh->10)
    w, b = _linear_init(keys[10], 4 * 4 * NH, NZ)
    p["c4_w"] = _pad2d(w, 4 * 4 * NH, LANE).astype(jnp.bfloat16)
    p["c4_t"] = _pad2d(b.reshape(1, NZ), 1, LANE)
    w, b = fold(*_linear_init(keys[11], NZ, NH), *_bn_fold(keys[12], NH))
    p["p1_w"] = _pad2d(w, LANE, NH).astype(jnp.bfloat16)
    p["p1_t"] = b.reshape(1, NH)
    w, b = fold(*_linear_init(keys[13], NH, NH), *_bn_fold(keys[14], NH))
    p["p2_w"] = w.astype(jnp.bfloat16)
    p["p2_t"] = b.reshape(1, NH)
    w, b = _linear_init(keys[15], NH, 10)
    p["fc_w"] = _pad2d(w, NH, LANE).astype(jnp.bfloat16)
    p["fc_t"] = jnp.full((1, LANE), NEG_BIG, jnp.float32).at[0, :10].set(b)
    return p


# ---------------------------------------------------------------------------
# EncoderSTN.forward
# ---------------------------------------------------------------------------

def encoder_stn_forward(p, x, u):
    """x: (B, 1, 28, 28) f32 NCHW, u: (B,) f32. Returns (log_softmax(y), x_rot, z)."""
    B = x.shape[0]

    # ---- STN regressor (single fused kernel) + eigenvector -> rotation ----
    feat = jnp.concatenate([u[:, None], x.reshape(B, 28 * 28)], axis=1)
    A_vec = stn_fused(feat, p)
    tcos, tsin = _smallest_eigvec_2x2(A_vec)
    _theta_angle = jnp.arctan2(tsin, tcos)        # mirrors self.theta_angle (unused)
    xr = _affine_grid_sample(x, tcos, tsin)       # (B, 1, 28, 28) f32

    # ---- conv encoder (NHWC bf16 activations, fused conv+BN+ReLU matmuls) ----
    # TODO(synk): im2col is still plain-JAX glue; an in-kernel 9-tap accumulation
    # (phase-split input) would remove the 9x HBM duplication of activations.
    h = jnp.transpose(xr, (0, 2, 3, 1)).astype(jnp.bfloat16)
    cols, ho, wo = im2col(h, 3, 2, 1)                                    # 28 -> 14
    cols = jnp.pad(cols.reshape(B * ho * wo, 9), ((0, 0), (0, LANE - 9)))
    h = conv_matmul(cols, p["c1_w"], p["c1_t"]).reshape(B, ho, wo, NH)
    cols, ho, wo = im2col(h, 3, 2, 1)                                    # 14 -> 7
    h = conv_matmul(cols.reshape(B * ho * wo, 9 * NH),
                    p["c2_w"], p["c2_t"]).reshape(B, ho, wo, NH)
    cols, ho, wo = im2col(h, 3, 2, 1)                                    # 7 -> 4
    h = conv_matmul(cols.reshape(B * ho * wo, 9 * NH),
                    p["c3_w"], p["c3_t"]).reshape(B, ho, wo, NH)

    # ---- conv4 + fc_pred + log_softmax in one fused kernel ----
    logp, z = head_fused(h.reshape(B, 4 * 4 * NH), p)
    return logp, xr, z.reshape(B, NZ, 1, 1)


if __name__ == "__main__":
    key = jax.random.PRNGKey(0)
    kx, ku, kp = jax.random.split(key, 3)
    B = 2
    x = jax.random.normal(kx, (B, 1, 28, 28), jnp.float32)
    u = jax.random.uniform(ku, (B,), jnp.float32, -1.0, 1.0)
    params = init_params(kp)

    fwd = jax.jit(encoder_stn_forward)
    logp, xr, z = jax.block_until_ready(fwd(params, x, u))

    assert logp.shape == (B, 10)
    assert xr.shape == (B, 1, 28, 28)
    assert z.shape == (B, NZ, 1, 1)
    assert bool(jnp.all(jnp.isfinite(logp)))
    # rows of log_softmax must sum (in prob space) to 1
    assert bool(jnp.allclose(jnp.sum(jnp.exp(logp), axis=1), 1.0, atol=1e-4))
    print("KERNEL_OK")
</pallas_src>

<mosaic_0001>
module attributes {stable_mosaic.version = 11 : i64} {
  func.func @_stn_kernel(%arg0: i32, %arg1: memref<16x896xbf16, #tpu.memory_space<vmem>>, %arg2: memref<896x256xbf16, #tpu.memory_space<vmem>>, %arg3: memref<1x256xf32, #tpu.memory_space<vmem>>, %arg4: memref<256x256xbf16, #tpu.memory_space<vmem>>, %arg5: memref<1x256xf32, #tpu.memory_space<vmem>>, %arg6: memref<256x128xbf16, #tpu.memory_space<vmem>>, %arg7: memref<1x128xf32, #tpu.memory_space<vmem>>, %arg8: memref<16x128xf32, #tpu.memory_space<vmem>>) attributes {dimension_semantics = [#tpu.dimension_semantics<parallel>], iteration_bounds = array<i64: 1>, scalar_prefetch = 0 : i64, scratch_operands = 0 : i64, tpu.core_type = #tpu.core_type<tc>, window_params = [{transform_indices = @transform_0, window_bounds = array<i64: 16, 896>}, {pipeline_mode = #tpu.pipeline_mode<synchronous>, transform_indices = @transform_1, window_bounds = array<i64: 896, 256>}, {pipeline_mode = #tpu.pipeline_mode<synchronous>, transform_indices = @transform_2, window_bounds = array<i64: 1, 256>}, {pipeline_mode = #tpu.pipeline_mode<synchronous>, transform_indices = @transform_3, window_bounds = array<i64: 256, 256>}, {pipeline_mode = #tpu.pipeline_mode<synchronous>, transform_indices = @transform_4, window_bounds = array<i64: 1, 256>}, {pipeline_mode = #tpu.pipeline_mode<synchronous>, transform_indices = @transform_5, window_bounds = array<i64: 256, 128>}, {pipeline_mode = #tpu.pipeline_mode<synchronous>, transform_indices = @transform_6, window_bounds = array<i64: 1, 128>}, {transform_indices = @transform_7, window_bounds = array<i64: 16, 128>}]} {
    %c0 = arith.constant 0 : index
    %c0_0 = arith.constant 0 : index
    %0 = vector.load %arg1[%c0, %c0_0] : memref<16x896xbf16, #tpu.memory_space<vmem>>, vector<16x896xbf16>
    %c0_1 = arith.constant 0 : index
    %c0_2 = arith.constant 0 : index
    %1 = vector.load %arg2[%c0_1, %c0_2] : memref<896x256xbf16, #tpu.memory_space<vmem>>, vector<896x256xbf16>
    %cst = arith.constant dense<0.000000e+00> : vector<16x256xf32>
    %2 = tpu.matmul %0, %1, %cst {dimension_numbers = #tpu.dot_dimension_numbers<[1], [0], [0], [1], [0, 0, 1, 1], [], []>} : vector<16x896xbf16>, vector<896x256xbf16>, vector<16x256xf32> -> vector<16x256xf32>
    %c0_3 = arith.constant 0 : index
    %c0_4 = arith.constant 0 : index
    %3 = vector.load %arg3[%c0_3, %c0_4] : memref<1x256xf32, #tpu.memory_space<vmem>>, vector<1x256xf32>
    %4 = vector.broadcast %3 : vector<1x256xf32> to vector<16x256xf32>
    %5 = arith.addf %2, %4 : vector<16x256xf32>
    %cst_5 = arith.constant 0.000000e+00 : f32
    %6 = vector.broadcast %cst_5 : f32 to vector<16x256xf32>
    %7 = arith.cmpf ogt, %5, %6 : vector<16x256xf32>
    %cst_6 = arith.constant 2.000000e-01 : f32
    %8 = vector.broadcast %cst_6 : f32 to vector<16x256xf32>
    %9 = arith.mulf %8, %5 : vector<16x256xf32>
    %10 = arith.select %7, %5, %9 : vector<16x256xi1>, vector<16x256xf32>
    %11 = arith.truncf %10 : vector<16x256xf32> to vector<16x256xbf16>
    %c0_7 = arith.constant 0 : index
    %c0_8 = arith.constant 0 : index
    %12 = vector.load %arg4[%c0_7, %c0_8] : memref<256x256xbf16, #tpu.memory_space<vmem>>, vector<256x256xbf16>
    %cst_9 = arith.constant dense<0.000000e+00> : vector<16x256xf32>
    %13 = tpu.matmul %11, %12, %cst_9 {dimension_numbers = #tpu.dot_dimension_numbers<[1], [0], [0], [1], [0, 0, 1, 1], [], []>} : vector<16x256xbf16>, vector<256x256xbf16>, vector<16x256xf32> -> vector<16x256xf32>
    %c0_10 = arith.constant 0 : index
    %c0_11 = arith.constant 0 : index
    %14 = vector.load %arg5[%c0_10, %c0_11] : memref<1x256xf32, #tpu.memory_space<vmem>>, vector<1x256xf32>
    %15 = vector.broadcast %14 : vector<1x256xf32> to vector<16x256xf32>
    %16 = arith.addf %13, %15 : vector<16x256xf32>
    %cst_12 = arith.constant 0.000000e+00 : f32
    %17 = vector.broadcast %cst_12 : f32 to vector<16x256xf32>
    %18 = arith.cmpf ogt, %16, %17 : vector<16x256xf32>
    %cst_13 = arith.constant 2.000000e-01 : f32
    %19 = vector.broadcast %cst_13 : f32 to vector<16x256xf32>
    %20 = arith.mulf %19, %16 : vector<16x256xf32>
    %21 = arith.select %18, %16, %20 : vector<16x256xi1>, vector<16x256xf32>
    %22 = arith.truncf %21 : vector<16x256xf32> to vector<16x256xbf16>
    %c0_14 = arith.constant 0 : index
    %c0_15 = arith.constant 0 : index
    %23 = vector.load %arg6[%c0_14, %c0_15] : memref<256x128xbf16, #tpu.memory_space<vmem>>, vector<256x128xbf16>
    %cst_16 = arith.constant dense<0.000000e+00> : vector<16x128xf32>
    %24 = tpu.matmul %22, %23, %cst_16 {dimension_numbers = #tpu.dot_dimension_numbers<[1], [0], [0], [1], [0, 0, 1, 1], [], []>} : vector<16x256xbf16>, vector<256x128xbf16>, vector<16x128xf32> -> vector<16x128xf32>
    %c0_17 = arith.constant 0 : index
    %c0_18 = arith.constant 0 : index
    %25 = vector.load %arg7[%c0_17, %c0_18] : memref<1x128xf32, #tpu.memory_space<vmem>>, vector<1x128xf32>
    %26 = vector.broadcast %25 : vector<1x128xf32> to vector<16x128xf32>
    %27 = arith.addf %24, %26 : vector<16x128xf32>
    %c0_19 = arith.constant 0 : index
    %c0_20 = arith.constant 0 : index
    %28 = vector.load %arg8[%c0_19, %c0_20] : memref<16x128xf32, #tpu.memory_space<vmem>>, vector<16x128xf32>
    tpu.vector_store %arg8[%c0_19, %c0_20], %27 {strides = array<i32>} : memref<16x128xf32, #tpu.memory_space<vmem>>, vector<16x128xf32>,
    return
  }
  func.func @transform_0(%arg0: i32) -> (i32, i32) {
    %c0_i32 = arith.constant 0 : i32
    %c0_i32_0 = arith.constant 0 : i32
    return %arg0, %c0_i32 : i32, i32
  }
  func.func @transform_1(%arg0: i32) -> (i32, i32) {
    %c0_i32 = arith.constant 0 : i32
    %c0_i32_0 = arith.constant 0 : i32
    %c0_i32_1 = arith.constant 0 : i32
    return %c0_i32, %c0_i32_0 : i32, i32
  }
  func.func @transform_2(%arg0: i32) -> (i32, i32) {
    %c0_i32 = arith.constant 0 : i32
    %c0_i32_0 = arith.constant 0 : i32
    %c0_i32_1 = arith.constant 0 : i32
    return %c0_i32, %c0_i32_0 : i32, i32
  }
  func.func @transform_3(%arg0: i32) -> (i32, i32) {
    %c0_i32 = arith.constant 0 : i32
    %c0_i32_0 = arith.constant 0 : i32
    %c0_i32_1 = arith.constant 0 : i32
    return %c0_i32, %c0_i32_0 : i32, i32
  }
  func.func @transform_4(%arg0: i32) -> (i32, i32) {
    %c0_i32 = arith.constant 0 : i32
    %c0_i32_0 = arith.constant 0 : i32
    %c0_i32_1 = arith.constant 0 : i32
    return %c0_i32, %c0_i32_0 : i32, i32
  }
  func.func @transform_5(%arg0: i32) -> (i32, i32) {
    %c0_i32 = arith.constant 0 : i32
    %c0_i32_0 = arith.constant 0 : i32
    %c0_i32_1 = arith.constant 0 : i32
    return %c0_i32, %c0_i32_0 : i32, i32
  }
  func.func @transform_6(%arg0: i32) -> (i32, i32) {
    %c0_i32 = arith.constant 0 : i32
    %c0_i32_0 = arith.constant 0 : i32
    %c0_i32_1 = arith.constant 0 : i32
    return %c0_i32, %c0_i32_0 : i32, i32
  }
  func.func @transform_7(%arg0: i32) -> (i32, i32) {
    %c0_i32 = arith.constant 0 : i32
    %c0_i32_0 = arith.constant 0 : i32
    return %arg0, %c0_i32 : i32, i32
  }
}

module attributes {stable_mosaic.version = 11 : i64} {
  func.func @_conv_mm_kernel(%arg0: i32, %arg1: memref<400x128xbf16, #tpu.memory_space<vmem>>, %arg2: memref<128x256xbf16, #tpu.memory_space<vmem>>, %arg3: memref<1x256xf32, #tpu.memory_space<vmem>>, %arg4: memref<400x256xbf16, #tpu.memory_space<vmem>>) attributes {dimension_semantics = [#tpu.dimension_semantics<parallel>], iteration_bounds = array<i64: 1>, scalar_prefetch = 0 : i64, scratch_operands = 0 : i64, tpu.core_type = #tpu.core_type<tc>, window_params = [{transform_indices = @transform_0, window_bounds = array<i64: 400, 128>}, {pipeline_mode = #tpu.pipeline_mode<synchronous>, transform_indices = @transform_1, window_bounds = array<i64: 128, 256>}, {pipeline_mode = #tpu.pipeline_mode<synchronous>, transform_indices = @transform_2, window_bounds = array<i64: 1, 256>}, {transform_indices = @transform_3, window_bounds = array<i64: 400, 256>}]} {
    %c0 = arith.constant 0 : index
    %c0_0 = arith.constant 0 : index
    %0 = vector.load %arg1[%c0, %c0_0] : memref<400x128xbf16, #tpu.memory_space<vmem>>, vector<400x128xbf16>
    %c0_1 = arith.constant 0 : index
    %c0_2 = arith.constant 0 : index
    %1 = vector.load %arg2[%c0_1, %c0_2] : memref<128x256xbf16, #tpu.memory_space<vmem>>, vector<128x256xbf16>
    %cst = arith.constant dense<0.000000e+00> : vector<400x256xf32>
    %2 = tpu.matmul %0, %1, %cst {dimension_numbers = #tpu.dot_dimension_numbers<[1], [0], [0], [1], [0, 0, 1, 1], [], []>} : vector<400x128xbf16>, vector<128x256xbf16>, vector<400x256xf32> -> vector<400x256xf32>
    %c0_3 = arith.constant 0 : index
    %c0_4 = arith.constant 0 : index
    %3 = vector.load %arg3[%c0_3, %c0_4] : memref<1x256xf32, #tpu.memory_space<vmem>>, vector<1x256xf32>
    %4 = vector.broadcast %3 : vector<1x256xf32> to vector<400x256xf32>
    %5 = arith.addf %2, %4 : vector<400x256xf32>
    %cst_5 = arith.constant 0.000000e+00 : f32
    %6 = vector.broadcast %cst_5 : f32 to vector<400x256xf32>
    %7 = arith.maximumf %5, %6 : vector<400x256xf32>
    %8 = arith.truncf %7 : vector<400x256xf32> to vector<400x256xbf16>
    %c0_6 = arith.constant 0 : index
    %c0_7 = arith.constant 0 : index
    %9 = vector.load %arg4[%c0_6, %c0_7] : memref<400x256xbf16, #tpu.memory_space<vmem>>, vector<400x256xbf16>
    tpu.vector_store %arg4[%c0_6, %c0_7], %8 {strides = array<i32>} : memref<400x256xbf16, #tpu.memory_space<vmem>>, vector<400x256xbf16>,
    return
  }
  func.func @transform_0(%arg0: i32) -> (i32, i32) {
    %c0_i32 = arith.constant 0 : i32
    %c0_i32_0 = arith.constant 0 : i32
    return %arg0, %c0_i32 : i32, i32
  }
  func.func @transform_1(%arg0: i32) -> (i32, i32) {
    %c0_i32 = arith.constant 0 : i32
    %c0_i32_0 = arith.constant 0 : i32
    %c0_i32_1 = arith.constant 0 : i32
    return %c0_i32, %c0_i32_0 : i32, i32
  }
  func.func @transform_2(%arg0: i32) -> (i32, i32) {
    %c0_i32 = arith.constant 0 : i32
    %c0_i32_0 = arith.constant 0 : i32
    %c0_i32_1 = arith.constant 0 : i32
    return %c0_i32, %c0_i32_0 : i32, i32
  }
  func.func @transform_3(%arg0: i32) -> (i32, i32) {
    %c0_i32 = arith.constant 0 : i32
    %c0_i32_0 = arith.constant 0 : i32
    return %arg0, %c0_i32 : i32, i32
  }
}

module attributes {stable_mosaic.version = 11 : i64} {
  func.func @_conv_mm_kernel(%arg0: i32, %arg1: memref<112x2304xbf16, #tpu.memory_space<vmem>>, %arg2: memref<2304x256xbf16, #tpu.memory_space<vmem>>, %arg3: memref<1x256xf32, #tpu.memory_space<vmem>>, %arg4: memref<112x256xbf16, #tpu.memory_space<vmem>>) attributes {dimension_semantics = [#tpu.dimension_semantics<parallel>], iteration_bounds = array<i64: 1>, scalar_prefetch = 0 : i64, scratch_operands = 0 : i64, tpu.core_type = #tpu.core_type<tc>, window_params = [{transform_indices = @transform_0, window_bounds = array<i64: 112, 2304>}, {pipeline_mode = #tpu.pipeline_mode<synchronous>, transform_indices = @transform_1, window_bounds = array<i64: 2304, 256>}, {pipeline_mode = #tpu.pipeline_mode<synchronous>, transform_indices = @transform_2, window_bounds = array<i64: 1, 256>}, {transform_indices = @transform_3, window_bounds = array<i64: 112, 256>}]} {
    %c0 = arith.constant 0 : index
    %c0_0 = arith.constant 0 : index
    %0 = vector.load %arg1[%c0, %c0_0] : memref<112x2304xbf16, #tpu.memory_space<vmem>>, vector<112x2304xbf16>
    %c0_1 = arith.constant 0 : index
    %c0_2 = arith.constant 0 : index
    %1 = vector.load %arg2[%c0_1, %c0_2] : memref<2304x256xbf16, #tpu.memory_space<vmem>>, vector<2304x256xbf16>
    %cst = arith.constant dense<0.000000e+00> : vector<112x256xf32>
    %2 = tpu.matmul %0, %1, %cst {dimension_numbers = #tpu.dot_dimension_numbers<[1], [0], [0], [1], [0, 0, 1, 1], [], []>} : vector<112x2304xbf16>, vector<2304x256xbf16>, vector<112x256xf32> -> vector<112x256xf32>
    %c0_3 = arith.constant 0 : index
    %c0_4 = arith.constant 0 : index
    %3 = vector.load %arg3[%c0_3, %c0_4] : memref<1x256xf32, #tpu.memory_space<vmem>>, vector<1x256xf32>
    %4 = vector.broadcast %3 : vector<1x256xf32> to vector<112x256xf32>
    %5 = arith.addf %2, %4 : vector<112x256xf32>
    %cst_5 = arith.constant 0.000000e+00 : f32
    %6 = vector.broadcast %cst_5 : f32 to vector<112x256xf32>
    %7 = arith.maximumf %5, %6 : vector<112x256xf32>
    %8 = arith.truncf %7 : vector<112x256xf32> to vector<112x256xbf16>
    %c0_6 = arith.constant 0 : index
    %c0_7 = arith.constant 0 : index
    %9 = vector.load %arg4[%c0_6, %c0_7] : memref<112x256xbf16, #tpu.memory_space<vmem>>, vector<112x256xbf16>
    tpu.vector_store %arg4[%c0_6, %c0_7], %8 {strides = array<i32>} : memref<112x256xbf16, #tpu.memory_space<vmem>>, vector<112x256xbf16>,
    return
  }
  func.func @transform_0(%arg0: i32) -> (i32, i32) {
    %c0_i32 = arith.constant 0 : i32
    %c0_i32_0 = arith.constant 0 : i32
    return %arg0, %c0_i32 : i32, i32
  }
  func.func @transform_1(%arg0: i32) -> (i32, i32) {
    %c0_i32 = arith.constant 0 : i32
    %c0_i32_0 = arith.constant 0 : i32
    %c0_i32_1 = arith.constant 0 : i32
    return %c0_i32, %c0_i32_0 : i32, i32
  }
  func.func @transform_2(%arg0: i32) -> (i32, i32) {
    %c0_i32 = arith.constant 0 : i32
    %c0_i32_0 = arith.constant 0 : i32
    %c0_i32_1 = arith.constant 0 : i32
    return %c0_i32, %c0_i32_0 : i32, i32
  }
  func.func @transform_3(%arg0: i32) -> (i32, i32) {
    %c0_i32 = arith.constant 0 : i32
    %c0_i32_0 = arith.constant 0 : i32
    return %arg0, %c0_i32 : i32, i32
  }
}

module attributes {stable_mosaic.version = 11 : i64} {
  func.func @_conv_mm_kernel(%arg0: i32, %arg1: memref<32x2304xbf16, #tpu.memory_space<vmem>>, %arg2: memref<2304x256xbf16, #tpu.memory_space<vmem>>, %arg3: memref<1x256xf32, #tpu.memory_space<vmem>>, %arg4: memref<32x256xbf16, #tpu.memory_space<vmem>>) attributes {dimension_semantics = [#tpu.dimension_semantics<parallel>], iteration_bounds = array<i64: 1>, scalar_prefetch = 0 : i64, scratch_operands = 0 : i64, tpu.core_type = #tpu.core_type<tc>, window_params = [{transform_indices = @transform_0, window_bounds = array<i64: 32, 2304>}, {pipeline_mode = #tpu.pipeline_mode<synchronous>, transform_indices = @transform_1, window_bounds = array<i64: 2304, 256>}, {pipeline_mode = #tpu.pipeline_mode<synchronous>, transform_indices = @transform_2, window_bounds = array<i64: 1, 256>}, {transform_indices = @transform_3, window_bounds = array<i64: 32, 256>}]} {
    %c0 = arith.constant 0 : index
    %c0_0 = arith.constant 0 : index
    %0 = vector.load %arg1[%c0, %c0_0] : memref<32x2304xbf16, #tpu.memory_space<vmem>>, vector<32x2304xbf16>
    %c0_1 = arith.constant 0 : index
    %c0_2 = arith.constant 0 : index
    %1 = vector.load %arg2[%c0_1, %c0_2] : memref<2304x256xbf16, #tpu.memory_space<vmem>>, vector<2304x256xbf16>
    %cst = arith.constant dense<0.000000e+00> : vector<32x256xf32>
    %2 = tpu.matmul %0, %1, %cst {dimension_numbers = #tpu.dot_dimension_numbers<[1], [0], [0], [1], [0, 0, 1, 1], [], []>} : vector<32x2304xbf16>, vector<2304x256xbf16>, vector<32x256xf32> -> vector<32x256xf32>
    %c0_3 = arith.constant 0 : index
    %c0_4 = arith.constant 0 : index
    %3 = vector.load %arg3[%c0_3, %c0_4] : memref<1x256xf32, #tpu.memory_space<vmem>>, vector<1x256xf32>
    %4 = vector.broadcast %3 : vector<1x256xf32> to vector<32x256xf32>
    %5 = arith.addf %2, %4 : vector<32x256xf32>
    %cst_5 = arith.constant 0.000000e+00 : f32
    %6 = vector.broadcast %cst_5 : f32 to vector<32x256xf32>
    %7 = arith.maximumf %5, %6 : vector<32x256xf32>
    %8 = arith.truncf %7 : vector<32x256xf32> to vector<32x256xbf16>
    %c0_6 = arith.constant 0 : index
    %c0_7 = arith.constant 0 : index
    %9 = vector.load %arg4[%c0_6, %c0_7] : memref<32x256xbf16, #tpu.memory_space<vmem>>, vector<32x256xbf16>
    tpu.vector_store %arg4[%c0_6, %c0_7], %8 {strides = array<i32>} : memref<32x256xbf16, #tpu.memory_space<vmem>>, vector<32x256xbf16>,
    return
  }
  func.func @transform_0(%arg0: i32) -> (i32, i32) {
    %c0_i32 = arith.constant 0 : i32
    %c0_i32_0 = arith.constant 0 : i32
    return %arg0, %c0_i32 : i32, i32
  }
  func.func @transform_1(%arg0: i32) -> (i32, i32) {
    %c0_i32 = arith.constant 0 : i32
    %c0_i32_0 = arith.constant 0 : i32
    %c0_i32_1 = arith.constant 0 : i32
    return %c0_i32, %c0_i32_0 : i32, i32
  }
  func.func @transform_2(%arg0: i32) -> (i32, i32) {
    %c0_i32 = arith.constant 0 : i32
    %c0_i32_0 = arith.constant 0 : i32
    %c0_i32_1 = arith.constant 0 : i32
    return %c0_i32, %c0_i32_0 : i32, i32
  }
  func.func @transform_3(%arg0: i32) -> (i32, i32) {
    %c0_i32 = arith.constant 0 : i32
    %c0_i32_0 = arith.constant 0 : i32
    return %arg0, %c0_i32 : i32, i32
  }
}

module attributes {stable_mosaic.version = 11 : i64} {
  func.func @_head_kernel(%arg0: i32, %arg1: memref<16x4096xbf16, #tpu.memory_space<vmem>>, %arg2: memref<4096x128xbf16, #tpu.memory_space<vmem>>, %arg3: memref<1x128xf32, #tpu.memory_space<vmem>>, %arg4: memref<128x256xbf16, #tpu.memory_space<vmem>>, %arg5: memref<1x256xf32, #tpu.memory_space<vmem>>, %arg6: memref<256x256xbf16, #tpu.memory_space<vmem>>, %arg7: memref<1x256xf32, #tpu.memory_space<vmem>>, %arg8: memref<256x128xbf16, #tpu.memory_space<vmem>>, %arg9: memref<1x128xf32, #tpu.memory_space<vmem>>, %arg10: memref<16x128xf32, #tpu.memory_space<vmem>>, %arg11: memref<16x128xf32, #tpu.memory_space<vmem>>) attributes {dimension_semantics = [#tpu.dimension_semantics<parallel>], iteration_bounds = array<i64: 1>, scalar_prefetch = 0 : i64, scratch_operands = 0 : i64, tpu.core_type = #tpu.core_type<tc>, window_params = [{transform_indices = @transform_0, window_bounds = array<i64: 16, 4096>}, {pipeline_mode = #tpu.pipeline_mode<synchronous>, transform_indices = @transform_1, window_bounds = array<i64: 4096, 128>}, {pipeline_mode = #tpu.pipeline_mode<synchronous>, transform_indices = @transform_2, window_bounds = array<i64: 1, 128>}, {pipeline_mode = #tpu.pipeline_mode<synchronous>, transform_indices = @transform_3, window_bounds = array<i64: 128, 256>}, {pipeline_mode = #tpu.pipeline_mode<synchronous>, transform_indices = @transform_4, window_bounds = array<i64: 1, 256>}, {pipeline_mode = #tpu.pipeline_mode<synchronous>, transform_indices = @transform_5, window_bounds = array<i64: 256, 256>}, {pipeline_mode = #tpu.pipeline_mode<synchronous>, transform_indices = @transform_6, window_bounds = array<i64: 1, 256>}, {pipeline_mode = #tpu.pipeline_mode<synchronous>, transform_indices = @transform_7, window_bounds = array<i64: 256, 128>}, {pipeline_mode = #tpu.pipeline_mode<synchronous>, transform_indices = @transform_8, window_bounds = array<i64: 1, 128>}, {transform_indices = @transform_9, window_bounds = array<i64: 16, 128>}, {transform_indices = @transform_10, window_bounds = array<i64: 16, 128>}]} {
    %c0 = arith.constant 0 : index
    %c0_0 = arith.constant 0 : index
    %0 = vector.load %arg1[%c0, %c0_0] : memref<16x4096xbf16, #tpu.memory_space<vmem>>, vector<16x4096xbf16>
    %c0_1 = arith.constant 0 : index
    %c0_2 = arith.constant 0 : index
    %1 = vector.load %arg2[%c0_1, %c0_2] : memref<4096x128xbf16, #tpu.memory_space<vmem>>, vector<4096x128xbf16>
    %cst = arith.constant dense<0.000000e+00> : vector<16x128xf32>
    %2 = tpu.matmul %0, %1, %cst {dimension_numbers = #tpu.dot_dimension_numbers<[1], [0], [0], [1], [0, 0, 1, 1], [], []>} : vector<16x4096xbf16>, vector<4096x128xbf16>, vector<16x128xf32> -> vector<16x128xf32>
    %c0_3 = arith.constant 0 : index
    %c0_4 = arith.constant 0 : index
    %3 = vector.load %arg3[%c0_3, %c0_4] : memref<1x128xf32, #tpu.memory_space<vmem>>, vector<1x128xf32>
    %4 = vector.broadcast %3 : vector<1x128xf32> to vector<16x128xf32>
    %5 = arith.addf %2, %4 : vector<16x128xf32>
    %cst_5 = arith.constant 0.000000e+00 : f32
    %6 = vector.broadcast %cst_5 : f32 to vector<16x128xf32>
    %7 = arith.maximumf %5, %6 : vector<16x128xf32>
    %c0_6 = arith.constant 0 : index
    %c0_7 = arith.constant 0 : index
    %8 = vector.load %arg11[%c0_6, %c0_7] : memref<16x128xf32, #tpu.memory_space<vmem>>, vector<16x128xf32>
    tpu.vector_store %arg11[%c0_6, %c0_7], %7 {strides = array<i32>} : memref<16x128xf32, #tpu.memory_space<vmem>>, vector<16x128xf32>,
    %9 = arith.truncf %7 : vector<16x128xf32> to vector<16x128xbf16>
    %c0_8 = arith.constant 0 : index
    %c0_9 = arith.constant 0 : index
    %10 = vector.load %arg4[%c0_8, %c0_9] : memref<128x256xbf16, #tpu.memory_space<vmem>>, vector<128x256xbf16>
    %cst_10 = arith.constant dense<0.000000e+00> : vector<16x256xf32>
    %11 = tpu.matmul %9, %10, %cst_10 {dimension_numbers = #tpu.dot_dimension_numbers<[1], [0], [0], [1], [0, 0, 1, 1], [], []>} : vector<16x128xbf16>, vector<128x256xbf16>, vector<16x256xf32> -> vector<16x256xf32>
    %c0_11 = arith.constant 0 : index
    %c0_12 = arith.constant 0 : index
    %12 = vector.load %arg5[%c0_11, %c0_12] : memref<1x256xf32, #tpu.memory_space<vmem>>, vector<1x256xf32>
    %13 = vector.broadcast %12 : vector<1x256xf32> to vector<16x256xf32>
    %14 = arith.addf %11, %13 : vector<16x256xf32>
    %cst_13 = arith.constant 0.000000e+00 : f32
    %15 = vector.broadcast %cst_13 : f32 to vector<16x256xf32>
    %16 = arith.maximumf %14, %15 : vector<16x256xf32>
    %17 = arith.truncf %16 : vector<16x256xf32> to vector<16x256xbf16>
    %c0_14 = arith.constant 0 : index
    %c0_15 = arith.constant 0 : index
    %18 = vector.load %arg6[%c0_14, %c0_15] : memref<256x256xbf16, #tpu.memory_space<vmem>>, vector<256x256xbf16>
    %cst_16 = arith.constant dense<0.000000e+00> : vector<16x256xf32>
    %19 = tpu.matmul %17, %18, %cst_16 {dimension_numbers = #tpu.dot_dimension_numbers<[1], [0], [0], [1], [0, 0, 1, 1], [], []>} : vector<16x256xbf16>, vector<256x256xbf16>, vector<16x256xf32> -> vector<16x256xf32>
    %c0_17 = arith.constant 0 : index
    %c0_18 = arith.constant 0 : index
    %20 = vector.load %arg7[%c0_17, %c0_18] : memref<1x256xf32, #tpu.memory_space<vmem>>, vector<1x256xf32>
    %21 = vector.broadcast %20 : vector<1x256xf32> to vector<16x256xf32>
    %22 = arith.addf %19, %21 : vector<16x256xf32>
    %cst_19 = arith.constant 0.000000e+00 : f32
    %23 = vector.broadcast %cst_19 : f32 to vector<16x256xf32>
    %24 = arith.maximumf %22, %23 : vector<16x256xf32>
    %25 = arith.truncf %24 : vector<16x256xf32> to vector<16x256xbf16>
    %c0_20 = arith.constant 0 : index
    %c0_21 = arith.constant 0 : index
    %26 = vector.load %arg8[%c0_20, %c0_21] : memref<256x128xbf16, #tpu.memory_space<vmem>>, vector<256x128xbf16>
    %cst_22 = arith.constant dense<0.000000e+00> : vector<16x128xf32>
    %27 = tpu.matmul %25, %26, %cst_22 {dimension_numbers = #tpu.dot_dimension_numbers<[1], [0], [0], [1], [0, 0, 1, 1], [], []>} : vector<16x256xbf16>, vector<256x128xbf16>, vector<16x128xf32> -> vector<16x128xf32>
    %c0_23 = arith.constant 0 : index
    %c0_24 = arith.constant 0 : index
    %28 = vector.load %arg9[%c0_23, %c0_24] : memref<1x128xf32, #tpu.memory_space<vmem>>, vector<1x128xf32>
    %29 = vector.broadcast %28 : vector<1x128xf32> to vector<16x128xf32>
    %30 = arith.addf %27, %29 : vector<16x128xf32>
    %cst_25 = arith.constant dense<0xFF800000> : vector<16xf32>
    %31 = vector.multi_reduction <maximumf>, %30, %cst_25 [1] : vector<16x128xf32> to vector<16xf32>
    %32 = vector.shape_cast %31 : vector<16xf32> to vector<16x1xf32>
    %33 = vector.broadcast %32 : vector<16x1xf32> to vector<16x128xf32>
    %34 = arith.subf %30, %33 : vector<16x128xf32>
    %35 = math.exp %34 : vector<16x128xf32>
    %cst_26 = arith.constant dense<0.000000e+00> : vector<16xf32>
    %36 = vector.multi_reduction <add>, %35, %cst_26 [1] : vector<16x128xf32> to vector<16xf32>
    %37 = vector.shape_cast %36 : vector<16xf32> to vector<16x1xf32>
    %38 = math.log %37 : vector<16x1xf32>
    %39 = vector.broadcast %38 : vector<16x1xf32> to vector<16x128xf32>
    %40 = arith.subf %34, %39 : vector<16x128xf32>
    %c0_27 = arith.constant 0 : index
    %c0_28 = arith.constant 0 : index
    %41 = vector.load %arg10[%c0_27, %c0_28] : memref<16x128xf32, #tpu.memory_space<vmem>>, vector<16x128xf32>
    tpu.vector_store %arg10[%c0_27, %c0_28], %40 {strides = array<i32>} : memref<16x128xf32, #tpu.memory_space<vmem>>, vector<16x128xf32>,
    return
  }
  func.func @transform_0(%arg0: i32) -> (i32, i32) {
    %c0_i32 = arith.constant 0 : i32
    %c0_i32_0 = arith.constant 0 : i32
    return %arg0, %c0_i32 : i32, i32
  }
  func.func @transform_1(%arg0: i32) -> (i32, i32) {
    %c0_i32 = arith.constant 0 : i32
    %c0_i32_0 = arith.constant 0 : i32
    %c0_i32_1 = arith.constant 0 : i32
    return %c0_i32, %c0_i32_0 : i32, i32
  }
  func.func @transform_2(%arg0: i32) -> (i32, i32) {
    %c0_i32 = arith.constant 0 : i32
    %c0_i32_0 = arith.constant 0 : i32
    %c0_i32_1 = arith.constant 0 : i32
    return %c0_i32, %c0_i32_0 : i32, i32
  }
  func.func @transform_3(%arg0: i32) -> (i32, i32) {
    %c0_i32 = arith.constant 0 : i32
    %c0_i32_0 = arith.constant 0 : i32
    %c0_i32_1 = arith.constant 0 : i32
    return %c0_i32, %c0_i32_0 : i32, i32
  }
  func.func @transform_4(%arg0: i32) -> (i32, i32) {
    %c0_i32 = arith.constant 0 : i32
    %c0_i32_0 = arith.constant 0 : i32
    %c0_i32_1 = arith.constant 0 : i32
    return %c0_i32, %c0_i32_0 : i32, i32
  }
  func.func @transform_5(%arg0: i32) -> (i32, i32) {
    %c0_i32 = arith.constant 0 : i32
    %c0_i32_0 = arith.constant 0 : i32
    %c0_i32_1 = arith.constant 0 : i32
    return %c0_i32, %c0_i32_0 : i32, i32
  }
  func.func @transform_6(%arg0: i32) -> (i32, i32) {
    %c0_i32 = arith.constant 0 : i32
    %c0_i32_0 = arith.constant 0 : i32
    %c0_i32_1 = arith.constant 0 : i32
    return %c0_i32, %c0_i32_0 : i32, i32
  }
  func.func @transform_7(%arg0: i32) -> (i32, i32) {
    %c0_i32 = arith.constant 0 : i32
    %c0_i32_0 = arith.constant 0 : i32
    %c0_i32_1 = arith.constant 0 : i32
    return %c0_i32, %c0_i32_0 : i32, i32
  }
  func.func @transform_8(%arg0: i32) -> (i32, i32) {
    %c0_i32 = arith.constant 0 : i32
    %c0_i32_0 = arith.constant 0 : i32
    %c0_i32_1 = arith.constant 0 : i32
    return %c0_i32, %c0_i32_0 : i32, i32
  }
  func.func @transform_9(%arg0: i32) -> (i32, i32) {
    %c0_i32 = arith.constant 0 : i32
    %c0_i32_0 = arith.constant 0 : i32
    return %arg0, %c0_i32 : i32, i32
  }
  func.func @transform_10(%arg0: i32) -> (i32, i32) {
    %c0_i32 = arith.constant 0 : i32
    %c0_i32_0 = arith.constant 0 : i32
    return %arg0, %c0_i32 : i32, i32
  }
}

</mosaic_0001>

<bundles_post_ra>
// kernel: encoder_stn_forward.5
= control target key start
LH: loop header
LB: loop body
LE: loop exit
PB: predicated region body
PF: predicated region fallthrough
CT: control target
= control target key end

     0   :  { %12 = vsyncpa [#allocation3], 0  ;;  %s2630_s0 = inlined_call_operand.vmem [shape: bf16[16,896], index: 0, kind: input, shape index: {}]   ;;  %s2631_s1 = inlined_call_operand.hbm [shape: bf16[896,256], index: 1, kind: input, shape index: {}]   ;;  %s2632_s2 = inlined_call_operand.hbm [shape: f32[1,256], index: 2, kind: input, shape index: {}]   ;;  %s2633_s3 = inlined_call_operand.hbm [shape: bf16[256,256], index: 3, kind: input, shape index: {}]   ;;  %s2634_s4 = inlined_call_operand.hbm [shape: f32[1,256], index: 4, kind: input, shape index: {}]   ;;  %s2635_s5 = inlined_call_operand.hbm [shape: bf16[256,128], index: 5, kind: input, shape index: {}]   ;;  %s2636_s6 = inlined_call_operand.hbm [shape: f32[1,128], index: 6, kind: input, shape index: {}]   ;;  %s2637_s7 = inlined_call_operand.vmem [shape: f32[16,128], index: 7, kind: output, shape index: {}]  }
   0x1   :  { %13 = vsyncpa [#allocation5], 0 }
   0x2   :  { %14 = vsyncpa [#allocation8], 0  ;;  %s36_s26 = sshll.u32 %s2632_s2, 4  ;;  %s37_s26 = int_to_ptr.hbm [resolvable:$true] %s36_s26 }
   0x3   :  { %15 = vsyncpa [#allocation11], 0  ;;  %s2482_s27 = smov [#allocation4]   ;;  %s60_s8 = sshll.u32 %s2634_s4, 4  ;;  %s61_s8 = int_to_ptr.hbm [resolvable:$true] %s60_s8 }
   0x4   :  { %s38_s28 = sshll.u32 %s2482_s27, 4  ;;  %s2483_s9 = smov [#allocation7]   ;;  %s39_s28 = int_to_ptr.vmem [resolvable:$true] %s38_s28 }
   0x5   :  { %41 = dma.hbm_to_vmem [thread:$0]  %s37_s26, 32, %s39_s28, [#allocation5]  }
   0x6   :  { %s62_s10 = sshll.u32 %s2483_s9, 4  ;;  %s22_s13 = sshll.u32 %s2631_s1, 4  ;;  %s63_s10 = int_to_ptr.vmem [resolvable:$true] %s62_s10  ;;  %s23_s13 = int_to_ptr.hbm [resolvable:$true] %s22_s13 }
   0x7   :  { %65 = dma.hbm_to_vmem [thread:$0]  %s61_s8, 32, %s63_s10, [#allocation8]  }
   0x8   :  { %s2484_s2 = smov [#allocation2]   ;;  %s46_s17 = sshll.u32 %s2633_s3, 4  ;;  %s47_s17 = int_to_ptr.hbm [resolvable:$true] %s46_s17 }
   0x9   :  { %s24_s14 = sshll.u32 %s2484_s2, 4  ;;  %s2485_s18 = smov 128   ;;  %s25_s14 = int_to_ptr.vmem [resolvable:$true] %s24_s14 }
   0xa   :  { %s2486_s4 = smov 8   ;;  %s2487_s19 = smov [#allocation6]  }
   0xb   :  { %30 = dma.hbm_to_vmem [thread:$0]  %s23_s13, 14336, %s25_s14, [#allocation3], %s2485_s18, %s2485_s18, %s2486_s4  }
   0xc   :  { %s48_s20 = sshll.u32 %s2487_s19, 4  ;;  %s70_s1 = sshll.u32 %s2635_s5, 4  ;;  %s49_s20 = int_to_ptr.vmem [resolvable:$true] %s48_s20  ;;  %s71_s1 = int_to_ptr.hbm [resolvable:$true] %s70_s1 }
   0xd   :  { %54 = dma.hbm_to_vmem [thread:$0]  %s47_s17, 4096, %s49_s20, [#allocation5], %s2485_s18, %s2485_s18, %s2486_s4  }
   0xe   :  { %s2488_s23 = smov [#allocation9]   ;;  %s84_s3 = sshll.u32 %s2636_s6, 4  ;;  %s85_s3 = int_to_ptr.hbm [resolvable:$true] %s84_s3 }
   0xf   :  { %s72_s24 = sshll.u32 %s2488_s23, 4  ;;  %s2489_s27 = smov 64   ;;  %s73_s24 = int_to_ptr.vmem [resolvable:$true] %s72_s24 }
  0x10   :  { %s2490_s28 = smov 4   ;;  %s2491_s29 = smov [#allocation10]  }
  0x11   :  { %78 = dma.hbm_to_vmem [thread:$0]  %s71_s1, 2048, %s73_s24, [#allocation8], %s2489_s27, %s2489_s27, %s2490_s28  }
  0x12   :  { %s86_s30 = sshll.u32 %s2491_s29, 4  ;;  %s87_s30 = int_to_ptr.vmem [resolvable:$true] %s86_s30 }
  0x13   :  { %89 = dma.hbm_to_vmem [thread:$0]  %s85_s3, 16, %s87_s30, [#allocation11]  }
  0x14   :  { %2474 = dma.done.wait [#allocation3], 14336  }
  0x15   :  { %2475 = vsyncadd [#allocation3], 4294952960 }
  0x16   :  { %2476 = dma.done.wait [#allocation5], 4128  }
  0x17   :  { %2477 = vsyncadd [#allocation5], 4294963168 }
  0x18   :  { %2478 = dma.done.wait [#allocation8], 2080  }
  0x19   :  { %2479 = vsyncadd [#allocation8], 4294965216 }
  0x1a   :  { %2480 = dma.done.wait [#allocation11], 16  }
  0x1b   :  { %2481 = vsyncadd [#allocation11], 4294967280  ;;  %v1570_v0 = vld [vmem:[#allocation2 + $0x70] sm:$0xf]  ;;  %v2174_v1 = vld [vmem:[#allocation2 + $0x74] sm:$0xf0] }
  0x1c   :  { %v1634_v2 = vld [vmem:[#allocation2 + $0xf0] sm:$0xf]  ;;  %v1571_v3 = vor.u32 %v2174_v1, %v1570_v0  ;;  %v2190_v4 = vld [vmem:[#allocation2 + $0xf4] sm:$0xf0]  ;;  %v1562_v9 = vld [vmem:[#allocation2 + $0x60] sm:$0xf] }
  0x1d   :  { %v1698_v5 = vld [vmem:[#allocation2 + $0x170] sm:$0xf]  ;;  %v2206_v6 = vld [vmem:[#allocation2 + $0x174] sm:$0xf0]  ;;  %v1635_v7 = vor.u32 %v2190_v4, %v1634_v2  ;;  %v2172_v10 = vld [vmem:[#allocation2 + $0x64] sm:$0xf0] }
  0x1e   :  { %v1699_v8 = vor.u32 %v2206_v6, %v1698_v5  ;;  %v1626_v11 = vld [vmem:[#allocation2 + $0xe0] sm:$0xf]  ;;  %836 = vmatpush.bf16.msra.mxu0 %v1571_v3  ;;  %v1563_v12 = vor.u32 %v2172_v10, %v1562_v9  ;;  %v2188_v13 = vld [vmem:[#allocation2 + $0xe4] sm:$0xf0]  ;;  %v1762_v18 = vld [vmem:[#allocation2 + $0x1f0] sm:$0xf] }
  0x1f   :  { %v1690_v14 = vld [vmem:[#allocation2 + $0x160] sm:$0xf]  ;;  %v2204_v15 = vld [vmem:[#allocation2 + $0x164] sm:$0xf0]  ;;  %850 = vmatpush.bf16.msra.mxu1 %v1635_v7  ;;  %v1627_v16 = vor.u32 %v2188_v13, %v1626_v11  ;;  %v2222_v19 = vld [vmem:[#allocation2 + $0x1f4] sm:$0xf0] }
  0x20   :  { %864 = vmatpush.bf16.msra.mxu2 %v1699_v8  ;;  %v1691_v17 = vor.u32 %v2204_v15, %v1690_v14  ;;  %v1554_v20 = vld [vmem:[#allocation2 + $0x50] sm:$0xf]  ;;  %v1763_v21 = vor.u32 %v2222_v19, %v1762_v18  ;;  %v2170_v22 = vld [vmem:[#allocation2 + $0x54] sm:$0xf0]  ;;  %v1754_v27 = vld [vmem:[#allocation2 + $0x1e0] sm:$0xf] }
  0x21   :  { %v1618_v23 = vld [vmem:[#allocation2 + $0xd0] sm:$0xf]  ;;  %v2186_v24 = vld [vmem:[#allocation2 + $0xd4] sm:$0xf0]  ;;  %v1555_v28 = vor.u32 %v2170_v22, %v1554_v20  ;;  %v2220_v29 = vld [vmem:[#allocation2 + $0x1e4] sm:$0xf0] }
  0x22   :  { %v1682_v25 = vld [vmem:[#allocation2 + $0x150] sm:$0xf]  ;;  %v2202_v26 = vld [vmem:[#allocation2 + $0x154] sm:$0xf0]  ;;  %837 = vmatpush.bf16.msra.mxu0 %v1563_v12  ;;  %878 = vmatpush.bf16.msra.mxu3 %v1763_v21  ;;  %v1546_v30 = vld [vmem:[#allocation2 + $0x40] sm:$0xf]  ;;  %v1619_v32 = vor.u32 %v2186_v24, %v1618_v23  ;;  %v1755_v34 = vor.u32 %v2220_v29, %v1754_v27 }
  0x23   :  { %v2168_v31 = vld [vmem:[#allocation2 + $0x44] sm:$0xf0]  ;;  %851 = vmatpush.bf16.msra.mxu1 %v1627_v16  ;;  %v1683_v33 = vor.u32 %v2202_v26, %v1682_v25  ;;  %v1610_v35 = vld [vmem:[#allocation2 + $0xc0] sm:$0xf]  ;;  %v1746_v39 = vld [vmem:[#allocation2 + $0x1d0] sm:$0xf] }
  0x24   :  { %865 = vmatpush.bf16.msra.mxu2 %v1691_v17  ;;  %v2184_v36 = vld [vmem:[#allocation2 + $0xc4] sm:$0xf0]  ;;  %v1674_v37 = vld [vmem:[#allocation2 + $0x140] sm:$0xf]  ;;  %v2218_v40 = vld [vmem:[#allocation2 + $0x1d4] sm:$0xf0]  ;;  %v1547_v41 = vor.u32 %v2168_v31, %v1546_v30 }
  0x25   :  { %v2200_v38 = vld [vmem:[#allocation2 + $0x144] sm:$0xf0]  ;;  %v1747_v42 = vor.u32 %v2218_v40, %v1746_v39  ;;  %v1538_v43 = vld [vmem:[#allocation2 + $0x30] sm:$0xf]  ;;  %v2166_v44 = vld [vmem:[#allocation2 + $0x34] sm:$0xf0]  ;;  %v1611_v45 = vor.u32 %v2184_v36, %v1610_v35 }
  0x26   :  { %838 = vmatpush.bf16.msra.mxu0 %v1555_v28  ;;  %879 = vmatpush.bf16.msra.mxu3 %v1755_v34  ;;  %v1675_v46 = vor.u32 %v2200_v38, %v1674_v37  ;;  %v1602_v47 = vld [vmem:[#allocation2 + $0xb0] sm:$0xf]  ;;  %v1738_v48 = vld [vmem:[#allocation2 + $0x1c0] sm:$0xf]  ;;  %v2216_v49 = vld [vmem:[#allocation2 + $0x1c4] sm:$0xf0]  ;;  %v1539_v53 = vor.u32 %v2166_v44, %v1538_v43 }
  0x27   :  { %852 = vmatpush.bf16.msra.mxu1 %v1619_v32  ;;  %v2182_v50 = vld [vmem:[#allocation2 + $0xb4] sm:$0xf0]  ;;  %v1666_v51 = vld [vmem:[#allocation2 + $0x130] sm:$0xf]  ;;  %v1739_v54 = vor.u32 %v2216_v49, %v1738_v48  ;;  %v1530_v55 = vld [vmem:[#allocation2 + $0x20] sm:$0xf] }
  0x28   :  { %866 = vmatpush.bf16.msra.mxu2 %v1683_v33  ;;  %v2198_v52 = vld [vmem:[#allocation2 + $0x134] sm:$0xf0]  ;;  %v2164_v56 = vld [vmem:[#allocation2 + $0x24] sm:$0xf0]  ;;  %v1603_v57 = vor.u32 %v2182_v50, %v1602_v47  ;;  %v1594_v59 = vld [vmem:[#allocation2 + $0xa0] sm:$0xf] }
  0x29   :  { %v1667_v58 = vor.u32 %v2198_v52, %v1666_v51  ;;  %v1730_v60 = vld [vmem:[#allocation2 + $0x1b0] sm:$0xf]  ;;  %v2214_v61 = vld [vmem:[#allocation2 + $0x1b4] sm:$0xf0]  ;;  %v2180_v62 = vld [vmem:[#allocation2 + $0xa4] sm:$0xf0]  ;;  %v1531_v1 = vor.u32 %v2164_v56, %v1530_v55 }
  0x2a   :  { %839 = vmatpush.bf16.msra.mxu0 %v1547_v41  ;;  %880 = vmatpush.bf16.msra.mxu3 %v1747_v42  ;;  %v1658_v63 = vld [vmem:[#allocation2 + $0x120] sm:$0xf]  ;;  %v2196_v0 = vld [vmem:[#allocation2 + $0x124] sm:$0xf0]  ;;  %v1731_v2 = vor.u32 %v2214_v61, %v1730_v60  ;;  %v1522_v3 = vld [vmem:[#allocation2 + $0x10] sm:$0xf]  ;;  %v1595_v5 = vor.u32 %v2180_v62, %v1594_v59 }
  0x2b   :  { %853 = vmatpush.bf16.msra.mxu1 %v1611_v45  ;;  %v2162_v4 = vld [vmem:[#allocation2 + $0x14] sm:$0xf0]  ;;  %v1659_v6 = vor.u32 %v2196_v0, %v1658_v63  ;;  %v1586_v7 = vld [vmem:[#allocation2 + $0x90] sm:$0xf]  ;;  %v1722_v8 = vld [vmem:[#allocation2 + $0x1a0] sm:$0xf] }
  0x2c   :  { %867 = vmatpush.bf16.msra.mxu2 %v1675_v46  ;;  %v2212_v9 = vld [vmem:[#allocation2 + $0x1a4] sm:$0xf0]  ;;  %v2178_v10 = vld [vmem:[#allocation2 + $0x94] sm:$0xf0]  ;;  %v1650_v11 = vld [vmem:[#allocation2 + $0x110] sm:$0xf]  ;;  %v1523_v13 = vor.u32 %v2162_v4, %v1522_v3 }
  0x2d   :  { %v2194_v12 = vld [vmem:[#allocation2 + $0x114] sm:$0xf0]  ;;  %v1723_v14 = vor.u32 %v2212_v9, %v1722_v8  ;;  %v1514_v15 = vld [vmem:[#allocation2] sm:$0xf]  ;;  %v2160_v16 = vld [vmem:[#allocation2 + $0x4] sm:$0xf0]  ;;  %v1587_v18 = vor.u32 %v2178_v10, %v1586_v7 }
  0x2e   :  { %840 = vmatpush.bf16.msra.mxu0 %v1539_v53  ;;  %881 = vmatpush.bf16.msra.mxu3 %v1739_v54  ;;  %v1578_v17 = vld [vmem:[#allocation2 + $0x80] sm:$0xf]  ;;  %v1651_v19 = vor.u32 %v2194_v12, %v1650_v11  ;;  %v2176_v20 = vld [vmem:[#allocation2 + $0x84] sm:$0xf0]  ;;  %v1714_v21 = vld [vmem:[#allocation2 + $0x190] sm:$0xf]  ;;  %v1515_v29 = vor.u32 %v2160_v16, %v1514_v15 }
  0x2f   :  { %854 = vmatpush.bf16.msra.mxu1 %v1603_v57  ;;  %v2210_v22 = vld [vmem:[#allocation2 + $0x194] sm:$0xf0]  ;;  %v1642_v23 = vld [vmem:[#allocation2 + $0x100] sm:$0xf]  ;;  %v2192_v24 = vld [vmem:[#allocation2 + $0x104] sm:$0xf0]  ;;  %v1579_v33 = vor.u32 %v2176_v20, %v1578_v17 }
  0x30   :  { %868 = vmatpush.bf16.msra.mxu2 %v1667_v58  ;;  %v1826_v25 = vld [vmem:[#allocation2 + $0x270] sm:$0xf]  ;;  %v2238_v26 = vld [vmem:[#allocation2 + $0x274] sm:$0xf0]  ;;  %v1715_v30 = vor.u32 %v2210_v22, %v1714_v21  ;;  %v1643_v34 = vor.u32 %v2192_v24, %v1642_v23  ;;  %v1706_v35 = vld [vmem:[#allocation2 + $0x180] sm:$0xf] }
  0x31   :  { %v1890_v27 = vld [vmem:[#allocation2 + $0x2f0] sm:$0xf]  ;;  %v2254_v28 = vld [vmem:[#allocation2 + $0x2f4] sm:$0xf0]  ;;  %v2208_v36 = vld [vmem:[#allocation2 + $0x184] sm:$0xf0]  ;;  %v1827_v38 = vor.u32 %v2238_v26, %v1826_v25 }
  0x32   :  { %841 = vmatpush.bf16.msra.mxu0 %v1531_v1  ;;  %882 = vmatpush.bf16.msra.mxu3 %v1731_v2  ;;  %v1954_v31 = vld [vmem:[#allocation2 + $0x370] sm:$0xf]  ;;  %v2270_v32 = vld [vmem:[#allocation2 + $0x374] sm:$0xf0]  ;;  %v1818_v37 = vld [vmem:[#allocation2 + $0x260] sm:$0xf]  ;;  %v1891_v39 = vor.u32 %v2254_v28, %v1890_v27  ;;  %v1707_v47 = vor.u32 %v2208_v36, %v1706_v35 }
  0x33   :  { %855 = vmatpush.bf16.msra.mxu1 %v1595_v5  ;;  %v2236_v40 = vld [vmem:[#allocation2 + $0x264] sm:$0xf0]  ;;  %v2173_v41 = vld [vmem:[#allocation2 + $0x74] sm:$0xf]  ;;  %v1572_v42 = vld [vmem:[#allocation2 + $0x78] sm:$0xf0]  ;;  %v1955_v43 = vor.u32 %v2270_v32, %v1954_v31 }
  0x34   :  { %869 = vmatpush.bf16.msra.mxu2 %v1659_v6  ;;  %v1882_v44 = vld [vmem:[#allocation2 + $0x2e0] sm:$0xf]  ;;  %v2252_v45 = vld [vmem:[#allocation2 + $0x2e4] sm:$0xf0]  ;;  %v2155_v50 = vld [vmem:[%s2630_s0 + $0x18] sm:$0xf0]  ;;  %v1575_v51 = vor.u32 %v2173_v41, %v1572_v42  ;;  %v1819_v56 = vor.u32 %v2236_v40, %v1818_v37 }
  0x35   :  { %v1946_v46 = vld [vmem:[#allocation2 + $0x360] sm:$0xf]  ;;  %v2268_v48 = vld [vmem:[#allocation2 + $0x364] sm:$0xf0]  ;;  %v1810_v52 = vld [vmem:[#allocation2 + $0x250] sm:$0xf]  ;;  %v1883_v57 = vor.u32 %v2252_v45, %v1882_v44 }
  0x36   :  { %842 = vmatpush.bf16.msra.mxu0 %v1523_v13  ;;  %883 = vmatpush.bf16.msra.mxu3 %v1723_v14  ;;  %v1486_v49 = vld [vmem:[%s2630_s0] sm:$0xf]  ;;  %v1494_v54 = vld [vmem:[%s2630_s0 + $0x8] sm:$0xf]  ;;  %v2156_v55 = vld [vmem:[%s2630_s0 + $0x20] sm:$0xf0]  ;;  %v1947_v62 = vor.u32 %v2268_v48, %v1946_v46 }
  0x37   :  { %856 = vmatpush.bf16.msra.mxu1 %v1587_v18  ;;  %v2556_v53 = vor.u32 %v2155_v50, %v1486_v49  ;;  %v2234_v58 = vld [vmem:[#allocation2 + $0x254] sm:$0xf0]  ;;  %v2171_v59 = vld [vmem:[#allocation2 + $0x64] sm:$0xf]  ;;  %v1564_v60 = vld [vmem:[#allocation2 + $0x68] sm:$0xf0]  ;;  %v2564_v61 = vor.u32 %v2156_v55, %v1494_v54 }
  0x38   :  { %870 = vmatpush.bf16.msra.mxu2 %v1651_v19  ;;  %v1874_v63 = vld [vmem:[#allocation2 + $0x2d0] sm:$0xf]  ;;  %v2250_v0 = vld [vmem:[#allocation2 + $0x2d4] sm:$0xf0]  ;;  %v2152_v1 = vld [vmem:[%s2630_s0 + $0x4] sm:$0xf]  ;;  %v1567_v5 = vor.u32 %v2171_v59, %v1564_v60  ;;  %v1811_v9 = vor.u32 %v2234_v58, %v1810_v52 }
  0x39   :  { %v1938_v2 = vld [vmem:[#allocation2 + $0x350] sm:$0xf]  ;;  %v2266_v3 = vld [vmem:[#allocation2 + $0x354] sm:$0xf0]  ;;  %v1488_v4 = vld [vmem:[%s2630_s0 + $0x1c] sm:$0xf0]  ;;  %v1875_v10 = vor.u32 %v2250_v0, %v1874_v63 }
  0x3a   :  { %843 = vmatpush.bf16.msra.mxu0 %v1515_v29  ;;  %884 = vmatpush.bf16.msra.mxu3 %v1715_v30  ;;  %v1802_v6 = vld [vmem:[#allocation2 + $0x240] sm:$0xf]  ;;  %v2232_v7 = vld [vmem:[#allocation2 + $0x244] sm:$0xf0]  ;;  %v2574_v8 = vor.u32 %v2152_v1, %v1488_v4  ;;  %v2169_v12 = vld [vmem:[#allocation2 + $0x54] sm:$0xf]  ;;  %v1939_v14 = vor.u32 %v2266_v3, %v1938_v2 }
  0x3b   :  { %857 = vmatpush.bf16.msra.mxu1 %v1579_v33  ;;  %v1866_v11 = vld [vmem:[#allocation2 + $0x2c0] sm:$0xf]  ;;  %v1556_v13 = vld [vmem:[#allocation2 + $0x58] sm:$0xf0]  ;;  %v2248_v15 = vld [vmem:[#allocation2 + $0x2c4] sm:$0xf0]  ;;  %v1803_v22 = vor.u32 %v2232_v7, %v1802_v6 }
  0x3c   :  { %871 = vmatpush.bf16.msra.mxu2 %v1643_v34  ;;  %v2153_v16 = vld [vmem:[%s2630_s0 + $0xc] sm:$0xf]  ;;  %v1496_v17 = vld [vmem:[%s2630_s0 + $0x24] sm:$0xf0]  ;;  %v1930_v18 = vld [vmem:[#allocation2 + $0x340] sm:$0xf]  ;;  %v1559_v21 = vor.u32 %v2169_v12, %v1556_v13  ;;  %v1867_v23 = vor.u32 %v2248_v15, %v1866_v11 }
  0x3d   :  { %844 = vmatmul.bf16.vlgmr.msra.gmra.mxu0 %v2556_v53  ;;  %v2264_v19 = vld [vmem:[#allocation2 + $0x344] sm:$0xf0]  ;;  %v2583_v20 = vor.u32 %v2153_v16, %v1496_v17  ;;  %v1794_v24 = vld [vmem:[#allocation2 + $0x230] sm:$0xf]  ;;  %v2167_v25 = vld [vmem:[#allocation2 + $0x44] sm:$0xf] }
  0x3e   :  { %892 = vmatpush.bf16.msrb.mxu0 %v1827_v38  ;;  %885 = vmatpush.bf16.msra.mxu3 %v1707_v47  ;;  %v1548_v26 = vld [vmem:[#allocation2 + $0x48] sm:$0xf0]  ;;  %v1931_v27 = vor.u32 %v2264_v19, %v1930_v18  ;;  %v2230_v28 = vld [vmem:[#allocation2 + $0x234] sm:$0xf0]  ;;  %v1858_v29 = vld [vmem:[#allocation2 + $0x2b0] sm:$0xf] }
  0x3f   :  { %906 = vmatpush.bf16.msrb.mxu1 %v1891_v39  ;;  %872 = vmatmul.bf16.vlgmr.msra.gmra.mxu2 %v2564_v61  ;;  %v2246_v30 = vld [vmem:[#allocation2 + $0x2b4] sm:$0xf0]  ;;  %v1922_v31 = vld [vmem:[#allocation2 + $0x330] sm:$0xf]  ;;  %v1551_v33 = vor.u32 %v2167_v25, %v1548_v26  ;;  %v1795_v34 = vor.u32 %v2230_v28, %v1794_v24  ;;  %v1786_v36 = vld [vmem:[#allocation2 + $0x220] sm:$0xf] }
  0x40   :  { %920 = vmatpush.bf16.msrb.mxu2 %v1955_v43  ;;  %858 = vmatmul.bf16.vlgmr.msra.gmra.mxu1 %v2574_v8  ;;  %v2262_v32 = vld [vmem:[#allocation2 + $0x334] sm:$0xf0]  ;;  %v1859_v35 = vor.u32 %v2246_v30, %v1858_v29  ;;  %v2165_v37 = vld [vmem:[#allocation2 + $0x34] sm:$0xf]  ;;  %v1540_v38 = vld [vmem:[#allocation2 + $0x38] sm:$0xf0] }
  0x41   :  { %886 = vmatmul.bf16.vlgmr.msra.gmra.mxu3 %v2583_v20  ;;  %v1923_v39 = vor.u32 %v2262_v32, %v1922_v31  ;;  %v2228_v40 = vld [vmem:[#allocation2 + $0x224] sm:$0xf0]  ;;  %v1850_v41 = vld [vmem:[#allocation2 + $0x2a0] sm:$0xf]  ;;  %v1543_v45 = vor.u32 %v2165_v37, %v1540_v38  ;;  %v1778_v48 = vld [vmem:[#allocation2 + $0x210] sm:$0xf] }
  0x42   :  { %934 = vmatpush.bf16.msrb.mxu3 %v1575_v51  ;;  %893 = vmatpush.bf16.msrb.mxu0 %v1819_v56  ;;  %v2244_v42 = vld [vmem:[#allocation2 + $0x2a4] sm:$0xf0]  ;;  %v1914_v43 = vld [vmem:[#allocation2 + $0x320] sm:$0xf]  ;;  %v1787_v46 = vor.u32 %v2228_v40, %v1786_v36  ;;  %v2163_v49 = vld [vmem:[#allocation2 + $0x24] sm:$0xf] }
  0x43   :  { %907 = vmatpush.bf16.msrb.mxu1 %v1883_v57  ;;  %v2260_v44 = vld [vmem:[#allocation2 + $0x324] sm:$0xf0]  ;;  %v1851_v47 = vor.u32 %v2244_v42, %v1850_v41  ;;  %v1532_v50 = vld [vmem:[#allocation2 + $0x28] sm:$0xf0]  ;;  %v2226_v52 = vld [vmem:[#allocation2 + $0x214] sm:$0xf0] }
  0x44   :  { %921 = vmatpush.bf16.msrb.mxu2 %v1947_v62  ;;  %v1915_v51 = vor.u32 %v2260_v44, %v1914_v43  ;;  %v1842_v54 = vld [vmem:[#allocation2 + $0x290] sm:$0xf]  ;;  %v2242_v55 = vld [vmem:[#allocation2 + $0x294] sm:$0xf0]  ;;  %v1535_v58 = vor.u32 %v2163_v49, %v1532_v50  ;;  %v1770_v59 = vld [vmem:[#allocation2 + $0x200] sm:$0xf]  ;;  %v1779_v0 = vor.u32 %v2226_v52, %v1778_v48 }
  0x45   :  { %v1906_v56 = vld [vmem:[#allocation2 + $0x310] sm:$0xf]  ;;  %v2258_v57 = vld [vmem:[#allocation2 + $0x314] sm:$0xf0]  ;;  %v2224_v60 = vld [vmem:[#allocation2 + $0x204] sm:$0xf0]  ;;  %v1843_v1 = vor.u32 %v2242_v55, %v1842_v54 }
  0x46   :  { %935 = vmatpush.bf16.msrb.mxu3 %v1567_v5  ;;  %894 = vmatpush.bf16.msrb.mxu0 %v1811_v9  ;;  %v1834_v62 = vld [vmem:[#allocation2 + $0x280] sm:$0xf]  ;;  %v2240_v63 = vld [vmem:[#allocation2 + $0x284] sm:$0xf0]  ;;  %v2161_v4 = vld [vmem:[#allocation2 + $0x14] sm:$0xf]  ;;  %v1907_v6 = vor.u32 %v2258_v57, %v1906_v56  ;;  %v1771_v19 = vor.u32 %v2224_v60, %v1770_v59 }
  0x47   :  { %908 = vmatpush.bf16.msrb.mxu1 %v1875_v10  ;;  %v1898_v2 = vld [vmem:[#allocation2 + $0x300] sm:$0xf]  ;;  %v2256_v3 = vld [vmem:[#allocation2 + $0x304] sm:$0xf0]  ;;  %v1524_v5 = vld [vmem:[#allocation2 + $0x18] sm:$0xf0] }
  0x48   :  { %922 = vmatpush.bf16.msrb.mxu2 %v1939_v14  ;;  %v2189_v7 = vld [vmem:[#allocation2 + $0xf4] sm:$0xf]  ;;  %v1636_v9 = vld [vmem:[#allocation2 + $0xf8] sm:$0xf0]  ;;  %v1502_v12 = vld [vmem:[%s2630_s0 + $0x10] sm:$0xf]  ;;  %v1527_v14 = vor.u32 %v2161_v4, %v1524_v5  ;;  %v1899_v25 = vor.u32 %v2256_v3, %v1898_v2 }
  0x49   :  { %v2205_v10 = vld [vmem:[#allocation2 + $0x174] sm:$0xf]  ;;  %v1700_v11 = vld [vmem:[#allocation2 + $0x178] sm:$0xf0]  ;;  %v2157_v13 = vld [vmem:[%s2630_s0 + $0x28] sm:$0xf0]  ;;  %v1639_v26 = vor.u32 %v2189_v7, %v1636_v9 }
  0x4a   :  { %936 = vmatpush.bf16.msrb.mxu3 %v1559_v21  ;;  %895 = vmatpush.bf16.msrb.mxu0 %v1803_v22  ;;  %v1510_v15 = vld [vmem:[%s2630_s0 + $0x18] sm:$0xf]  ;;  %v2158_v16 = vld [vmem:[%s2630_s0 + $0x30] sm:$0xf0]  ;;  %v1764_v18 = vld [vmem:[#allocation2 + $0x1f8] sm:$0xf0]  ;;  %v1835_v21 = vor.u32 %v2240_v63, %v1834_v62  ;;  %v1703_v30 = vor.u32 %v2205_v10, %v1700_v11 }
  0x4b   :  { %909 = vmatpush.bf16.msrb.mxu1 %v1867_v23  ;;  %v2221_v17 = vld [vmem:[#allocation2 + $0x1f4] sm:$0xf]  ;;  %v1504_v23 = vld [vmem:[%s2630_s0 + $0x2c] sm:$0xf0]  ;;  %v2159_v24 = vld [vmem:[#allocation2 + $0x4] sm:$0xf]  ;;  %v2608_v40 = vor.u32 %v2158_v16, %v1510_v15 }
  0x4c   :  { %923 = vmatpush.bf16.msrb.mxu2 %v1931_v27  ;;  %v2154_v22 = vld [vmem:[%s2630_s0 + $0x14] sm:$0xf]  ;;  %v1516_v27 = vld [vmem:[#allocation2 + $0x8] sm:$0xf0]  ;;  %v2187_v28 = vld [vmem:[#allocation2 + $0xe4] sm:$0xf]  ;;  %v1767_v31 = vor.u32 %v2221_v17, %v1764_v18 }
  0x4d   :  { %v1628_v29 = vld [vmem:[#allocation2 + $0xe8] sm:$0xf0]  ;;  %v2203_v32 = vld [vmem:[#allocation2 + $0x164] sm:$0xf]  ;;  %v2606_v36 = vor.u32 %v2154_v22, %v1504_v23  ;;  %v1519_v41 = vor.u32 %v2159_v24, %v1516_v27  ;;  %v2185_v44 = vld [vmem:[#allocation2 + $0xd4] sm:$0xf] }
  0x4e   :  { %937 = vmatpush.bf16.msrb.mxu3 %v1551_v33  ;;  %896 = vmatpush.bf16.msrb.mxu0 %v1795_v34  ;;  %v2237_v33 = vld [vmem:[#allocation2 + $0x274] sm:$0xf]  ;;  %v1828_v34 = vld [vmem:[#allocation2 + $0x278] sm:$0xf0]  ;;  %v1692_v37 = vld [vmem:[#allocation2 + $0x168] sm:$0xf0]  ;;  %v1631_v42 = vor.u32 %v2187_v28, %v1628_v29 }
  0x4f   :  { %910 = vmatpush.bf16.msrb.mxu1 %v1859_v35  ;;  %v2604_v35 = vor.u32 %v2157_v13, %v1502_v12  ;;  %v2219_v38 = vld [vmem:[#allocation2 + $0x1e4] sm:$0xf]  ;;  %v1831_v43 = vor.u32 %v2237_v33, %v1828_v34  ;;  %v2201_v48 = vld [vmem:[#allocation2 + $0x154] sm:$0xf]  ;;  %v1820_v50 = vld [vmem:[#allocation2 + $0x268] sm:$0xf0] }
  0x50   :  { %924 = vmatpush.bf16.msrb.mxu2 %v1923_v39  ;;  %v1756_v39 = vld [vmem:[#allocation2 + $0x1e8] sm:$0xf0]  ;;  %v2235_v49 = vld [vmem:[#allocation2 + $0x264] sm:$0xf]  ;;  %v2217_v52 = vld [vmem:[#allocation2 + $0x1d4] sm:$0xf] }
  0x51   :  { %v1748_v54 = vld [vmem:[#allocation2 + $0x1d8] sm:$0xf0]  ;;  %v1823_v56 = vor.u32 %v2235_v49, %v1820_v50  ;;  %v2183_v57 = vld [vmem:[#allocation2 + $0xc4] sm:$0xf]  ;;  %v2233_v63 = vld [vmem:[#allocation2 + $0x254] sm:$0xf] }
  0x52   :  { %938 = vmatpush.bf16.msrb.mxu3 %v1543_v45  ;;  %897 = vmatpush.bf16.msrb.mxu0 %v1787_v46  ;;  %v1620_v45 = vld [vmem:[#allocation2 + $0xd8] sm:$0xf0]  ;;  %v1695_v46 = vor.u32 %v2203_v32, %v1692_v37  ;;  %v1751_v60 = vor.u32 %v2217_v52, %v1748_v54  ;;  %v2199_v62 = vld [vmem:[#allocation2 + $0x144] sm:$0xf]  ;;  %v1740_v3 = vld [vmem:[#allocation2 + $0x1c8] sm:$0xf0] }
  0x53   :  { %911 = vmatpush.bf16.msrb.mxu1 %v1851_v47  ;;  %v1759_v47 = vor.u32 %v2219_v38, %v1756_v39  ;;  %v1623_v55 = vor.u32 %v2185_v44, %v1620_v45  ;;  %v2215_v2 = vld [vmem:[#allocation2 + $0x1c4] sm:$0xf]  ;;  %v1604_v7 = vld [vmem:[#allocation2 + $0xb8] sm:$0xf0]  ;;  %v2197_v11 = vld [vmem:[#allocation2 + $0x134] sm:$0xf] }
  0x54   :  { %925 = vmatpush.bf16.msrb.mxu2 %v1915_v51  ;;  %v1684_v51 = vld [vmem:[#allocation2 + $0x158] sm:$0xf0]  ;;  %v1743_v10 = vor.u32 %v2215_v2, %v1740_v3  ;;  %v2231_v12 = vld [vmem:[#allocation2 + $0x244] sm:$0xf]  ;;  %v1804_v13 = vld [vmem:[#allocation2 + $0x248] sm:$0xf0] }
  0x55   :  { %v1687_v59 = vor.u32 %v2201_v48, %v1684_v51  ;;  %v2213_v15 = vld [vmem:[#allocation2 + $0x1b4] sm:$0xf]  ;;  %v1732_v16 = vld [vmem:[#allocation2 + $0x1b8] sm:$0xf0]  ;;  %v2179_v18 = vld [vmem:[#allocation2 + $0xa4] sm:$0xf] }
  0x56   :  { %939 = vmatpush.bf16.msrb.mxu3 %v1535_v58  ;;  %898 = vmatpush.bf16.msrb.mxu0 %v1779_v0  ;;  %v1612_v58 = vld [vmem:[#allocation2 + $0xc8] sm:$0xf0]  ;;  %v1812_v0 = vld [vmem:[#allocation2 + $0x258] sm:$0xf0]  ;;  %v1735_v23 = vor.u32 %v2213_v15, %v1732_v16  ;;  %v2229_v24 = vld [vmem:[#allocation2 + $0x234] sm:$0xf] }
  0x57   :  { %912 = vmatpush.bf16.msrb.mxu1 %v1843_v1  ;;  %v1676_v1 = vld [vmem:[#allocation2 + $0x148] sm:$0xf0]  ;;  %v1615_v4 = vor.u32 %v2183_v57, %v1612_v58  ;;  %v1815_v5 = vor.u32 %v2233_v63, %v1812_v0  ;;  %v2211_v27 = vld [vmem:[#allocation2 + $0x1a4] sm:$0xf]  ;;  %v1588_v32 = vld [vmem:[#allocation2 + $0x98] sm:$0xf0] }
  0x58   :  { %926 = vmatpush.bf16.msrb.mxu2 %v1907_v6  ;;  %v2181_v6 = vld [vmem:[#allocation2 + $0xb4] sm:$0xf]  ;;  %v1679_v9 = vor.u32 %v2199_v62, %v1676_v1  ;;  %v1724_v28 = vld [vmem:[#allocation2 + $0x1a8] sm:$0xf0]  ;;  %v2227_v38 = vld [vmem:[#allocation2 + $0x224] sm:$0xf] }
  0x59   :  { %v1607_v17 = vor.u32 %v2181_v6, %v1604_v7  ;;  %v1727_v34 = vor.u32 %v2211_v27, %v1724_v28  ;;  %v2193_v37 = vld [vmem:[#allocation2 + $0x114] sm:$0xf]  ;;  %v1788_v39 = vld [vmem:[#allocation2 + $0x228] sm:$0xf0]  ;;  %v2191_v48 = vld [vmem:[#allocation2 + $0x104] sm:$0xf] }
  0x5a   :  { %940 = vmatpush.bf16.msrb.mxu3 %v1527_v14  ;;  %899 = vmatpush.bf16.msrb.mxu0 %v1771_v19  ;;  %v1668_v14 = vld [vmem:[#allocation2 + $0x138] sm:$0xf0]  ;;  %v1596_v19 = vld [vmem:[#allocation2 + $0xa8] sm:$0xf0]  ;;  %v1791_v45 = vor.u32 %v2227_v38, %v1788_v39  ;;  %v2225_v52 = vld [vmem:[#allocation2 + $0x214] sm:$0xf] }
  0x5b   :  { %913 = vmatpush.bf16.msrb.mxu1 %v1835_v21  ;;  %v2195_v21 = vld [vmem:[#allocation2 + $0x124] sm:$0xf]  ;;  %v1671_v22 = vor.u32 %v2197_v11, %v1668_v14  ;;  %v1599_v29 = vor.u32 %v2179_v18, %v1596_v19  ;;  %v1644_v51 = vld [vmem:[#allocation2 + $0x108] sm:$0xf0]  ;;  %v1780_v54 = vld [vmem:[#allocation2 + $0x218] sm:$0xf0] }
  0x5c   :  { %927 = vmatpush.bf16.msrb.mxu2 %v1899_v25  ;;  %v1796_v25 = vld [vmem:[#allocation2 + $0x238] sm:$0xf0]  ;;  %v2269_v57 = vld [vmem:[#allocation2 + $0x374] sm:$0xf]  ;;  %v1783_v63 = vor.u32 %v2225_v52, %v1780_v54  ;;  %v1647_v0 = vor.u32 %v2191_v48, %v1644_v51  ;;  %v2223_v2 = vld [vmem:[#allocation2 + $0x204] sm:$0xf] }
  0x5d   :  { %900 = vmatmul.bf16.vlgmr.msrb.gmra.mxu0 %v2604_v35  ;;  %v1956_v58 = vld [vmem:[#allocation2 + $0x378] sm:$0xf0]  ;;  %v1772_v3 = vld [vmem:[#allocation2 + $0x208] sm:$0xf0]  ;;  %v2251_v6 = vld [vmem:[#allocation2 + $0x2e4] sm:$0xf] }
  0x5e   :  { %948 = vmatpush.bf16.msra.mxu0 %v1639_v26  ;;  %914 = vmatmul.bf16.vlgmr.msrb.gmra.mxu1 %v2606_v36  ;;  %v1660_v26 = vld [vmem:[#allocation2 + $0x128] sm:$0xf0]  ;;  %v1775_v11 = vor.u32 %v2223_v2, %v1772_v3  ;;  %v2249_v14 = vld [vmem:[#allocation2 + $0x2d4] sm:$0xf]  ;;  %v1876_v15 = vld [vmem:[#allocation2 + $0x2d8] sm:$0xf0] }
  0x5f   :  { %962 = vmatpush.bf16.msra.mxu1 %v1703_v30  ;;  %928 = vmatmul.bf16.vlgmr.msrb.gmra.mxu2 %v2608_v40  ;;  %v1799_v30 = vor.u32 %v2229_v24, %v1796_v25  ;;  %v1663_v33 = vor.u32 %v2195_v21, %v1660_v26  ;;  %v1884_v7 = vld [vmem:[#allocation2 + $0x2e8] sm:$0xf0]  ;;  %v2265_v16 = vld [vmem:[#allocation2 + $0x354] sm:$0xf]  ;;  %v2247_v19 = vld [vmem:[#allocation2 + $0x2c4] sm:$0xf] }
  0x60   :  { %976 = vmatpush.bf16.msra.mxu2 %v1767_v31  ;;  %941 = vmatpush.bf16.msrb.mxu3 %v1519_v41  ;;  %v2177_v31 = vld [vmem:[#allocation2 + $0x94] sm:$0xf]  ;;  %v1652_v41 = vld [vmem:[#allocation2 + $0x118] sm:$0xf0]  ;;  %v1868_v21 = vld [vmem:[#allocation2 + $0x2c8] sm:$0xf0] }
  0x61   :  { %v1591_v44 = vor.u32 %v2177_v31, %v1588_v32  ;;  %v1655_v49 = vor.u32 %v2193_v37, %v1652_v41  ;;  %v1871_v24 = vor.u32 %v2247_v19, %v1868_v21  ;;  %v2245_v25 = vld [vmem:[#allocation2 + $0x2b4] sm:$0xf]  ;;  %v1860_v26 = vld [vmem:[#allocation2 + $0x2b8] sm:$0xf0]  ;;  %v2259_v31 = vld [vmem:[#allocation2 + $0x324] sm:$0xf] }
  0x62   :  { %949 = vmatpush.bf16.msra.mxu0 %v1631_v42  ;;  %v2209_v42 = vld [vmem:[#allocation2 + $0x194] sm:$0xf]  ;;  %v1863_v28 = vor.u32 %v2245_v25, %v1860_v26  ;;  %v1916_v32 = vld [vmem:[#allocation2 + $0x328] sm:$0xf0]  ;;  %v1844_v37 = vld [vmem:[#allocation2 + $0x298] sm:$0xf0] }
  0x63   :  { %963 = vmatpush.bf16.msra.mxu1 %v1695_v46  ;;  %942 = vmatmul.bf16.vlgmr.msrb.gmra.mxu3 %v2556_v53  ;;  %v1807_v53 = vor.u32 %v2231_v12, %v1804_v13  ;;  %v2175_v46 = vld [vmem:[#allocation2 + $0x84] sm:$0xf]  ;;  %v1887_v12 = vor.u32 %v2251_v6, %v1884_v7  ;;  %v2261_v27 = vld [vmem:[#allocation2 + $0x334] sm:$0xf]  ;;  %v1908_v39 = vld [vmem:[#allocation2 + $0x318] sm:$0xf0] }
  0x64   :  { %990 = vmatpush.bf16.msra.mxu3 %v1831_v43  ;;  %977 = vmatpush.bf16.msra.mxu2 %v1759_v47  ;;  %v1716_v43 = vld [vmem:[#allocation2 + $0x198] sm:$0xf0]  ;;  %v1580_v47 = vld [vmem:[#allocation2 + $0x88] sm:$0xf0]  ;;  %v2257_v38 = vld [vmem:[#allocation2 + $0x314] sm:$0xf] }
  0x65   :  { %v1719_v50 = vor.u32 %v2209_v42, %v1716_v43  ;;  %v1583_v62 = vor.u32 %v2175_v46, %v1580_v47  ;;  %v1911_v42 = vor.u32 %v2257_v38, %v1908_v39  ;;  %v2239_v43 = vld [vmem:[#allocation2 + $0x284] sm:$0xf]  ;;  %v1900_v46 = vld [vmem:[#allocation2 + $0x308] sm:$0xf0]  ;;  %v2285_v51 = vld [vmem:[#allocation6 + $0x74] sm:$0xf] }
  0x66   :  { %950 = vmatpush.bf16.msra.mxu0 %v1623_v55  ;;  %v2253_v55 = vld [vmem:[#allocation2 + $0x2f4] sm:$0xf]  ;;  %v2020_v54 = vld [vmem:[#allocation6 + $0x78] sm:$0xf0]  ;;  %v1994_v3 = vld [vmem:[#allocation6 + $0x40] sm:$0xf] }
  0x67   :  { %964 = vmatpush.bf16.msra.mxu1 %v1687_v59  ;;  %v2207_v59 = vld [vmem:[#allocation2 + $0x184] sm:$0xf]  ;;  %v1996_v7 = vld [vmem:[#allocation6 + $0x48] sm:$0xf0]  ;;  %v2620_v21 = vld [vmem:[#allocation4] sm:$0x3] }
  0x68   :  { %991 = vmatpush.bf16.msra.mxu3 %v1823_v56  ;;  %978 = vmatpush.bf16.msra.mxu2 %v1751_v60  ;;  %v1892_v56 = vld [vmem:[#allocation2 + $0x2f8] sm:$0xf0]  ;;  %v1708_v60 = vld [vmem:[#allocation2 + $0x188] sm:$0xf0]  ;;  %v2273_v26 = vld [vmem:[#allocation6 + $0x14] sm:$0xf] }
  0x69   :  { %v1895_v1 = vor.u32 %v2253_v55, %v1892_v56  ;;  %v2023_v55 = vor.u32 %v2285_v51, %v2020_v54  ;;  %v2010_v56 = vld [vmem:[#allocation6 + $0x60] sm:$0xf]  ;;  %v1980_v19 = vld [vmem:[#allocation6 + $0x28] sm:$0xf0]  ;;  %v2274_v25 = vld [vmem:[#allocation6 + $0x14] sm:$0xf0] }
  0x6a   :  { %951 = vmatpush.bf16.msra.mxu0 %v1615_v4  ;;  %v1959_v4 = vor.u32 %v2269_v57, %v1956_v58  ;;  %v2284_v57 = vld [vmem:[#allocation6 + $0x64] sm:$0xf0]  ;;  %v2283_v58 = vld [vmem:[#allocation6 + $0x64] sm:$0xf] }
  0x6b   :  { %965 = vmatpush.bf16.msra.mxu1 %v1679_v9  ;;  %v2267_v9 = vld [vmem:[#allocation2 + $0x364] sm:$0xf] }
  0x6c   :  { %992 = vmatpush.bf16.msra.mxu3 %v1815_v5  ;;  %979 = vmatpush.bf16.msra.mxu2 %v1743_v10  ;;  %v1711_v5 = vor.u32 %v2207_v59, %v1708_v60  ;;  %v1948_v10 = vld [vmem:[#allocation2 + $0x368] sm:$0xf0]  ;;  %v2011_v59 = vor.u32 %v2284_v57, %v2010_v56 }
  0x6d   :  { %v1951_v13 = vor.u32 %v2267_v9, %v1948_v10  ;;  %v2012_v60 = vld [vmem:[#allocation6 + $0x68] sm:$0xf0]  ;;  %v1986_v10 = vld [vmem:[#allocation6 + $0x30] sm:$0xf] }
  0x6e   :  { %952 = vmatpush.bf16.msra.mxu0 %v1607_v17  ;;  %v1940_v17 = vld [vmem:[#allocation2 + $0x358] sm:$0xf0] }
  0x6f   :  { %966 = vmatpush.bf16.msra.mxu1 %v1671_v22  ;;  %v1943_v18 = vor.u32 %v2265_v16, %v1940_v17  ;;  %v2263_v22 = vld [vmem:[#allocation2 + $0x344] sm:$0xf]  ;;  %v2276_v17 = vld [vmem:[#allocation6 + $0x24] sm:$0xf0] }
  0x70   :  { %993 = vmatpush.bf16.msra.mxu3 %v1807_v53  ;;  %980 = vmatpush.bf16.msra.mxu2 %v1735_v23  ;;  %v1879_v53 = vor.u32 %v2249_v14, %v1876_v15  ;;  %v1932_v23 = vld [vmem:[#allocation2 + $0x348] sm:$0xf0]  ;;  %v1988_v14 = vld [vmem:[#allocation6 + $0x38] sm:$0xf0]  ;;  %v1978_v16 = vld [vmem:[#allocation6 + $0x20] sm:$0xf] }
  0x72   :  { %953 = vmatpush.bf16.msra.mxu0 %v1599_v29  ;;  %v2243_v29 = vld [vmem:[#allocation2 + $0x2a4] sm:$0xf] }
  0x73   :  { %967 = vmatpush.bf16.msra.mxu1 %v1663_v33  ;;  %v1919_v33 = vor.u32 %v2259_v31, %v1916_v32  ;;  %v2271_v31 = vld [vmem:[#allocation6 + $0x4] sm:$0xf] }
  0x74   :  { %994 = vmatpush.bf16.msra.mxu3 %v1799_v30  ;;  %981 = vmatpush.bf16.msra.mxu2 %v1727_v34  ;;  %v1852_v30 = vld [vmem:[#allocation2 + $0x2a8] sm:$0xf0]  ;;  %v2241_v34 = vld [vmem:[#allocation2 + $0x294] sm:$0xf] }
  0x75   :  { %v1847_v41 = vor.u32 %v2241_v34, %v1844_v37 }
  0x76   :  { %954 = vmatpush.bf16.msra.mxu0 %v1591_v44  ;;  %v1836_v44 = vld [vmem:[#allocation2 + $0x288] sm:$0xf0] }
  0x77   :  { %968 = vmatpush.bf16.msra.mxu1 %v1655_v49  ;;  %v1839_v47 = vor.u32 %v2239_v43, %v1836_v44  ;;  %v2018_v49 = vld [vmem:[#allocation6 + $0x70] sm:$0xf] }
  0x78   :  { %995 = vmatpush.bf16.msra.mxu3 %v1791_v45  ;;  %982 = vmatpush.bf16.msra.mxu2 %v1719_v50  ;;  %v2255_v45 = vld [vmem:[#allocation2 + $0x304] sm:$0xf]  ;;  %v2286_v50 = vld [vmem:[#allocation6 + $0x74] sm:$0xf0] }
  0x79   :  { %v1903_v48 = vor.u32 %v2255_v45, %v1900_v46  ;;  %v2019_v52 = vor.u32 %v2286_v50, %v2018_v49 }
  0x7a   :  { %955 = vmatpush.bf16.msra.mxu0 %v1583_v62  ;;  %v2015_v62 = vor.u32 %v2283_v58, %v2012_v60  ;;  %v2082_v58 = vld [vmem:[#allocation6 + $0xf0] sm:$0xf]  ;;  %v2301_v60 = vld [vmem:[#allocation6 + $0xf4] sm:$0xf] }
  0x7b   :  { %969 = vmatpush.bf16.msra.mxu1 %v1647_v0  ;;  %v2282_v0 = vld [vmem:[#allocation6 + $0x54] sm:$0xf0] }
  0x7c   :  { %996 = vmatpush.bf16.msra.mxu3 %v1783_v63  ;;  %983 = vmatpush.bf16.msra.mxu2 %v1711_v5  ;;  %v2002_v63 = vld [vmem:[#allocation6 + $0x50] sm:$0xf]  ;;  %v2279_v5 = vld [vmem:[#allocation6 + $0x44] sm:$0xf] }
  0x7d   :  { %956 = vmatmul.bf16.vlgmr.msra.gmra.mxu0 %v2574_v8  ;;  %v1935_v8 = vor.u32 %v2263_v22, %v1932_v23  ;;  %v1999_v9 = vor.u32 %v2279_v5, %v1996_v7  ;;  %v2074_v5 = vld [vmem:[#allocation6 + $0xe0] sm:$0xf]  ;;  %v2299_v7 = vld [vmem:[#allocation6 + $0xe4] sm:$0xf] }
  0x7e   :  { %1004 = vmatpush.bf16.msrb.mxu0 %v1895_v1  ;;  %970 = vmatmul.bf16.vlgmr.msra.gmra.mxu1 %v2564_v61  ;;  %v1924_v61 = vld [vmem:[#allocation2 + $0x338] sm:$0xf0] }
  0x7f   :  { %1018 = vmatpush.bf16.msrb.mxu1 %v1959_v4  ;;  %984 = vmatmul.bf16.vlgmr.msra.gmra.mxu2 %v2583_v20  ;;  %v1927_v20 = vor.u32 %v2261_v27, %v1924_v61  ;;  %v2004_v1 = vld [vmem:[#allocation6 + $0x58] sm:$0xf0]  ;;  %v2280_v4 = vld [vmem:[#allocation6 + $0x44] sm:$0xf0]  ;;  %v236_v27 = vperm.slane %v2620_v21, 0 }
  0x80   :  { %997 = vmatpush.bf16.msra.mxu3 %v1775_v11  ;;  %1244 = vmatpush.bf16.msrb.mxu2 %v2019_v52  ;;  %v1995_v6 = vor.u32 %v2280_v4, %v1994_v3  ;;  %v2278_v11 = vld [vmem:[#allocation6 + $0x34] sm:$0xf0] }
  0x82   :  { %1005 = vmatpush.bf16.msrb.mxu0 %v1887_v12  ;;  %v2277_v12 = vld [vmem:[#allocation6 + $0x34] sm:$0xf] }
  0x83   :  { %1019 = vmatpush.bf16.msrb.mxu1 %v1951_v13  ;;  %998 = vmatmul.bf16.vlgmr.msra.gmra.mxu3 %v2604_v35  ;;  %v1855_v35 = vor.u32 %v2243_v29, %v1852_v30  ;;  %v1987_v13 = vor.u32 %v2278_v11, %v1986_v10  ;;  %v1991_v15 = vor.u32 %v2277_v12, %v1988_v14  ;;  %v1962_v29 = vld [vmem:[#allocation6] sm:$0xf]  ;;  %v2272_v30 = vld [vmem:[#allocation6 + $0x4] sm:$0xf0]  ;;  %v2076_v11 = vld [vmem:[#allocation6 + $0xe8] sm:$0xf0] }
  0x84   :  { %1245 = vmatpush.bf16.msrb.mxu2 %v2011_v59  ;;  %v2302_v59 = vld [vmem:[#allocation6 + $0xf4] sm:$0xf0]  ;;  %v2066_v12 = vld [vmem:[#allocation6 + $0xd0] sm:$0xf]  ;;  %v2079_v14 = vor.u32 %v2299_v7, %v2076_v11 }
  0x86   :  { %1006 = vmatpush.bf16.msrb.mxu0 %v1879_v53  ;;  %v2275_v53 = vld [vmem:[#allocation6 + $0x24] sm:$0xf] }
  0x87   :  { %1020 = vmatpush.bf16.msrb.mxu1 %v1943_v18  ;;  %v1979_v18 = vor.u32 %v2276_v17, %v1978_v16  ;;  %v1983_v22 = vor.u32 %v2275_v53, %v1980_v19  ;;  %v2068_v16 = vld [vmem:[#allocation6 + $0xd8] sm:$0xf0]  ;;  %v2296_v19 = vld [vmem:[#allocation6 + $0xc4] sm:$0xf0] }
  0x8a   :  { %1007 = vmatpush.bf16.msrb.mxu0 %v1871_v24 }
  0x8b   :  { %1021 = vmatpush.bf16.msrb.mxu1 %v1935_v8  ;;  %v1970_v8 = vld [vmem:[#allocation6 + $0x10] sm:$0xf] }
  0x8c   :  { %v1971_v61 = vor.u32 %v2274_v25, %v1970_v8  ;;  %v2295_v25 = vld [vmem:[#allocation6 + $0xc4] sm:$0xf] }
  0x8e   :  { %1008 = vmatpush.bf16.msrb.mxu0 %v1863_v28  ;;  %v1972_v28 = vld [vmem:[#allocation6 + $0x18] sm:$0xf0] }
  0x8f   :  { %1022 = vmatpush.bf16.msrb.mxu1 %v1927_v20  ;;  %v1975_v20 = vor.u32 %v2273_v26, %v1972_v28  ;;  %v2060_v26 = vld [vmem:[#allocation6 + $0xc8] sm:$0xf0]  ;;  %v2050_v28 = vld [vmem:[#allocation6 + $0xb0] sm:$0xf] }
  0x92   :  { %1009 = vmatpush.bf16.msrb.mxu0 %v1855_v35  ;;  %v1963_v35 = vor.u32 %v2272_v30, %v1962_v29  ;;  %v2293_v29 = vld [vmem:[#allocation6 + $0xb4] sm:$0xf] }
  0x93   :  { %1023 = vmatpush.bf16.msrb.mxu1 %v1919_v33  ;;  %v1964_v33 = vld [vmem:[#allocation6 + $0x8] sm:$0xf0] }
  0x94   :  { %v1967_v37 = vor.u32 %v2271_v31, %v1964_v33  ;;  %v2052_v31 = vld [vmem:[#allocation6 + $0xb8] sm:$0xf0]  ;;  %v2292_v33 = vld [vmem:[#allocation6 + $0xa4] sm:$0xf0] }
  0x96   :  { %1010 = vmatpush.bf16.msrb.mxu0 %v1847_v41 }
  0x97   :  { %1024 = vmatpush.bf16.msrb.mxu1 %v1911_v42 }
  0x9a   :  { %1011 = vmatpush.bf16.msrb.mxu0 %v1839_v47 }
  0x9b   :  { %1025 = vmatpush.bf16.msrb.mxu1 %v1903_v48 }
  0x9d   :  { %1012 = vmatmul.bf16.vlgmr.msrb.gmra.mxu0 %v2606_v36  ;;  %v2281_v36 = vld [vmem:[#allocation6 + $0x54] sm:$0xf] }
  0x9e   :  { %1026 = vmatmul.bf16.vlgmr.msrb.gmra.mxu1 %v2608_v40  ;;  %1272 = vmatpush.bf16.msra.mxu0 %v2023_v55  ;;  %v2003_v40 = vor.u32 %v2282_v0, %v2002_v63  ;;  %v2007_v2 = vor.u32 %v2281_v36, %v2004_v1  ;;  %v2084_v63 = vld [vmem:[#allocation6 + $0xf8] sm:$0xf0] }
  0xa0   :  { %1246 = vmatpush.bf16.msrb.mxu2 %v2003_v40  ;;  %v2087_v40 = vor.u32 %v2301_v60, %v2084_v63 }
  0xa2   :  { %1273 = vmatpush.bf16.msra.mxu0 %v2015_v62  ;;  %v2083_v62 = vor.u32 %v2302_v59, %v2082_v58  ;;  %1286 = vmatpush.bf16.msra.mxu1 %v2087_v40 }
  0xa4   :  { %1247 = vmatpush.bf16.msrb.mxu2 %v1995_v6  ;;  %1258 = vmatpush.bf16.msrb.mxu3 %v2083_v62  ;;  %v2300_v6 = vld [vmem:[#allocation6 + $0xe4] sm:$0xf0] }
  0xa5   :  { %v2075_v10 = vor.u32 %v2300_v6, %v2074_v5 }
  0xa6   :  { %1274 = vmatpush.bf16.msra.mxu0 %v2007_v2  ;;  %1287 = vmatpush.bf16.msra.mxu1 %v2079_v14 }
  0xa8   :  { %1248 = vmatpush.bf16.msrb.mxu2 %v1987_v13  ;;  %v2298_v13 = vld [vmem:[#allocation6 + $0xd4] sm:$0xf0]  ;;  %1259 = vmatpush.bf16.msrb.mxu3 %v2075_v10 }
  0xa9   :  { %v2067_v53 = vor.u32 %v2298_v13, %v2066_v12 }
  0xaa   :  { %1275 = vmatpush.bf16.msra.mxu0 %v1999_v9 }
  0xac   :  { %1249 = vmatpush.bf16.msrb.mxu2 %v1979_v18  ;;  %v2058_v18 = vld [vmem:[#allocation6 + $0xc0] sm:$0xf]  ;;  %1260 = vmatpush.bf16.msrb.mxu3 %v2067_v53 }
  0xae   :  { %1276 = vmatpush.bf16.msra.mxu0 %v1991_v15  ;;  %v2297_v15 = vld [vmem:[#allocation6 + $0xd4] sm:$0xf] }
  0xb0   :  { %1250 = vmatpush.bf16.msrb.mxu2 %v1971_v61  ;;  %v2063_v61 = vor.u32 %v2295_v25, %v2060_v26  ;;  %v2317_v25 = vld [vmem:[#allocation9 + $0x70] sm:$0xff] }
  0xb1   :  { %v2309_v26 = vld [vmem:[#allocation9 + $0x30] sm:$0xff] }
  0xb2   :  { %1277 = vmatpush.bf16.msra.mxu0 %v1983_v22 }
  0xb4   :  { %1251 = vmatpush.bf16.msrb.mxu2 %v1963_v35  ;;  %v2042_v35 = vld [vmem:[#allocation6 + $0xa0] sm:$0xf] }
  0xb6   :  { %1278 = vmatpush.bf16.msra.mxu0 %v1975_v20  ;;  %v2294_v20 = vld [vmem:[#allocation6 + $0xb4] sm:$0xf0] }
  0xb7   :  { %v2051_v30 = vor.u32 %v2294_v20, %v2050_v28  ;;  %v2315_v28 = vld [vmem:[#allocation9 + $0x60] sm:$0xff]  ;;  %v2314_v20 = vld [vmem:[#allocation9 + $0x58] sm:$0xff] }
  0xba   :  { %v845_v23 = vpop.f32.mrf.mxu0  ;;  %1279 = vmatpush.bf16.msra.mxu0 %v1967_v37 }
  0xbb   :  { %v846_v32 = vadd.f32 %v845_v23, %v236_v27 }
  0xbd   :  { %v859_v24 = vpop.f32.mrf.mxu1 }
  0xbe   :  { %v860_v38 = vadd.f32 %v859_v24, %v846_v32  ;;  %v2071_v24 = vor.u32 %v2297_v15, %v2068_v16  ;;  %v2055_v32 = vor.u32 %v2293_v29, %v2052_v31  ;;  %v2307_v29 = vld [vmem:[#allocation9 + $0x20] sm:$0xff]  ;;  %v2306_v31 = vld [vmem:[#allocation9 + $0x18] sm:$0xff] }
  0xc0   :  { %1288 = vmatpush.bf16.msra.mxu1 %v2071_v24  ;;  %v2318_v24 = vld [vmem:[#allocation9 + $0x78] sm:$0xff] }
  0xc2   :  { %v873_v34 = vpop.f32.mrf.mxu2  ;;  %v847_v39 = vpop.f32.mrf.mxu0 }
  0xc3   :  { %v874_v42 = vadd.f32 %v873_v34, %v860_v38  ;;  %v848_v44 = vadd.f32 %v847_v39, %v236_v27  ;;  %v2059_v27 = vor.u32 %v2296_v19, %v2058_v18  ;;  %v2291_v34 = vld [vmem:[#allocation6 + $0xa4] sm:$0xf]  ;;  %v2043_v38 = vor.u32 %v2292_v33, %v2042_v35  ;;  %v2044_v39 = vld [vmem:[#allocation6 + $0xa8] sm:$0xf0]  ;;  %v2305_v35 = vld [vmem:[#allocation9 + $0x10] sm:$0xff] }
  0xc4   :  { %v887_v43 = vpop.f32.mrf.mxu3  ;;  %1289 = vmatpush.bf16.msra.mxu1 %v2063_v61  ;;  %v2308_v61 = vld [vmem:[#allocation9 + $0x28] sm:$0xff]  ;;  %v2311_v33 = vld [vmem:[#allocation9 + $0x40] sm:$0xff] }
  0xc5   :  { %v861_v41 = vpop.f32.mrf.mxu1  ;;  %v888_v46 = vadd.f32 %v887_v43, %v874_v42  ;;  %1261 = vmatpush.bf16.msrb.mxu3 %v2059_v27  ;;  %v2034_v42 = vld [vmem:[#allocation6 + $0x90] sm:$0xf]  ;;  %v2290_v43 = vld [vmem:[#allocation6 + $0x94] sm:$0xf0] }
  0xc6   :  { %v862_v47 = vadd.f32 %v861_v41, %v848_v44  ;;  %v2047_v41 = vor.u32 %v2291_v34, %v2044_v39  ;;  %v2289_v44 = vld [vmem:[#allocation6 + $0x94] sm:$0xf]  ;;  %v2316_v27 = vld [vmem:[#allocation9 + $0x68] sm:$0xff]  ;;  %v1078_v39 = vld [vmem:[#allocation7] sm:$0x3] }
  0xc7   :  { %v2304_v34 = vld [vmem:[#allocation9 + $0x8] sm:$0xff] }
  0xc8   :  { %1290 = vmatpush.bf16.msra.mxu1 %v2055_v32  ;;  %v2312_v32 = vld [vmem:[#allocation9 + $0x48] sm:$0xff] }
  0xc9   :  { %1262 = vmatpush.bf16.msrb.mxu3 %v2051_v30  ;;  %v2313_v30 = vld [vmem:[#allocation9 + $0x50] sm:$0xff] }
  0xca   :  { %v875_v45 = vpop.f32.mrf.mxu2 }
  0xcb   :  { %v876_v51 = vadd.f32 %v875_v45, %v862_v47  ;;  %v2035_v45 = vor.u32 %v2290_v43, %v2034_v42 }
  0xcc   :  { %v889_v52 = vpop.f32.mrf.mxu3  ;;  %1291 = vmatpush.bf16.msra.mxu1 %v2047_v41  ;;  %v1081_v41 = vperm.slane %v1078_v39, 1 }
  0xcd   :  { %v890_v56 = vadd.f32 %v889_v52, %v876_v51  ;;  %1263 = vmatpush.bf16.msrb.mxu3 %v2043_v38  ;;  %v2287_v51 = vld [vmem:[#allocation6 + $0x84] sm:$0xf] }
  0xd1   :  { %1264 = vmatpush.bf16.msrb.mxu3 %v2035_v45 }
  0xda   :  { %v901_v48 = vpop.f32.mrf.mxu0 }
  0xdb   :  { %v915_v49 = vpop.f32.mrf.mxu1  ;;  %v902_v50 = vadd.f32 %v901_v48, %v888_v46  ;;  %v2036_v46 = vld [vmem:[#allocation6 + $0x98] sm:$0xf0]  ;;  %v237_v48 = vperm.slane %v2620_v21, 1 }
  0xdc   :  { %v2039_v47 = vor.u32 %v2289_v44, %v2036_v46  ;;  %v1080_v46 = vperm.slane %v1078_v39, 0 }
  0xdd   :  { %v916_v54 = vadd.f32 %v915_v49, %v902_v50  ;;  %v2026_v49 = vld [vmem:[#allocation6 + $0x80] sm:$0xf]  ;;  %v2288_v50 = vld [vmem:[#allocation6 + $0x84] sm:$0xf0] }
  0xde   :  { %1292 = vmatpush.bf16.msra.mxu1 %v2039_v47 }
  0xe2   :  { %v929_v55 = vpop.f32.mrf.mxu2  ;;  %v903_v57 = vpop.f32.mrf.mxu0 }
  0xe3   :  { %v930_v0 = vadd.f32 %v929_v55, %v916_v54  ;;  %v904_v36 = vadd.f32 %v903_v57, %v890_v56  ;;  %v917_v1 = vpop.f32.mrf.mxu1  ;;  %v2027_v54 = vor.u32 %v2288_v50, %v2026_v49  ;;  %v2028_v55 = vld [vmem:[#allocation6 + $0x88] sm:$0xf0] }
  0xe4   :  { %v2031_v57 = vor.u32 %v2287_v51, %v2028_v55 }
  0xe5   :  { %v1036_v2 = vmul.f32 0.2, %v930_v0  ;;  %v918_v3 = vadd.f32 %v917_v1, %v904_v36  ;;  %vm1032_vm0 = vcmp.gt.f32.partialorder %v930_v0, 0.0  ;;  %1265 = vmatpush.bf16.msrb.mxu3 %v2027_v54 }
  0xe6   :  { %v943_v37 = vpop.f32.mrf.mxu3  ;;  %1293 = vmatpush.bf16.msra.mxu1 %v2031_v57 }
  0xe7   :  { %v1040_v22 = vsel %vm1032_vm0, %v930_v0, %v1036_v2  ;;  %v944_v59 = vadd.f32 %v943_v37, %v237_v48  ;;  %v2303_v37 = vld [vmem:[#allocation9] sm:$0xff] }
  0xe9   :  { %1460 = vmatpush.bf16.msra.mxu3 %v2318_v24 }
  0xea   :  { %v931_v4 = vpop.f32.mrf.mxu2 }
  0xeb   :  { %v932_v9 = vadd.f32 %v931_v4, %v918_v3 }
  0xed   :  { %vm1034_vm1 = vcmp.gt.f32.partialorder %v932_v9, 0.0  ;;  %v1038_v17 = vmul.f32 0.2, %v932_v9  ;;  %1461 = vmatpush.bf16.msra.mxu3 %v2317_v25 }
  0xee   :  { %v945_v58 = vpop.f32.mrf.mxu3 }
  0xef   :  { %v1042_v23 = vsel %vm1034_vm1, %v932_v9, %v1038_v17  ;;  %v946_v63 = vadd.f32 %v945_v58, %v237_v48 }
  0xf0   :  { %v1044_v8 = vpack.c.bf16 %v1042_v23, %v1040_v22 }
  0xf1   :  { %1462 = vmatpush.bf16.msra.mxu3 %v2316_v27 }
  0xf2   :  { %1252 = vmatmul.bf16.vlgmr.msrb.gmra.mxu2 %v1044_v8  ;;  %1280 = vmatmul.bf16.vlgmr.msra.gmra.mxu0 %v1044_v8  ;;  %v2310_v8 = vld [vmem:[#allocation9 + $0x38] sm:$0xff] }
  0xf3   :  { %1446 = vmatpush.bf16.msra.mxu2 %v2310_v8 }
  0xf5   :  { %1463 = vmatpush.bf16.msra.mxu3 %v2315_v28 }
  0xf7   :  { %1447 = vmatpush.bf16.msra.mxu2 %v2309_v26 }
  0xf9   :  { %1464 = vmatpush.bf16.msra.mxu3 %v2314_v20 }
  0xfa   :  { %v957_v52 = vpop.f32.mrf.mxu0 }
  0xfb   :  { %v971_v56 = vpop.f32.mrf.mxu1  ;;  %v958_v60 = vadd.f32 %v957_v52, %v944_v59  ;;  %1448 = vmatpush.bf16.msra.mxu2 %v2308_v61 }
  0xfd   :  { %v972_v36 = vadd.f32 %v971_v56, %v958_v60  ;;  %1465 = vmatpush.bf16.msra.mxu3 %v2313_v30 }
  0xff   :  { %1449 = vmatpush.bf16.msra.mxu2 %v2307_v29 }
 0x101   :  { %1466 = vmatpush.bf16.msra.mxu3 %v2312_v32 }
 0x102   :  { %v985_v62 = vpop.f32.mrf.mxu2  ;;  %v959_v0 = vpop.f32.mrf.mxu0 }
 0x103   :  { %v973_v21 = vpop.f32.mrf.mxu1  ;;  %v960_v1 = vadd.f32 %v959_v0, %v946_v63  ;;  %v986_v2 = vadd.f32 %v985_v62, %v972_v36  ;;  %1450 = vmatpush.bf16.msra.mxu2 %v2306_v31 }
 0x105   :  { %v974_v3 = vadd.f32 %v973_v21, %v960_v1  ;;  %1467 = vmatpush.bf16.msra.mxu3 %v2311_v33 }
 0x106   :  { %v999_v40 = vpop.f32.mrf.mxu3 }
 0x107   :  { %v1000_v6 = vadd.f32 %v999_v40, %v986_v2  ;;  %1451 = vmatpush.bf16.msra.mxu2 %v2305_v35 }
 0x10a   :  { %v987_v4 = vpop.f32.mrf.mxu2 }
 0x10b   :  { %v988_v9 = vadd.f32 %v987_v4, %v974_v3  ;;  %1452 = vmatpush.bf16.msra.mxu2 %v2304_v34  ;;  %v2329_v3 = vld [vmem:[#allocation10] ss:$0 sm:$0xff] }
 0x10e   :  { %v1001_v11 = vpop.f32.mrf.mxu3 }
 0x10f   :  { %v1002_v12 = vadd.f32 %v1001_v11, %v988_v9  ;;  %1453 = vmatpush.bf16.msra.mxu2 %v2303_v37 }
 0x11a   :  { %v1013_v5 = vpop.f32.mrf.mxu0 }
 0x11b   :  { %v1027_v7 = vpop.f32.mrf.mxu1  ;;  %v1014_v10 = vadd.f32 %v1013_v5, %v1000_v6 }
 0x11d   :  { %v1028_v13 = vadd.f32 %v1027_v7, %v1014_v10 }
 0x11f   :  { %v1037_v17 = vmul.f32 0.2, %v1028_v13  ;;  %vm1033_vm2 = vcmp.gt.f32.partialorder %v1028_v13, 0.0 }
 0x121   :  { %v1041_v19 = vsel %vm1033_vm2, %v1028_v13, %v1037_v17 }
 0x122   :  { %v1015_v14 = vpop.f32.mrf.mxu0 }
 0x123   :  { %v1016_v15 = vadd.f32 %v1015_v14, %v1002_v12  ;;  %v1029_v16 = vpop.f32.mrf.mxu1 }
 0x125   :  { %v1030_v53 = vadd.f32 %v1029_v16, %v1016_v15 }
 0x127   :  { %vm1035_vm3 = vcmp.gt.f32.partialorder %v1030_v53, 0.0  ;;  %v1039_v18 = vmul.f32 0.2, %v1030_v53 }
 0x129   :  { %v1043_v22 = vsel %vm1035_vm3, %v1030_v53, %v1039_v18 }
 0x12a   :  { %v1045_v23 = vpack.c.bf16 %v1043_v22, %v1041_v19 }
 0x12c   :  { %1266 = vmatmul.bf16.vlgmr.msrb.gmra.mxu3 %v1045_v23  ;;  %1294 = vmatmul.bf16.vlgmr.msra.gmra.mxu1 %v1045_v23 }
 0x16f   :  { %v1281_v38 = vpop.f32.mrf.mxu0 }
 0x170   :  { %v1282_v44 = vadd.f32 %v1281_v38, %v1081_v41 }
 0x175   :  { %v1253_v42 = vpop.f32.mrf.mxu2 }
 0x176   :  { %v1254_v51 = vadd.f32 %v1253_v42, %v1080_v46 }
 0x177   :  { %v1283_v45 = vpop.f32.mrf.mxu0 }
 0x178   :  { %v1284_v49 = vadd.f32 %v1283_v45, %v1081_v41 }
 0x17d   :  { %v1255_v55 = vpop.f32.mrf.mxu2 }
 0x17e   :  { %v1256_v58 = vadd.f32 %v1255_v55, %v1080_v46 }
 0x1a9   :  { %v1295_v43 = vpop.f32.mrf.mxu1 }
 0x1aa   :  { %v1296_v47 = vadd.f32 %v1295_v43, %v1282_v44 }
 0x1ac   :  { %v1305_v52 = vmul.f32 0.2, %v1296_v47  ;;  %vm1301_vm4 = vcmp.gt.f32.partialorder %v1296_v47, 0.0 }
 0x1ae   :  { %v1309_v59 = vsel %vm1301_vm4, %v1296_v47, %v1305_v52 }
 0x1af   :  { %v1267_v48 = vpop.f32.mrf.mxu3 }
 0x1b0   :  { %v1268_v56 = vadd.f32 %v1267_v48, %v1254_v51 }
 0x1b1   :  { %v1297_v50 = vpop.f32.mrf.mxu1 }
 0x1b2   :  { %v1298_v54 = vadd.f32 %v1297_v50, %v1284_v49  ;;  %v1304_v0 = vmul.f32 0.2, %v1268_v56  ;;  %vm1300_vm6 = vcmp.gt.f32.partialorder %v1268_v56, 0.0 }
 0x1b4   :  { %vm1303_vm5 = vcmp.gt.f32.partialorder %v1298_v54, 0.0  ;;  %v1307_v57 = vmul.f32 0.2, %v1298_v54  ;;  %v1308_v40 = vsel %vm1300_vm6, %v1268_v56, %v1304_v0 }
 0x1b6   :  { %v1311_v60 = vsel %vm1303_vm5, %v1298_v54, %v1307_v57 }
 0x1b7   :  { %v1313_v62 = vpack.c.bf16 %v1311_v60, %v1309_v59  ;;  %v1269_v63 = vpop.f32.mrf.mxu3 }
 0x1b8   :  { %v1270_v36 = vadd.f32 %v1269_v63, %v1256_v58 }
 0x1b9   :  { %1468 = vmatmul.bf16.vlgmr.msra.gmra.mxu3 %v1313_v62 }
 0x1ba   :  { %vm1302_vm7 = vcmp.gt.f32.partialorder %v1270_v36, 0.0  ;;  %v1306_v21 = vmul.f32 0.2, %v1270_v36 }
 0x1bc   :  { %v1310_v1 = vsel %vm1302_vm7, %v1270_v36, %v1306_v21 }
 0x1bd   :  { %v1312_v2 = vpack.c.bf16 %v1310_v1, %v1308_v40 }
 0x1bf   :  { %1454 = vmatmul.bf16.vlgmr.msra.gmra.mxu2 %v1312_v2 }
 0x23c   :  { %v1469_v4 = vpop.f32.mrf.mxu3 }
 0x242   :  { %v1455_v5 = vpop.f32.mrf.mxu2 }
 0x243   :  { %v1456_v6 = vadd.f32 %v2329_v3, %v1455_v5 }
 0x244   :  { %v1471_v11 = vpop.f32.mrf.mxu3 }
 0x245   :  { %v1470_v7 = vadd.f32 %v1469_v4, %v1456_v6 }
 0x247   :  { %1474 = vst [vmem:[%s2637_s7] sm:$0xff] %v1470_v7 }
 0x24a   :  { %v1457_v9 = vpop.f32.mrf.mxu2 }
 0x24b   :  { %v1458_v10 = vadd.f32 %v2329_v3, %v1457_v9 }
 0x24d   :  { %v1472_v12 = vadd.f32 %v1471_v11, %v1458_v10 }
 0x24f   :  { %1475 = vst [vmem:[%s2637_s7 + $0x8] sm:$0xff] %v1472_v12 }
 0x250   :  { %1480 = vsyncpa [#allocation3], 1 }
 0x251   :  { %1481 = vsyncpa [#allocation5], 1 }
 0x252   :  { %1482 = vsyncpa [#allocation8], 1 }
 0x253   :  { %1483 = vsyncpa [#allocation11], 1 }

// kernel: encoder_stn_forward.6
= control target key start
LH: loop header
LB: loop body
LE: loop exit
PB: predicated region body
PF: predicated region fallthrough
CT: control target
= control target key end

     0   :  { %s1467_s1 = inlined_call_operand.vmem [shape: bf16[128,256], index: 1, kind: input, shape index: {}]   ;;  %s1468_s0 = inlined_call_operand.vmem [shape: bf16[400,128], index: 0, kind: input, shape index: {}]   ;;  %s1469_s2 = inlined_call_operand.vmem [shape: f32[1,256], index: 2, kind: input, shape index: {}]   ;;  %s1470_s3 = inlined_call_operand.vmem [shape: bf16[400,256], index: 3, kind: output, shape index: {}]  }
   0x1   :  { %v946_v0 = vld [vmem:[%s1467_s1 + $0x70] sm:$0xf]  ;;  %v992_v1 = vld [vmem:[%s1467_s1 + $0x74] sm:$0xf0]  ;;  %v991_v2 = vld [vmem:[%s1467_s1 + $0x74] sm:$0xf] }
   0x2   :  { %v947_v3 = vor.u32 %v992_v1, %v946_v0  ;;  %v948_v4 = vld [vmem:[%s1467_s1 + $0x78] sm:$0xf0]  ;;  %v938_v5 = vld [vmem:[%s1467_s1 + $0x60] sm:$0xf]  ;;  %v990_v6 = vld [vmem:[%s1467_s1 + $0x64] sm:$0xf0] }
   0x3   :  { %v951_v7 = vor.u32 %v991_v2, %v948_v4  ;;  %v989_v8 = vld [vmem:[%s1467_s1 + $0x64] sm:$0xf]  ;;  %v940_v9 = vld [vmem:[%s1467_s1 + $0x68] sm:$0xf0]  ;;  %v939_v10 = vor.u32 %v990_v6, %v938_v5  ;;  %v930_v12 = vld [vmem:[%s1467_s1 + $0x50] sm:$0xf] }
   0x4   :  { %316 = vmatpush.bf16.msra.mxu0 %v947_v3  ;;  %993 = vmatpush.bf16.msra.mxu2 %v947_v3  ;;  %v943_v11 = vor.u32 %v989_v8, %v940_v9  ;;  %v988_v13 = vld [vmem:[%s1467_s1 + $0x54] sm:$0xf0]  ;;  %v987_v14 = vld [vmem:[%s1467_s1 + $0x54] sm:$0xf]  ;;  %v932_v15 = vld [vmem:[%s1467_s1 + $0x58] sm:$0xf0] }
   0x5   :  { %450 = vmatpush.bf16.msra.mxu1 %v951_v7  ;;  %1001 = vmatpush.bf16.msra.mxu3 %v951_v7  ;;  %v931_v16 = vor.u32 %v988_v13, %v930_v12  ;;  %v935_v17 = vor.u32 %v987_v14, %v932_v15  ;;  %v922_v18 = vld [vmem:[%s1467_s1 + $0x40] sm:$0xf]  ;;  %v986_v19 = vld [vmem:[%s1467_s1 + $0x44] sm:$0xf0]  ;;  %v985_v20 = vld [vmem:[%s1467_s1 + $0x44] sm:$0xf] }
   0x6   :  { %v924_v21 = vld [vmem:[%s1467_s1 + $0x48] sm:$0xf0]  ;;  %v923_v22 = vor.u32 %v986_v19, %v922_v18  ;;  %v914_v24 = vld [vmem:[%s1467_s1 + $0x30] sm:$0xf]  ;;  %v984_v25 = vld [vmem:[%s1467_s1 + $0x34] sm:$0xf0] }
   0x7   :  { %v927_v23 = vor.u32 %v985_v20, %v924_v21  ;;  %v983_v26 = vld [vmem:[%s1467_s1 + $0x34] sm:$0xf]  ;;  %v916_v27 = vld [vmem:[%s1467_s1 + $0x38] sm:$0xf0]  ;;  %v915_v28 = vor.u32 %v984_v25, %v914_v24  ;;  %v906_v30 = vld [vmem:[%s1467_s1 + $0x20] sm:$0xf] }
   0x8   :  { %317 = vmatpush.bf16.msra.mxu0 %v939_v10  ;;  %994 = vmatpush.bf16.msra.mxu2 %v939_v10  ;;  %v919_v29 = vor.u32 %v983_v26, %v916_v27  ;;  %v982_v31 = vld [vmem:[%s1467_s1 + $0x24] sm:$0xf0]  ;;  %v981_v32 = vld [vmem:[%s1467_s1 + $0x24] sm:$0xf]  ;;  %v908_v33 = vld [vmem:[%s1467_s1 + $0x28] sm:$0xf0] }
   0x9   :  { %451 = vmatpush.bf16.msra.mxu1 %v943_v11  ;;  %1002 = vmatpush.bf16.msra.mxu3 %v943_v11  ;;  %v907_v34 = vor.u32 %v982_v31, %v906_v30  ;;  %v911_v35 = vor.u32 %v981_v32, %v908_v33  ;;  %v898_v36 = vld [vmem:[%s1467_s1 + $0x10] sm:$0xf]  ;;  %v980_v37 = vld [vmem:[%s1467_s1 + $0x14] sm:$0xf0]  ;;  %v979_v38 = vld [vmem:[%s1467_s1 + $0x14] sm:$0xf] }
   0xa   :  { %v900_v39 = vld [vmem:[%s1467_s1 + $0x18] sm:$0xf0]  ;;  %v899_v40 = vor.u32 %v980_v37, %v898_v36  ;;  %v890_v42 = vld [vmem:[%s1467_s1] sm:$0xf]  ;;  %v978_v43 = vld [vmem:[%s1467_s1 + $0x4] sm:$0xf0] }
   0xb   :  { %v903_v41 = vor.u32 %v979_v38, %v900_v39  ;;  %v977_v44 = vld [vmem:[%s1467_s1 + $0x4] sm:$0xf]  ;;  %v892_v45 = vld [vmem:[%s1467_s1 + $0x8] sm:$0xf0]  ;;  %v891_v46 = vor.u32 %v978_v43, %v890_v42  ;;  %v966_v52 = vld [vmem:[%s1468_s0 + $0x70] sm:$0xff] }
   0xc   :  { %318 = vmatpush.bf16.msra.mxu0 %v931_v16  ;;  %995 = vmatpush.bf16.msra.mxu2 %v931_v16  ;;  %v895_v47 = vor.u32 %v977_v44, %v892_v45  ;;  %v952_v48 = vld [vmem:[%s1468_s0] sm:$0xff]  ;;  %v965_v50 = vld [vmem:[%s1468_s0 + $0x68] sm:$0xff]  ;;  %v954_v53 = vld [vmem:[%s1468_s0 + $0x10] sm:$0xff] }
   0xd   :  { %452 = vmatpush.bf16.msra.mxu1 %v935_v17  ;;  %1003 = vmatpush.bf16.msra.mxu3 %v935_v17  ;;  %v1131_v49 = vld [vmem:[%s1468_s0 + $0x60] sm:$0xff]  ;;  %v953_v51 = vld [vmem:[%s1468_s0 + $0x8] sm:$0xff]  ;;  %v967_v54 = vld [vmem:[%s1468_s0 + $0x78] sm:$0xff] }
   0xe   :  { %v955_v55 = vld [vmem:[%s1468_s0 + $0x18] sm:$0xff]  ;;  %v968_v56 = vld [vmem:[%s1468_s0 + $0x80] sm:$0xff]  ;;  %v969_v58 = vld [vmem:[%s1468_s0 + $0x88] sm:$0xff] }
   0xf   :  { %v956_v57 = vld [vmem:[%s1468_s0 + $0x20] sm:$0xff]  ;;  %v957_v59 = vld [vmem:[%s1468_s0 + $0x28] sm:$0xff]  ;;  %v970_v60 = vld [vmem:[%s1468_s0 + $0x90] sm:$0xff] }
  0x10   :  { %319 = vmatpush.bf16.msra.mxu0 %v923_v22  ;;  %996 = vmatpush.bf16.msra.mxu2 %v923_v22  ;;  %v958_v61 = vld [vmem:[%s1468_s0 + $0x30] sm:$0xff]  ;;  %v971_v62 = vld [vmem:[%s1468_s0 + $0x98] sm:$0xff]  ;;  %v972_v0 = vld [vmem:[%s1468_s0 + $0xa0] sm:$0xff] }
  0x11   :  { %453 = vmatpush.bf16.msra.mxu1 %v927_v23  ;;  %1004 = vmatpush.bf16.msra.mxu3 %v927_v23  ;;  %v959_v63 = vld [vmem:[%s1468_s0 + $0x38] sm:$0xff]  ;;  %v80_v1 = vld [vmem:[%s1469_s2] sm:$0x3]  ;;  %v973_v6 = vld [vmem:[%s1468_s0 + $0xa8] sm:$0xff] }
  0x12   :  { %v1182_v2 = vperm.slane %v80_v1, 0  ;;  %v1184_v3 = vperm.slane %v80_v1, 1  ;;  %v960_v4 = vld [vmem:[%s1468_s0 + $0x40] sm:$0xff]  ;;  %v961_v23 = vld [vmem:[%s1468_s0 + $0x48] sm:$0xff]  ;;  %v974_v26 = vld [vmem:[%s1468_s0 + $0xb0] sm:$0xff] }
  0x14   :  { %320 = vmatpush.bf16.msra.mxu0 %v915_v28  ;;  %997 = vmatpush.bf16.msra.mxu2 %v915_v28 }
  0x15   :  { %454 = vmatpush.bf16.msra.mxu1 %v919_v29  ;;  %1005 = vmatpush.bf16.msra.mxu3 %v919_v29 }
  0x18   :  { %321 = vmatpush.bf16.msra.mxu0 %v907_v34  ;;  %998 = vmatpush.bf16.msra.mxu2 %v907_v34 }
  0x19   :  { %455 = vmatpush.bf16.msra.mxu1 %v911_v35  ;;  %1006 = vmatpush.bf16.msra.mxu3 %v911_v35 }
  0x1c   :  { %322 = vmatpush.bf16.msra.mxu0 %v899_v40  ;;  %999 = vmatpush.bf16.msra.mxu2 %v899_v40 }
  0x1d   :  { %456 = vmatpush.bf16.msra.mxu1 %v903_v41  ;;  %1007 = vmatpush.bf16.msra.mxu3 %v903_v41 }
  0x20   :  { %323 = vmatpush.bf16.msra.mxu0 %v891_v46  ;;  %1000 = vmatpush.bf16.msra.mxu2 %v891_v46 }
  0x21   :  { %457 = vmatpush.bf16.msra.mxu1 %v895_v47  ;;  %1008 = vmatpush.bf16.msra.mxu3 %v895_v47 }
  0x23   :  { %324 = vmatmul.bf16.vlgmr.msra.gmra.mxu0 %v952_v48  ;;  %384 = vmatmul.bf16.vlgmr.msra.gmra.mxu2 %v1131_v49 }
  0x24   :  { %458 = vmatmul.bf16.vlgmr.msra.gmra.mxu1 %v952_v48  ;;  %523 = vmatmul.bf16.vlgmr.msra.gmra.mxu3 %v965_v50 }
  0x33   :  { %329 = vmatmul.bf16.gmra.mxu0 %v953_v51  ;;  %389 = vmatmul.bf16.gmra.mxu2 %v965_v50 }
  0x34   :  { %463 = vmatmul.bf16.gmra.mxu1 %v953_v51  ;;  %528 = vmatmul.bf16.gmra.mxu3 %v966_v52  ;;  %v962_v51 = vld [vmem:[%s1468_s0 + $0x50] sm:$0xff] }
  0x43   :  { %334 = vmatmul.bf16.gmra.mxu0 %v954_v53  ;;  %394 = vmatmul.bf16.gmra.mxu2 %v966_v52 }
  0x44   :  { %468 = vmatmul.bf16.gmra.mxu1 %v954_v53  ;;  %533 = vmatmul.bf16.gmra.mxu3 %v967_v54 }
  0x53   :  { %339 = vmatmul.bf16.gmra.mxu0 %v955_v55  ;;  %399 = vmatmul.bf16.gmra.mxu2 %v967_v54  ;;  %v975_v54 = vld [vmem:[%s1468_s0 + $0xb8] sm:$0xff] }
  0x54   :  { %473 = vmatmul.bf16.gmra.mxu1 %v955_v55  ;;  %538 = vmatmul.bf16.gmra.mxu3 %v968_v56 }
  0x63   :  { %344 = vmatmul.bf16.gmra.mxu0 %v956_v57  ;;  %404 = vmatmul.bf16.gmra.mxu2 %v968_v56 }
  0x64   :  { %478 = vmatmul.bf16.gmra.mxu1 %v956_v57  ;;  %543 = vmatmul.bf16.gmra.mxu3 %v969_v58 }
  0x73   :  { %349 = vmatmul.bf16.gmra.mxu0 %v957_v59  ;;  %409 = vmatmul.bf16.gmra.mxu2 %v969_v58 }
  0x74   :  { %483 = vmatmul.bf16.gmra.mxu1 %v957_v59  ;;  %548 = vmatmul.bf16.gmra.mxu3 %v970_v60 }
  0x83   :  { %354 = vmatmul.bf16.gmra.mxu0 %v958_v61  ;;  %414 = vmatmul.bf16.gmra.mxu2 %v970_v60 }
  0x84   :  { %488 = vmatmul.bf16.gmra.mxu1 %v958_v61  ;;  %553 = vmatmul.bf16.gmra.mxu3 %v971_v62 }
  0x93   :  { %359 = vmatmul.bf16.gmra.mxu0 %v959_v63  ;;  %419 = vmatmul.bf16.gmra.mxu2 %v971_v62 }
  0x94   :  { %493 = vmatmul.bf16.gmra.mxu1 %v959_v63  ;;  %558 = vmatmul.bf16.gmra.mxu3 %v972_v0 }
  0xa0   :  { %v325_v5 = vpop.f32.mrf.mxu0 }
  0xa1   :  { %v326_v7 = vadd.f32 %v325_v5, %v1182_v2  ;;  %v459_v8 = vpop.f32.mrf.mxu1 }
  0xa2   :  { %v460_v9 = vadd.f32 %v459_v8, %v1184_v3 }
  0xa3   :  { %v584_v10 = vmax.f32 %v326_v7, 0.0  ;;  %364 = vmatmul.bf16.gmra.mxu0 %v960_v4  ;;  %424 = vmatmul.bf16.gmra.mxu2 %v972_v0 }
  0xa4   :  { %v585_v11 = vmax.f32 %v460_v9, 0.0  ;;  %498 = vmatmul.bf16.gmra.mxu1 %v960_v4  ;;  %563 = vmatmul.bf16.gmra.mxu3 %v973_v6 }
  0xa6   :  { %v684_v12 = vpack.c.bf16 %v585_v11, %v584_v10  ;;  %v1194_v13 = vpop.f32.mrf.mxu2 }
  0xa7   :  { %v524_v14 = vpop.f32.mrf.mxu3 }
  0xa8   :  { %734 = vst [vmem:[%s1470_s3] sm:$0xff] %v684_v12  ;;  %v327_v15 = vpop.f32.mrf.mxu0  ;;  %v525_v30 = vadd.f32 %v524_v14, %v1184_v3 }
  0xa9   :  { %v328_v16 = vadd.f32 %v327_v15, %v1182_v2  ;;  %v461_v17 = vpop.f32.mrf.mxu1 }
  0xaa   :  { %v462_v18 = vadd.f32 %v461_v17, %v1184_v3  ;;  %v637_v35 = vmax.f32 %v525_v30, 0.0 }
  0xab   :  { %v586_v19 = vmax.f32 %v328_v16, 0.0 }
  0xac   :  { %v587_v20 = vmax.f32 %v462_v18, 0.0 }
  0xae   :  { %v685_v21 = vpack.c.bf16 %v587_v20, %v586_v19  ;;  %v1201_v22 = vpop.f32.mrf.mxu2  ;;  %v963_v20 = vld [vmem:[%s1468_s0 + $0x58] sm:$0xff] }
  0xaf   :  { %v526_v24 = vpop.f32.mrf.mxu3 }
  0xb0   :  { %735 = vst [vmem:[%s1470_s3 + $0x8] sm:$0xff] %v685_v21  ;;  %v330_v25 = vpop.f32.mrf.mxu0  ;;  %v527_v46 = vadd.f32 %v526_v24, %v1184_v3  ;;  %v976_v24 = vld [vmem:[%s1468_s0 + $0xc0] sm:$0xff] }
  0xb1   :  { %v331_v27 = vadd.f32 %v330_v25, %v1182_v2  ;;  %v464_v28 = vpop.f32.mrf.mxu1 }
  0xb2   :  { %v465_v29 = vadd.f32 %v464_v28, %v1184_v3  ;;  %v639_v55 = vmax.f32 %v527_v46, 0.0 }
  0xb3   :  { %v588_v31 = vmax.f32 %v331_v27, 0.0  ;;  %369 = vmatmul.bf16.gmra.mxu0 %v961_v23  ;;  %429 = vmatmul.bf16.gmra.mxu2 %v973_v6 }
  0xb4   :  { %v589_v32 = vmax.f32 %v465_v29, 0.0  ;;  %503 = vmatmul.bf16.gmra.mxu1 %v961_v23  ;;  %568 = vmatmul.bf16.gmra.mxu3 %v974_v26 }
  0xb6   :  { %v686_v33 = vpack.c.bf16 %v589_v32, %v588_v31  ;;  %v390_v34 = vpop.f32.mrf.mxu2 }
  0xb7   :  { %v391_v36 = vadd.f32 %v390_v34, %v1182_v2  ;;  %v529_v37 = vpop.f32.mrf.mxu3 }
  0xb8   :  { %736 = vst [vmem:[%s1470_s3 + $0x10] sm:$0xff] %v686_v33  ;;  %v332_v38 = vpop.f32.mrf.mxu0  ;;  %v530_v61 = vadd.f32 %v529_v37, %v1184_v3 }
  0xb9   :  { %v636_v39 = vmax.f32 %v391_v36, 0.0  ;;  %v333_v40 = vadd.f32 %v332_v38, %v1182_v2  ;;  %v466_v41 = vpop.f32.mrf.mxu1 }
  0xba   :  { %v467_v42 = vadd.f32 %v466_v41, %v1184_v3  ;;  %v641_v4 = vmax.f32 %v530_v61, 0.0 }
  0xbb   :  { %v710_v43 = vpack.c.bf16 %v637_v35, %v636_v39  ;;  %v590_v44 = vmax.f32 %v333_v40, 0.0 }
  0xbc   :  { %v591_v45 = vmax.f32 %v467_v42, 0.0 }
  0xbd   :  { %760 = vst [vmem:[%s1470_s3 + $0xd0] sm:$0xff] %v710_v43 }
  0xbe   :  { %v687_v47 = vpack.c.bf16 %v591_v45, %v590_v44  ;;  %v392_v48 = vpop.f32.mrf.mxu2 }
  0xbf   :  { %v393_v50 = vadd.f32 %v392_v48, %v1182_v2  ;;  %v531_v52 = vpop.f32.mrf.mxu3 }
  0xc0   :  { %737 = vst [vmem:[%s1470_s3 + $0x18] sm:$0xff] %v687_v47  ;;  %v335_v53 = vpop.f32.mrf.mxu0  ;;  %v532_v16 = vadd.f32 %v531_v52, %v1184_v3 }
  0xc1   :  { %v638_v56 = vmax.f32 %v393_v50, 0.0  ;;  %v336_v57 = vadd.f32 %v335_v53, %v1182_v2  ;;  %v469_v58 = vpop.f32.mrf.mxu1 }
  0xc2   :  { %v470_v59 = vadd.f32 %v469_v58, %v1184_v3  ;;  %v643_v25 = vmax.f32 %v532_v16, 0.0 }
  0xc3   :  { %v711_v60 = vpack.c.bf16 %v639_v55, %v638_v56  ;;  %v592_v62 = vmax.f32 %v336_v57, 0.0  ;;  %374 = vmatmul.bf16.gmra.mxu0 %v962_v51  ;;  %434 = vmatmul.bf16.gmra.mxu2 %v974_v26 }
  0xc4   :  { %v593_v63 = vmax.f32 %v470_v59, 0.0  ;;  %508 = vmatmul.bf16.gmra.mxu1 %v962_v51  ;;  %573 = vmatmul.bf16.gmra.mxu3 %v975_v54 }
  0xc5   :  { %761 = vst [vmem:[%s1470_s3 + $0xd8] sm:$0xff] %v711_v60 }
  0xc6   :  { %v688_v0 = vpack.c.bf16 %v593_v63, %v592_v62  ;;  %v395_v1 = vpop.f32.mrf.mxu2 }
  0xc7   :  { %v396_v5 = vadd.f32 %v395_v1, %v1182_v2  ;;  %v534_v6 = vpop.f32.mrf.mxu3 }
  0xc8   :  { %738 = vst [vmem:[%s1470_s3 + $0x20] sm:$0xff] %v688_v0  ;;  %v337_v7 = vpop.f32.mrf.mxu0  ;;  %v535_v31 = vadd.f32 %v534_v6, %v1184_v3 }
  0xc9   :  { %v640_v8 = vmax.f32 %v396_v5, 0.0  ;;  %v338_v9 = vadd.f32 %v337_v7, %v1182_v2  ;;  %v471_v10 = vpop.f32.mrf.mxu1 }
  0xca   :  { %v472_v11 = vadd.f32 %v471_v10, %v1184_v3  ;;  %v645_v36 = vmax.f32 %v535_v31, 0.0 }
  0xcb   :  { %v712_v12 = vpack.c.bf16 %v641_v4, %v640_v8  ;;  %v594_v14 = vmax.f32 %v338_v9, 0.0 }
  0xcc   :  { %v595_v15 = vmax.f32 %v472_v11, 0.0 }
  0xcd   :  { %762 = vst [vmem:[%s1470_s3 + $0xe0] sm:$0xff] %v712_v12 }
  0xce   :  { %v689_v17 = vpack.c.bf16 %v595_v15, %v594_v14  ;;  %v397_v18 = vpop.f32.mrf.mxu2 }
  0xcf   :  { %v398_v19 = vadd.f32 %v397_v18, %v1182_v2  ;;  %v536_v21 = vpop.f32.mrf.mxu3 }
  0xd0   :  { %739 = vst [vmem:[%s1470_s3 + $0x28] sm:$0xff] %v689_v17  ;;  %v340_v23 = vpop.f32.mrf.mxu0  ;;  %v537_v47 = vadd.f32 %v536_v21, %v1184_v3 }
  0xd1   :  { %v642_v26 = vmax.f32 %v398_v19, 0.0  ;;  %v341_v27 = vadd.f32 %v340_v23, %v1182_v2  ;;  %v474_v28 = vpop.f32.mrf.mxu1 }
  0xd2   :  { %v475_v29 = vadd.f32 %v474_v28, %v1184_v3 }
  0xd3   :  { %v713_v30 = vpack.c.bf16 %v643_v25, %v642_v26  ;;  %v596_v32 = vmax.f32 %v341_v27, 0.0  ;;  %379 = vmatmul.bf16.gmra.mxu0 %v963_v20  ;;  %439 = vmatmul.bf16.gmra.mxu2 %v975_v54  ;;  %v647_v54 = vmax.f32 %v537_v47, 0.0 }
  0xd4   :  { %v597_v33 = vmax.f32 %v475_v29, 0.0  ;;  %513 = vmatmul.bf16.gmra.mxu1 %v963_v20  ;;  %578 = vmatmul.bf16.gmra.mxu3 %v976_v24 }
  0xd5   :  { %763 = vst [vmem:[%s1470_s3 + $0xe8] sm:$0xff] %v713_v30 }
  0xd6   :  { %v690_v34 = vpack.c.bf16 %v597_v33, %v596_v32  ;;  %v400_v35 = vpop.f32.mrf.mxu2 }
  0xd7   :  { %v401_v37 = vadd.f32 %v400_v35, %v1182_v2  ;;  %v539_v38 = vpop.f32.mrf.mxu3 }
  0xd8   :  { %740 = vst [vmem:[%s1470_s3 + $0x30] sm:$0xff] %v690_v34  ;;  %v342_v39 = vpop.f32.mrf.mxu0  ;;  %v540_v60 = vadd.f32 %v539_v38, %v1184_v3 }
  0xd9   :  { %v644_v40 = vmax.f32 %v401_v37, 0.0  ;;  %v343_v41 = vadd.f32 %v342_v39, %v1182_v2  ;;  %v476_v42 = vpop.f32.mrf.mxu1 }
  0xda   :  { %v477_v43 = vadd.f32 %v476_v42, %v1184_v3  ;;  %v649_v1 = vmax.f32 %v540_v60, 0.0 }
  0xdb   :  { %v714_v44 = vpack.c.bf16 %v645_v36, %v644_v40  ;;  %v598_v45 = vmax.f32 %v343_v41, 0.0 }
  0xdc   :  { %v599_v46 = vmax.f32 %v477_v43, 0.0 }
  0xdd   :  { %764 = vst [vmem:[%s1470_s3 + $0xf0] sm:$0xff] %v714_v44 }
  0xde   :  { %v691_v48 = vpack.c.bf16 %v599_v46, %v598_v45  ;;  %v402_v50 = vpop.f32.mrf.mxu2 }
  0xdf   :  { %v403_v51 = vadd.f32 %v402_v50, %v1182_v2  ;;  %v541_v52 = vpop.f32.mrf.mxu3 }
  0xe0   :  { %741 = vst [vmem:[%s1470_s3 + $0x38] sm:$0xff] %v691_v48  ;;  %v345_v53 = vpop.f32.mrf.mxu0  ;;  %v542_v14 = vadd.f32 %v541_v52, %v1184_v3 }
  0xe1   :  { %v646_v55 = vmax.f32 %v403_v51, 0.0  ;;  %v346_v56 = vadd.f32 %v345_v53, %v1182_v2  ;;  %v479_v57 = vpop.f32.mrf.mxu1 }
  0xe2   :  { %v480_v58 = vadd.f32 %v479_v57, %v1184_v3  ;;  %v651_v20 = vmax.f32 %v542_v14, 0.0 }
  0xe3   :  { %v715_v59 = vpack.c.bf16 %v647_v54, %v646_v55  ;;  %v600_v61 = vmax.f32 %v346_v56, 0.0  ;;  %444 = vmatmul.bf16.gmra.mxu2 %v976_v24 }
  0xe4   :  { %v601_v62 = vmax.f32 %v480_v58, 0.0  ;;  %518 = vmatmul.bf16.gmra.mxu1 %v1131_v49 }
  0xe5   :  { %765 = vst [vmem:[%s1470_s3 + $0xf8] sm:$0xff] %v715_v59 }
  0xe6   :  { %v692_v63 = vpack.c.bf16 %v601_v62, %v600_v61  ;;  %v405_v0 = vpop.f32.mrf.mxu2 }
  0xe7   :  { %v406_v4 = vadd.f32 %v405_v0, %v1182_v2  ;;  %v544_v5 = vpop.f32.mrf.mxu3 }
  0xe8   :  { %742 = vst [vmem:[%s1470_s3 + $0x40] sm:$0xff] %v692_v63  ;;  %v347_v6 = vpop.f32.mrf.mxu0  ;;  %v545_v27 = vadd.f32 %v544_v5, %v1184_v3 }
  0xe9   :  { %v648_v7 = vmax.f32 %v406_v4, 0.0  ;;  %v348_v8 = vadd.f32 %v347_v6, %v1182_v2  ;;  %v481_v9 = vpop.f32.mrf.mxu1 }
  0xea   :  { %v482_v49 = vadd.f32 %v481_v9, %v1184_v3  ;;  %v653_v32 = vmax.f32 %v545_v27, 0.0 }
  0xeb   :  { %v716_v10 = vpack.c.bf16 %v649_v1, %v648_v7  ;;  %v602_v11 = vmax.f32 %v348_v8, 0.0 }
  0xec   :  { %v603_v12 = vmax.f32 %v482_v49, 0.0 }
  0xed   :  { %766 = vst [vmem:[%s1470_s3 + $0x100] sm:$0xff] %v716_v10 }
  0xee   :  { %v693_v15 = vpack.c.bf16 %v603_v12, %v602_v11  ;;  %v407_v16 = vpop.f32.mrf.mxu2 }
  0xef   :  { %v408_v17 = vadd.f32 %v407_v16, %v1182_v2  ;;  %v546_v18 = vpop.f32.mrf.mxu3 }
  0xf0   :  { %743 = vst [vmem:[%s1470_s3 + $0x48] sm:$0xff] %v693_v15  ;;  %v350_v19 = vpop.f32.mrf.mxu0  ;;  %v547_v43 = vadd.f32 %v546_v18, %v1184_v3 }
  0xf1   :  { %v650_v21 = vmax.f32 %v408_v17, 0.0  ;;  %v351_v23 = vadd.f32 %v350_v19, %v1182_v2  ;;  %v484_v24 = vpop.f32.mrf.mxu1 }
  0xf2   :  { %v485_v25 = vadd.f32 %v484_v24, %v1184_v3  ;;  %v655_v50 = vmax.f32 %v547_v43, 0.0 }
  0xf3   :  { %v717_v26 = vpack.c.bf16 %v651_v20, %v650_v21  ;;  %v604_v28 = vmax.f32 %v351_v23, 0.0 }
  0xf4   :  { %v605_v29 = vmax.f32 %v485_v25, 0.0 }
  0xf5   :  { %767 = vst [vmem:[%s1470_s3 + $0x108] sm:$0xff] %v717_v26 }
  0xf6   :  { %v694_v30 = vpack.c.bf16 %v605_v29, %v604_v28  ;;  %v410_v31 = vpop.f32.mrf.mxu2 }
  0xf7   :  { %v411_v33 = vadd.f32 %v410_v31, %v1182_v2  ;;  %v549_v34 = vpop.f32.mrf.mxu3 }
  0xf8   :  { %744 = vst [vmem:[%s1470_s3 + $0x50] sm:$0xff] %v694_v30  ;;  %v352_v35 = vpop.f32.mrf.mxu0  ;;  %v550_v56 = vadd.f32 %v549_v34, %v1184_v3 }
  0xf9   :  { %v652_v36 = vmax.f32 %v411_v33, 0.0  ;;  %v353_v37 = vadd.f32 %v352_v35, %v1182_v2  ;;  %v486_v38 = vpop.f32.mrf.mxu1 }
  0xfa   :  { %v487_v39 = vadd.f32 %v486_v38, %v1184_v3  ;;  %v657_v61 = vmax.f32 %v550_v56, 0.0 }
  0xfb   :  { %v718_v40 = vpack.c.bf16 %v653_v32, %v652_v36  ;;  %v606_v41 = vmax.f32 %v353_v37, 0.0 }
  0xfc   :  { %v607_v42 = vmax.f32 %v487_v39, 0.0 }
  0xfd   :  { %768 = vst [vmem:[%s1470_s3 + $0x110] sm:$0xff] %v718_v40 }
  0xfe   :  { %v695_v44 = vpack.c.bf16 %v607_v42, %v606_v41  ;;  %v412_v45 = vpop.f32.mrf.mxu2 }
  0xff   :  { %v413_v46 = vadd.f32 %v412_v45, %v1182_v2  ;;  %v551_v47 = vpop.f32.mrf.mxu3 }
 0x100   :  { %745 = vst [vmem:[%s1470_s3 + $0x58] sm:$0xff] %v695_v44  ;;  %v355_v48 = vpop.f32.mrf.mxu0  ;;  %v552_v49 = vadd.f32 %v551_v47, %v1184_v3 }
 0x101   :  { %v654_v51 = vmax.f32 %v413_v46, 0.0  ;;  %v356_v52 = vadd.f32 %v355_v48, %v1182_v2  ;;  %v489_v53 = vpop.f32.mrf.mxu1 }
 0x102   :  { %v490_v54 = vadd.f32 %v489_v53, %v1184_v3  ;;  %v659_v16 = vmax.f32 %v552_v49, 0.0 }
 0x103   :  { %v719_v55 = vpack.c.bf16 %v655_v50, %v654_v51  ;;  %v608_v57 = vmax.f32 %v356_v52, 0.0 }
 0x104   :  { %v609_v58 = vmax.f32 %v490_v54, 0.0 }
 0x105   :  { %769 = vst [vmem:[%s1470_s3 + $0x118] sm:$0xff] %v719_v55 }
 0x106   :  { %v696_v59 = vpack.c.bf16 %v609_v58, %v608_v57  ;;  %v415_v60 = vpop.f32.mrf.mxu2 }
 0x107   :  { %v416_v62 = vadd.f32 %v415_v60, %v1182_v2  ;;  %v554_v63 = vpop.f32.mrf.mxu3 }
 0x108   :  { %746 = vst [vmem:[%s1470_s3 + $0x60] sm:$0xff] %v696_v59  ;;  %v357_v0 = vpop.f32.mrf.mxu0  ;;  %v555_v23 = vadd.f32 %v554_v63, %v1184_v3 }
 0x109   :  { %v656_v1 = vmax.f32 %v416_v62, 0.0  ;;  %v358_v4 = vadd.f32 %v357_v0, %v1182_v2  ;;  %v491_v5 = vpop.f32.mrf.mxu1 }
 0x10a   :  { %v492_v6 = vadd.f32 %v491_v5, %v1184_v3  ;;  %v661_v28 = vmax.f32 %v555_v23, 0.0 }
 0x10b   :  { %v720_v7 = vpack.c.bf16 %v657_v61, %v656_v1  ;;  %v610_v8 = vmax.f32 %v358_v4, 0.0 }
 0x10c   :  { %v611_v9 = vmax.f32 %v492_v6, 0.0 }
 0x10d   :  { %770 = vst [vmem:[%s1470_s3 + $0x120] sm:$0xff] %v720_v7 }
 0x10e   :  { %v697_v10 = vpack.c.bf16 %v611_v9, %v610_v8  ;;  %v417_v11 = vpop.f32.mrf.mxu2 }
 0x10f   :  { %v418_v12 = vadd.f32 %v417_v11, %v1182_v2  ;;  %v556_v14 = vpop.f32.mrf.mxu3 }
 0x110   :  { %747 = vst [vmem:[%s1470_s3 + $0x68] sm:$0xff] %v697_v10  ;;  %v360_v15 = vpop.f32.mrf.mxu0  ;;  %v557_v39 = vadd.f32 %v556_v14, %v1184_v3 }
 0x111   :  { %v658_v17 = vmax.f32 %v418_v12, 0.0  ;;  %v361_v18 = vadd.f32 %v360_v15, %v1182_v2  ;;  %v494_v19 = vpop.f32.mrf.mxu1 }
 0x112   :  { %v495_v20 = vadd.f32 %v494_v19, %v1184_v3  ;;  %v663_v45 = vmax.f32 %v557_v39, 0.0 }
 0x113   :  { %v721_v21 = vpack.c.bf16 %v659_v16, %v658_v17  ;;  %v612_v24 = vmax.f32 %v361_v18, 0.0 }
 0x114   :  { %v613_v25 = vmax.f32 %v495_v20, 0.0 }
 0x115   :  { %771 = vst [vmem:[%s1470_s3 + $0x128] sm:$0xff] %v721_v21 }
 0x116   :  { %v698_v26 = vpack.c.bf16 %v613_v25, %v612_v24  ;;  %v420_v27 = vpop.f32.mrf.mxu2 }
 0x117   :  { %v421_v29 = vadd.f32 %v420_v27, %v1182_v2  ;;  %v559_v30 = vpop.f32.mrf.mxu3 }
 0x118   :  { %748 = vst [vmem:[%s1470_s3 + $0x70] sm:$0xff] %v698_v26  ;;  %v362_v31 = vpop.f32.mrf.mxu0  ;;  %v560_v52 = vadd.f32 %v559_v30, %v1184_v3 }
 0x119   :  { %v660_v32 = vmax.f32 %v421_v29, 0.0  ;;  %v363_v33 = vadd.f32 %v362_v31, %v1182_v2  ;;  %v496_v34 = vpop.f32.mrf.mxu1 }
 0x11a   :  { %v497_v35 = vadd.f32 %v496_v34, %v1184_v3  ;;  %v665_v57 = vmax.f32 %v560_v52, 0.0 }
 0x11b   :  { %v722_v36 = vpack.c.bf16 %v661_v28, %v660_v32  ;;  %v614_v37 = vmax.f32 %v363_v33, 0.0 }
 0x11c   :  { %v615_v38 = vmax.f32 %v497_v35, 0.0 }
 0x11d   :  { %772 = vst [vmem:[%s1470_s3 + $0x130] sm:$0xff] %v722_v36 }
 0x11e   :  { %v699_v40 = vpack.c.bf16 %v615_v38, %v614_v37  ;;  %v422_v41 = vpop.f32.mrf.mxu2 }
 0x11f   :  { %v423_v42 = vadd.f32 %v422_v41, %v1182_v2  ;;  %v561_v43 = vpop.f32.mrf.mxu3 }
 0x120   :  { %749 = vst [vmem:[%s1470_s3 + $0x78] sm:$0xff] %v699_v40  ;;  %v365_v44 = vpop.f32.mrf.mxu0  ;;  %v562_v6 = vadd.f32 %v561_v43, %v1184_v3 }
 0x121   :  { %v662_v46 = vmax.f32 %v423_v42, 0.0  ;;  %v366_v47 = vadd.f32 %v365_v44, %v1182_v2  ;;  %v499_v48 = vpop.f32.mrf.mxu1 }
 0x122   :  { %v500_v50 = vadd.f32 %v499_v48, %v1184_v3  ;;  %v667_v11 = vmax.f32 %v562_v6, 0.0 }
 0x123   :  { %v723_v51 = vpack.c.bf16 %v663_v45, %v662_v46  ;;  %v616_v53 = vmax.f32 %v366_v47, 0.0 }
 0x124   :  { %v617_v54 = vmax.f32 %v500_v50, 0.0 }
 0x125   :  { %773 = vst [vmem:[%s1470_s3 + $0x138] sm:$0xff] %v723_v51 }
 0x126   :  { %v700_v55 = vpack.c.bf16 %v617_v54, %v616_v53  ;;  %v425_v56 = vpop.f32.mrf.mxu2 }
 0x127   :  { %v426_v58 = vadd.f32 %v425_v56, %v1182_v2  ;;  %v564_v59 = vpop.f32.mrf.mxu3 }
 0x128   :  { %750 = vst [vmem:[%s1470_s3 + $0x80] sm:$0xff] %v700_v55  ;;  %v367_v60 = vpop.f32.mrf.mxu0  ;;  %v565_v18 = vadd.f32 %v564_v59, %v1184_v3 }
 0x129   :  { %v664_v61 = vmax.f32 %v426_v58, 0.0  ;;  %v368_v62 = vadd.f32 %v367_v60, %v1182_v2  ;;  %v501_v63 = vpop.f32.mrf.mxu1 }
 0x12a   :  { %v502_v0 = vadd.f32 %v501_v63, %v1184_v3  ;;  %v669_v24 = vmax.f32 %v565_v18, 0.0 }
 0x12b   :  { %v724_v1 = vpack.c.bf16 %v665_v57, %v664_v61  ;;  %v618_v4 = vmax.f32 %v368_v62, 0.0 }
 0x12c   :  { %v619_v5 = vmax.f32 %v502_v0, 0.0 }
 0x12d   :  { %774 = vst [vmem:[%s1470_s3 + $0x140] sm:$0xff] %v724_v1 }
 0x12e   :  { %v701_v7 = vpack.c.bf16 %v619_v5, %v618_v4  ;;  %v427_v8 = vpop.f32.mrf.mxu2 }
 0x12f   :  { %v428_v9 = vadd.f32 %v427_v8, %v1182_v2  ;;  %v566_v49 = vpop.f32.mrf.mxu3 }
 0x130   :  { %751 = vst [vmem:[%s1470_s3 + $0x88] sm:$0xff] %v701_v7  ;;  %v370_v10 = vpop.f32.mrf.mxu0  ;;  %v567_v35 = vadd.f32 %v566_v49, %v1184_v3 }
 0x131   :  { %v666_v12 = vmax.f32 %v428_v9, 0.0  ;;  %v371_v14 = vadd.f32 %v370_v10, %v1182_v2  ;;  %v504_v15 = vpop.f32.mrf.mxu1 }
 0x132   :  { %v505_v16 = vadd.f32 %v504_v15, %v1184_v3  ;;  %v671_v40 = vmax.f32 %v567_v35, 0.0 }
 0x133   :  { %v725_v17 = vpack.c.bf16 %v667_v11, %v666_v12  ;;  %v620_v19 = vmax.f32 %v371_v14, 0.0 }
 0x134   :  { %v621_v20 = vmax.f32 %v505_v16, 0.0 }
 0x135   :  { %775 = vst [vmem:[%s1470_s3 + $0x148] sm:$0xff] %v725_v17 }
 0x136   :  { %v702_v21 = vpack.c.bf16 %v621_v20, %v620_v19  ;;  %v430_v23 = vpop.f32.mrf.mxu2 }
 0x137   :  { %v431_v25 = vadd.f32 %v430_v23, %v1182_v2  ;;  %v569_v27 = vpop.f32.mrf.mxu3 }
 0x138   :  { %752 = vst [vmem:[%s1470_s3 + $0x90] sm:$0xff] %v702_v21  ;;  %v372_v26 = vpop.f32.mrf.mxu0  ;;  %v570_v47 = vadd.f32 %v569_v27, %v1184_v3 }
 0x139   :  { %v668_v28 = vmax.f32 %v431_v25, 0.0  ;;  %v373_v29 = vadd.f32 %v372_v26, %v1182_v2  ;;  %v506_v30 = vpop.f32.mrf.mxu1 }
 0x13a   :  { %v507_v31 = vadd.f32 %v506_v30, %v1184_v3  ;;  %v673_v53 = vmax.f32 %v570_v47, 0.0  ;;  %v388_v47 = vadd.f32 %v1201_v22, %v1182_v2 }
 0x13b   :  { %v726_v32 = vpack.c.bf16 %v669_v24, %v668_v28  ;;  %v622_v33 = vmax.f32 %v373_v29, 0.0 }
 0x13c   :  { %v623_v34 = vmax.f32 %v507_v31, 0.0 }
 0x13d   :  { %776 = vst [vmem:[%s1470_s3 + $0x150] sm:$0xff] %v726_v32 }
 0x13e   :  { %v703_v36 = vpack.c.bf16 %v623_v34, %v622_v33  ;;  %v432_v37 = vpop.f32.mrf.mxu2  ;;  %v386_v34 = vadd.f32 %v1194_v13, %v1182_v2 }
 0x13f   :  { %v433_v38 = vadd.f32 %v432_v37, %v1182_v2  ;;  %v571_v45 = vpop.f32.mrf.mxu3 }
 0x140   :  { %753 = vst [vmem:[%s1470_s3 + $0x98] sm:$0xff] %v703_v36  ;;  %v375_v39 = vpop.f32.mrf.mxu0  ;;  %v572_v0 = vadd.f32 %v571_v45, %v1184_v3 }
 0x141   :  { %v670_v41 = vmax.f32 %v433_v38, 0.0  ;;  %v376_v42 = vadd.f32 %v375_v39, %v1182_v2  ;;  %v509_v43 = vpop.f32.mrf.mxu1 }
 0x142   :  { %v510_v44 = vadd.f32 %v509_v43, %v1184_v3  ;;  %v675_v7 = vmax.f32 %v572_v0, 0.0 }
 0x143   :  { %v727_v46 = vpack.c.bf16 %v671_v40, %v670_v41  ;;  %v624_v48 = vmax.f32 %v376_v42, 0.0  ;;  %v632_v42 = vmax.f32 %v386_v34, 0.0 }
 0x144   :  { %v625_v50 = vmax.f32 %v510_v44, 0.0 }
 0x145   :  { %777 = vst [vmem:[%s1470_s3 + $0x158] sm:$0xff] %v727_v46 }
 0x146   :  { %v704_v51 = vpack.c.bf16 %v625_v50, %v624_v48  ;;  %v435_v52 = vpop.f32.mrf.mxu2 }
 0x147   :  { %v436_v54 = vadd.f32 %v435_v52, %v1182_v2  ;;  %v574_v63 = vpop.f32.mrf.mxu3 }
 0x148   :  { %754 = vst [vmem:[%s1470_s3 + $0xa0] sm:$0xff] %v704_v51  ;;  %v377_v55 = vpop.f32.mrf.mxu0  ;;  %v575_v12 = vadd.f32 %v574_v63, %v1184_v3 }
 0x149   :  { %v672_v56 = vmax.f32 %v436_v54, 0.0  ;;  %v378_v57 = vadd.f32 %v377_v55, %v1182_v2  ;;  %v511_v58 = vpop.f32.mrf.mxu1  ;;  %v634_v54 = vmax.f32 %v388_v47, 0.0 }
 0x14a   :  { %v512_v59 = vadd.f32 %v511_v58, %v1184_v3  ;;  %v677_v19 = vmax.f32 %v575_v12, 0.0 }
 0x14b   :  { %v728_v60 = vpack.c.bf16 %v673_v53, %v672_v56  ;;  %v626_v61 = vmax.f32 %v378_v57, 0.0 }
 0x14c   :  { %v627_v62 = vmax.f32 %v512_v59, 0.0 }
 0x14d   :  { %778 = vst [vmem:[%s1470_s3 + $0x160] sm:$0xff] %v728_v60 }
 0x14e   :  { %v705_v1 = vpack.c.bf16 %v627_v62, %v626_v61  ;;  %v437_v4 = vpop.f32.mrf.mxu2 }
 0x14f   :  { %v438_v5 = vadd.f32 %v437_v4, %v1182_v2  ;;  %v576_v18 = vpop.f32.mrf.mxu3 }
 0x150   :  { %755 = vst [vmem:[%s1470_s3 + $0xa8] sm:$0xff] %v705_v1  ;;  %v380_v6 = vpop.f32.mrf.mxu0  ;;  %v577_v30 = vadd.f32 %v576_v18, %v1184_v3 }
 0x151   :  { %v674_v8 = vmax.f32 %v438_v5, 0.0  ;;  %v381_v9 = vadd.f32 %v380_v6, %v1182_v2  ;;  %v514_v49 = vpop.f32.mrf.mxu1 }
 0x152   :  { %v515_v10 = vadd.f32 %v514_v49, %v1184_v3  ;;  %v679_v36 = vmax.f32 %v577_v30, 0.0 }
 0x153   :  { %v729_v11 = vpack.c.bf16 %v675_v7, %v674_v8  ;;  %v628_v14 = vmax.f32 %v381_v9, 0.0 }
 0x154   :  { %v629_v15 = vmax.f32 %v515_v10, 0.0 }
 0x155   :  { %779 = vst [vmem:[%s1470_s3 + $0x168] sm:$0xff] %v729_v11 }
 0x156   :  { %v706_v16 = vpack.c.bf16 %v629_v15, %v628_v14  ;;  %v440_v17 = vpop.f32.mrf.mxu2 }
 0x157   :  { %v441_v20 = vadd.f32 %v440_v17, %v1182_v2  ;;  %v579_v35 = vpop.f32.mrf.mxu3 }
 0x158   :  { %756 = vst [vmem:[%s1470_s3 + $0xb0] sm:$0xff] %v706_v16  ;;  %v382_v21 = vpop.f32.mrf.mxu0  ;;  %v580_v41 = vadd.f32 %v579_v35, %v1184_v3 }
 0x159   :  { %v676_v23 = vmax.f32 %v441_v20, 0.0  ;;  %v383_v24 = vadd.f32 %v382_v21, %v1182_v2  ;;  %v516_v25 = vpop.f32.mrf.mxu1 }
 0x15a   :  { %v517_v26 = vadd.f32 %v516_v25, %v1184_v3  ;;  %v681_v45 = vmax.f32 %v580_v41, 0.0 }
 0x15b   :  { %v730_v27 = vpack.c.bf16 %v677_v19, %v676_v23  ;;  %v630_v28 = vmax.f32 %v383_v24, 0.0 }
 0x15c   :  { %v631_v29 = vmax.f32 %v517_v26, 0.0 }
 0x15d   :  { %780 = vst [vmem:[%s1470_s3 + $0x170] sm:$0xff] %v730_v27 }
 0x15e   :  { %v707_v31 = vpack.c.bf16 %v631_v29, %v630_v28  ;;  %v442_v32 = vpop.f32.mrf.mxu2 }
 0x15f   :  { %v443_v33 = vadd.f32 %v442_v32, %v1182_v2  ;;  %v581_v51 = vpop.f32.mrf.mxu3 }
 0x160   :  { %757 = vst [vmem:[%s1470_s3 + $0xb8] sm:$0xff] %v707_v31  ;;  %v582_v56 = vadd.f32 %v581_v51, %v1184_v3 }
 0x161   :  { %v678_v37 = vmax.f32 %v443_v33, 0.0  ;;  %v519_v38 = vpop.f32.mrf.mxu1 }
 0x162   :  { %v520_v39 = vadd.f32 %v519_v38, %v1184_v3  ;;  %v683_v59 = vmax.f32 %v582_v56, 0.0 }
 0x163   :  { %v731_v40 = vpack.c.bf16 %v679_v36, %v678_v37 }
 0x164   :  { %v633_v43 = vmax.f32 %v520_v39, 0.0 }
 0x165   :  { %781 = vst [vmem:[%s1470_s3 + $0x178] sm:$0xff] %v731_v40 }
 0x166   :  { %v708_v13 = vpack.c.bf16 %v633_v43, %v632_v42  ;;  %v445_v44 = vpop.f32.mrf.mxu2 }
 0x167   :  { %v446_v46 = vadd.f32 %v445_v44, %v1182_v2 }
 0x168   :  { %758 = vst [vmem:[%s1470_s3 + $0xc0] sm:$0xff] %v708_v13 }
 0x169   :  { %v680_v48 = vmax.f32 %v446_v46, 0.0  ;;  %v521_v50 = vpop.f32.mrf.mxu1 }
 0x16a   :  { %v522_v52 = vadd.f32 %v521_v50, %v1184_v3 }
 0x16b   :  { %v732_v53 = vpack.c.bf16 %v681_v45, %v680_v48 }
 0x16c   :  { %v635_v55 = vmax.f32 %v522_v52, 0.0 }
 0x16d   :  { %782 = vst [vmem:[%s1470_s3 + $0x180] sm:$0xff] %v732_v53 }
 0x16e   :  { %v709_v57 = vpack.c.bf16 %v635_v55, %v634_v54  ;;  %v447_v22 = vpop.f32.mrf.mxu2 }
 0x16f   :  { %v448_v58 = vadd.f32 %v447_v22, %v1182_v2 }
 0x170   :  { %759 = vst [vmem:[%s1470_s3 + $0xc8] sm:$0xff] %v709_v57 }
 0x171   :  { %v682_v60 = vmax.f32 %v448_v58, 0.0 }
 0x173   :  { %v733_v61 = vpack.c.bf16 %v683_v59, %v682_v60 }
 0x175   :  { %783 = vst [vmem:[%s1470_s3 + $0x188] sm:$0xff] %v733_v61 }

// kernel: encoder_stn_forward.7
= control target key start
LH: loop header
LB: loop body
LE: loop exit
PB: predicated region body
PF: predicated region fallthrough
CT: control target
= control target key end

     0   :  { %s9685_s1 = inlined_call_operand.vmem [shape: bf16[2304,256], index: 1, kind: input, shape index: {}]   ;;  %s9686_s0 = inlined_call_operand.vmem [shape: bf16[112,2304], index: 0, kind: input, shape index: {}]   ;;  %s9687_s2 = inlined_call_operand.vmem [shape: f32[1,256], index: 2, kind: input, shape index: {}]   ;;  %s9688_s3 = inlined_call_operand.vmem [shape: bf16[112,256], index: 3, kind: output, shape index: {}]  }
   0x1   :  { %v4710_v0 = vld [vmem:[%s9685_s1 + $0x70] sm:$0xf]  ;;  %v5945_v1 = vld [vmem:[%s9685_s1 + $0x74] sm:$0xf0]  ;;  %v4702_v11 = vld [vmem:[%s9685_s1 + $0x60] sm:$0xf] }
   0x2   :  { %v4774_v2 = vld [vmem:[%s9685_s1 + $0xf0] sm:$0xf]  ;;  %v4711_v3 = vor.u32 %v5945_v1, %v4710_v0  ;;  %v5961_v4 = vld [vmem:[%s9685_s1 + $0xf4] sm:$0xf0]  ;;  %v5943_v13 = vld [vmem:[%s9685_s1 + $0x64] sm:$0xf0] }
   0x3   :  { %v4838_v5 = vld [vmem:[%s9685_s1 + $0x170] sm:$0xf]  ;;  %v5977_v6 = vld [vmem:[%s9685_s1 + $0x174] sm:$0xf0]  ;;  %v4775_v7 = vor.u32 %v5961_v4, %v4774_v2  ;;  %v4766_v14 = vld [vmem:[%s9685_s1 + $0xe0] sm:$0xf]  ;;  %v4703_v16 = vor.u32 %v5943_v13, %v4702_v11 }
   0x4   :  { %v4839_v8 = vor.u32 %v5977_v6, %v4838_v5  ;;  %v4902_v9 = vld [vmem:[%s9685_s1 + $0x1f0] sm:$0xf]  ;;  %v5993_v10 = vld [vmem:[%s9685_s1 + $0x1f4] sm:$0xf0]  ;;  %2504 = vmatpush.bf16.msra.mxu0 %v4711_v3  ;;  %v5959_v15 = vld [vmem:[%s9685_s1 + $0xe4] sm:$0xf0] }
   0x5   :  { %v4903_v12 = vor.u32 %v5993_v10, %v4902_v9  ;;  %2548 = vmatpush.bf16.msra.mxu1 %v4775_v7  ;;  %v4767_v17 = vor.u32 %v5959_v15, %v4766_v14  ;;  %v4830_v18 = vld [vmem:[%s9685_s1 + $0x160] sm:$0xf]  ;;  %v5975_v19 = vld [vmem:[%s9685_s1 + $0x164] sm:$0xf0]  ;;  %v4694_v23 = vld [vmem:[%s9685_s1 + $0x50] sm:$0xf] }
   0x6   :  { %2592 = vmatpush.bf16.msra.mxu2 %v4839_v8  ;;  %v4894_v20 = vld [vmem:[%s9685_s1 + $0x1e0] sm:$0xf]  ;;  %v4831_v21 = vor.u32 %v5975_v19, %v4830_v18  ;;  %v5991_v22 = vld [vmem:[%s9685_s1 + $0x1e4] sm:$0xf0]  ;;  %v5941_v24 = vld [vmem:[%s9685_s1 + $0x54] sm:$0xf0] }
   0x7   :  { %2636 = vmatpush.bf16.msra.mxu3 %v4903_v12  ;;  %v4895_v25 = vor.u32 %v5991_v22, %v4894_v20  ;;  %v4758_v26 = vld [vmem:[%s9685_s1 + $0xd0] sm:$0xf]  ;;  %v5957_v27 = vld [vmem:[%s9685_s1 + $0xd4] sm:$0xf0]  ;;  %v4695_v29 = vor.u32 %v5941_v24, %v4694_v23  ;;  %v4686_v35 = vld [vmem:[%s9685_s1 + $0x40] sm:$0xf] }
   0x8   :  { %v4822_v28 = vld [vmem:[%s9685_s1 + $0x150] sm:$0xf]  ;;  %2505 = vmatpush.bf16.msra.mxu0 %v4703_v16  ;;  %v5973_v30 = vld [vmem:[%s9685_s1 + $0x154] sm:$0xf0]  ;;  %v4759_v33 = vor.u32 %v5957_v27, %v4758_v26  ;;  %v5939_v36 = vld [vmem:[%s9685_s1 + $0x44] sm:$0xf0] }
   0x9   :  { %v4886_v31 = vld [vmem:[%s9685_s1 + $0x1d0] sm:$0xf]  ;;  %v5989_v32 = vld [vmem:[%s9685_s1 + $0x1d4] sm:$0xf0]  ;;  %2549 = vmatpush.bf16.msra.mxu1 %v4767_v17  ;;  %v4823_v34 = vor.u32 %v5973_v30, %v4822_v28  ;;  %v4750_v37 = vld [vmem:[%s9685_s1 + $0xc0] sm:$0xf]  ;;  %v4687_v44 = vor.u32 %v5939_v36, %v4686_v35 }
   0xa   :  { %2593 = vmatpush.bf16.msra.mxu2 %v4831_v21  ;;  %v4887_v38 = vor.u32 %v5989_v32, %v4886_v31  ;;  %v5955_v39 = vld [vmem:[%s9685_s1 + $0xc4] sm:$0xf0]  ;;  %v4814_v40 = vld [vmem:[%s9685_s1 + $0x140] sm:$0xf]  ;;  %v4678_v47 = vld [vmem:[%s9685_s1 + $0x30] sm:$0xf] }
   0xb   :  { %2637 = vmatpush.bf16.msra.mxu3 %v4895_v25  ;;  %v5971_v41 = vld [vmem:[%s9685_s1 + $0x144] sm:$0xf0]  ;;  %v4878_v42 = vld [vmem:[%s9685_s1 + $0x1c0] sm:$0xf]  ;;  %v4751_v45 = vor.u32 %v5955_v39, %v4750_v37  ;;  %v5937_v48 = vld [vmem:[%s9685_s1 + $0x34] sm:$0xf0] }
   0xc   :  { %v5987_v43 = vld [vmem:[%s9685_s1 + $0x1c4] sm:$0xf0]  ;;  %2506 = vmatpush.bf16.msra.mxu0 %v4695_v29  ;;  %v4815_v46 = vor.u32 %v5971_v41, %v4814_v40  ;;  %v4742_v49 = vld [vmem:[%s9685_s1 + $0xb0] sm:$0xf]  ;;  %v5953_v51 = vld [vmem:[%s9685_s1 + $0xb4] sm:$0xf0]  ;;  %v4679_v56 = vor.u32 %v5937_v48, %v4678_v47 }
   0xd   :  { %2550 = vmatpush.bf16.msra.mxu1 %v4759_v33  ;;  %v4879_v50 = vor.u32 %v5987_v43, %v4878_v42  ;;  %v4806_v52 = vld [vmem:[%s9685_s1 + $0x130] sm:$0xf]  ;;  %v5969_v53 = vld [vmem:[%s9685_s1 + $0x134] sm:$0xf0]  ;;  %v4743_v57 = vor.u32 %v5953_v51, %v4742_v49  ;;  %v4670_v59 = vld [vmem:[%s9685_s1 + $0x20] sm:$0xf] }
   0xe   :  { %2594 = vmatpush.bf16.msra.mxu2 %v4823_v34  ;;  %v4870_v54 = vld [vmem:[%s9685_s1 + $0x1b0] sm:$0xf]  ;;  %v5985_v55 = vld [vmem:[%s9685_s1 + $0x1b4] sm:$0xf0]  ;;  %v4807_v58 = vor.u32 %v5969_v53, %v4806_v52  ;;  %v5935_v60 = vld [vmem:[%s9685_s1 + $0x24] sm:$0xf0] }
   0xf   :  { %2638 = vmatpush.bf16.msra.mxu3 %v4887_v38  ;;  %v4734_v61 = vld [vmem:[%s9685_s1 + $0xa0] sm:$0xf]  ;;  %v4871_v62 = vor.u32 %v5985_v55, %v4870_v54  ;;  %v5951_v63 = vld [vmem:[%s9685_s1 + $0xa4] sm:$0xf0]  ;;  %v4671_v4 = vor.u32 %v5935_v60, %v4670_v59  ;;  %v4662_v7 = vld [vmem:[%s9685_s1 + $0x10] sm:$0xf] }
  0x10   :  { %2507 = vmatpush.bf16.msra.mxu0 %v4687_v44  ;;  %v4798_v0 = vld [vmem:[%s9685_s1 + $0x120] sm:$0xf]  ;;  %v5967_v1 = vld [vmem:[%s9685_s1 + $0x124] sm:$0xf0]  ;;  %v4735_v5 = vor.u32 %v5951_v63, %v4734_v61  ;;  %v5933_v8 = vld [vmem:[%s9685_s1 + $0x14] sm:$0xf0] }
  0x11   :  { %2551 = vmatpush.bf16.msra.mxu1 %v4751_v45  ;;  %v4862_v2 = vld [vmem:[%s9685_s1 + $0x1a0] sm:$0xf]  ;;  %v5983_v3 = vld [vmem:[%s9685_s1 + $0x1a4] sm:$0xf0]  ;;  %v4799_v6 = vor.u32 %v5967_v1, %v4798_v0  ;;  %v4726_v9 = vld [vmem:[%s9685_s1 + $0x90] sm:$0xf]  ;;  %v4663_v17 = vor.u32 %v5933_v8, %v4662_v7 }
  0x12   :  { %2595 = vmatpush.bf16.msra.mxu2 %v4815_v46  ;;  %v4863_v10 = vor.u32 %v5983_v3, %v4862_v2  ;;  %v5949_v11 = vld [vmem:[%s9685_s1 + $0x94] sm:$0xf0]  ;;  %v4790_v12 = vld [vmem:[%s9685_s1 + $0x110] sm:$0xf]  ;;  %v4654_v16 = vld [vmem:[%s9685_s1] sm:$0xf] }
  0x13   :  { %2639 = vmatpush.bf16.msra.mxu3 %v4879_v50  ;;  %v5965_v13 = vld [vmem:[%s9685_s1 + $0x114] sm:$0xf0]  ;;  %v4854_v14 = vld [vmem:[%s9685_s1 + $0x190] sm:$0xf]  ;;  %v5931_v18 = vld [vmem:[%s9685_s1 + $0x4] sm:$0xf0]  ;;  %v4727_v21 = vor.u32 %v5949_v11, %v4726_v9 }
  0x14   :  { %2508 = vmatpush.bf16.msra.mxu0 %v4679_v56  ;;  %v5981_v15 = vld [vmem:[%s9685_s1 + $0x194] sm:$0xf0]  ;;  %v4718_v19 = vld [vmem:[%s9685_s1 + $0x80] sm:$0xf]  ;;  %v5947_v20 = vld [vmem:[%s9685_s1 + $0x84] sm:$0xf0]  ;;  %v4791_v22 = vor.u32 %v5965_v13, %v4790_v12  ;;  %v4655_v34 = vor.u32 %v5931_v18, %v4654_v16 }
  0x15   :  { %2552 = vmatpush.bf16.msra.mxu1 %v4743_v57  ;;  %v4782_v23 = vld [vmem:[%s9685_s1 + $0x100] sm:$0xf]  ;;  %v5963_v24 = vld [vmem:[%s9685_s1 + $0x104] sm:$0xf0]  ;;  %v4855_v26 = vor.u32 %v5981_v15, %v4854_v14  ;;  %v5804_v30 = vld [vmem:[%s9686_s0 + $0x4] sm:$0xf]  ;;  %v4719_v38 = vor.u32 %v5947_v20, %v4718_v19 }
  0x16   :  { %2596 = vmatpush.bf16.msra.mxu2 %v4807_v58  ;;  %v4846_v25 = vld [vmem:[%s9685_s1 + $0x180] sm:$0xf]  ;;  %v5979_v27 = vld [vmem:[%s9685_s1 + $0x184] sm:$0xf0]  ;;  %v4152_v31 = vld [vmem:[%s9686_s0 + $0x48] sm:$0xf0]  ;;  %v4783_v39 = vor.u32 %v5963_v24, %v4782_v23 }
  0x17   :  { %2640 = vmatpush.bf16.msra.mxu3 %v4871_v62  ;;  %v4150_v28 = vld [vmem:[%s9686_s0] sm:$0xf]  ;;  %v5813_v29 = vld [vmem:[%s9686_s0 + $0x44] sm:$0xf0]  ;;  %v5094_v32 = vld [vmem:[%s9685_s1 + $0x370] sm:$0xf]  ;;  %v4847_v43 = vor.u32 %v5979_v27, %v4846_v25  ;;  %v6487_v53 = vor.u32 %v5804_v30, %v4152_v31 }
  0x18   :  { %2509 = vmatpush.bf16.msra.mxu0 %v4671_v4  ;;  %v6041_v33 = vld [vmem:[%s9685_s1 + $0x374] sm:$0xf0]  ;;  %v4158_v35 = vld [vmem:[%s9686_s0 + $0x8] sm:$0xf]  ;;  %v5158_v36 = vld [vmem:[%s9685_s1 + $0x3f0] sm:$0xf]  ;;  %v6476_v48 = vor.u32 %v5813_v29, %v4150_v28 }
  0x19   :  { %2553 = vmatpush.bf16.msra.mxu1 %v4735_v5  ;;  %v6057_v37 = vld [vmem:[%s9685_s1 + $0x3f4] sm:$0xf0]  ;;  %v5814_v40 = vld [vmem:[%s9686_s0 + $0x4c] sm:$0xf0]  ;;  %v5805_v41 = vld [vmem:[%s9686_s0 + $0xc] sm:$0xf]  ;;  %v5095_v44 = vor.u32 %v6041_v33, %v5094_v32 }
  0x1a   :  { %2597 = vmatpush.bf16.msra.mxu2 %v4799_v6  ;;  %v4160_v42 = vld [vmem:[%s9686_s0 + $0x50] sm:$0xf0]  ;;  %v4966_v45 = vld [vmem:[%s9685_s1 + $0x270] sm:$0xf]  ;;  %v6009_v46 = vld [vmem:[%s9685_s1 + $0x274] sm:$0xf0]  ;;  %v5159_v49 = vor.u32 %v6057_v37, %v5158_v36  ;;  %v6489_v54 = vor.u32 %v5814_v40, %v4158_v35 }
  0x1b   :  { %2641 = vmatpush.bf16.msra.mxu3 %v4863_v10  ;;  %v5030_v47 = vld [vmem:[%s9685_s1 + $0x2f0] sm:$0xf]  ;;  %v6025_v50 = vld [vmem:[%s9685_s1 + $0x2f4] sm:$0xf0]  ;;  %v5086_v51 = vld [vmem:[%s9685_s1 + $0x360] sm:$0xf]  ;;  %v6497_v57 = vor.u32 %v5805_v41, %v4160_v42  ;;  %v4967_v58 = vor.u32 %v6009_v46, %v4966_v45 }
  0x1c   :  { %2510 = vmatpush.bf16.msra.mxu0 %v4663_v17  ;;  %v6039_v52 = vld [vmem:[%s9685_s1 + $0x364] sm:$0xf0]  ;;  %v5150_v55 = vld [vmem:[%s9685_s1 + $0x3e0] sm:$0xf]  ;;  %v5031_v59 = vor.u32 %v6025_v50, %v5030_v47  ;;  %v5078_v2 = vld [vmem:[%s9685_s1 + $0x350] sm:$0xf] }
  0x1d   :  { %2554 = vmatpush.bf16.msra.mxu1 %v4727_v21  ;;  %v6055_v56 = vld [vmem:[%s9685_s1 + $0x3e4] sm:$0xf0]  ;;  %v5087_v60 = vor.u32 %v6039_v52, %v5086_v51  ;;  %v4958_v61 = vld [vmem:[%s9685_s1 + $0x260] sm:$0xf]  ;;  %v6037_v3 = vld [vmem:[%s9685_s1 + $0x354] sm:$0xf0] }
  0x1e   :  { %2598 = vmatpush.bf16.msra.mxu2 %v4791_v22  ;;  %v6007_v62 = vld [vmem:[%s9685_s1 + $0x264] sm:$0xf0]  ;;  %v5022_v63 = vld [vmem:[%s9685_s1 + $0x2e0] sm:$0xf]  ;;  %v5151_v0 = vor.u32 %v6055_v56, %v5150_v55  ;;  %v5142_v4 = vld [vmem:[%s9685_s1 + $0x3d0] sm:$0xf]  ;;  %v5079_v8 = vor.u32 %v6037_v3, %v5078_v2 }
  0x1f   :  { %2642 = vmatpush.bf16.msra.mxu3 %v4855_v26  ;;  %v6023_v1 = vld [vmem:[%s9685_s1 + $0x2e4] sm:$0xf0]  ;;  %v6053_v5 = vld [vmem:[%s9685_s1 + $0x3d4] sm:$0xf0]  ;;  %v4959_v6 = vor.u32 %v6007_v62, %v4958_v61  ;;  %v4950_v9 = vld [vmem:[%s9685_s1 + $0x250] sm:$0xf] }
  0x20   :  { %2511 = vmatpush.bf16.msra.mxu0 %v4655_v34  ;;  %v5023_v7 = vor.u32 %v6023_v1, %v5022_v63  ;;  %v6005_v10 = vld [vmem:[%s9685_s1 + $0x254] sm:$0xf0]  ;;  %v5014_v11 = vld [vmem:[%s9685_s1 + $0x2d0] sm:$0xf]  ;;  %v5143_v12 = vor.u32 %v6053_v5, %v5142_v4  ;;  %v5070_v14 = vld [vmem:[%s9685_s1 + $0x340] sm:$0xf] }
  0x21   :  { %2555 = vmatpush.bf16.msra.mxu1 %v4719_v38  ;;  %v6021_v13 = vld [vmem:[%s9685_s1 + $0x2d4] sm:$0xf0]  ;;  %v6035_v15 = vld [vmem:[%s9685_s1 + $0x344] sm:$0xf0]  ;;  %v5134_v16 = vld [vmem:[%s9685_s1 + $0x3c0] sm:$0xf]  ;;  %v4951_v18 = vor.u32 %v6005_v10, %v4950_v9 }
  0x22   :  { %2599 = vmatpush.bf16.msra.mxu2 %v4783_v39  ;;  %v6051_v17 = vld [vmem:[%s9685_s1 + $0x3c4] sm:$0xf0]  ;;  %v5015_v19 = vor.u32 %v6021_v13, %v5014_v11  ;;  %v5071_v20 = vor.u32 %v6035_v15, %v5070_v14  ;;  %v4942_v21 = vld [vmem:[%s9685_s1 + $0x240] sm:$0xf]  ;;  %v4222_v26 = vld [vmem:[%s9686_s0 + $0x90] sm:$0xf] }
  0x23   :  { %2643 = vmatpush.bf16.msra.mxu3 %v4847_v43  ;;  %2512 = vmatmul.bf16.vlgmr.msra.gmra.mxu0 %v6476_v48  ;;  %v6003_v22 = vld [vmem:[%s9685_s1 + $0x244] sm:$0xf0]  ;;  %v5135_v23 = vor.u32 %v6051_v17, %v5134_v16  ;;  %v5006_v24 = vld [vmem:[%s9685_s1 + $0x2c0] sm:$0xf]  ;;  %v5831_v27 = vld [vmem:[%s9686_s0 + $0xd4] sm:$0xf0] }
  0x24   :  { %2556 = vmatmul.bf16.vlgmr.msra.gmra.mxu1 %v6487_v53  ;;  %2680 = vmatpush.bf16.msrb.mxu0 %v4967_v58  ;;  %v6019_v25 = vld [vmem:[%s9685_s1 + $0x2c4] sm:$0xf0]  ;;  %v5822_v28 = vld [vmem:[%s9686_s0 + $0x94] sm:$0xf]  ;;  %v4224_v29 = vld [vmem:[%s9686_s0 + $0xd8] sm:$0xf0]  ;;  %v4943_v32 = vor.u32 %v6003_v22, %v4942_v21  ;;  %v6587_v36 = vor.u32 %v5831_v27, %v4222_v26 }
  0x25   :  { %2600 = vmatmul.bf16.vlgmr.msra.gmra.mxu2 %v6489_v54  ;;  %2724 = vmatpush.bf16.msrb.mxu1 %v5031_v59  ;;  %v4230_v30 = vld [vmem:[%s9686_s0 + $0x98] sm:$0xf]  ;;  %v5832_v31 = vld [vmem:[%s9686_s0 + $0xdc] sm:$0xf0]  ;;  %v5823_v33 = vld [vmem:[%s9686_s0 + $0x9c] sm:$0xf]  ;;  %v5007_v35 = vor.u32 %v6019_v25, %v5006_v24  ;;  %v6589_v37 = vor.u32 %v5822_v28, %v4224_v29 }
  0x26   :  { %2768 = vmatpush.bf16.msrb.mxu2 %v5095_v44  ;;  %2644 = vmatmul.bf16.vlgmr.msra.gmra.mxu3 %v6497_v57  ;;  %v4232_v34 = vld [vmem:[%s9686_s0 + $0xe0] sm:$0xf0]  ;;  %v6591_v38 = vor.u32 %v5832_v31, %v4230_v30  ;;  %v5062_v40 = vld [vmem:[%s9685_s1 + $0x330] sm:$0xf]  ;;  %v6033_v41 = vld [vmem:[%s9685_s1 + $0x334] sm:$0xf0] }
  0x27   :  { %2812 = vmatpush.bf16.msrb.mxu3 %v5159_v49  ;;  %v6593_v39 = vor.u32 %v5823_v33, %v4232_v34  ;;  %v4934_v42 = vld [vmem:[%s9685_s1 + $0x230] sm:$0xf]  ;;  %v5063_v43 = vor.u32 %v6033_v41, %v5062_v40  ;;  %v6001_v44 = vld [vmem:[%s9685_s1 + $0x234] sm:$0xf0]  ;;  %v4294_v55 = vld [vmem:[%s9686_s0 + $0x120] sm:$0xf] }
  0x28   :  { %2681 = vmatpush.bf16.msrb.mxu0 %v4959_v6  ;;  %v5126_v45 = vld [vmem:[%s9685_s1 + $0x3b0] sm:$0xf]  ;;  %v6049_v46 = vld [vmem:[%s9685_s1 + $0x3b4] sm:$0xf0]  ;;  %v4935_v47 = vor.u32 %v6001_v44, %v4934_v42  ;;  %v5849_v56 = vld [vmem:[%s9686_s0 + $0x164] sm:$0xf0] }
  0x29   :  { %2725 = vmatpush.bf16.msrb.mxu1 %v5023_v7  ;;  %v5127_v49 = vor.u32 %v6049_v46, %v5126_v45  ;;  %v4998_v50 = vld [vmem:[%s9685_s1 + $0x2b0] sm:$0xf]  ;;  %v6017_v51 = vld [vmem:[%s9685_s1 + $0x2b4] sm:$0xf0]  ;;  %v5840_v58 = vld [vmem:[%s9686_s0 + $0x124] sm:$0xf] }
  0x2a   :  { %2769 = vmatpush.bf16.msrb.mxu2 %v5087_v60  ;;  %v4999_v52 = vor.u32 %v6017_v51, %v4998_v50  ;;  %v4296_v59 = vld [vmem:[%s9686_s0 + $0x168] sm:$0xf0]  ;;  %v4302_v60 = vld [vmem:[%s9686_s0 + $0x128] sm:$0xf]  ;;  %v5850_v61 = vld [vmem:[%s9686_s0 + $0x16c] sm:$0xf0] }
  0x2b   :  { %2813 = vmatpush.bf16.msrb.mxu3 %v5151_v0  ;;  %v5841_v62 = vld [vmem:[%s9686_s0 + $0x12c] sm:$0xf]  ;;  %v4304_v63 = vld [vmem:[%s9686_s0 + $0x170] sm:$0xf0]  ;;  %v6647_v0 = vor.u32 %v5849_v56, %v4294_v55  ;;  %v6649_v1 = vor.u32 %v5840_v58, %v4296_v59  ;;  %v6651_v2 = vor.u32 %v5850_v61, %v4302_v60  ;;  %v5054_v4 = vld [vmem:[%s9685_s1 + $0x320] sm:$0xf] }
  0x2c   :  { %2682 = vmatpush.bf16.msrb.mxu0 %v4951_v18  ;;  %v6653_v3 = vor.u32 %v5841_v62, %v4304_v63  ;;  %v6031_v5 = vld [vmem:[%s9685_s1 + $0x324] sm:$0xf0]  ;;  %v4926_v6 = vld [vmem:[%s9685_s1 + $0x220] sm:$0xf]  ;;  %v4366_v16 = vld [vmem:[%s9686_s0 + $0x1b0] sm:$0xf] }
  0x2d   :  { %2726 = vmatpush.bf16.msrb.mxu1 %v5015_v19  ;;  %v5055_v7 = vor.u32 %v6031_v5, %v5054_v4  ;;  %v5118_v9 = vld [vmem:[%s9685_s1 + $0x3a0] sm:$0xf]  ;;  %v6047_v10 = vld [vmem:[%s9685_s1 + $0x3a4] sm:$0xf0]  ;;  %v5867_v17 = vld [vmem:[%s9686_s0 + $0x1f4] sm:$0xf0] }
  0x2e   :  { %2770 = vmatpush.bf16.msrb.mxu2 %v5079_v8  ;;  %v5999_v8 = vld [vmem:[%s9685_s1 + $0x224] sm:$0xf0]  ;;  %v4990_v13 = vld [vmem:[%s9685_s1 + $0x2a0] sm:$0xf]  ;;  %v5858_v18 = vld [vmem:[%s9686_s0 + $0x1b4] sm:$0xf]  ;;  %v6707_v24 = vor.u32 %v5867_v17, %v4366_v16 }
  0x2f   :  { %2814 = vmatpush.bf16.msrb.mxu3 %v5143_v12  ;;  %v4927_v11 = vor.u32 %v5999_v8, %v4926_v6  ;;  %v5119_v12 = vor.u32 %v6047_v10, %v5118_v9  ;;  %v6015_v14 = vld [vmem:[%s9685_s1 + $0x2a4] sm:$0xf0]  ;;  %v4368_v19 = vld [vmem:[%s9686_s0 + $0x1f8] sm:$0xf0]  ;;  %v5868_v21 = vld [vmem:[%s9686_s0 + $0x1fc] sm:$0xf0] }
  0x30   :  { %2683 = vmatpush.bf16.msrb.mxu0 %v4943_v32  ;;  %v4991_v15 = vor.u32 %v6015_v14, %v4990_v13  ;;  %v5859_v22 = vld [vmem:[%s9686_s0 + $0x1bc] sm:$0xf]  ;;  %v6709_v25 = vor.u32 %v5858_v18, %v4368_v19  ;;  %v5046_v28 = vld [vmem:[%s9685_s1 + $0x310] sm:$0xf]  ;;  %v6029_v29 = vld [vmem:[%s9685_s1 + $0x314] sm:$0xf0] }
  0x31   :  { %2727 = vmatpush.bf16.msrb.mxu1 %v5007_v35  ;;  %v4918_v30 = vld [vmem:[%s9685_s1 + $0x210] sm:$0xf]  ;;  %v5047_v31 = vor.u32 %v6029_v29, %v5046_v28  ;;  %v5997_v32 = vld [vmem:[%s9685_s1 + $0x214] sm:$0xf0]  ;;  %v4438_v44 = vld [vmem:[%s9686_s0 + $0x240] sm:$0xf] }
  0x32   :  { %2771 = vmatpush.bf16.msrb.mxu2 %v5071_v20  ;;  %v4374_v20 = vld [vmem:[%s9686_s0 + $0x1b8] sm:$0xf]  ;;  %v5110_v33 = vld [vmem:[%s9685_s1 + $0x390] sm:$0xf]  ;;  %v4919_v35 = vor.u32 %v5997_v32, %v4918_v30  ;;  %v5885_v45 = vld [vmem:[%s9686_s0 + $0x284] sm:$0xf0] }
  0x33   :  { %2815 = vmatpush.bf16.msrb.mxu3 %v5135_v23  ;;  %2517 = vmatmul.bf16.gmra.mxu0 %v6587_v36  ;;  %v4376_v23 = vld [vmem:[%s9686_s0 + $0x200] sm:$0xf0]  ;;  %v6711_v26 = vor.u32 %v5868_v21, %v4374_v20  ;;  %v6045_v34 = vld [vmem:[%s9685_s1 + $0x394] sm:$0xf0]  ;;  %v4982_v41 = vld [vmem:[%s9685_s1 + $0x290] sm:$0xf]  ;;  %v6767_v55 = vor.u32 %v5885_v45, %v4438_v44 }
  0x34   :  { %2561 = vmatmul.bf16.gmra.mxu1 %v6589_v37  ;;  %2684 = vmatpush.bf16.msrb.mxu0 %v4935_v47  ;;  %v6713_v27 = vor.u32 %v5859_v22, %v4376_v23  ;;  %v5111_v40 = vor.u32 %v6045_v34, %v5110_v33  ;;  %v6013_v42 = vld [vmem:[%s9685_s1 + $0x294] sm:$0xf0]  ;;  %v5876_v46 = vld [vmem:[%s9686_s0 + $0x244] sm:$0xf]  ;;  %v4440_v47 = vld [vmem:[%s9686_s0 + $0x288] sm:$0xf0] }
  0x35   :  { %2605 = vmatmul.bf16.gmra.mxu2 %v6591_v38  ;;  %2728 = vmatpush.bf16.msrb.mxu1 %v4999_v52  ;;  %9773 = vst [vmem:[#allocation2_spill] sm:$0xff] %v6711_v26  ;;  %v5886_v50 = vld [vmem:[%s9686_s0 + $0x28c] sm:$0xf0]  ;;  %v5877_v51 = vld [vmem:[%s9686_s0 + $0x24c] sm:$0xf]  ;;  %v6769_v56 = vor.u32 %v5876_v46, %v4440_v47 }
  0x36   :  { %2649 = vmatmul.bf16.gmra.mxu3 %v6593_v39  ;;  %2772 = vmatpush.bf16.msrb.mxu2 %v5063_v43  ;;  %9774 = vst [vmem:[#allocation3_spill] sm:$0xff] %v6713_v27  ;;  %v4983_v43 = vor.u32 %v6013_v42, %v4982_v41  ;;  %v4448_v52 = vld [vmem:[%s9686_s0 + $0x290] sm:$0xf0]  ;;  %v5038_v60 = vld [vmem:[%s9685_s1 + $0x300] sm:$0xf] }
  0x37   :  { %2816 = vmatpush.bf16.msrb.mxu3 %v5127_v49  ;;  %v4446_v49 = vld [vmem:[%s9686_s0 + $0x248] sm:$0xf]  ;;  %v6773_v59 = vor.u32 %v5877_v51, %v4448_v52  ;;  %v4910_v62 = vld [vmem:[%s9685_s1 + $0x200] sm:$0xf]  ;;  %v5903_v13 = vld [vmem:[%s9686_s0 + $0x314] sm:$0xf0] }
  0x38   :  { %2685 = vmatpush.bf16.msrb.mxu0 %v4927_v11  ;;  %v6771_v58 = vor.u32 %v5886_v50, %v4446_v49  ;;  %v6027_v61 = vld [vmem:[%s9685_s1 + $0x304] sm:$0xf0]  ;;  %v5102_v5 = vld [vmem:[%s9685_s1 + $0x380] sm:$0xf]  ;;  %v5894_v14 = vld [vmem:[%s9686_s0 + $0x2d4] sm:$0xf] }
  0x39   :  { %2729 = vmatpush.bf16.msrb.mxu1 %v4991_v15  ;;  %9776 = vst [vmem:[#allocation5_spill] sm:$0xff] %v6773_v59  ;;  %v5039_v63 = vor.u32 %v6027_v61, %v5038_v60  ;;  %v5995_v4 = vld [vmem:[%s9685_s1 + $0x204] sm:$0xf0]  ;;  %v4974_v9 = vld [vmem:[%s9685_s1 + $0x280] sm:$0xf] }
  0x3a   :  { %2773 = vmatpush.bf16.msrb.mxu2 %v5055_v7  ;;  %9775 = vst [vmem:[#allocation4_spill] sm:$0xff] %v6771_v58  ;;  %v6043_v6 = vld [vmem:[%s9685_s1 + $0x384] sm:$0xf0]  ;;  %v4911_v7 = vor.u32 %v5995_v4, %v4910_v62  ;;  %v4512_v15 = vld [vmem:[%s9686_s0 + $0x318] sm:$0xf0] }
  0x3b   :  { %2817 = vmatpush.bf16.msrb.mxu3 %v5119_v12  ;;  %v5103_v8 = vor.u32 %v6043_v6, %v5102_v5  ;;  %v6011_v10 = vld [vmem:[%s9685_s1 + $0x284] sm:$0xf0]  ;;  %v4510_v12 = vld [vmem:[%s9686_s0 + $0x2d0] sm:$0xf]  ;;  %v4518_v16 = vld [vmem:[%s9686_s0 + $0x2d8] sm:$0xf]  ;;  %v6829_v21 = vor.u32 %v5894_v14, %v4512_v15 }
  0x3c   :  { %2686 = vmatpush.bf16.msrb.mxu0 %v4919_v35  ;;  %v4975_v11 = vor.u32 %v6011_v10, %v4974_v9  ;;  %v5904_v17 = vld [vmem:[%s9686_s0 + $0x31c] sm:$0xf0]  ;;  %v5895_v18 = vld [vmem:[%s9686_s0 + $0x2dc] sm:$0xf]  ;;  %v4520_v19 = vld [vmem:[%s9686_s0 + $0x320] sm:$0xf0]  ;;  %v6827_v20 = vor.u32 %v5903_v13, %v4510_v12 }
  0x3d   :  { %2730 = vmatpush.bf16.msrb.mxu1 %v4983_v43  ;;  %v6831_v22 = vor.u32 %v5904_v17, %v4518_v16  ;;  %v6833_v23 = vor.u32 %v5895_v18, %v4520_v19  ;;  %v5350_v28 = vld [vmem:[%s9685_s1 + $0x570] sm:$0xf]  ;;  %v6105_v29 = vld [vmem:[%s9685_s1 + $0x574] sm:$0xf0]  ;;  %v4582_v44 = vld [vmem:[%s9686_s0 + $0x360] sm:$0xf] }
  0x3e   :  { %2774 = vmatpush.bf16.msrb.mxu2 %v5047_v31  ;;  %v5222_v30 = vld [vmem:[%s9685_s1 + $0x470] sm:$0xf]  ;;  %v5351_v31 = vor.u32 %v6105_v29, %v5350_v28  ;;  %v6073_v32 = vld [vmem:[%s9685_s1 + $0x474] sm:$0xf0]  ;;  %v5921_v45 = vld [vmem:[%s9686_s0 + $0x3a4] sm:$0xf0] }
  0x3f   :  { %2818 = vmatpush.bf16.msrb.mxu3 %v5111_v40  ;;  %9777 = vst [vmem:[#allocation6_spill] sm:$0xff] %v6831_v22  ;;  %v5414_v33 = vld [vmem:[%s9685_s1 + $0x5f0] sm:$0xf]  ;;  %v6121_v34 = vld [vmem:[%s9685_s1 + $0x5f4] sm:$0xf0]  ;;  %v5223_v35 = vor.u32 %v6073_v32, %v5222_v30  ;;  %v6887_v60 = vor.u32 %v5921_v45, %v4582_v44 }
  0x40   :  { %2687 = vmatpush.bf16.msrb.mxu0 %v4911_v7  ;;  %9778 = vst [vmem:[#allocation7_spill] sm:$0xff] %v6833_v23  ;;  %v5415_v40 = vor.u32 %v6121_v34, %v5414_v33  ;;  %v5286_v41 = vld [vmem:[%s9685_s1 + $0x4f0] sm:$0xf]  ;;  %v6089_v42 = vld [vmem:[%s9685_s1 + $0x4f4] sm:$0xf0] }
  0x41   :  { %2731 = vmatpush.bf16.msrb.mxu1 %v4975_v11  ;;  %v5287_v43 = vor.u32 %v6089_v42, %v5286_v41  ;;  %v5912_v46 = vld [vmem:[%s9686_s0 + $0x364] sm:$0xf]  ;;  %v4584_v47 = vld [vmem:[%s9686_s0 + $0x3a8] sm:$0xf0]  ;;  %v4590_v49 = vld [vmem:[%s9686_s0 + $0x368] sm:$0xf] }
  0x42   :  { %2775 = vmatpush.bf16.msrb.mxu2 %v5039_v63  ;;  %v5922_v50 = vld [vmem:[%s9686_s0 + $0x3ac] sm:$0xf0]  ;;  %v5913_v51 = vld [vmem:[%s9686_s0 + $0x36c] sm:$0xf]  ;;  %v4592_v52 = vld [vmem:[%s9686_s0 + $0x3b0] sm:$0xf0]  ;;  %v6889_v61 = vor.u32 %v5912_v46, %v4584_v47 }
  0x43   :  { %2522 = vmatmul.bf16.gmra.mxu0 %v6647_v0  ;;  %2819 = vmatpush.bf16.msrb.mxu3 %v5103_v8  ;;  %v6891_v62 = vor.u32 %v5922_v50, %v4590_v49  ;;  %v6893_v63 = vor.u32 %v5913_v51, %v4592_v52  ;;  %v5342_v4 = vld [vmem:[%s9685_s1 + $0x560] sm:$0xf]  ;;  %v6103_v5 = vld [vmem:[%s9685_s1 + $0x564] sm:$0xf0]  ;;  %v4166_v16 = vld [vmem:[%s9686_s0 + $0x10] sm:$0xf] }
  0x44   :  { %2566 = vmatmul.bf16.gmra.mxu1 %v6649_v1  ;;  %2856 = vmatpush.bf16.msra.mxu0 %v5223_v35  ;;  %v5343_v6 = vor.u32 %v6103_v5, %v5342_v4  ;;  %v5214_v7 = vld [vmem:[%s9685_s1 + $0x460] sm:$0xf]  ;;  %v6071_v8 = vld [vmem:[%s9685_s1 + $0x464] sm:$0xf0]  ;;  %v5815_v17 = vld [vmem:[%s9686_s0 + $0x54] sm:$0xf0] }
  0x45   :  { %2610 = vmatmul.bf16.gmra.mxu2 %v6651_v2  ;;  %2900 = vmatpush.bf16.msra.mxu1 %v5287_v43  ;;  %9779 = vst [vmem:[#allocation8_spill] sm:$0xff] %v6891_v62  ;;  %v5215_v9 = vor.u32 %v6071_v8, %v5214_v7  ;;  %v5406_v10 = vld [vmem:[%s9685_s1 + $0x5e0] sm:$0xf]  ;;  %v6119_v11 = vld [vmem:[%s9685_s1 + $0x5e4] sm:$0xf0]  ;;  %v6947_v32 = vor.u32 %v5815_v17, %v4166_v16 }
  0x46   :  { %2654 = vmatmul.bf16.gmra.mxu3 %v6653_v3  ;;  %2944 = vmatpush.bf16.msra.mxu2 %v5351_v31  ;;  %9780 = vst [vmem:[#allocation9_spill] sm:$0xff] %v6893_v63  ;;  %v5278_v12 = vld [vmem:[%s9685_s1 + $0x4e0] sm:$0xf]  ;;  %v5407_v13 = vor.u32 %v6119_v11, %v5406_v10  ;;  %v6087_v14 = vld [vmem:[%s9685_s1 + $0x4e4] sm:$0xf0] }
  0x47   :  { %2988 = vmatpush.bf16.msra.mxu3 %v5415_v40  ;;  %v5279_v15 = vor.u32 %v6087_v14, %v5278_v12  ;;  %v5806_v18 = vld [vmem:[%s9686_s0 + $0x14] sm:$0xf]  ;;  %v4168_v19 = vld [vmem:[%s9686_s0 + $0x58] sm:$0xf0]  ;;  %v4174_v28 = vld [vmem:[%s9686_s0 + $0x18] sm:$0xf] }
  0x48   :  { %2857 = vmatpush.bf16.msra.mxu0 %v5215_v9  ;;  %v5816_v29 = vld [vmem:[%s9686_s0 + $0x5c] sm:$0xf0]  ;;  %v5807_v30 = vld [vmem:[%s9686_s0 + $0x1c] sm:$0xf]  ;;  %v4176_v31 = vld [vmem:[%s9686_s0 + $0x60] sm:$0xf0]  ;;  %v6949_v33 = vor.u32 %v5806_v18, %v4168_v19 }
  0x49   :  { %2901 = vmatpush.bf16.msra.mxu1 %v5279_v15  ;;  %v6951_v34 = vor.u32 %v5816_v29, %v4174_v28  ;;  %v6953_v35 = vor.u32 %v5807_v30, %v4176_v31  ;;  %v5334_v40 = vld [vmem:[%s9685_s1 + $0x550] sm:$0xf]  ;;  %v6101_v41 = vld [vmem:[%s9685_s1 + $0x554] sm:$0xf0]  ;;  %v428_v52 = vld [vmem:[%s9687_s2] sm:$0x3] }
  0x4a   :  { %2945 = vmatpush.bf16.msra.mxu2 %v5343_v6  ;;  %v5335_v42 = vor.u32 %v6101_v41, %v5334_v40  ;;  %v5206_v43 = vld [vmem:[%s9685_s1 + $0x450] sm:$0xf]  ;;  %v6069_v44 = vld [vmem:[%s9685_s1 + $0x454] sm:$0xf0]  ;;  %v6986_v5 = vperm.slane %v428_v52, 0 }
  0x4b   :  { %2989 = vmatpush.bf16.msra.mxu3 %v5407_v13  ;;  %9781 = vst [vmem:[#allocation10_spill] sm:$0xff] %v6951_v34  ;;  %v5398_v45 = vld [vmem:[%s9685_s1 + $0x5d0] sm:$0xf]  ;;  %v5207_v46 = vor.u32 %v6069_v44, %v5206_v43  ;;  %v6117_v47 = vld [vmem:[%s9685_s1 + $0x5d4] sm:$0xf0] }
  0x4c   :  { %9782 = vst [vmem:[#allocation11_spill] sm:$0xff] %v6953_v35  ;;  %v5399_v49 = vor.u32 %v6117_v47, %v5398_v45  ;;  %v5270_v50 = vld [vmem:[%s9685_s1 + $0x4d0] sm:$0xf]  ;;  %v6085_v51 = vld [vmem:[%s9685_s1 + $0x4d4] sm:$0xf0] }
  0x4d   :  { %2858 = vmatpush.bf16.msra.mxu0 %v5207_v46  ;;  %v5271_v4 = vor.u32 %v6085_v51, %v5270_v50  ;;  %v5326_v6 = vld [vmem:[%s9685_s1 + $0x540] sm:$0xf]  ;;  %v6099_v7 = vld [vmem:[%s9685_s1 + $0x544] sm:$0xf0]  ;;  %v5824_v10 = vld [vmem:[%s9686_s0 + $0xa4] sm:$0xf] }
  0x4e   :  { %2946 = vmatpush.bf16.msra.mxu2 %v5335_v42  ;;  %v4238_v8 = vld [vmem:[%s9686_s0 + $0xa0] sm:$0xf]  ;;  %v5833_v9 = vld [vmem:[%s9686_s0 + $0xe4] sm:$0xf0]  ;;  %v5327_v11 = vor.u32 %v6099_v7, %v5326_v6  ;;  %v4240_v12 = vld [vmem:[%s9686_s0 + $0xe8] sm:$0xf0] }
  0x4f   :  { %2990 = vmatpush.bf16.msra.mxu3 %v5399_v49  ;;  %2902 = vmatpush.bf16.msra.mxu1 %v5271_v4  ;;  %v4246_v13 = vld [vmem:[%s9686_s0 + $0xa8] sm:$0xf]  ;;  %v5834_v14 = vld [vmem:[%s9686_s0 + $0xec] sm:$0xf0]  ;;  %v5825_v15 = vld [vmem:[%s9686_s0 + $0xac] sm:$0xf]  ;;  %v7018_v17 = vor.u32 %v5833_v9, %v4238_v8  ;;  %v7020_v19 = vor.u32 %v5824_v10, %v4240_v12 }
  0x50   :  { %v4248_v16 = vld [vmem:[%s9686_s0 + $0xf0] sm:$0xf0]  ;;  %v7022_v28 = vor.u32 %v5834_v14, %v4246_v13  ;;  %v5198_v40 = vld [vmem:[%s9685_s1 + $0x440] sm:$0xf]  ;;  %v6067_v41 = vld [vmem:[%s9685_s1 + $0x444] sm:$0xf0] }
  0x51   :  { %v7025_v31 = vor.u32 %v5825_v15, %v4248_v16  ;;  %v5390_v42 = vld [vmem:[%s9685_s1 + $0x5c0] sm:$0xf]  ;;  %v5199_v44 = vor.u32 %v6067_v41, %v5198_v40  ;;  %v6115_v45 = vld [vmem:[%s9685_s1 + $0x5c4] sm:$0xf0]  ;;  %v4310_v10 = vld [vmem:[%s9686_s0 + $0x130] sm:$0xf] }
  0x52   :  { %2947 = vmatpush.bf16.msra.mxu2 %v5327_v11  ;;  %9783 = vst [vmem:[#allocation12_spill] sm:$0xff] %v7022_v28  ;;  %v5262_v46 = vld [vmem:[%s9685_s1 + $0x4c0] sm:$0xf]  ;;  %v6083_v47 = vld [vmem:[%s9685_s1 + $0x4c4] sm:$0xf0]  ;;  %v5391_v49 = vor.u32 %v6115_v45, %v5390_v42 }
  0x53   :  { %2527 = vmatmul.bf16.gmra.mxu0 %v6707_v24  ;;  %9784 = vst [vmem:[#allocation13_spill] sm:$0xff] %v7025_v31  ;;  %v5263_v50 = vor.u32 %v6083_v47, %v5262_v46  ;;  %v5851_v11 = vld [vmem:[%s9686_s0 + $0x174] sm:$0xf0]  ;;  %v5842_v13 = vld [vmem:[%s9686_s0 + $0x134] sm:$0xf] }
  0x54   :  { %2571 = vmatmul.bf16.gmra.mxu1 %v6709_v25  ;;  %2859 = vmatpush.bf16.msra.mxu0 %v5199_v44  ;;  %v5318_v14 = vld [vmem:[%s9685_s1 + $0x530] sm:$0xf]  ;;  %v6097_v15 = vld [vmem:[%s9685_s1 + $0x534] sm:$0xf0]  ;;  %v4312_v41 = vld [vmem:[%s9686_s0 + $0x178] sm:$0xf0] }
  0x55   :  { %2615 = vmatmul.bf16.gmra.mxu2 %v6711_v26  ;;  %2991 = vmatpush.bf16.msra.mxu3 %v5391_v49  ;;  %v5190_v16 = vld [vmem:[%s9685_s1 + $0x430] sm:$0xf]  ;;  %v6113_v40 = vld [vmem:[%s9685_s1 + $0x5b4] sm:$0xf0]  ;;  %v5843_v46 = vld [vmem:[%s9686_s0 + $0x13c] sm:$0xf] }
  0x56   :  { %2659 = vmatmul.bf16.gmra.mxu3 %v6713_v27  ;;  %2903 = vmatpush.bf16.msra.mxu1 %v5263_v50  ;;  %v4318_v42 = vld [vmem:[%s9686_s0 + $0x138] sm:$0xf]  ;;  %v4320_v47 = vld [vmem:[%s9686_s0 + $0x180] sm:$0xf0]  ;;  %v7094_v50 = vor.u32 %v5851_v11, %v4310_v10  ;;  %v5254_v10 = vld [vmem:[%s9685_s1 + $0x4b0] sm:$0xf] }
  0x57   :  { %v6081_v11 = vld [vmem:[%s9685_s1 + $0x4b4] sm:$0xf0] }
  0x63   :  { %2532 = vmatmul.bf16.gmra.mxu0 %v6767_v55 }
  0x64   :  { %2576 = vmatmul.bf16.gmra.mxu1 %v6769_v56 }
  0x65   :  { %2620 = vmatmul.bf16.gmra.mxu2 %v6771_v58 }
  0x66   :  { %2664 = vmatmul.bf16.gmra.mxu3 %v6773_v59  ;;  %v5590_v59 = vld [vmem:[%s9685_s1 + $0x750] sm:$0xf] }
  0x73   :  { %2537 = vmatmul.bf16.gmra.mxu0 %v6827_v20 }
  0x74   :  { %2581 = vmatmul.bf16.gmra.mxu1 %v6829_v21 }
  0x75   :  { %2625 = vmatmul.bf16.gmra.mxu2 %v6831_v22 }
  0x76   :  { %2669 = vmatmul.bf16.gmra.mxu3 %v6833_v23 }
  0x83   :  { %2542 = vmatmul.bf16.gmra.mxu0 %v6887_v60 }
  0x84   :  { %2586 = vmatmul.bf16.gmra.mxu1 %v6889_v61 }
  0x85   :  { %2630 = vmatmul.bf16.gmra.mxu2 %v6891_v62 }
  0x86   :  { %2674 = vmatmul.bf16.gmra.mxu3 %v6893_v63 }
  0x93   :  { %2688 = vmatmul.bf16.vlgmr.msrb.gmra.mxu0 %v6947_v32 }
  0x94   :  { %2732 = vmatmul.bf16.vlgmr.msrb.gmra.mxu1 %v6949_v33 }
  0x95   :  { %2776 = vmatmul.bf16.vlgmr.msrb.gmra.mxu2 %v6951_v34 }
  0x96   :  { %2820 = vmatmul.bf16.vlgmr.msrb.gmra.mxu3 %v6953_v35 }
  0xa0   :  { %v2513_v18 = vpop.f32.mrf.mxu0 }
  0xa1   :  { %v2514_v29 = vadd.f32 %v2513_v18, %v6986_v5  ;;  %v2557_v30 = vpop.f32.mrf.mxu1  ;;  %v5319_v18 = vor.u32 %v6097_v15, %v5318_v14  ;;  %v7101_v15 = vor.u32 %v5843_v46, %v4320_v47  ;;  %v5860_v47 = vld [vmem:[%s9686_s0 + $0x1c4] sm:$0xf] }
  0xa3   :  { %v2558_v43 = vadd.f32 %v2557_v30, %v2514_v29  ;;  %2693 = vmatmul.bf16.gmra.mxu0 %v7018_v17  ;;  %v6065_v29 = vld [vmem:[%s9685_s1 + $0x434] sm:$0xf0]  ;;  %v5382_v30 = vld [vmem:[%s9685_s1 + $0x5b0] sm:$0xf]  ;;  %2948 = vmatpush.bf16.msra.mxu2 %v5319_v18  ;;  %9786 = vst [vmem:[#allocation15_spill] sm:$0xff] %v7101_v15 }
  0xa4   :  { %2737 = vmatmul.bf16.gmra.mxu1 %v7020_v19  ;;  %v5191_v44 = vor.u32 %v6065_v29, %v5190_v16  ;;  %v5383_v45 = vor.u32 %v6113_v40, %v5382_v30 }
  0xa5   :  { %2781 = vmatmul.bf16.gmra.mxu2 %v7022_v28 }
  0xa6   :  { %2825 = vmatmul.bf16.gmra.mxu3 %v7025_v31  ;;  %2860 = vmatpush.bf16.msra.mxu0 %v5191_v44  ;;  %v4382_v44 = vld [vmem:[%s9686_s0 + $0x1c0] sm:$0xf] }
  0xa7   :  { %2992 = vmatpush.bf16.msra.mxu3 %v5383_v45  ;;  %v5869_v45 = vld [vmem:[%s9686_s0 + $0x204] sm:$0xf0] }
  0xa8   :  { %v2601_v51 = vpop.f32.mrf.mxu2  ;;  %v2515_v6 = vpop.f32.mrf.mxu0 }
  0xa9   :  { %v2602_v52 = vadd.f32 %v2601_v51, %v2558_v43  ;;  %v2645_v4 = vpop.f32.mrf.mxu3  ;;  %v2516_v7 = vadd.f32 %v2515_v6, %v6986_v5  ;;  %v2559_v8 = vpop.f32.mrf.mxu1  ;;  %v5852_v43 = vld [vmem:[%s9686_s0 + $0x17c] sm:$0xf0]  ;;  %v7096_v6 = vor.u32 %v5842_v13, %v4312_v41  ;;  %v5255_v13 = vor.u32 %v6081_v11, %v5254_v10  ;;  %v6063_v10 = vld [vmem:[%s9685_s1 + $0x424] sm:$0xf0] }
  0xaa   :  { %v5374_v11 = vld [vmem:[%s9685_s1 + $0x5a0] sm:$0xf] }
  0xab   :  { %v7050_v9 = vadd.f32 %v2645_v4, %v2602_v52  ;;  %v2560_v12 = vadd.f32 %v2559_v8, %v2516_v7  ;;  %v7098_v7 = vor.u32 %v5852_v43, %v4318_v42  ;;  %2904 = vmatpush.bf16.msra.mxu1 %v5255_v13  ;;  %v5870_v13 = vld [vmem:[%s9686_s0 + $0x20c] sm:$0xf0] }
  0xad   :  { %9785 = vst [vmem:[#allocation14_spill] sm:$0xff] %v7098_v7 }
  0xb0   :  { %v2603_v49 = vpop.f32.mrf.mxu2  ;;  %v2518_v4 = vpop.f32.mrf.mxu0 }
  0xb1   :  { %v2604_v51 = vadd.f32 %v2603_v49, %v2560_v12  ;;  %v2647_v52 = vpop.f32.mrf.mxu3  ;;  %v2519_v8 = vadd.f32 %v2518_v4, %v6986_v5  ;;  %v2562_v14 = vpop.f32.mrf.mxu1  ;;  %v4384_v49 = vld [vmem:[%s9686_s0 + $0x208] sm:$0xf0]  ;;  %v6095_v4 = vld [vmem:[%s9685_s1 + $0x524] sm:$0xf0] }
  0xb3   :  { %v7103_v16 = vadd.f32 %v2647_v52, %v2604_v51  ;;  %v2563_v12 = vadd.f32 %v2562_v14, %v2519_v8  ;;  %2698 = vmatmul.bf16.gmra.mxu0 %v7094_v50  ;;  %v4390_v51 = vld [vmem:[%s9686_s0 + $0x1c8] sm:$0xf]  ;;  %v5310_v52 = vld [vmem:[%s9685_s1 + $0x520] sm:$0xf] }
  0xb4   :  { %2742 = vmatmul.bf16.gmra.mxu1 %v7096_v6  ;;  %v5182_v8 = vld [vmem:[%s9685_s1 + $0x420] sm:$0xf]  ;;  %v5311_v14 = vor.u32 %v6095_v4, %v5310_v52 }
  0xb5   :  { %2786 = vmatmul.bf16.gmra.mxu2 %v7098_v7  ;;  %v7170_v7 = vor.u32 %v5870_v13, %v4390_v51 }
  0xb6   :  { %2830 = vmatmul.bf16.gmra.mxu3 %v7101_v15  ;;  %2949 = vmatpush.bf16.msra.mxu2 %v5311_v14  ;;  %v7168_v15 = vor.u32 %v5860_v47, %v4384_v49 }
  0xb7   :  { %9789 = vst [vmem:[#allocation18_spill] sm:$0xff] %v7170_v7 }
  0xb8   :  { %v2606_v18 = vpop.f32.mrf.mxu2  ;;  %v2520_v40 = vpop.f32.mrf.mxu0  ;;  %9788 = vst [vmem:[#allocation17_spill] sm:$0xff] %v7168_v15 }
  0xb9   :  { %v2607_v29 = vadd.f32 %v2606_v18, %v2563_v12  ;;  %v2650_v30 = vpop.f32.mrf.mxu3  ;;  %v2521_v41 = vadd.f32 %v2520_v40, %v6986_v5  ;;  %v2564_v42 = vpop.f32.mrf.mxu1  ;;  %v6111_v12 = vld [vmem:[%s9685_s1 + $0x5a4] sm:$0xf0]  ;;  %v5183_v18 = vor.u32 %v6063_v10, %v5182_v8  ;;  %v7166_v8 = vor.u32 %v5869_v45, %v4382_v44 }
  0xba   :  { %v6079_v40 = vld [vmem:[%s9685_s1 + $0x4a4] sm:$0xf0] }
  0xbb   :  { %v7116_v43 = vadd.f32 %v2650_v30, %v2607_v29  ;;  %v2565_v46 = vadd.f32 %v2564_v42, %v2521_v41  ;;  %v5375_v29 = vor.u32 %v6111_v12, %v5374_v11  ;;  %v5246_v30 = vld [vmem:[%s9685_s1 + $0x4a0] sm:$0xf]  ;;  %v5861_v41 = vld [vmem:[%s9686_s0 + $0x1cc] sm:$0xf]  ;;  %v4392_v42 = vld [vmem:[%s9686_s0 + $0x210] sm:$0xf0]  ;;  %2861 = vmatpush.bf16.msra.mxu0 %v5183_v18 }
  0xbc   :  { %v5247_v52 = vor.u32 %v6079_v40, %v5246_v30  ;;  %9787 = vst [vmem:[#allocation16_spill] sm:$0xff] %v7166_v8  ;;  %v7173_v35 = vor.u32 %v5861_v41, %v4392_v42  ;;  %v5302_v18 = vld [vmem:[%s9685_s1 + $0x510] sm:$0xf]  ;;  %v5878_v41 = vld [vmem:[%s9686_s0 + $0x254] sm:$0xf] }
  0xbd   :  { %2993 = vmatpush.bf16.msra.mxu3 %v5375_v29  ;;  %v6093_v29 = vld [vmem:[%s9685_s1 + $0x514] sm:$0xf0] }
  0xbe   :  { %2905 = vmatpush.bf16.msra.mxu1 %v5247_v52  ;;  %9790 = vst [vmem:[#allocation19_spill] sm:$0xff] %v7173_v35  ;;  %v5303_v42 = vor.u32 %v6093_v29, %v5302_v18  ;;  %v5174_v52 = vld [vmem:[%s9685_s1 + $0x410] sm:$0xf]  ;;  %v5879_v18 = vld [vmem:[%s9686_s0 + $0x25c] sm:$0xf] }
  0xbf   :  { %v4464_v29 = vld [vmem:[%s9686_s0 + $0x2a0] sm:$0xf0] }
  0xc0   :  { %v2608_v4 = vpop.f32.mrf.mxu2  ;;  %v2523_v12 = vpop.f32.mrf.mxu0  ;;  %2950 = vmatpush.bf16.msra.mxu2 %v5303_v42 }
  0xc1   :  { %v2609_v10 = vadd.f32 %v2608_v4, %v2565_v46  ;;  %v2652_v11 = vpop.f32.mrf.mxu3  ;;  %v2524_v31 = vadd.f32 %v2523_v12, %v6986_v5  ;;  %v2567_v28 = vpop.f32.mrf.mxu1  ;;  %v6061_v4 = vld [vmem:[%s9685_s1 + $0x414] sm:$0xf0] }
  0xc2   :  { %v6109_v12 = vld [vmem:[%s9685_s1 + $0x594] sm:$0xf0] }
  0xc3   :  { %v7175_v14 = vadd.f32 %v2652_v11, %v2609_v10  ;;  %v2568_v30 = vadd.f32 %v2567_v28, %v2524_v31  ;;  %2703 = vmatmul.bf16.gmra.mxu0 %v7166_v8  ;;  %v4454_v28 = vld [vmem:[%s9686_s0 + $0x250] sm:$0xf]  ;;  %v5887_v31 = vld [vmem:[%s9686_s0 + $0x294] sm:$0xf0]  ;;  %v5175_v11 = vor.u32 %v6061_v4, %v5174_v52 }
  0xc4   :  { %2747 = vmatmul.bf16.gmra.mxu1 %v7168_v15  ;;  %v5366_v10 = vld [vmem:[%s9685_s1 + $0x590] sm:$0xf]  ;;  %v7232_v4 = vor.u32 %v5887_v31, %v4454_v28  ;;  %v5294_v28 = vld [vmem:[%s9685_s1 + $0x500] sm:$0xf] }
  0xc5   :  { %2791 = vmatmul.bf16.gmra.mxu2 %v7170_v7  ;;  %2862 = vmatpush.bf16.msra.mxu0 %v5175_v11 }
  0xc6   :  { %2835 = vmatmul.bf16.gmra.mxu3 %v7173_v35  ;;  %9791 = vst [vmem:[#allocation20_spill] sm:$0xff] %v7232_v4 }
  0xc8   :  { %v2611_v44 = vpop.f32.mrf.mxu2  ;;  %v2525_v47 = vpop.f32.mrf.mxu0 }
  0xc9   :  { %v2612_v45 = vadd.f32 %v2611_v44, %v2568_v30  ;;  %v2655_v46 = vpop.f32.mrf.mxu3  ;;  %v2526_v49 = vadd.f32 %v2525_v47, %v6986_v5  ;;  %v2569_v51 = vpop.f32.mrf.mxu1  ;;  %v5238_v30 = vld [vmem:[%s9685_s1 + $0x490] sm:$0xf]  ;;  %v6077_v44 = vld [vmem:[%s9685_s1 + $0x494] sm:$0xf0]  ;;  %v5888_v47 = vld [vmem:[%s9686_s0 + $0x29c] sm:$0xf0] }
  0xcb   :  { %v7182_v13 = vadd.f32 %v2655_v46, %v2612_v45  ;;  %v2570_v40 = vadd.f32 %v2569_v51, %v2526_v49  ;;  %v4456_v45 = vld [vmem:[%s9686_s0 + $0x298] sm:$0xf0]  ;;  %v4462_v46 = vld [vmem:[%s9686_s0 + $0x258] sm:$0xf]  ;;  %v5367_v49 = vor.u32 %v6109_v12, %v5366_v10  ;;  %v5239_v51 = vor.u32 %v6077_v44, %v5238_v30 }
  0xcc   :  { %v7234_v42 = vor.u32 %v5878_v41, %v4456_v45  ;;  %v7236_v10 = vor.u32 %v5888_v47, %v4462_v46  ;;  %v7239_v44 = vor.u32 %v5879_v18, %v4464_v29  ;;  %v5358_v18 = vld [vmem:[%s9685_s1 + $0x580] sm:$0xf] }
  0xcd   :  { %2994 = vmatpush.bf16.msra.mxu3 %v5367_v49  ;;  %2906 = vmatpush.bf16.msra.mxu1 %v5239_v51  ;;  %v5166_v49 = vld [vmem:[%s9685_s1 + $0x400] sm:$0xf]  ;;  %v6059_v51 = vld [vmem:[%s9685_s1 + $0x404] sm:$0xf0] }
  0xce   :  { %9792 = vst [vmem:[#allocation21_spill] sm:$0xff] %v7234_v42 }
  0xcf   :  { %9793 = vst [vmem:[#allocation22_spill] sm:$0xff] %v7236_v10 }
  0xd0   :  { %v2613_v52 = vpop.f32.mrf.mxu2  ;;  %v2528_v34 = vpop.f32.mrf.mxu0  ;;  %9794 = vst [vmem:[#allocation23_spill] sm:$0xff] %v7239_v44 }
  0xd1   :  { %v2614_v35 = vadd.f32 %v2613_v52, %v2570_v40  ;;  %v2657_v7 = vpop.f32.mrf.mxu3  ;;  %v2529_v12 = vadd.f32 %v2528_v34, %v6986_v5  ;;  %v2572_v30 = vpop.f32.mrf.mxu1  ;;  %v6091_v34 = vld [vmem:[%s9685_s1 + $0x504] sm:$0xf0]  ;;  %v5167_v52 = vor.u32 %v6059_v51, %v5166_v49  ;;  %v4536_v49 = vld [vmem:[%s9686_s0 + $0x330] sm:$0xf0] }
  0xd2   :  { %v5295_v31 = vor.u32 %v6091_v34, %v5294_v28  ;;  %v4526_v28 = vld [vmem:[%s9686_s0 + $0x2e0] sm:$0xf]  ;;  %v5905_v34 = vld [vmem:[%s9686_s0 + $0x324] sm:$0xf0] }
  0xd3   :  { %v7241_v63 = vadd.f32 %v2657_v7, %v2614_v35  ;;  %v2573_v11 = vadd.f32 %v2572_v30, %v2529_v12  ;;  %2708 = vmatmul.bf16.gmra.mxu0 %v7232_v4  ;;  %v6107_v12 = vld [vmem:[%s9685_s1 + $0x584] sm:$0xf0]  ;;  %v5230_v30 = vld [vmem:[%s9685_s1 + $0x480] sm:$0xf] }
  0xd4   :  { %2752 = vmatmul.bf16.gmra.mxu1 %v7234_v42  ;;  %2951 = vmatpush.bf16.msra.mxu2 %v5295_v31  ;;  %v5896_v31 = vld [vmem:[%s9686_s0 + $0x2e4] sm:$0xf] }
  0xd5   :  { %2796 = vmatmul.bf16.gmra.mxu2 %v7236_v10  ;;  %2863 = vmatpush.bf16.msra.mxu0 %v5167_v52 }
  0xd6   :  { %2840 = vmatmul.bf16.gmra.mxu3 %v7239_v44 }
  0xd8   :  { %v2616_v35 = vpop.f32.mrf.mxu2  ;;  %v2530_v41 = vpop.f32.mrf.mxu0 }
  0xd9   :  { %v2617_v7 = vadd.f32 %v2616_v35, %v2573_v11  ;;  %v2660_v40 = vpop.f32.mrf.mxu3  ;;  %v2531_v45 = vadd.f32 %v2530_v41, %v6986_v5  ;;  %v2574_v46 = vpop.f32.mrf.mxu1  ;;  %v6075_v11 = vld [vmem:[%s9685_s1 + $0x484] sm:$0xf0]  ;;  %v5359_v35 = vor.u32 %v6107_v12, %v5358_v18  ;;  %v7298_v18 = vor.u32 %v5905_v34, %v4526_v28  ;;  %v6169_v28 = vld [vmem:[%s9685_s1 + $0x774] sm:$0xf0] }
  0xda   :  { %v4534_v41 = vld [vmem:[%s9686_s0 + $0x2e8] sm:$0xf] }
  0xdb   :  { %v7254_v47 = vadd.f32 %v2660_v40, %v2617_v7  ;;  %v2575_v29 = vadd.f32 %v2574_v46, %v2531_v45  ;;  %v5231_v7 = vor.u32 %v6075_v11, %v5230_v30  ;;  %v4528_v40 = vld [vmem:[%s9686_s0 + $0x328] sm:$0xf0]  ;;  %v5906_v45 = vld [vmem:[%s9686_s0 + $0x32c] sm:$0xf0]  ;;  %2995 = vmatpush.bf16.msra.mxu3 %v5359_v35  ;;  %9795 = vst [vmem:[#allocation24_spill] sm:$0xff] %v7298_v18 }
  0xdc   :  { %v5897_v46 = vld [vmem:[%s9686_s0 + $0x2ec] sm:$0xf]  ;;  %v7300_v44 = vor.u32 %v5896_v31, %v4528_v40  ;;  %v7302_v10 = vor.u32 %v5906_v45, %v4534_v41  ;;  %v6137_v31 = vld [vmem:[%s9685_s1 + $0x674] sm:$0xf0]  ;;  %v5670_v35 = vld [vmem:[%s9685_s1 + $0x7f0] sm:$0xf] }
  0xdd   :  { %2907 = vmatpush.bf16.msra.mxu1 %v5231_v7  ;;  %v7305_v23 = vor.u32 %v5897_v46, %v4536_v49  ;;  %v6185_v7 = vld [vmem:[%s9685_s1 + $0x7f4] sm:$0xf0] }
  0xde   :  { %9796 = vst [vmem:[#allocation25_spill] sm:$0xff] %v7300_v44  ;;  %v5671_v45 = vor.u32 %v6185_v7, %v5670_v35  ;;  %v4600_v35 = vld [vmem:[%s9686_s0 + $0x3b8] sm:$0xf0]  ;;  %v4606_v7 = vld [vmem:[%s9686_s0 + $0x378] sm:$0xf] }
  0xdf   :  { %9797 = vst [vmem:[#allocation26_spill] sm:$0xff] %v7302_v10 }
  0xe0   :  { %v2618_v51 = vpop.f32.mrf.mxu2  ;;  %v2533_v11 = vpop.f32.mrf.mxu0  ;;  %9798 = vst [vmem:[#allocation27_spill] sm:$0xff] %v7305_v23  ;;  %3164 = vmatpush.bf16.msrb.mxu3 %v5671_v45  ;;  %v4608_v45 = vld [vmem:[%s9686_s0 + $0x3c0] sm:$0xf0] }
  0xe1   :  { %v2619_v12 = vadd.f32 %v2618_v51, %v2575_v29  ;;  %v2662_v30 = vpop.f32.mrf.mxu3  ;;  %v2534_v52 = vadd.f32 %v2533_v11, %v6986_v5  ;;  %v2577_v62 = vpop.f32.mrf.mxu1  ;;  %v5606_v29 = vld [vmem:[%s9685_s1 + $0x770] sm:$0xf] }
  0xe2   :  { %v5607_v34 = vor.u32 %v6169_v28, %v5606_v29  ;;  %v6153_v29 = vld [vmem:[%s9685_s1 + $0x6f4] sm:$0xf0] }
  0xe3   :  { %v7307_v22 = vadd.f32 %v2662_v30, %v2619_v12  ;;  %v2578_v42 = vadd.f32 %v2577_v62, %v2534_v52  ;;  %2713 = vmatmul.bf16.gmra.mxu0 %v7298_v18  ;;  %v5478_v62 = vld [vmem:[%s9685_s1 + $0x670] sm:$0xf] }
  0xe4   :  { %2757 = vmatmul.bf16.gmra.mxu1 %v7300_v44  ;;  %v5479_v41 = vor.u32 %v6137_v31, %v5478_v62  ;;  %3120 = vmatpush.bf16.msrb.mxu2 %v5607_v34  ;;  %v5542_v52 = vld [vmem:[%s9685_s1 + $0x6f0] sm:$0xf]  ;;  %v5923_v34 = vld [vmem:[%s9686_s0 + $0x3b4] sm:$0xf0]  ;;  %v5914_v31 = vld [vmem:[%s9686_s0 + $0x374] sm:$0xf] }
  0xe5   :  { %2801 = vmatmul.bf16.gmra.mxu2 %v7302_v10  ;;  %v4598_v62 = vld [vmem:[%s9686_s0 + $0x370] sm:$0xf] }
  0xe6   :  { %2845 = vmatmul.bf16.gmra.mxu3 %v7305_v23  ;;  %3032 = vmatpush.bf16.msrb.mxu0 %v5479_v41  ;;  %v5915_v41 = vld [vmem:[%s9686_s0 + $0x37c] sm:$0xf] }
  0xe7   :  { %v7371_v10 = vor.u32 %v5915_v41, %v4608_v45  ;;  %v5534_v41 = vld [vmem:[%s9685_s1 + $0x6e0] sm:$0xf] }
  0xe8   :  { %v2621_v40 = vpop.f32.mrf.mxu2  ;;  %v2535_v51 = vpop.f32.mrf.mxu0 }
  0xe9   :  { %v2622_v46 = vadd.f32 %v2621_v40, %v2578_v42  ;;  %v2665_v49 = vpop.f32.mrf.mxu3  ;;  %v2536_v12 = vadd.f32 %v2535_v51, %v6986_v5  ;;  %v2579_v30 = vpop.f32.mrf.mxu1  ;;  %v5543_v42 = vor.u32 %v6153_v29, %v5542_v52  ;;  %v5924_v40 = vld [vmem:[%s9686_s0 + $0x3bc] sm:$0xf0]  ;;  %v7366_v52 = vor.u32 %v5914_v31, %v4600_v35  ;;  %9802 = vst [vmem:[#allocation31_spill] sm:$0xff] %v7371_v10  ;;  %v6135_v31 = vld [vmem:[%s9685_s1 + $0x664] sm:$0xf0] }
  0xea   :  { %v7368_v29 = vor.u32 %v5924_v40, %v4606_v7  ;;  %v5662_v7 = vld [vmem:[%s9685_s1 + $0x7e0] sm:$0xf]  ;;  %v6183_v40 = vld [vmem:[%s9685_s1 + $0x7e4] sm:$0xf0] }
  0xeb   :  { %v7332_v11 = vadd.f32 %v2665_v49, %v2622_v46  ;;  %v2580_v28 = vadd.f32 %v2579_v30, %v2536_v12  ;;  %3076 = vmatpush.bf16.msrb.mxu1 %v5543_v42  ;;  %v7364_v49 = vor.u32 %v5923_v34, %v4598_v62  ;;  %9800 = vst [vmem:[#allocation29_spill] sm:$0xff] %v7366_v52  ;;  %v6167_v62 = vld [vmem:[%s9685_s1 + $0x764] sm:$0xf0] }
  0xec   :  { %9801 = vst [vmem:[#allocation30_spill] sm:$0xff] %v7368_v29 }
  0xed   :  { %9799 = vst [vmem:[#allocation28_spill] sm:$0xff] %v7364_v49 }
  0xf0   :  { %v2623_v46 = vpop.f32.mrf.mxu2  ;;  %v2538_v30 = vpop.f32.mrf.mxu0 }
  0xf1   :  { %v2624_v51 = vadd.f32 %v2623_v46, %v2580_v28  ;;  %v2667_v12 = vpop.f32.mrf.mxu3  ;;  %v2539_v42 = vadd.f32 %v2538_v30, %v6986_v5  ;;  %v2582_v23 = vpop.f32.mrf.mxu1  ;;  %v5598_v28 = vld [vmem:[%s9685_s1 + $0x760] sm:$0xf]  ;;  %v5663_v46 = vor.u32 %v6183_v40, %v5662_v7  ;;  %v4184_v40 = vld [vmem:[%s9686_s0 + $0x68] sm:$0xf0] }
  0xf2   :  { %v5599_v34 = vor.u32 %v6167_v62, %v5598_v28  ;;  %v4182_v7 = vld [vmem:[%s9686_s0 + $0x20] sm:$0xf] }
  0xf3   :  { %v7373_v44 = vadd.f32 %v2667_v12, %v2624_v51  ;;  %v2583_v18 = vadd.f32 %v2582_v23, %v2539_v42  ;;  %2718 = vmatmul.bf16.gmra.mxu0 %v7364_v49  ;;  %v5470_v23 = vld [vmem:[%s9685_s1 + $0x660] sm:$0xf]  ;;  %v6151_v51 = vld [vmem:[%s9685_s1 + $0x6e4] sm:$0xf0]  ;;  %3165 = vmatpush.bf16.msrb.mxu3 %v5663_v46  ;;  %v5809_v46 = vld [vmem:[%s9686_s0 + $0x2c] sm:$0xf] }
  0xf4   :  { %2762 = vmatmul.bf16.gmra.mxu1 %v7366_v52  ;;  %3121 = vmatpush.bf16.msrb.mxu2 %v5599_v34  ;;  %v5471_v35 = vor.u32 %v6135_v31, %v5470_v23  ;;  %v5535_v28 = vor.u32 %v6151_v51, %v5534_v41  ;;  %v4190_v41 = vld [vmem:[%s9686_s0 + $0x28] sm:$0xf]  ;;  %v4192_v51 = vld [vmem:[%s9686_s0 + $0x70] sm:$0xf0] }
  0xf5   :  { %2806 = vmatmul.bf16.gmra.mxu2 %v7368_v29  ;;  %v7437_v49 = vor.u32 %v5809_v46, %v4192_v51  ;;  %v6149_v51 = vld [vmem:[%s9685_s1 + $0x6d4] sm:$0xf0] }
  0xf6   :  { %2850 = vmatmul.bf16.gmra.mxu3 %v7371_v10  ;;  %3033 = vmatpush.bf16.msrb.mxu0 %v5471_v35  ;;  %v5808_v35 = vld [vmem:[%s9686_s0 + $0x24] sm:$0xf] }
  0xf7   :  { %3077 = vmatpush.bf16.msrb.mxu1 %v5535_v28  ;;  %9806 = vst [vmem:[#allocation35_spill] sm:$0xff] %v7437_v49 }
  0xf8   :  { %v2626_v45 = vpop.f32.mrf.mxu2  ;;  %v2540_v42 = vpop.f32.mrf.mxu0 }
  0xf9   :  { %v2627_v12 = vadd.f32 %v2626_v45, %v2583_v18  ;;  %v2670_v30 = vpop.f32.mrf.mxu3  ;;  %v2541_v62 = vadd.f32 %v2540_v42, %v6986_v5  ;;  %v2584_v34 = vpop.f32.mrf.mxu1  ;;  %v5817_v18 = vld [vmem:[%s9686_s0 + $0x64] sm:$0xf0]  ;;  %v5818_v45 = vld [vmem:[%s9686_s0 + $0x6c] sm:$0xf0] }
  0xfa   :  { %v7434_v10 = vor.u32 %v5818_v45, %v4190_v41  ;;  %v5654_v41 = vld [vmem:[%s9685_s1 + $0x7d0] sm:$0xf] }
  0xfb   :  { %v7404_v23 = vadd.f32 %v2670_v30, %v2627_v12  ;;  %v2585_v31 = vadd.f32 %v2584_v34, %v2541_v62  ;;  %v7430_v30 = vor.u32 %v5817_v18, %v4182_v7  ;;  %v7432_v34 = vor.u32 %v5808_v35, %v4184_v40  ;;  %v5462_v35 = vld [vmem:[%s9685_s1 + $0x650] sm:$0xf]  ;;  %v6133_v40 = vld [vmem:[%s9685_s1 + $0x654] sm:$0xf0] }
  0xfc   :  { %9805 = vst [vmem:[#allocation34_spill] sm:$0xff] %v7434_v10  ;;  %v5526_v45 = vld [vmem:[%s9685_s1 + $0x6d0] sm:$0xf] }
  0xfd   :  { %9803 = vst [vmem:[#allocation32_spill] sm:$0xff] %v7430_v30 }
  0xfe   :  { %9804 = vst [vmem:[#allocation33_spill] sm:$0xff] %v7432_v34 }
 0x100   :  { %v2628_v12 = vpop.f32.mrf.mxu2  ;;  %v2543_v62 = vpop.f32.mrf.mxu0 }
 0x101   :  { %v2629_v42 = vadd.f32 %v2628_v12, %v2585_v31  ;;  %v2672_v28 = vpop.f32.mrf.mxu3  ;;  %v2544_v29 = vadd.f32 %v2543_v62, %v6986_v5  ;;  %v2587_v52 = vpop.f32.mrf.mxu1  ;;  %v6165_v31 = vld [vmem:[%s9685_s1 + $0x754] sm:$0xf0]  ;;  %v5527_v62 = vor.u32 %v6149_v51, %v5526_v45  ;;  %v4256_v45 = vld [vmem:[%s9686_s0 + $0xf8] sm:$0xf0]  ;;  %v5836_v51 = vld [vmem:[%s9686_s0 + $0xfc] sm:$0xf0] }
 0x102   :  { %v5591_v18 = vor.u32 %v6165_v31, %v5590_v59  ;;  %v6181_v59 = vld [vmem:[%s9685_s1 + $0x7d4] sm:$0xf0] }
 0x103   :  { %v7439_v4 = vadd.f32 %v2672_v28, %v2629_v42  ;;  %v2588_v7 = vadd.f32 %v2587_v52, %v2544_v29  ;;  %2864 = vmatmul.bf16.vlgmr.msra.gmra.mxu0 %v7430_v30  ;;  %v5463_v52 = vor.u32 %v6133_v40, %v5462_v35  ;;  %v5655_v29 = vor.u32 %v6181_v59, %v5654_v41  ;;  %v5582_v41 = vld [vmem:[%s9685_s1 + $0x740] sm:$0xf]  ;;  %v5826_v59 = vld [vmem:[%s9686_s0 + $0xb4] sm:$0xf] }
 0x104   :  { %2908 = vmatmul.bf16.vlgmr.msra.gmra.mxu1 %v7432_v34  ;;  %3122 = vmatpush.bf16.msrb.mxu2 %v5591_v18 }
 0x105   :  { %2952 = vmatmul.bf16.vlgmr.msra.gmra.mxu2 %v7434_v10  ;;  %3034 = vmatpush.bf16.msrb.mxu0 %v5463_v52  ;;  %v6163_v52 = vld [vmem:[%s9685_s1 + $0x744] sm:$0xf0] }
 0x106   :  { %2996 = vmatmul.bf16.vlgmr.msra.gmra.mxu3 %v7437_v49  ;;  %3078 = vmatpush.bf16.msrb.mxu1 %v5527_v62 }
 0x107   :  { %3166 = vmatpush.bf16.msrb.mxu3 %v5655_v29  ;;  %v5583_v29 = vor.u32 %v6163_v52, %v5582_v41  ;;  %v7504_v52 = vor.u32 %v5826_v59, %v4256_v45  ;;  %v6179_v59 = vld [vmem:[%s9685_s1 + $0x7c4] sm:$0xf0]  ;;  %v5518_v45 = vld [vmem:[%s9685_s1 + $0x6c0] sm:$0xf] }
 0x108   :  { %v2631_v46 = vpop.f32.mrf.mxu2  ;;  %v2545_v28 = vpop.f32.mrf.mxu0 }
 0x109   :  { %v2632_v12 = vadd.f32 %v2631_v46, %v2588_v7  ;;  %v2675_v42 = vpop.f32.mrf.mxu3  ;;  %v2546_v31 = vadd.f32 %v2545_v28, %v6986_v5  ;;  %v2589_v35 = vpop.f32.mrf.mxu1  ;;  %v4254_v7 = vld [vmem:[%s9686_s0 + $0xb0] sm:$0xf]  ;;  %v5835_v5 = vld [vmem:[%s9686_s0 + $0xf4] sm:$0xf0]  ;;  %3123 = vmatpush.bf16.msrb.mxu2 %v5583_v29  ;;  %9808 = vst [vmem:[#allocation37_spill] sm:$0xff] %v7504_v52 }
 0x10a   :  { %v4262_v46 = vld [vmem:[%s9686_s0 + $0xb8] sm:$0xf]  ;;  %v7502_v62 = vor.u32 %v5835_v5, %v4254_v7  ;;  %v5454_v29 = vld [vmem:[%s9685_s1 + $0x640] sm:$0xf] }
 0x10b   :  { %v7470_v18 = vadd.f32 %v2675_v42, %v2632_v12  ;;  %v2590_v40 = vadd.f32 %v2589_v35, %v2546_v31  ;;  %v5827_v12 = vld [vmem:[%s9686_s0 + $0xbc] sm:$0xf]  ;;  %v4264_v42 = vld [vmem:[%s9686_s0 + $0x100] sm:$0xf0]  ;;  %v7506_v49 = vor.u32 %v5836_v51, %v4262_v46  ;;  %v5646_v7 = vld [vmem:[%s9685_s1 + $0x7c0] sm:$0xf] }
 0x10c   :  { %9807 = vst [vmem:[#allocation36_spill] sm:$0xff] %v7502_v62  ;;  %v7509_v30 = vor.u32 %v5827_v12, %v4264_v42  ;;  %v6147_v46 = vld [vmem:[%s9685_s1 + $0x6c4] sm:$0xf0] }
 0x10d   :  { %9809 = vst [vmem:[#allocation38_spill] sm:$0xff] %v7506_v49 }
 0x10e   :  { %9810 = vst [vmem:[#allocation39_spill] sm:$0xff] %v7509_v30 }
 0x110   :  { %v2633_v28 = vpop.f32.mrf.mxu2  ;;  %v2689_v41 = vpop.f32.mrf.mxu0 }
 0x111   :  { %v2634_v31 = vadd.f32 %v2633_v28, %v2590_v40  ;;  %v2677_v35 = vpop.f32.mrf.mxu3  ;;  %v2690_v10 = vadd.f32 %v2689_v41, %v7050_v9  ;;  %v2733_v34 = vpop.f32.mrf.mxu1  ;;  %v6131_v40 = vld [vmem:[%s9685_s1 + $0x644] sm:$0xf0] }
 0x112   :  { %v5455_v9 = vor.u32 %v6131_v40, %v5454_v29  ;;  %v4326_v29 = vld [vmem:[%s9686_s0 + $0x140] sm:$0xf]  ;;  %v5853_v40 = vld [vmem:[%s9686_s0 + $0x184] sm:$0xf0] }
 0x113   :  { %v7511_v58 = vadd.f32 %v2677_v35, %v2634_v31  ;;  %v2734_v5 = vadd.f32 %v2733_v34, %v2690_v10  ;;  %2869 = vmatmul.bf16.gmra.mxu0 %v7502_v62  ;;  %v5647_v10 = vor.u32 %v6179_v59, %v5646_v7  ;;  %v5519_v34 = vor.u32 %v6147_v46, %v5518_v45  ;;  %v5446_v59 = vld [vmem:[%s9685_s1 + $0x630] sm:$0xf]  ;;  %v6129_v46 = vld [vmem:[%s9685_s1 + $0x634] sm:$0xf0] }
 0x114   :  { %2913 = vmatmul.bf16.gmra.mxu1 %v7504_v52  ;;  %3035 = vmatpush.bf16.msrb.mxu0 %v5455_v9  ;;  %v6161_v9 = vld [vmem:[%s9685_s1 + $0x734] sm:$0xf0] }
 0x115   :  { %2957 = vmatmul.bf16.gmra.mxu2 %v7506_v49  ;;  %3167 = vmatpush.bf16.msrb.mxu3 %v5647_v10  ;;  %v5638_v10 = vld [vmem:[%s9685_s1 + $0x7b0] sm:$0xf] }
 0x116   :  { %3001 = vmatmul.bf16.gmra.mxu3 %v7509_v30  ;;  %3079 = vmatpush.bf16.msrb.mxu1 %v5519_v34  ;;  %v6177_v34 = vld [vmem:[%s9685_s1 + $0x7b4] sm:$0xf0]  ;;  %v7580_v30 = vor.u32 %v5853_v40, %v4326_v29  ;;  %v5510_v29 = vld [vmem:[%s9685_s1 + $0x6b0] sm:$0xf] }
 0x117   :  { %v6145_v40 = vld [vmem:[%s9685_s1 + $0x6b4] sm:$0xf0] }
 0x118   :  { %v2777_v51 = vpop.f32.mrf.mxu2  ;;  %v2691_v28 = vpop.f32.mrf.mxu0  ;;  %9811 = vst [vmem:[#allocation40_spill] sm:$0xff] %v7580_v30 }
 0x119   :  { %v2778_v12 = vadd.f32 %v2777_v51, %v2734_v5  ;;  %v2821_v42 = vpop.f32.mrf.mxu3  ;;  %v2692_v31 = vadd.f32 %v2691_v28, %v7103_v16  ;;  %v2735_v35 = vpop.f32.mrf.mxu1  ;;  %v5844_v5 = vld [vmem:[%s9686_s0 + $0x144] sm:$0xf]  ;;  %v5574_v16 = vld [vmem:[%s9685_s1 + $0x730] sm:$0xf]  ;;  %v4328_v51 = vld [vmem:[%s9686_s0 + $0x188] sm:$0xf0]  ;;  %v5447_v28 = vor.u32 %v6129_v46, %v5446_v59 }
 0x11a   :  { %v5575_v45 = vor.u32 %v6161_v9, %v5574_v16  ;;  %v4336_v16 = vld [vmem:[%s9686_s0 + $0x190] sm:$0xf0]  ;;  %v7582_v15 = vor.u32 %v5844_v5, %v4328_v51  ;;  %v5511_v5 = vor.u32 %v6145_v40, %v5510_v29  ;;  %v6127_v40 = vld [vmem:[%s9685_s1 + $0x624] sm:$0xf0] }
 0x11b   :  { %v7536_v41 = vadd.f32 %v2821_v42, %v2778_v12  ;;  %v2736_v7 = vadd.f32 %v2735_v35, %v2692_v31  ;;  %v4334_v12 = vld [vmem:[%s9686_s0 + $0x148] sm:$0xf]  ;;  %v5854_v42 = vld [vmem:[%s9686_s0 + $0x18c] sm:$0xf0]  ;;  %v5639_v31 = vor.u32 %v6177_v34, %v5638_v10  ;;  %v5845_v35 = vld [vmem:[%s9686_s0 + $0x14c] sm:$0xf]  ;;  %3036 = vmatpush.bf16.msrb.mxu0 %v5447_v28 }
 0x11c   :  { %3124 = vmatpush.bf16.msrb.mxu2 %v5575_v45  ;;  %9812 = vst [vmem:[#allocation41_spill] sm:$0xff] %v7582_v15  ;;  %v7584_v59 = vor.u32 %v5854_v42, %v4334_v12  ;;  %v7587_v34 = vor.u32 %v5845_v35, %v4336_v16  ;;  %3080 = vmatpush.bf16.msrb.mxu1 %v5511_v5  ;;  %v4398_v42 = vld [vmem:[%s9686_s0 + $0x1d0] sm:$0xf]  ;;  %v5871_v28 = vld [vmem:[%s9686_s0 + $0x214] sm:$0xf0] }
 0x11d   :  { %3168 = vmatpush.bf16.msrb.mxu3 %v5639_v31  ;;  %v5862_v35 = vld [vmem:[%s9686_s0 + $0x1d4] sm:$0xf]  ;;  %v4406_v16 = vld [vmem:[%s9686_s0 + $0x1d8] sm:$0xf]  ;;  %v6175_v5 = vld [vmem:[%s9685_s1 + $0x7a4] sm:$0xf0] }
 0x11e   :  { %9813 = vst [vmem:[#allocation42_spill] sm:$0xff] %v7584_v59 }
 0x11f   :  { %9814 = vst [vmem:[#allocation43_spill] sm:$0xff] %v7587_v34 }
 0x120   :  { %v2779_v9 = vpop.f32.mrf.mxu2  ;;  %v2694_v62 = vpop.f32.mrf.mxu0 }
 0x121   :  { %v2780_v49 = vadd.f32 %v2779_v9, %v2736_v7  ;;  %v2823_v52 = vpop.f32.mrf.mxu3  ;;  %v2695_v46 = vadd.f32 %v2694_v62, %v7116_v43  ;;  %v2738_v10 = vpop.f32.mrf.mxu1  ;;  %v5566_v9 = vld [vmem:[%s9685_s1 + $0x720] sm:$0xf] }
 0x123   :  { %v7589_v8 = vadd.f32 %v2823_v52, %v2780_v49  ;;  %v2739_v7 = vadd.f32 %v2738_v10, %v2695_v46  ;;  %2874 = vmatmul.bf16.gmra.mxu0 %v7580_v30  ;;  %v6159_v46 = vld [vmem:[%s9685_s1 + $0x724] sm:$0xf0]  ;;  %v5438_v10 = vld [vmem:[%s9685_s1 + $0x620] sm:$0xf] }
 0x124   :  { %2918 = vmatmul.bf16.gmra.mxu1 %v7582_v15  ;;  %v5567_v29 = vor.u32 %v6159_v46, %v5566_v9  ;;  %v4408_v9 = vld [vmem:[%s9686_s0 + $0x220] sm:$0xf0] }
 0x125   :  { %2962 = vmatmul.bf16.gmra.mxu2 %v7584_v59 }
 0x126   :  { %3006 = vmatmul.bf16.gmra.mxu3 %v7587_v34  ;;  %3125 = vmatpush.bf16.msrb.mxu2 %v5567_v29 }
 0x128   :  { %v2782_v43 = vpop.f32.mrf.mxu2  ;;  %v2696_v52 = vpop.f32.mrf.mxu0 }
 0x129   :  { %v2783_v49 = vadd.f32 %v2782_v43, %v2739_v7  ;;  %v2826_v62 = vpop.f32.mrf.mxu3  ;;  %v2697_v45 = vadd.f32 %v2696_v52, %v7175_v14  ;;  %v2740_v51 = vpop.f32.mrf.mxu1  ;;  %v4400_v14 = vld [vmem:[%s9686_s0 + $0x218] sm:$0xf0]  ;;  %v5630_v7 = vld [vmem:[%s9685_s1 + $0x7a0] sm:$0xf] }
 0x12a   :  { %v5872_v43 = vld [vmem:[%s9686_s0 + $0x21c] sm:$0xf0]  ;;  %v7654_v59 = vor.u32 %v5862_v35, %v4400_v14 }
 0x12b   :  { %v7602_v12 = vadd.f32 %v2826_v62, %v2783_v49  ;;  %v2741_v31 = vadd.f32 %v2740_v51, %v2697_v45  ;;  %v5439_v49 = vor.u32 %v6127_v40, %v5438_v10  ;;  %v5631_v62 = vor.u32 %v6175_v5, %v5630_v7  ;;  %v5502_v52 = vld [vmem:[%s9685_s1 + $0x6a0] sm:$0xf]  ;;  %v6143_v45 = vld [vmem:[%s9685_s1 + $0x6a4] sm:$0xf0]  ;;  %v5863_v51 = vld [vmem:[%s9686_s0 + $0x1dc] sm:$0xf] }
 0x12c   :  { %v5503_v46 = vor.u32 %v6143_v45, %v5502_v52  ;;  %v7652_v40 = vor.u32 %v5871_v28, %v4398_v42  ;;  %9816 = vst [vmem:[#allocation45_spill] sm:$0xff] %v7654_v59  ;;  %v7656_v15 = vor.u32 %v5872_v43, %v4406_v16  ;;  %v7659_v26 = vor.u32 %v5863_v51, %v4408_v9  ;;  %v5558_v16 = vld [vmem:[%s9685_s1 + $0x710] sm:$0xf]  ;;  %v6157_v43 = vld [vmem:[%s9685_s1 + $0x714] sm:$0xf0] }
 0x12d   :  { %3037 = vmatpush.bf16.msrb.mxu0 %v5439_v49  ;;  %3169 = vmatpush.bf16.msrb.mxu3 %v5631_v62  ;;  %v5880_v49 = vld [vmem:[%s9686_s0 + $0x264] sm:$0xf]  ;;  %v5559_v62 = vor.u32 %v6157_v43, %v5558_v16  ;;  %v5430_v45 = vld [vmem:[%s9685_s1 + $0x610] sm:$0xf]  ;;  %v6125_v51 = vld [vmem:[%s9685_s1 + $0x614] sm:$0xf0] }
 0x12e   :  { %9815 = vst [vmem:[#allocation44_spill] sm:$0xff] %v7652_v40  ;;  %3081 = vmatpush.bf16.msrb.mxu1 %v5503_v46  ;;  %v5622_v9 = vld [vmem:[%s9685_s1 + $0x790] sm:$0xf]  ;;  %v5431_v46 = vor.u32 %v6125_v51, %v5430_v45 }
 0x12f   :  { %9817 = vst [vmem:[#allocation46_spill] sm:$0xff] %v7656_v15  ;;  %3126 = vmatpush.bf16.msrb.mxu2 %v5559_v62 }
 0x130   :  { %v2784_v10 = vpop.f32.mrf.mxu2  ;;  %v2699_v34 = vpop.f32.mrf.mxu0  ;;  %9818 = vst [vmem:[#allocation47_spill] sm:$0xff] %v7659_v26 }
 0x131   :  { %v2785_v7 = vadd.f32 %v2784_v10, %v2741_v31  ;;  %v2828_v5 = vpop.f32.mrf.mxu3  ;;  %v2700_v30 = vadd.f32 %v2699_v34, %v7182_v13  ;;  %v2743_v27 = vpop.f32.mrf.mxu1  ;;  %v6173_v10 = vld [vmem:[%s9685_s1 + $0x794] sm:$0xf0]  ;;  %3038 = vmatpush.bf16.msrb.mxu0 %v5431_v46 }
 0x133   :  { %v7661_v29 = vadd.f32 %v2828_v5, %v2785_v7  ;;  %v2744_v52 = vadd.f32 %v2743_v27, %v2700_v30  ;;  %2879 = vmatmul.bf16.gmra.mxu0 %v7652_v40  ;;  %v4470_v27 = vld [vmem:[%s9686_s0 + $0x260] sm:$0xf]  ;;  %v5889_v30 = vld [vmem:[%s9686_s0 + $0x2a4] sm:$0xf0]  ;;  %v5494_v7 = vld [vmem:[%s9685_s1 + $0x690] sm:$0xf] }
 0x134   :  { %2923 = vmatmul.bf16.gmra.mxu1 %v7654_v59  ;;  %v6141_v5 = vld [vmem:[%s9685_s1 + $0x694] sm:$0xf0]  ;;  %v7718_v43 = vor.u32 %v5889_v30, %v4470_v27  ;;  %v5550_v27 = vld [vmem:[%s9685_s1 + $0x700] sm:$0xf] }
 0x135   :  { %2967 = vmatmul.bf16.gmra.mxu2 %v7656_v15 }
 0x136   :  { %3011 = vmatmul.bf16.gmra.mxu3 %v7659_v26  ;;  %9819 = vst [vmem:[#allocation48_spill] sm:$0xff] %v7718_v43 }
 0x138   :  { %v2787_v42 = vpop.f32.mrf.mxu2  ;;  %v2701_v35 = vpop.f32.mrf.mxu0 }
 0x139   :  { %v2788_v28 = vadd.f32 %v2787_v42, %v2744_v52  ;;  %v2831_v31 = vpop.f32.mrf.mxu3  ;;  %v2702_v13 = vadd.f32 %v2701_v35, %v7241_v63  ;;  %v2745_v34 = vpop.f32.mrf.mxu1  ;;  %v4472_v52 = vld [vmem:[%s9686_s0 + $0x2a8] sm:$0xf0]  ;;  %v4478_v42 = vld [vmem:[%s9686_s0 + $0x268] sm:$0xf]  ;;  %v5495_v35 = vor.u32 %v6141_v5, %v5494_v7 }
 0x13a   :  { %v7720_v62 = vor.u32 %v5880_v49, %v4472_v52 }
 0x13b   :  { %v7668_v14 = vadd.f32 %v2831_v31, %v2788_v28  ;;  %v2746_v63 = vadd.f32 %v2745_v34, %v2702_v13  ;;  %v5890_v28 = vld [vmem:[%s9686_s0 + $0x2ac] sm:$0xf0]  ;;  %v5623_v31 = vor.u32 %v6173_v10, %v5622_v9  ;;  %v5881_v13 = vld [vmem:[%s9686_s0 + $0x26c] sm:$0xf]  ;;  %v4480_v34 = vld [vmem:[%s9686_s0 + $0x2b0] sm:$0xf0]  ;;  %3082 = vmatpush.bf16.msrb.mxu1 %v5495_v35 }
 0x13c   :  { %9820 = vst [vmem:[#allocation49_spill] sm:$0xff] %v7720_v62  ;;  %v7722_v9 = vor.u32 %v5890_v28, %v4478_v42  ;;  %v7725_v5 = vor.u32 %v5881_v13, %v4480_v34  ;;  %v5422_v35 = vld [vmem:[%s9685_s1 + $0x600] sm:$0xf]  ;;  %v6123_v13 = vld [vmem:[%s9685_s1 + $0x604] sm:$0xf0] }
 0x13d   :  { %3170 = vmatpush.bf16.msrb.mxu3 %v5623_v31  ;;  %v5614_v34 = vld [vmem:[%s9685_s1 + $0x780] sm:$0xf] }
 0x13e   :  { %9821 = vst [vmem:[#allocation50_spill] sm:$0xff] %v7722_v9 }
 0x13f   :  { %9822 = vst [vmem:[#allocation51_spill] sm:$0xff] %v7725_v5 }
 0x140   :  { %v2789_v16 = vpop.f32.mrf.mxu2  ;;  %v2704_v26 = vpop.f32.mrf.mxu0 }
 0x141   :  { %v2790_v45 = vadd.f32 %v2789_v16, %v2746_v63  ;;  %v2833_v51 = vpop.f32.mrf.mxu3  ;;  %v2705_v10 = vadd.f32 %v2704_v26, %v7254_v47  ;;  %v2748_v7 = vpop.f32.mrf.mxu1  ;;  %v6155_v26 = vld [vmem:[%s9685_s1 + $0x704] sm:$0xf0] }
 0x142   :  { %v5551_v47 = vor.u32 %v6155_v26, %v5550_v27  ;;  %v5898_v27 = vld [vmem:[%s9686_s0 + $0x2f4] sm:$0xf] }
 0x143   :  { %v7727_v15 = vadd.f32 %v2833_v51, %v2790_v45  ;;  %v2749_v46 = vadd.f32 %v2748_v7, %v2705_v10  ;;  %2884 = vmatmul.bf16.gmra.mxu0 %v7718_v43  ;;  %v5423_v45 = vor.u32 %v6123_v13, %v5422_v35  ;;  %v5486_v51 = vld [vmem:[%s9685_s1 + $0x680] sm:$0xf]  ;;  %v6139_v10 = vld [vmem:[%s9685_s1 + $0x684] sm:$0xf0]  ;;  %v4542_v7 = vld [vmem:[%s9686_s0 + $0x2f0] sm:$0xf] }
 0x144   :  { %2928 = vmatmul.bf16.gmra.mxu1 %v7720_v62  ;;  %3127 = vmatpush.bf16.msrb.mxu2 %v5551_v47  ;;  %v5487_v47 = vor.u32 %v6139_v10, %v5486_v51 }
 0x145   :  { %2972 = vmatmul.bf16.gmra.mxu2 %v7722_v9  ;;  %3039 = vmatpush.bf16.msrb.mxu0 %v5423_v45 }
 0x146   :  { %3016 = vmatmul.bf16.gmra.mxu3 %v7725_v5  ;;  %3083 = vmatpush.bf16.msrb.mxu1 %v5487_v47 }
 0x148   :  { %v2792_v30 = vpop.f32.mrf.mxu2  ;;  %v2706_v52 = vpop.f32.mrf.mxu0 }
 0x149   :  { %v2793_v63 = vadd.f32 %v2792_v30, %v2749_v46  ;;  %v2836_v49 = vpop.f32.mrf.mxu3  ;;  %v2707_v42 = vadd.f32 %v2706_v52, %v7307_v22  ;;  %v2750_v28 = vpop.f32.mrf.mxu1  ;;  %v6171_v22 = vld [vmem:[%s9685_s1 + $0x784] sm:$0xf0]  ;;  %v5907_v46 = vld [vmem:[%s9686_s0 + $0x334] sm:$0xf0]  ;;  %v4544_v30 = vld [vmem:[%s9686_s0 + $0x338] sm:$0xf0] }
 0x14a   :  { %v5615_v26 = vor.u32 %v6171_v22, %v5614_v34  ;;  %v5899_v52 = vld [vmem:[%s9686_s0 + $0x2fc] sm:$0xf]  ;;  %v7784_v35 = vor.u32 %v5907_v46, %v4542_v7  ;;  %v7786_v51 = vor.u32 %v5898_v27, %v4544_v30  ;;  %v6201_v46 = vld [vmem:[%s9685_s1 + $0x874] sm:$0xf0]  ;;  %v5960_v27 = vld [vmem:[%s9685_s1 + $0xf4] sm:$0xf] }
 0x14b   :  { %v7740_v31 = vadd.f32 %v2836_v49, %v2793_v63  ;;  %v2751_v16 = vadd.f32 %v2750_v28, %v2707_v42  ;;  %v4550_v63 = vld [vmem:[%s9686_s0 + $0x2f8] sm:$0xf]  ;;  %v5908_v49 = vld [vmem:[%s9686_s0 + $0x33c] sm:$0xf0]  ;;  %v4552_v42 = vld [vmem:[%s9686_s0 + $0x340] sm:$0xf0] }
 0x14c   :  { %3171 = vmatpush.bf16.msrb.mxu3 %v5615_v26  ;;  %9823 = vst [vmem:[#allocation52_spill] sm:$0xff] %v7784_v35  ;;  %v7788_v10 = vor.u32 %v5908_v49, %v4550_v63  ;;  %v7791_v9 = vor.u32 %v5899_v52, %v4552_v42  ;;  %v4776_v26 = vld [vmem:[%s9685_s1 + $0xf8] sm:$0xf0] }
 0x14d   :  { %9824 = vst [vmem:[#allocation53_spill] sm:$0xff] %v7786_v51  ;;  %v4779_v63 = vor.u32 %v5960_v27, %v4776_v26  ;;  %v5926_v27 = vld [vmem:[%s9686_s0 + $0x3cc] sm:$0xf0]  ;;  %v5917_v26 = vld [vmem:[%s9686_s0 + $0x38c] sm:$0xf] }
 0x14e   :  { %9825 = vst [vmem:[#allocation54_spill] sm:$0xff] %v7788_v10 }
 0x14f   :  { %9826 = vst [vmem:[#allocation55_spill] sm:$0xff] %v7791_v9 }
 0x150   :  { %v2794_v28 = vpop.f32.mrf.mxu2  ;;  %v2709_v22 = vpop.f32.mrf.mxu0  ;;  %3340 = vmatpush.bf16.msra.mxu3 %v4779_v63 }
 0x151   :  { %v2795_v13 = vadd.f32 %v2794_v28, %v2751_v16  ;;  %v2838_v34 = vpop.f32.mrf.mxu3  ;;  %v2710_v45 = vadd.f32 %v2709_v22, %v7332_v11  ;;  %v2753_v5 = vpop.f32.mrf.mxu1  ;;  %v5944_v16 = vld [vmem:[%s9685_s1 + $0x74] sm:$0xf]  ;;  %v4712_v11 = vld [vmem:[%s9685_s1 + $0x78] sm:$0xf0]  ;;  %v5798_v22 = vld [vmem:[%s9685_s1 + $0x8f0] sm:$0xf] }
 0x152   :  { %v4715_v7 = vor.u32 %v5944_v16, %v4712_v11  ;;  %v4614_v11 = vld [vmem:[%s9686_s0 + $0x380] sm:$0xf] }
 0x153   :  { %v7793_v62 = vadd.f32 %v2838_v34, %v2795_v13  ;;  %v2754_v43 = vadd.f32 %v2753_v5, %v2710_v45  ;;  %2889 = vmatmul.bf16.gmra.mxu0 %v7784_v35  ;;  %v5734_v5 = vld [vmem:[%s9685_s1 + $0x870] sm:$0xf]  ;;  %v6217_v45 = vld [vmem:[%s9685_s1 + $0x8f4] sm:$0xf0] }
 0x154   :  { %2933 = vmatmul.bf16.gmra.mxu1 %v7786_v51  ;;  %v5735_v30 = vor.u32 %v6201_v46, %v5734_v5  ;;  %3296 = vmatpush.bf16.msra.mxu2 %v4715_v7  ;;  %v5916_v5 = vld [vmem:[%s9686_s0 + $0x384] sm:$0xf]  ;;  %v4616_v7 = vld [vmem:[%s9686_s0 + $0x3c8] sm:$0xf0]  ;;  %v4622_v46 = vld [vmem:[%s9686_s0 + $0x388] sm:$0xf] }
 0x155   :  { %2977 = vmatmul.bf16.gmra.mxu2 %v7788_v10 }
 0x156   :  { %3021 = vmatmul.bf16.gmra.mxu3 %v7791_v9  ;;  %3208 = vmatpush.bf16.msra.mxu0 %v5735_v30 }
 0x158   :  { %v2797_v47 = vpop.f32.mrf.mxu2  ;;  %v2711_v42 = vpop.f32.mrf.mxu0 }
 0x159   :  { %v2798_v49 = vadd.f32 %v2797_v47, %v2754_v43  ;;  %v2841_v52 = vpop.f32.mrf.mxu3  ;;  %v2712_v28 = vadd.f32 %v2711_v42, %v7373_v44  ;;  %v2755_v13 = vpop.f32.mrf.mxu1  ;;  %v5799_v43 = vor.u32 %v6217_v45, %v5798_v22  ;;  %v5925_v44 = vld [vmem:[%s9686_s0 + $0x3c4] sm:$0xf0]  ;;  %v4624_v47 = vld [vmem:[%s9686_s0 + $0x3d0] sm:$0xf0] }
 0x15a   :  { %v7850_v63 = vor.u32 %v5925_v44, %v4614_v11  ;;  %v4704_v11 = vld [vmem:[%s9685_s1 + $0x68] sm:$0xf0]  ;;  %v5726_v44 = vld [vmem:[%s9685_s1 + $0x860] sm:$0xf] }
 0x15b   :  { %v7818_v34 = vadd.f32 %v2841_v52, %v2798_v49  ;;  %v2756_v16 = vadd.f32 %v2755_v13, %v2712_v28  ;;  %3252 = vmatpush.bf16.msra.mxu1 %v5799_v43  ;;  %v7852_v28 = vor.u32 %v5916_v5, %v4616_v7  ;;  %v7854_v13 = vor.u32 %v5926_v27, %v4622_v46  ;;  %v6199_v5 = vld [vmem:[%s9685_s1 + $0x864] sm:$0xf0]  ;;  %v5958_v46 = vld [vmem:[%s9685_s1 + $0xe4] sm:$0xf]  ;;  %v4768_v27 = vld [vmem:[%s9685_s1 + $0xe8] sm:$0xf0] }
 0x15c   :  { %9827 = vst [vmem:[#allocation56_spill] sm:$0xff] %v7850_v63  ;;  %v7857_v43 = vor.u32 %v5917_v26, %v4624_v47  ;;  %v5727_v7 = vor.u32 %v6199_v5, %v5726_v44  ;;  %v5790_v26 = vld [vmem:[%s9685_s1 + $0x8e0] sm:$0xf]  ;;  %v4198_v5 = vld [vmem:[%s9686_s0 + $0x30] sm:$0xf] }
 0x15d   :  { %9828 = vst [vmem:[#allocation57_spill] sm:$0xff] %v7852_v28 }
 0x15e   :  { %9829 = vst [vmem:[#allocation58_spill] sm:$0xff] %v7854_v13  ;;  %3209 = vmatpush.bf16.msra.mxu0 %v5727_v7  ;;  %v5810_v7 = vld [vmem:[%s9686_s0 + $0x34] sm:$0xf] }
 0x15f   :  { %9830 = vst [vmem:[#allocation59_spill] sm:$0xff] %v7857_v43 }
 0x160   :  { %v2799_v30 = vpop.f32.mrf.mxu2  ;;  %v2714_v42 = vpop.f32.mrf.mxu0 }
 0x161   :  { %v2800_v49 = vadd.f32 %v2799_v30, %v2756_v16  ;;  %v2843_v52 = vpop.f32.mrf.mxu3  ;;  %v2715_v22 = vadd.f32 %v2714_v42, %v7404_v23  ;;  %v2758_v45 = vpop.f32.mrf.mxu1  ;;  %v5942_v16 = vld [vmem:[%s9685_s1 + $0x64] sm:$0xf]  ;;  %v4771_v30 = vor.u32 %v5958_v46, %v4768_v27  ;;  %v4206_v46 = vld [vmem:[%s9686_s0 + $0x38] sm:$0xf]  ;;  %v5820_v27 = vld [vmem:[%s9686_s0 + $0x7c] sm:$0xf0] }
 0x162   :  { %v4707_v23 = vor.u32 %v5942_v16, %v4704_v11 }
 0x163   :  { %v7859_v9 = vadd.f32 %v2843_v52, %v2800_v49  ;;  %v2759_v10 = vadd.f32 %v2758_v45, %v2715_v22  ;;  %2894 = vmatmul.bf16.gmra.mxu0 %v7850_v63  ;;  %v6215_v49 = vld [vmem:[%s9685_s1 + $0x8e4] sm:$0xf0]  ;;  %3341 = vmatpush.bf16.msra.mxu3 %v4771_v30  ;;  %v5940_v63 = vld [vmem:[%s9685_s1 + $0x54] sm:$0xf] }
 0x164   :  { %2938 = vmatmul.bf16.gmra.mxu1 %v7852_v28  ;;  %3297 = vmatpush.bf16.msra.mxu2 %v4707_v23  ;;  %v5791_v45 = vor.u32 %v6215_v49, %v5790_v26  ;;  %v5811_v26 = vld [vmem:[%s9686_s0 + $0x3c] sm:$0xf] }
 0x165   :  { %2982 = vmatmul.bf16.gmra.mxu2 %v7854_v13 }
 0x166   :  { %3026 = vmatmul.bf16.gmra.mxu3 %v7857_v43  ;;  %3253 = vmatpush.bf16.msra.mxu1 %v5791_v45 }
 0x168   :  { %v2802_v47 = vpop.f32.mrf.mxu2  ;;  %v2716_v22 = vpop.f32.mrf.mxu0 }
 0x169   :  { %v2803_v52 = vadd.f32 %v2802_v47, %v2759_v10  ;;  %v2846_v42 = vpop.f32.mrf.mxu3  ;;  %v2717_v16 = vadd.f32 %v2716_v22, %v7439_v4  ;;  %v2760_v11 = vpop.f32.mrf.mxu1  ;;  %v5819_v10 = vld [vmem:[%s9686_s0 + $0x74] sm:$0xf0]  ;;  %v4200_v4 = vld [vmem:[%s9686_s0 + $0x78] sm:$0xf0]  ;;  %v4208_v47 = vld [vmem:[%s9686_s0 + $0x80] sm:$0xf0] }
 0x16a   :  { %v7916_v49 = vor.u32 %v5819_v10, %v4198_v5  ;;  %v7918_v45 = vor.u32 %v5810_v7, %v4200_v4  ;;  %v7923_v13 = vor.u32 %v5811_v26, %v4208_v47  ;;  %v6197_v7 = vld [vmem:[%s9685_s1 + $0x854] sm:$0xf0]  ;;  %v5956_v4 = vld [vmem:[%s9685_s1 + $0xd4] sm:$0xf] }
 0x16b   :  { %v7890_v23 = vadd.f32 %v2846_v42, %v2803_v52  ;;  %v2761_v44 = vadd.f32 %v2760_v11, %v2717_v16  ;;  %v7920_v16 = vor.u32 %v5820_v27, %v4206_v46  ;;  %v5782_v27 = vld [vmem:[%s9685_s1 + $0x8d0] sm:$0xf]  ;;  %v6213_v47 = vld [vmem:[%s9685_s1 + $0x8d4] sm:$0xf0] }
 0x16c   :  { %9831 = vst [vmem:[#allocation60_spill] sm:$0xff] %v7916_v49 }
 0x16d   :  { %9832 = vst [vmem:[#allocation61_spill] sm:$0xff] %v7918_v45 }
 0x16e   :  { %9833 = vst [vmem:[#allocation62_spill] sm:$0xff] %v7920_v16 }
 0x16f   :  { %9834 = vst [vmem:[#allocation63_spill] sm:$0xff] %v7923_v13 }
 0x170   :  { %v2804_v30 = vpop.f32.mrf.mxu2  ;;  %v2719_v22 = vpop.f32.mrf.mxu0 }
 0x171   :  { %v2805_v52 = vadd.f32 %v2804_v30, %v2761_v44  ;;  %v2848_v42 = vpop.f32.mrf.mxu3  ;;  %v2720_v11 = vadd.f32 %v2719_v22, %v7470_v18  ;;  %v2763_v43 = vpop.f32.mrf.mxu1  ;;  %v4696_v44 = vld [vmem:[%s9685_s1 + $0x58] sm:$0xf0]  ;;  %v5718_v18 = vld [vmem:[%s9685_s1 + $0x850] sm:$0xf]  ;;  %v5783_v22 = vor.u32 %v6213_v47, %v5782_v27  ;;  %v4278_v27 = vld [vmem:[%s9686_s0 + $0xc8] sm:$0xf] }
 0x172   :  { %v4699_v10 = vor.u32 %v5940_v63, %v4696_v44  ;;  %v4760_v63 = vld [vmem:[%s9685_s1 + $0xd8] sm:$0xf0]  ;;  %v5829_v47 = vld [vmem:[%s9686_s0 + $0xcc] sm:$0xf] }
 0x173   :  { %v7925_v28 = vadd.f32 %v2848_v42, %v2805_v52  ;;  %v2764_v5 = vadd.f32 %v2763_v43, %v2720_v11  ;;  %3040 = vmatmul.bf16.vlgmr.msrb.gmra.mxu0 %v7916_v49  ;;  %v5719_v43 = vor.u32 %v6197_v7, %v5718_v18  ;;  %v4763_v46 = vor.u32 %v5956_v4, %v4760_v63  ;;  %v5938_v7 = vld [vmem:[%s9685_s1 + $0x44] sm:$0xf]  ;;  %v4688_v4 = vld [vmem:[%s9685_s1 + $0x48] sm:$0xf0] }
 0x174   :  { %3084 = vmatmul.bf16.vlgmr.msrb.gmra.mxu1 %v7918_v45  ;;  %3298 = vmatpush.bf16.msra.mxu2 %v4699_v10  ;;  %v4691_v63 = vor.u32 %v5938_v7, %v4688_v4 }
 0x175   :  { %3128 = vmatmul.bf16.vlgmr.msrb.gmra.mxu2 %v7920_v16  ;;  %3210 = vmatpush.bf16.msra.mxu0 %v5719_v43  ;;  %v5828_v43 = vld [vmem:[%s9686_s0 + $0xc4] sm:$0xf] }
 0x176   :  { %3172 = vmatmul.bf16.vlgmr.msrb.gmra.mxu3 %v7923_v13  ;;  %3254 = vmatpush.bf16.msra.mxu1 %v5783_v22 }
 0x177   :  { %3342 = vmatpush.bf16.msra.mxu3 %v4763_v46  ;;  %v4272_v46 = vld [vmem:[%s9686_s0 + $0x108] sm:$0xf0] }
 0x178   :  { %v2807_v26 = vpop.f32.mrf.mxu2  ;;  %v2721_v42 = vpop.f32.mrf.mxu0  ;;  %3299 = vmatpush.bf16.msra.mxu2 %v4691_v63  ;;  %v7990_v7 = vor.u32 %v5828_v43, %v4272_v46  ;;  %v5710_v63 = vld [vmem:[%s9685_s1 + $0x840] sm:$0xf]  ;;  %v4752_v43 = vld [vmem:[%s9685_s1 + $0xc8] sm:$0xf0] }
 0x179   :  { %v2808_v30 = vadd.f32 %v2807_v26, %v2764_v5  ;;  %v2851_v52 = vpop.f32.mrf.mxu3  ;;  %v2722_v11 = vadd.f32 %v2721_v42, %v7511_v58  ;;  %v2765_v44 = vpop.f32.mrf.mxu1  ;;  %v4270_v5 = vld [vmem:[%s9686_s0 + $0xc0] sm:$0xf]  ;;  %v5837_v58 = vld [vmem:[%s9686_s0 + $0x104] sm:$0xf0]  ;;  %v5838_v26 = vld [vmem:[%s9686_s0 + $0x10c] sm:$0xf0] }
 0x17a   :  { %v7988_v42 = vor.u32 %v5837_v58, %v4270_v5  ;;  %9836 = vst [vmem:[#allocation65_spill] sm:$0xff] %v7990_v7  ;;  %v7992_v4 = vor.u32 %v5838_v26, %v4278_v27  ;;  %v5954_v5 = vld [vmem:[%s9685_s1 + $0xc4] sm:$0xf]  ;;  %v5774_v46 = vld [vmem:[%s9685_s1 + $0x8c0] sm:$0xf] }
 0x17b   :  { %v7956_v10 = vadd.f32 %v2851_v52, %v2808_v30  ;;  %v2766_v18 = vadd.f32 %v2765_v44, %v2722_v11  ;;  %v4280_v30 = vld [vmem:[%s9686_s0 + $0x110] sm:$0xf0]  ;;  %v6211_v27 = vld [vmem:[%s9685_s1 + $0x8c4] sm:$0xf0] }
 0x17c   :  { %9835 = vst [vmem:[#allocation64_spill] sm:$0xff] %v7988_v42  ;;  %v7995_v45 = vor.u32 %v5829_v47, %v4280_v30 }
 0x17d   :  { %9837 = vst [vmem:[#allocation66_spill] sm:$0xff] %v7992_v4 }
 0x17e   :  { %9838 = vst [vmem:[#allocation67_spill] sm:$0xff] %v7995_v45 }
 0x180   :  { %v2809_v52 = vpop.f32.mrf.mxu2  ;;  %v2865_v44 = vpop.f32.mrf.mxu0 }
 0x181   :  { %v2810_v22 = vadd.f32 %v2809_v52, %v2766_v18  ;;  %v2853_v11 = vpop.f32.mrf.mxu3  ;;  %v2866_v13 = vadd.f32 %v2865_v44, %v7536_v41  ;;  %v2909_v16 = vpop.f32.mrf.mxu1  ;;  %v6195_v18 = vld [vmem:[%s9685_s1 + $0x844] sm:$0xf0] }
 0x182   :  { %v5711_v41 = vor.u32 %v6195_v18, %v5710_v63  ;;  %v4342_v63 = vld [vmem:[%s9686_s0 + $0x150] sm:$0xf]  ;;  %v5855_v18 = vld [vmem:[%s9686_s0 + $0x194] sm:$0xf0] }
 0x183   :  { %v7997_v49 = vadd.f32 %v2853_v11, %v2810_v22  ;;  %v2910_v58 = vadd.f32 %v2909_v16, %v2866_v13  ;;  %3045 = vmatmul.bf16.gmra.mxu0 %v7988_v42  ;;  %v4755_v13 = vor.u32 %v5954_v5, %v4752_v43  ;;  %v5775_v16 = vor.u32 %v6211_v27, %v5774_v46  ;;  %v5702_v43 = vld [vmem:[%s9685_s1 + $0x830] sm:$0xf]  ;;  %v6193_v27 = vld [vmem:[%s9685_s1 + $0x834] sm:$0xf0] }
 0x184   :  { %3089 = vmatmul.bf16.gmra.mxu1 %v7990_v7  ;;  %3211 = vmatpush.bf16.msra.mxu0 %v5711_v41  ;;  %v4680_v41 = vld [vmem:[%s9685_s1 + $0x38] sm:$0xf0] }
 0x185   :  { %3133 = vmatmul.bf16.gmra.mxu2 %v7992_v4  ;;  %3343 = vmatpush.bf16.msra.mxu3 %v4755_v13  ;;  %v5952_v13 = vld [vmem:[%s9685_s1 + $0xb4] sm:$0xf] }
 0x186   :  { %3177 = vmatmul.bf16.gmra.mxu3 %v7995_v45  ;;  %3255 = vmatpush.bf16.msra.mxu1 %v5775_v16  ;;  %v4744_v16 = vld [vmem:[%s9685_s1 + $0xb8] sm:$0xf0]  ;;  %v8066_v45 = vor.u32 %v5855_v18, %v4342_v63  ;;  %v5766_v63 = vld [vmem:[%s9685_s1 + $0x8b0] sm:$0xf]  ;;  %v6209_v18 = vld [vmem:[%s9685_s1 + $0x8b4] sm:$0xf0] }
 0x188   :  { %v2953_v26 = vpop.f32.mrf.mxu2  ;;  %v2867_v52 = vpop.f32.mrf.mxu0  ;;  %9839 = vst [vmem:[#allocation68_spill] sm:$0xff] %v8066_v45 }
 0x189   :  { %v2954_v47 = vadd.f32 %v2953_v26, %v2910_v58  ;;  %v2997_v30 = vpop.f32.mrf.mxu3  ;;  %v2868_v22 = vadd.f32 %v2867_v52, %v7589_v8  ;;  %v2911_v11 = vpop.f32.mrf.mxu1  ;;  %v5846_v58 = vld [vmem:[%s9686_s0 + $0x154] sm:$0xf]  ;;  %v4344_v26 = vld [vmem:[%s9686_s0 + $0x198] sm:$0xf0]  ;;  %v5703_v52 = vor.u32 %v6193_v27, %v5702_v43 }
 0x18a   :  { %v5936_v8 = vld [vmem:[%s9685_s1 + $0x34] sm:$0xf]  ;;  %v8068_v51 = vor.u32 %v5846_v58, %v4344_v26  ;;  %v5767_v58 = vor.u32 %v6209_v18, %v5766_v63  ;;  %v6191_v18 = vld [vmem:[%s9685_s1 + $0x824] sm:$0xf0] }
 0x18b   :  { %v8022_v44 = vadd.f32 %v2997_v30, %v2954_v47  ;;  %v2912_v5 = vadd.f32 %v2911_v11, %v2868_v22  ;;  %v4683_v46 = vor.u32 %v5936_v8, %v4680_v41  ;;  %v4350_v47 = vld [vmem:[%s9686_s0 + $0x158] sm:$0xf]  ;;  %v5856_v30 = vld [vmem:[%s9686_s0 + $0x19c] sm:$0xf0]  ;;  %v4747_v22 = vor.u32 %v5952_v13, %v4744_v16  ;;  %v5847_v11 = vld [vmem:[%s9686_s0 + $0x15c] sm:$0xf]  ;;  %3212 = vmatpush.bf16.msra.mxu0 %v5703_v52 }
 0x18c   :  { %v4352_v8 = vld [vmem:[%s9686_s0 + $0x1a0] sm:$0xf0]  ;;  %9840 = vst [vmem:[#allocation69_spill] sm:$0xff] %v8068_v51  ;;  %v8070_v43 = vor.u32 %v5856_v30, %v4350_v47  ;;  %3256 = vmatpush.bf16.msra.mxu1 %v5767_v58  ;;  %v4414_v30 = vld [vmem:[%s9686_s0 + $0x1e0] sm:$0xf] }
 0x18d   :  { %3300 = vmatpush.bf16.msra.mxu2 %v4683_v46  ;;  %3344 = vmatpush.bf16.msra.mxu3 %v4747_v22  ;;  %v8073_v16 = vor.u32 %v5847_v11, %v4352_v8  ;;  %v5873_v52 = vld [vmem:[%s9686_s0 + $0x224] sm:$0xf0]  ;;  %v5864_v11 = vld [vmem:[%s9686_s0 + $0x1e4] sm:$0xf]  ;;  %v4736_v58 = vld [vmem:[%s9685_s1 + $0xa8] sm:$0xf0] }
 0x18e   :  { %9841 = vst [vmem:[#allocation70_spill] sm:$0xff] %v8070_v43  ;;  %v4422_v8 = vld [vmem:[%s9686_s0 + $0x1e8] sm:$0xf] }
 0x18f   :  { %9842 = vst [vmem:[#allocation71_spill] sm:$0xff] %v8073_v16 }
 0x190   :  { %v2955_v41 = vpop.f32.mrf.mxu2  ;;  %v2870_v42 = vpop.f32.mrf.mxu0 }
 0x191   :  { %v2956_v4 = vadd.f32 %v2955_v41, %v2912_v5  ;;  %v2999_v7 = vpop.f32.mrf.mxu3  ;;  %v2871_v27 = vadd.f32 %v2870_v42, %v7602_v12  ;;  %v2914_v13 = vpop.f32.mrf.mxu1  ;;  %v5934_v41 = vld [vmem:[%s9685_s1 + $0x24] sm:$0xf] }
 0x193   :  { %v8075_v35 = vadd.f32 %v2999_v7, %v2956_v4  ;;  %v2915_v5 = vadd.f32 %v2914_v13, %v2871_v27  ;;  %3050 = vmatmul.bf16.gmra.mxu0 %v8066_v45  ;;  %v4672_v27 = vld [vmem:[%s9685_s1 + $0x28] sm:$0xf0]  ;;  %v5694_v13 = vld [vmem:[%s9685_s1 + $0x820] sm:$0xf] }
 0x194   :  { %3094 = vmatmul.bf16.gmra.mxu1 %v8068_v51  ;;  %v4675_v63 = vor.u32 %v5934_v41, %v4672_v27  ;;  %v4424_v41 = vld [vmem:[%s9686_s0 + $0x230] sm:$0xf0] }
 0x195   :  { %3138 = vmatmul.bf16.gmra.mxu2 %v8070_v43 }
 0x196   :  { %3182 = vmatmul.bf16.gmra.mxu3 %v8073_v16  ;;  %3301 = vmatpush.bf16.msra.mxu2 %v4675_v63 }
 0x198   :  { %v2958_v12 = vpop.f32.mrf.mxu2  ;;  %v2872_v4 = vpop.f32.mrf.mxu0 }
 0x199   :  { %v2959_v42 = vadd.f32 %v2958_v12, %v2915_v5  ;;  %v3002_v7 = vpop.f32.mrf.mxu3  ;;  %v2873_v46 = vadd.f32 %v2872_v4, %v7661_v29  ;;  %v2916_v26 = vpop.f32.mrf.mxu1  ;;  %v4416_v29 = vld [vmem:[%s9686_s0 + $0x228] sm:$0xf0]  ;;  %v5950_v5 = vld [vmem:[%s9685_s1 + $0xa4] sm:$0xf]  ;;  %v5874_v12 = vld [vmem:[%s9686_s0 + $0x22c] sm:$0xf0] }
 0x19a   :  { %v5758_v4 = vld [vmem:[%s9685_s1 + $0x8a0] sm:$0xf]  ;;  %v8140_v43 = vor.u32 %v5864_v11, %v4416_v29  ;;  %v8142_v51 = vor.u32 %v5874_v12, %v4422_v8  ;;  %v5932_v8 = vld [vmem:[%s9685_s1 + $0x14] sm:$0xf]  ;;  %v4664_v12 = vld [vmem:[%s9685_s1 + $0x18] sm:$0xf0] }
 0x19b   :  { %v8088_v47 = vadd.f32 %v3002_v7, %v2959_v42  ;;  %v2917_v22 = vadd.f32 %v2916_v26, %v2873_v46  ;;  %v5695_v42 = vor.u32 %v6191_v18, %v5694_v13  ;;  %v4739_v7 = vor.u32 %v5950_v5, %v4736_v58  ;;  %v6207_v46 = vld [vmem:[%s9685_s1 + $0x8a4] sm:$0xf0]  ;;  %v5865_v26 = vld [vmem:[%s9686_s0 + $0x1ec] sm:$0xf] }
 0x19c   :  { %v5759_v27 = vor.u32 %v6207_v46, %v5758_v4  ;;  %v8138_v18 = vor.u32 %v5873_v52, %v4414_v30  ;;  %9843 = vst [vmem:[#allocation72_spill] sm:$0xff] %v8142_v51  ;;  %v8145_v40 = vor.u32 %v5865_v26, %v4424_v41  ;;  %v5686_v46 = vld [vmem:[%s9685_s1 + $0x810] sm:$0xf]  ;;  %v6189_v26 = vld [vmem:[%s9685_s1 + $0x814] sm:$0xf0] }
 0x19d   :  { %3213 = vmatpush.bf16.msra.mxu0 %v5695_v42  ;;  %3345 = vmatpush.bf16.msra.mxu3 %v4739_v7  ;;  %v5882_v42 = vld [vmem:[%s9686_s0 + $0x274] sm:$0xf]  ;;  %v4667_v7 = vor.u32 %v5932_v8, %v4664_v12 }
 0x19e   :  { %3257 = vmatpush.bf16.msra.mxu1 %v5759_v27  ;;  %9844 = vst [vmem:[#allocation73_spill] sm:$0xff] %v8145_v40  ;;  %v5948_v41 = vld [vmem:[%s9685_s1 + $0x94] sm:$0xf]  ;;  %v5687_v27 = vor.u32 %v6189_v26, %v5686_v46 }
 0x19f   :  { %3302 = vmatpush.bf16.msra.mxu2 %v4667_v7 }
 0x1a0   :  { %v2960_v13 = vpop.f32.mrf.mxu2  ;;  %v2875_v16 = vpop.f32.mrf.mxu0 }
 0x1a1   :  { %v2961_v5 = vadd.f32 %v2960_v13, %v2917_v22  ;;  %v3004_v58 = vpop.f32.mrf.mxu3  ;;  %v2876_v45 = vadd.f32 %v2875_v16, %v7668_v14  ;;  %v2919_v59 = vpop.f32.mrf.mxu1  ;;  %v4728_v13 = vld [vmem:[%s9685_s1 + $0x98] sm:$0xf0]  ;;  %3214 = vmatpush.bf16.msra.mxu0 %v5687_v27 }
 0x1a3   :  { %v8147_v63 = vadd.f32 %v3004_v58, %v2961_v5  ;;  %v2920_v4 = vadd.f32 %v2919_v59, %v2876_v45  ;;  %3055 = vmatmul.bf16.gmra.mxu0 %v8138_v18  ;;  %v4486_v59 = vld [vmem:[%s9686_s0 + $0x270] sm:$0xf]  ;;  %v5891_v45 = vld [vmem:[%s9686_s0 + $0x2b4] sm:$0xf0] }
 0x1a4   :  { %3099 = vmatmul.bf16.gmra.mxu1 %v8140_v43  ;;  %v5750_v5 = vld [vmem:[%s9685_s1 + $0x890] sm:$0xf]  ;;  %v6205_v58 = vld [vmem:[%s9685_s1 + $0x894] sm:$0xf0]  ;;  %v8204_v12 = vor.u32 %v5891_v45, %v4486_v59  ;;  %v5930_v59 = vld [vmem:[%s9685_s1 + $0x4] sm:$0xf] }
 0x1a5   :  { %3143 = vmatmul.bf16.gmra.mxu2 %v8142_v51 }
 0x1a6   :  { %3187 = vmatmul.bf16.gmra.mxu3 %v8145_v40  ;;  %9845 = vst [vmem:[#allocation74_spill] sm:$0xff] %v8204_v12 }
 0x1a8   :  { %v2963_v30 = vpop.f32.mrf.mxu2  ;;  %v2877_v11 = vpop.f32.mrf.mxu0 }
 0x1a9   :  { %v2964_v52 = vadd.f32 %v2963_v30, %v2920_v4  ;;  %v3007_v22 = vpop.f32.mrf.mxu3  ;;  %v2878_v14 = vadd.f32 %v2877_v11, %v7727_v15  ;;  %v2921_v16 = vpop.f32.mrf.mxu1  ;;  %v4488_v4 = vld [vmem:[%s9686_s0 + $0x2b8] sm:$0xf0]  ;;  %v4494_v30 = vld [vmem:[%s9686_s0 + $0x278] sm:$0xf]  ;;  %v5751_v11 = vor.u32 %v6205_v58, %v5750_v5 }
 0x1aa   :  { %v8206_v7 = vor.u32 %v5882_v42, %v4488_v4 }
 0x1ab   :  { %v8154_v29 = vadd.f32 %v3007_v22, %v2964_v52  ;;  %v2922_v15 = vadd.f32 %v2921_v16, %v2878_v14  ;;  %v5892_v52 = vld [vmem:[%s9686_s0 + $0x2bc] sm:$0xf0]  ;;  %v4731_v22 = vor.u32 %v5948_v41, %v4728_v13  ;;  %v5883_v14 = vld [vmem:[%s9686_s0 + $0x27c] sm:$0xf]  ;;  %v4496_v16 = vld [vmem:[%s9686_s0 + $0x2c0] sm:$0xf0]  ;;  %3258 = vmatpush.bf16.msra.mxu1 %v5751_v11 }
 0x1ac   :  { %9846 = vst [vmem:[#allocation75_spill] sm:$0xff] %v8206_v7  ;;  %v8208_v41 = vor.u32 %v5892_v52, %v4494_v30  ;;  %v8211_v58 = vor.u32 %v5883_v14, %v4496_v16  ;;  %v5678_v11 = vld [vmem:[%s9685_s1 + $0x800] sm:$0xf]  ;;  %v6187_v14 = vld [vmem:[%s9685_s1 + $0x804] sm:$0xf0] }
 0x1ad   :  { %3346 = vmatpush.bf16.msra.mxu3 %v4731_v22  ;;  %v5946_v16 = vld [vmem:[%s9685_s1 + $0x84] sm:$0xf] }
 0x1ae   :  { %9847 = vst [vmem:[#allocation76_spill] sm:$0xff] %v8208_v41 }
 0x1af   :  { %9848 = vst [vmem:[#allocation77_spill] sm:$0xff] %v8211_v58 }
 0x1b0   :  { %v2965_v8 = vpop.f32.mrf.mxu2  ;;  %v2880_v40 = vpop.f32.mrf.mxu0 }
 0x1b1   :  { %v2966_v46 = vadd.f32 %v2965_v8, %v2922_v15  ;;  %v3009_v26 = vpop.f32.mrf.mxu3  ;;  %v2881_v13 = vadd.f32 %v2880_v40, %v7740_v31  ;;  %v2924_v5 = vpop.f32.mrf.mxu1  ;;  %v4656_v40 = vld [vmem:[%s9685_s1 + $0x8] sm:$0xf0] }
 0x1b2   :  { %v4659_v31 = vor.u32 %v5930_v59, %v4656_v40  ;;  %v5900_v59 = vld [vmem:[%s9686_s0 + $0x304] sm:$0xf] }
 0x1b3   :  { %v8213_v51 = vadd.f32 %v3009_v26, %v2966_v46  ;;  %v2925_v27 = vadd.f32 %v2924_v5, %v2881_v13  ;;  %3060 = vmatmul.bf16.gmra.mxu0 %v8204_v12  ;;  %v5679_v46 = vor.u32 %v6187_v14, %v5678_v11  ;;  %v5742_v26 = vld [vmem:[%s9685_s1 + $0x880] sm:$0xf]  ;;  %v6203_v13 = vld [vmem:[%s9685_s1 + $0x884] sm:$0xf0] }
 0x1b4   :  { %3104 = vmatmul.bf16.gmra.mxu1 %v8206_v7  ;;  %3303 = vmatpush.bf16.msra.mxu2 %v4659_v31  ;;  %v4558_v5 = vld [vmem:[%s9686_s0 + $0x300] sm:$0xf]  ;;  %v5743_v31 = vor.u32 %v6203_v13, %v5742_v26 }
 0x1b5   :  { %3148 = vmatmul.bf16.gmra.mxu2 %v8208_v41  ;;  %3215 = vmatpush.bf16.msra.mxu0 %v5679_v46 }
 0x1b6   :  { %3192 = vmatmul.bf16.gmra.mxu3 %v8211_v58  ;;  %3259 = vmatpush.bf16.msra.mxu1 %v5743_v31 }
 0x1b8   :  { %v2968_v45 = vpop.f32.mrf.mxu2  ;;  %v2882_v4 = vpop.f32.mrf.mxu0 }
 0x1b9   :  { %v2969_v15 = vadd.f32 %v2968_v45, %v2925_v27  ;;  %v3012_v42 = vpop.f32.mrf.mxu3  ;;  %v2883_v30 = vadd.f32 %v2882_v4, %v7793_v62  ;;  %v2926_v52 = vpop.f32.mrf.mxu1  ;;  %v4720_v62 = vld [vmem:[%s9685_s1 + $0x88] sm:$0xf0]  ;;  %v5909_v27 = vld [vmem:[%s9686_s0 + $0x344] sm:$0xf0] }
 0x1ba   :  { %v4723_v40 = vor.u32 %v5946_v16, %v4720_v62  ;;  %v4560_v45 = vld [vmem:[%s9686_s0 + $0x348] sm:$0xf0]  ;;  %v8270_v11 = vor.u32 %v5909_v27, %v4558_v5  ;;  %v4840_v27 = vld [vmem:[%s9685_s1 + $0x178] sm:$0xf0] }
 0x1bb   :  { %v8226_v22 = vadd.f32 %v3012_v42, %v2969_v15  ;;  %v2927_v8 = vadd.f32 %v2926_v52, %v2883_v30  ;;  %v4566_v15 = vld [vmem:[%s9686_s0 + $0x308] sm:$0xf]  ;;  %v5910_v42 = vld [vmem:[%s9686_s0 + $0x34c] sm:$0xf0]  ;;  %v5901_v4 = vld [vmem:[%s9686_s0 + $0x30c] sm:$0xf]  ;;  %v8272_v26 = vor.u32 %v5900_v59, %v4560_v45 }
 0x1bc   :  { %v4568_v30 = vld [vmem:[%s9686_s0 + $0x350] sm:$0xf0]  ;;  %3347 = vmatpush.bf16.msra.mxu3 %v4723_v40  ;;  %v8274_v13 = vor.u32 %v5910_v42, %v4566_v15  ;;  %v5032_v40 = vld [vmem:[%s9685_s1 + $0x2f8] sm:$0xf0] }
 0x1bd   :  { %v8277_v41 = vor.u32 %v5901_v4, %v4568_v30  ;;  %v6024_v59 = vld [vmem:[%s9685_s1 + $0x2f4] sm:$0xf] }
 0x1be   :  { %9849 = vst [vmem:[#allocation78_spill] sm:$0xff] %v8274_v13  ;;  %v5035_v15 = vor.u32 %v6024_v59, %v5032_v40  ;;  %v5928_v59 = vld [vmem:[%s9686_s0 + $0x3dc] sm:$0xf0]  ;;  %v5919_v40 = vld [vmem:[%s9686_s0 + $0x39c] sm:$0xf] }
 0x1bf   :  { %9850 = vst [vmem:[#allocation79_spill] sm:$0xff] %v8277_v41 }
 0x1c0   :  { %v2970_v52 = vpop.f32.mrf.mxu2  ;;  %v2885_v62 = vpop.f32.mrf.mxu0  ;;  %3516 = vmatpush.bf16.msrb.mxu3 %v5035_v15 }
 0x1c1   :  { %v2971_v14 = vadd.f32 %v2970_v52, %v2927_v8  ;;  %v3014_v16 = vpop.f32.mrf.mxu3  ;;  %v2886_v46 = vadd.f32 %v2885_v62, %v7818_v34  ;;  %v2929_v58 = vpop.f32.mrf.mxu1  ;;  %v6008_v8 = vld [vmem:[%s9685_s1 + $0x274] sm:$0xf]  ;;  %v4968_v34 = vld [vmem:[%s9685_s1 + $0x278] sm:$0xf0] }
 0x1c2   :  { %v4971_v5 = vor.u32 %v6008_v8, %v4968_v34  ;;  %v5992_v62 = vld [vmem:[%s9685_s1 + $0x1f4] sm:$0xf]  ;;  %v4630_v34 = vld [vmem:[%s9686_s0 + $0x390] sm:$0xf] }
 0x1c3   :  { %v8279_v7 = vadd.f32 %v3014_v16, %v2971_v14  ;;  %v2930_v12 = vadd.f32 %v2929_v58, %v2886_v46  ;;  %3065 = vmatmul.bf16.gmra.mxu0 %v8270_v11  ;;  %v5976_v58 = vld [vmem:[%s9685_s1 + $0x174] sm:$0xf]  ;;  %v4904_v46 = vld [vmem:[%s9685_s1 + $0x1f8] sm:$0xf0] }
 0x1c4   :  { %3109 = vmatmul.bf16.gmra.mxu1 %v8272_v26  ;;  %v4843_v45 = vor.u32 %v5976_v58, %v4840_v27  ;;  %3472 = vmatpush.bf16.msrb.mxu2 %v4971_v5  ;;  %v5918_v58 = vld [vmem:[%s9686_s0 + $0x394] sm:$0xf]  ;;  %v4632_v5 = vld [vmem:[%s9686_s0 + $0x3d8] sm:$0xf0]  ;;  %v4638_v27 = vld [vmem:[%s9686_s0 + $0x398] sm:$0xf] }
 0x1c5   :  { %3153 = vmatmul.bf16.gmra.mxu2 %v8274_v13 }
 0x1c6   :  { %3197 = vmatmul.bf16.gmra.mxu3 %v8277_v41  ;;  %3384 = vmatpush.bf16.msrb.mxu0 %v4843_v45 }
 0x1c8   :  { %v2973_v31 = vpop.f32.mrf.mxu2  ;;  %v2887_v30 = vpop.f32.mrf.mxu0 }
 0x1c9   :  { %v2974_v42 = vadd.f32 %v2973_v31, %v2930_v12  ;;  %v3017_v4 = vpop.f32.mrf.mxu3  ;;  %v2888_v52 = vadd.f32 %v2887_v30, %v7859_v9  ;;  %v2931_v14 = vpop.f32.mrf.mxu1  ;;  %v4907_v12 = vor.u32 %v5992_v62, %v4904_v46  ;;  %v5927_v9 = vld [vmem:[%s9686_s0 + $0x3d4] sm:$0xf0]  ;;  %v4640_v31 = vld [vmem:[%s9686_s0 + $0x3e0] sm:$0xf0] }
 0x1ca   :  { %v8336_v15 = vor.u32 %v5927_v9, %v4630_v34  ;;  %v4960_v34 = vld [vmem:[%s9685_s1 + $0x268] sm:$0xf0]  ;;  %v5974_v9 = vld [vmem:[%s9685_s1 + $0x164] sm:$0xf] }
 0x1cb   :  { %v8304_v16 = vadd.f32 %v3017_v4, %v2974_v42  ;;  %v2932_v8 = vadd.f32 %v2931_v14, %v2888_v52  ;;  %3428 = vmatpush.bf16.msrb.mxu1 %v4907_v12  ;;  %v8338_v52 = vor.u32 %v5918_v58, %v4632_v5  ;;  %v8340_v14 = vor.u32 %v5928_v59, %v4638_v27  ;;  %v4832_v58 = vld [vmem:[%s9685_s1 + $0x168] sm:$0xf0]  ;;  %v6022_v5 = vld [vmem:[%s9685_s1 + $0x2e4] sm:$0xf] }
 0x1cc   :  { %v8343_v12 = vor.u32 %v5919_v40, %v4640_v31  ;;  %v4835_v27 = vor.u32 %v5974_v9, %v4832_v58  ;;  %v5024_v59 = vld [vmem:[%s9685_s1 + $0x2e8] sm:$0xf0]  ;;  %v5990_v40 = vld [vmem:[%s9685_s1 + $0x1e4] sm:$0xf]  ;;  %v4214_v58 = vld [vmem:[%s9686_s0 + $0x40] sm:$0xf] }
 0x1cd   :  { %9851 = vst [vmem:[#allocation80_spill] sm:$0xff] %v8340_v14  ;;  %v4896_v31 = vld [vmem:[%s9685_s1 + $0x1e8] sm:$0xf0] }
 0x1ce   :  { %9852 = vst [vmem:[#allocation81_spill] sm:$0xff] %v8343_v12  ;;  %3385 = vmatpush.bf16.msrb.mxu0 %v4835_v27 }
 0x1d0   :  { %v2975_v45 = vpop.f32.mrf.mxu2  ;;  %v2890_v30 = vpop.f32.mrf.mxu0 }
 0x1d1   :  { %v2976_v42 = vadd.f32 %v2975_v45, %v2932_v8  ;;  %v3019_v4 = vpop.f32.mrf.mxu3  ;;  %v2891_v62 = vadd.f32 %v2890_v30, %v7890_v23  ;;  %v2934_v46 = vpop.f32.mrf.mxu1  ;;  %v6006_v8 = vld [vmem:[%s9685_s1 + $0x264] sm:$0xf] }
 0x1d2   :  { %v4963_v23 = vor.u32 %v6006_v8, %v4960_v34 }
 0x1d3   :  { %v8345_v41 = vadd.f32 %v3019_v4, %v2976_v42  ;;  %v2935_v13 = vadd.f32 %v2934_v46, %v2891_v62  ;;  %3070 = vmatmul.bf16.gmra.mxu0 %v8336_v15  ;;  %v5027_v42 = vor.u32 %v6022_v5, %v5024_v59  ;;  %v4899_v4 = vor.u32 %v5990_v40, %v4896_v31  ;;  %v5821_v5 = vld [vmem:[%s9686_s0 + $0x84] sm:$0xf0] }
 0x1d4   :  { %3114 = vmatmul.bf16.gmra.mxu1 %v8338_v52  ;;  %3473 = vmatpush.bf16.msrb.mxu2 %v4963_v23  ;;  %v8390_v59 = vor.u32 %v5821_v5, %v4214_v58  ;;  %v5972_v58 = vld [vmem:[%s9685_s1 + $0x154] sm:$0xf] }
 0x1d5   :  { %3158 = vmatmul.bf16.gmra.mxu2 %v8340_v14  ;;  %3517 = vmatpush.bf16.msrb.mxu3 %v5027_v42  ;;  %v6020_v5 = vld [vmem:[%s9685_s1 + $0x2d4] sm:$0xf] }
 0x1d6   :  { %3202 = vmatmul.bf16.gmra.mxu3 %v8343_v12  ;;  %3429 = vmatpush.bf16.msrb.mxu1 %v4899_v4 }
 0x1d8   :  { %v2978_v45 = vpop.f32.mrf.mxu2  ;;  %v2892_v46 = vpop.f32.mrf.mxu0 }
 0x1d9   :  { %v2979_v30 = vadd.f32 %v2978_v45, %v2935_v13  ;;  %v3022_v62 = vpop.f32.mrf.mxu3  ;;  %v2893_v8 = vadd.f32 %v2892_v46, %v7925_v28  ;;  %v2936_v34 = vpop.f32.mrf.mxu1  ;;  %v5812_v13 = vld [vmem:[%s9686_s0 + $0x44] sm:$0xf]  ;;  %v4216_v28 = vld [vmem:[%s9686_s0 + $0x88] sm:$0xf0]  ;;  %v6004_v46 = vld [vmem:[%s9685_s1 + $0x254] sm:$0xf] }
 0x1da   :  { %v8392_v42 = vor.u32 %v5812_v13, %v4216_v28  ;;  %v5016_v28 = vld [vmem:[%s9685_s1 + $0x2d8] sm:$0xf0] }
 0x1db   :  { %v8376_v23 = vadd.f32 %v3022_v62, %v2979_v30  ;;  %v2937_v9 = vadd.f32 %v2936_v34, %v2893_v8  ;;  %v4952_v8 = vld [vmem:[%s9685_s1 + $0x258] sm:$0xf0] }
 0x1e0   :  { %v2980_v27 = vpop.f32.mrf.mxu2  ;;  %v2895_v45 = vpop.f32.mrf.mxu0 }
 0x1e1   :  { %v2981_v40 = vadd.f32 %v2980_v27, %v2937_v9  ;;  %v3024_v31 = vpop.f32.mrf.mxu3  ;;  %v2896_v4 = vadd.f32 %v2895_v45, %v7956_v10  ;;  %v2939_v30 = vpop.f32.mrf.mxu1  ;;  %v4955_v9 = vor.u32 %v6004_v46, %v4952_v8  ;;  %v4824_v10 = vld [vmem:[%s9685_s1 + $0x158] sm:$0xf0]  ;;  %v5019_v27 = vor.u32 %v6020_v5, %v5016_v28  ;;  %v4944_v5 = vld [vmem:[%s9685_s1 + $0x248] sm:$0xf0]  ;;  %v5830_v28 = vld [vmem:[%s9686_s0 + $0xd4] sm:$0xf] }
 0x1e2   :  { %v4827_v13 = vor.u32 %v5972_v58, %v4824_v10  ;;  %v6002_v10 = vld [vmem:[%s9685_s1 + $0x244] sm:$0xf] }
 0x1e3   :  { %v8395_v62 = vadd.f32 %v3024_v31, %v2981_v40  ;;  %v2940_v34 = vadd.f32 %v2939_v30, %v2896_v4  ;;  %3216 = vmatmul.bf16.vlgmr.msra.gmra.mxu0 %v8390_v59  ;;  %3474 = vmatpush.bf16.msrb.mxu2 %v4955_v9  ;;  %v5988_v40 = vld [vmem:[%s9685_s1 + $0x1d4] sm:$0xf]  ;;  %v4888_v31 = vld [vmem:[%s9685_s1 + $0x1d8] sm:$0xf0] }
 0x1e4   :  { %3260 = vmatmul.bf16.vlgmr.msra.gmra.mxu1 %v8392_v42  ;;  %3386 = vmatpush.bf16.msrb.mxu0 %v4827_v13  ;;  %v4891_v45 = vor.u32 %v5988_v40, %v4888_v31  ;;  %v4947_v13 = vor.u32 %v6002_v10, %v4944_v5  ;;  %v5970_v10 = vld [vmem:[%s9685_s1 + $0x144] sm:$0xf]  ;;  %v4816_v5 = vld [vmem:[%s9685_s1 + $0x148] sm:$0xf0] }
 0x1e5   :  { %3304 = vmatmul.bf16.vlgmr.msra.gmra.mxu2 %v6476_v48  ;;  %3518 = vmatpush.bf16.msrb.mxu3 %v5019_v27  ;;  %v4288_v27 = vld [vmem:[%s9686_s0 + $0x118] sm:$0xf0] }
 0x1e6   :  { %3348 = vmatmul.bf16.vlgmr.msra.gmra.mxu3 %v6487_v53  ;;  %3430 = vmatpush.bf16.msrb.mxu1 %v4891_v45 }
 0x1e7   :  { %3475 = vmatpush.bf16.msrb.mxu2 %v4947_v13  ;;  %v5986_v13 = vld [vmem:[%s9685_s1 + $0x1c4] sm:$0xf] }
 0x1e8   :  { %v2983_v48 = vpop.f32.mrf.mxu2  ;;  %v2897_v46 = vpop.f32.mrf.mxu0 }
 0x1e9   :  { %v2984_v4 = vadd.f32 %v2983_v48, %v2940_v34  ;;  %v3027_v30 = vpop.f32.mrf.mxu3  ;;  %v2898_v53 = vadd.f32 %v2897_v46, %v7997_v49  ;;  %v2941_v8 = vpop.f32.mrf.mxu1  ;;  %v4286_v34 = vld [vmem:[%s9686_s0 + $0xd0] sm:$0xf]  ;;  %v5839_v49 = vld [vmem:[%s9686_s0 + $0x114] sm:$0xf0] }
 0x1ea   :  { %v8446_v31 = vor.u32 %v5839_v49, %v4286_v34  ;;  %v4819_v49 = vor.u32 %v5970_v10, %v4816_v5 }
 0x1eb   :  { %v8426_v9 = vadd.f32 %v3027_v30, %v2984_v4  ;;  %v2942_v58 = vadd.f32 %v2941_v8, %v2898_v53  ;;  %v8448_v30 = vor.u32 %v5830_v28, %v4288_v27  ;;  %v4880_v28 = vld [vmem:[%s9685_s1 + $0x1c8] sm:$0xf0] }
 0x1ec   :  { %9853 = vst [vmem:[#allocation82_spill] sm:$0xff] %v8446_v31  ;;  %3387 = vmatpush.bf16.msrb.mxu0 %v4819_v49  ;;  %v5968_v49 = vld [vmem:[%s9685_s1 + $0x134] sm:$0xf] }
 0x1ed   :  { %9854 = vst [vmem:[#allocation83_spill] sm:$0xff] %v8448_v30 }
 0x1f0   :  { %v2985_v40 = vpop.f32.mrf.mxu2  ;;  %v3041_v4 = vpop.f32.mrf.mxu0 }
 0x1f1   :  { %v2986_v45 = vadd.f32 %v2985_v40, %v2942_v58  ;;  %v3029_v48 = vpop.f32.mrf.mxu3  ;;  %v3042_v46 = vadd.f32 %v3041_v4, %v8022_v44  ;;  %v3085_v53 = vpop.f32.mrf.mxu1  ;;  %v6018_v58 = vld [vmem:[%s9685_s1 + $0x2c4] sm:$0xf]  ;;  %v5008_v44 = vld [vmem:[%s9685_s1 + $0x2c8] sm:$0xf0]  ;;  %v4883_v40 = vor.u32 %v5986_v13, %v4880_v28  ;;  %v4808_v13 = vld [vmem:[%s9685_s1 + $0x138] sm:$0xf0] }
 0x1f2   :  { %v5011_v27 = vor.u32 %v6018_v58, %v5008_v44  ;;  %v6016_v28 = vld [vmem:[%s9685_s1 + $0x2b4] sm:$0xf] }
 0x1f3   :  { %v8451_v8 = vadd.f32 %v3029_v48, %v2986_v45  ;;  %v3086_v34 = vadd.f32 %v3085_v53, %v3042_v46  ;;  %3221 = vmatmul.bf16.gmra.mxu0 %v8446_v31  ;;  %3431 = vmatpush.bf16.msrb.mxu1 %v4883_v40  ;;  %v5848_v40 = vld [vmem:[%s9686_s0 + $0x164] sm:$0xf] }
 0x1f4   :  { %3265 = vmatmul.bf16.gmra.mxu1 %v8448_v30  ;;  %3519 = vmatpush.bf16.msrb.mxu3 %v5011_v27  ;;  %v5000_v27 = vld [vmem:[%s9685_s1 + $0x2b8] sm:$0xf0] }
 0x1f5   :  { %3309 = vmatmul.bf16.gmra.mxu2 %v6587_v36  ;;  %v4358_v36 = vld [vmem:[%s9686_s0 + $0x160] sm:$0xf] }
 0x1f6   :  { %3353 = vmatmul.bf16.gmra.mxu3 %v6589_v37  ;;  %v5857_v37 = vld [vmem:[%s9686_s0 + $0x1a4] sm:$0xf0] }
 0x1f8   :  { %v3129_v45 = vpop.f32.mrf.mxu2  ;;  %v3043_v46 = vpop.f32.mrf.mxu0 }
 0x1f9   :  { %v3130_v48 = vadd.f32 %v3129_v45, %v3086_v34  ;;  %v3173_v4 = vpop.f32.mrf.mxu3  ;;  %v3044_v53 = vadd.f32 %v3043_v46, %v8075_v35  ;;  %v3087_v10 = vpop.f32.mrf.mxu1  ;;  %v6000_v34 = vld [vmem:[%s9685_s1 + $0x234] sm:$0xf]  ;;  %v4936_v35 = vld [vmem:[%s9685_s1 + $0x238] sm:$0xf0]  ;;  %v4360_v45 = vld [vmem:[%s9686_s0 + $0x1a8] sm:$0xf0] }
 0x1fa   :  { %v4939_v44 = vor.u32 %v6000_v34, %v4936_v35  ;;  %v8510_v12 = vor.u32 %v5848_v40, %v4360_v45 }
 0x1fb   :  { %v8476_v5 = vadd.f32 %v3173_v4, %v3130_v48  ;;  %v3088_v58 = vadd.f32 %v3087_v10, %v3044_v53  ;;  %v4811_v48 = vor.u32 %v5968_v49, %v4808_v13  ;;  %v5003_v4 = vor.u32 %v6016_v28, %v5000_v27  ;;  %v5984_v49 = vld [vmem:[%s9685_s1 + $0x1b4] sm:$0xf] }
 0x1fc   :  { %3476 = vmatpush.bf16.msrb.mxu2 %v4939_v44  ;;  %v8508_v53 = vor.u32 %v5857_v37, %v4358_v36  ;;  %v4872_v36 = vld [vmem:[%s9685_s1 + $0x1b8] sm:$0xf0] }
 0x1fd   :  { %3388 = vmatpush.bf16.msrb.mxu0 %v4811_v48  ;;  %3520 = vmatpush.bf16.msrb.mxu3 %v5003_v4  ;;  %v4928_v48 = vld [vmem:[%s9685_s1 + $0x228] sm:$0xf0]  ;;  %v5966_v4 = vld [vmem:[%s9685_s1 + $0x124] sm:$0xf] }
 0x200   :  { %v3131_v46 = vpop.f32.mrf.mxu2  ;;  %v3046_v35 = vpop.f32.mrf.mxu0 }
 0x201   :  { %v3132_v10 = vadd.f32 %v3131_v46, %v3088_v58  ;;  %v3175_v34 = vpop.f32.mrf.mxu3  ;;  %v3047_v14 = vadd.f32 %v3046_v35, %v8088_v47  ;;  %v3090_v30 = vpop.f32.mrf.mxu1  ;;  %v4875_v58 = vor.u32 %v5984_v49, %v4872_v36  ;;  %v4992_v35 = vld [vmem:[%s9685_s1 + $0x2a8] sm:$0xf0]  ;;  %v4432_v49 = vld [vmem:[%s9686_s0 + $0x238] sm:$0xf0] }
 0x203   :  { %v8513_v31 = vadd.f32 %v3175_v34, %v3132_v10  ;;  %v3091_v37 = vadd.f32 %v3090_v30, %v3047_v14  ;;  %3226 = vmatmul.bf16.gmra.mxu0 %v8508_v53  ;;  %3432 = vmatpush.bf16.msrb.mxu1 %v4875_v58  ;;  %v4430_v14 = vld [vmem:[%s9686_s0 + $0x1f0] sm:$0xf]  ;;  %v4800_v10 = vld [vmem:[%s9685_s1 + $0x128] sm:$0xf0]  ;;  %v6014_v34 = vld [vmem:[%s9685_s1 + $0x2a4] sm:$0xf] }
 0x204   :  { %3270 = vmatmul.bf16.gmra.mxu1 %v8510_v12  ;;  %v4803_v36 = vor.u32 %v5966_v4, %v4800_v10  ;;  %v5982_v58 = vld [vmem:[%s9685_s1 + $0x1a4] sm:$0xf] }
 0x205   :  { %3314 = vmatmul.bf16.gmra.mxu2 %v6647_v0  ;;  %v5875_v0 = vld [vmem:[%s9686_s0 + $0x234] sm:$0xf0] }
 0x206   :  { %3358 = vmatmul.bf16.gmra.mxu3 %v6649_v1  ;;  %v5866_v1 = vld [vmem:[%s9686_s0 + $0x1f4] sm:$0xf]  ;;  %3389 = vmatpush.bf16.msrb.mxu0 %v4803_v36  ;;  %v4502_v36 = vld [vmem:[%s9686_s0 + $0x280] sm:$0xf] }
 0x208   :  { %v3134_v47 = vpop.f32.mrf.mxu2  ;;  %v3048_v28 = vpop.f32.mrf.mxu0 }
 0x209   :  { %v3135_v44 = vadd.f32 %v3134_v47, %v3091_v37  ;;  %v3178_v13 = vpop.f32.mrf.mxu3  ;;  %v3049_v27 = vadd.f32 %v3048_v28, %v8147_v63  ;;  %v3092_v40 = vpop.f32.mrf.mxu1  ;;  %v5998_v63 = vld [vmem:[%s9685_s1 + $0x224] sm:$0xf]  ;;  %v4995_v37 = vor.u32 %v6014_v34, %v4992_v35  ;;  %v4864_v47 = vld [vmem:[%s9685_s1 + $0x1a8] sm:$0xf0]  ;;  %v8564_v28 = vor.u32 %v5875_v0, %v4430_v14 }
 0x20a   :  { %v4931_v46 = vor.u32 %v5998_v63, %v4928_v48  ;;  %v8566_v48 = vor.u32 %v5866_v1, %v4432_v49 }
 0x20b   :  { %v8526_v45 = vadd.f32 %v3178_v13, %v3135_v44  ;;  %v3093_v30 = vadd.f32 %v3092_v40, %v3049_v27  ;;  %v4867_v44 = vor.u32 %v5982_v58, %v4864_v47  ;;  %9855 = vst [vmem:[#allocation84_spill] sm:$0xff] %v8564_v28  ;;  %3521 = vmatpush.bf16.msrb.mxu3 %v4995_v37  ;;  %v5893_v37 = vld [vmem:[%s9686_s0 + $0x2c4] sm:$0xf0]  ;;  %v5964_v47 = vld [vmem:[%s9685_s1 + $0x114] sm:$0xf] }
 0x20c   :  { %3477 = vmatpush.bf16.msrb.mxu2 %v4931_v46  ;;  %9856 = vst [vmem:[#allocation85_spill] sm:$0xff] %v8566_v48 }
 0x20d   :  { %3433 = vmatpush.bf16.msrb.mxu1 %v4867_v44  ;;  %v4792_v44 = vld [vmem:[%s9685_s1 + $0x118] sm:$0xf0] }
 0x210   :  { %v3136_v13 = vpop.f32.mrf.mxu2  ;;  %v3051_v63 = vpop.f32.mrf.mxu0 }
 0x211   :  { %v3137_v27 = vadd.f32 %v3136_v13, %v3093_v30  ;;  %v3180_v40 = vpop.f32.mrf.mxu3  ;;  %v3052_v4 = vadd.f32 %v3051_v63, %v8154_v29  ;;  %v3095_v10 = vpop.f32.mrf.mxu1  ;;  %v6012_v13 = vld [vmem:[%s9685_s1 + $0x294] sm:$0xf] }
 0x212   :  { %v5980_v63 = vld [vmem:[%s9685_s1 + $0x194] sm:$0xf] }
 0x213   :  { %v8569_v34 = vadd.f32 %v3180_v40, %v3137_v27  ;;  %v3096_v35 = vadd.f32 %v3095_v10, %v3052_v4  ;;  %3231 = vmatmul.bf16.gmra.mxu0 %v8564_v28  ;;  %v4795_v27 = vor.u32 %v5964_v47, %v4792_v44  ;;  %v4984_v40 = vld [vmem:[%s9685_s1 + $0x298] sm:$0xf0]  ;;  %v5884_v10 = vld [vmem:[%s9686_s0 + $0x284] sm:$0xf] }
 0x214   :  { %3275 = vmatmul.bf16.gmra.mxu1 %v8566_v48  ;;  %v4856_v4 = vld [vmem:[%s9685_s1 + $0x198] sm:$0xf0] }
 0x215   :  { %3319 = vmatmul.bf16.gmra.mxu2 %v6707_v24  ;;  %v5996_v24 = vld [vmem:[%s9685_s1 + $0x214] sm:$0xf]  ;;  %3390 = vmatpush.bf16.msrb.mxu0 %v4795_v27 }
 0x216   :  { %3363 = vmatmul.bf16.gmra.mxu3 %v6709_v25  ;;  %v4920_v25 = vld [vmem:[%s9685_s1 + $0x218] sm:$0xf0] }
 0x217   :  { %v4923_v58 = vor.u32 %v5996_v24, %v4920_v25 }
 0x218   :  { %v3139_v14 = vpop.f32.mrf.mxu2  ;;  %v3053_v1 = vpop.f32.mrf.mxu0 }
 0x219   :  { %v3140_v0 = vadd.f32 %v3139_v14, %v3096_v35  ;;  %v3183_v30 = vpop.f32.mrf.mxu3  ;;  %v3054_v46 = vadd.f32 %v3053_v1, %v8213_v51  ;;  %v3097_v49 = vpop.f32.mrf.mxu1  ;;  %v4504_v35 = vld [vmem:[%s9686_s0 + $0x2c8] sm:$0xf0]  ;;  %3478 = vmatpush.bf16.msrb.mxu2 %v4923_v58  ;;  %v4987_v14 = vor.u32 %v6012_v13, %v4984_v40  ;;  %v8614_v1 = vor.u32 %v5893_v37, %v4502_v36  ;;  %v5994_v36 = vld [vmem:[%s9685_s1 + $0x204] sm:$0xf] }
 0x21a   :  { %v8616_v25 = vor.u32 %v5884_v10, %v4504_v35 }
 0x21b   :  { %v8576_v29 = vadd.f32 %v3183_v30, %v3140_v0  ;;  %v3098_v51 = vadd.f32 %v3097_v49, %v3054_v46  ;;  %v4859_v0 = vor.u32 %v5980_v63, %v4856_v4  ;;  %3522 = vmatpush.bf16.msrb.mxu3 %v4987_v14  ;;  %v4784_v4 = vld [vmem:[%s9685_s1 + $0x108] sm:$0xf0]  ;;  %v5978_v14 = vld [vmem:[%s9685_s1 + $0x184] sm:$0xf] }
 0x21d   :  { %3434 = vmatpush.bf16.msrb.mxu1 %v4859_v0  ;;  %v4848_v0 = vld [vmem:[%s9685_s1 + $0x188] sm:$0xf0] }
 0x220   :  { %v3141_v30 = vpop.f32.mrf.mxu2  ;;  %v3056_v24 = vpop.f32.mrf.mxu0 }
 0x221   :  { %v3142_v46 = vadd.f32 %v3141_v30, %v3098_v51  ;;  %v3185_v49 = vpop.f32.mrf.mxu3  ;;  %v3057_v47 = vadd.f32 %v3056_v24, %v8226_v22  ;;  %v3100_v44 = vpop.f32.mrf.mxu1  ;;  %v4912_v22 = vld [vmem:[%s9685_s1 + $0x208] sm:$0xf0]  ;;  %v4574_v30 = vld [vmem:[%s9686_s0 + $0x310] sm:$0xf]  ;;  %v4851_v24 = vor.u32 %v5978_v14, %v4848_v0 }
 0x222   :  { %v4915_v37 = vor.u32 %v5994_v36, %v4912_v22 }
 0x223   :  { %v8619_v48 = vadd.f32 %v3185_v49, %v3142_v46  ;;  %v3101_v28 = vadd.f32 %v3100_v44, %v3057_v47  ;;  %3236 = vmatmul.bf16.gmra.mxu0 %v8614_v1  ;;  %v5911_v46 = vld [vmem:[%s9686_s0 + $0x354] sm:$0xf0]  ;;  %v5902_v47 = vld [vmem:[%s9686_s0 + $0x314] sm:$0xf]  ;;  %v4576_v44 = vld [vmem:[%s9686_s0 + $0x358] sm:$0xf0]  ;;  %3435 = vmatpush.bf16.msrb.mxu1 %v4851_v24 }
 0x224   :  { %3280 = vmatmul.bf16.gmra.mxu1 %v8616_v25  ;;  %3479 = vmatpush.bf16.msrb.mxu2 %v4915_v37  ;;  %v8664_v22 = vor.u32 %v5911_v46, %v4574_v30 }
 0x225   :  { %3324 = vmatmul.bf16.gmra.mxu2 %v6767_v55 }
 0x226   :  { %3368 = vmatmul.bf16.gmra.mxu3 %v6769_v56  ;;  %v5962_v56 = vld [vmem:[%s9685_s1 + $0x104] sm:$0xf] }
 0x227   :  { %v4787_v35 = vor.u32 %v5962_v56, %v4784_v4  ;;  %v6072_v4 = vld [vmem:[%s9685_s1 + $0x474] sm:$0xf] }
 0x228   :  { %v3144_v51 = vpop.f32.mrf.mxu2  ;;  %v3058_v27 = vpop.f32.mrf.mxu0 }
 0x229   :  { %v3145_v58 = vadd.f32 %v3144_v51, %v3101_v28  ;;  %v3188_v13 = vpop.f32.mrf.mxu3  ;;  %v3059_v40 = vadd.f32 %v3058_v27, %v8279_v7  ;;  %v3102_v63 = vpop.f32.mrf.mxu1  ;;  %v6010_v28 = vld [vmem:[%s9685_s1 + $0x284] sm:$0xf]  ;;  %v4976_v7 = vld [vmem:[%s9685_s1 + $0x288] sm:$0xf0]  ;;  %3391 = vmatpush.bf16.msrb.mxu0 %v4787_v35  ;;  %v5096_v35 = vld [vmem:[%s9685_s1 + $0x378] sm:$0xf0] }
 0x22a   :  { %v4979_v49 = vor.u32 %v6010_v28, %v4976_v7  ;;  %v6040_v28 = vld [vmem:[%s9685_s1 + $0x374] sm:$0xf] }
 0x22b   :  { %v8632_v55 = vadd.f32 %v3188_v13, %v3145_v58  ;;  %v3103_v10 = vadd.f32 %v3102_v63, %v3059_v40  ;;  %v8666_v13 = vor.u32 %v5902_v47, %v4576_v44  ;;  %v5099_v14 = vor.u32 %v6040_v28, %v5096_v35 }
 0x22c   :  { %3523 = vmatpush.bf16.msrb.mxu3 %v4979_v49 }
 0x22d   :  { %3560 = vmatpush.bf16.msra.mxu0 %v5099_v14 }
 0x230   :  { %v3146_v36 = vpop.f32.mrf.mxu2  ;;  %v3061_v58 = vpop.f32.mrf.mxu0 }
 0x231   :  { %v3147_v37 = vadd.f32 %v3146_v36, %v3103_v10  ;;  %v3190_v51 = vpop.f32.mrf.mxu3  ;;  %v3062_v27 = vadd.f32 %v3061_v58, %v8304_v16  ;;  %v3105_v40 = vpop.f32.mrf.mxu1  ;;  %v5224_v16 = vld [vmem:[%s9685_s1 + $0x478] sm:$0xf0]  ;;  %v6056_v36 = vld [vmem:[%s9685_s1 + $0x3f4] sm:$0xf] }
 0x232   :  { %v5227_v10 = vor.u32 %v6072_v4, %v5224_v16 }
 0x233   :  { %v8669_v63 = vadd.f32 %v3190_v51, %v3147_v37  ;;  %v3106_v56 = vadd.f32 %v3105_v40, %v3062_v27  ;;  %3241 = vmatmul.bf16.gmra.mxu0 %v8664_v22  ;;  %v5160_v37 = vld [vmem:[%s9685_s1 + $0x3f8] sm:$0xf0]  ;;  %v4646_v27 = vld [vmem:[%s9686_s0 + $0x3a0] sm:$0xf]  ;;  %v5920_v40 = vld [vmem:[%s9686_s0 + $0x3a4] sm:$0xf] }
 0x234   :  { %3285 = vmatmul.bf16.gmra.mxu1 %v8666_v13  ;;  %3648 = vmatpush.bf16.msra.mxu2 %v5227_v10  ;;  %v5163_v58 = vor.u32 %v6056_v36, %v5160_v37 }
 0x235   :  { %3329 = vmatmul.bf16.gmra.mxu2 %v6827_v20  ;;  %v6088_v20 = vld [vmem:[%s9685_s1 + $0x4f4] sm:$0xf] }
 0x236   :  { %3373 = vmatmul.bf16.gmra.mxu3 %v6829_v21  ;;  %v5288_v21 = vld [vmem:[%s9685_s1 + $0x4f8] sm:$0xf0]  ;;  %3604 = vmatpush.bf16.msra.mxu1 %v5163_v58  ;;  %v5152_v58 = vld [vmem:[%s9685_s1 + $0x3e8] sm:$0xf0] }
 0x237   :  { %v5291_v0 = vor.u32 %v6088_v20, %v5288_v21 }
 0x238   :  { %v3149_v7 = vpop.f32.mrf.mxu2  ;;  %v3063_v49 = vpop.f32.mrf.mxu0 }
 0x239   :  { %v3150_v30 = vadd.f32 %v3149_v7, %v3106_v56  ;;  %v3193_v46 = vpop.f32.mrf.mxu3  ;;  %v3064_v24 = vadd.f32 %v3063_v49, %v8345_v41  ;;  %v3107_v47 = vpop.f32.mrf.mxu1  ;;  %3692 = vmatpush.bf16.msra.mxu3 %v5291_v0  ;;  %v5929_v41 = vld [vmem:[%s9686_s0 + $0x3e4] sm:$0xf0]  ;;  %v4648_v56 = vld [vmem:[%s9686_s0 + $0x3e8] sm:$0xf0] }
 0x23a   :  { %v8714_v16 = vor.u32 %v5929_v41, %v4646_v27  ;;  %v8716_v20 = vor.u32 %v5920_v40, %v4648_v56 }
 0x23b   :  { %v8694_v44 = vadd.f32 %v3193_v46, %v3150_v30  ;;  %v3108_v51 = vadd.f32 %v3107_v47, %v3064_v24  ;;  %v6070_v30 = vld [vmem:[%s9685_s1 + $0x464] sm:$0xf]  ;;  %v5088_v24 = vld [vmem:[%s9685_s1 + $0x368] sm:$0xf0] }
 0x23c   :  { %v6038_v46 = vld [vmem:[%s9685_s1 + $0x364] sm:$0xf] }
 0x23d   :  { %v5091_v36 = vor.u32 %v6038_v46, %v5088_v24 }
 0x23f   :  { %3561 = vmatpush.bf16.msra.mxu0 %v5091_v36 }
 0x240   :  { %v3151_v4 = vpop.f32.mrf.mxu2  ;;  %v3066_v35 = vpop.f32.mrf.mxu0 }
 0x241   :  { %v3152_v28 = vadd.f32 %v3151_v4, %v3108_v51  ;;  %v3195_v10 = vpop.f32.mrf.mxu3  ;;  %v3067_v21 = vadd.f32 %v3066_v35, %v8376_v23  ;;  %v3110_v7 = vpop.f32.mrf.mxu1  ;;  %v5216_v23 = vld [vmem:[%s9685_s1 + $0x468] sm:$0xf0]  ;;  %v6054_v51 = vld [vmem:[%s9685_s1 + $0x3e4] sm:$0xf] }
 0x242   :  { %v5219_v49 = vor.u32 %v6070_v30, %v5216_v23  ;;  %v5155_v56 = vor.u32 %v6054_v51, %v5152_v58 }
 0x243   :  { %v8719_v14 = vadd.f32 %v3195_v10, %v3152_v28  ;;  %v3111_v0 = vadd.f32 %v3110_v7, %v3067_v21  ;;  %3246 = vmatmul.bf16.gmra.mxu0 %v8714_v16 }
 0x244   :  { %3290 = vmatmul.bf16.gmra.mxu1 %v8716_v20  ;;  %3649 = vmatpush.bf16.msra.mxu2 %v5219_v49  ;;  %v5208_v49 = vld [vmem:[%s9685_s1 + $0x458] sm:$0xf0] }
 0x245   :  { %3334 = vmatmul.bf16.gmra.mxu2 %v6887_v60  ;;  %v6086_v60 = vld [vmem:[%s9685_s1 + $0x4e4] sm:$0xf]  ;;  %3605 = vmatpush.bf16.msra.mxu1 %v5155_v56 }
 0x246   :  { %3378 = vmatmul.bf16.gmra.mxu3 %v6889_v61  ;;  %v5280_v61 = vld [vmem:[%s9685_s1 + $0x4e8] sm:$0xf0] }
 0x247   :  { %v5283_v37 = vor.u32 %v6086_v60, %v5280_v61 }
 0x248   :  { %v3154_v47 = vpop.f32.mrf.mxu2  ;;  %v3068_v40 = vpop.f32.mrf.mxu0 }
 0x249   :  { %v3155_v27 = vadd.f32 %v3154_v47, %v3111_v0  ;;  %v3198_v41 = vpop.f32.mrf.mxu3  ;;  %v3069_v4 = vadd.f32 %v3068_v40, %v8395_v62  ;;  %v3112_v28 = vpop.f32.mrf.mxu1  ;;  %3693 = vmatpush.bf16.msra.mxu3 %v5283_v37  ;;  %v6068_v62 = vld [vmem:[%s9685_s1 + $0x454] sm:$0xf]  ;;  %v5080_v47 = vld [vmem:[%s9685_s1 + $0x358] sm:$0xf0] }
 0x24a   :  { %v5211_v61 = vor.u32 %v6068_v62, %v5208_v49 }
 0x24b   :  { %v8750_v10 = vadd.f32 %v3198_v41, %v3155_v27  ;;  %v3113_v35 = vadd.f32 %v3112_v28, %v3069_v4 }
 0x24c   :  { %3650 = vmatpush.bf16.msra.mxu2 %v5211_v61  ;;  %v6034_v61 = vld [vmem:[%s9685_s1 + $0x344] sm:$0xf] }
 0x250   :  { %v3156_v21 = vpop.f32.mrf.mxu2  ;;  %v3071_v23 = vpop.f32.mrf.mxu0 }
 0x251   :  { %v3157_v7 = vadd.f32 %v3156_v21, %v3113_v35  ;;  %v3200_v30 = vpop.f32.mrf.mxu3  ;;  %v3072_v46 = vadd.f32 %v3071_v23, %v8426_v9  ;;  %v3115_v0 = vpop.f32.mrf.mxu1  ;;  %v6036_v9 = vld [vmem:[%s9685_s1 + $0x354] sm:$0xf]  ;;  %v6066_v21 = vld [vmem:[%s9685_s1 + $0x444] sm:$0xf] }
 0x252   :  { %v5083_v36 = vor.u32 %v6036_v9, %v5080_v47  ;;  %v5072_v9 = vld [vmem:[%s9685_s1 + $0x348] sm:$0xf0]  ;;  %v6082_v47 = vld [vmem:[%s9685_s1 + $0x4c4] sm:$0xf] }
 0x253   :  { %v8753_v24 = vadd.f32 %v3200_v30, %v3157_v7  ;;  %v3116_v60 = vadd.f32 %v3115_v0, %v3072_v46  ;;  %3392 = vmatmul.bf16.vlgmr.msrb.gmra.mxu0 %v6489_v54  ;;  %v6084_v54 = vld [vmem:[%s9685_s1 + $0x4d4] sm:$0xf]  ;;  %v5200_v7 = vld [vmem:[%s9685_s1 + $0x448] sm:$0xf0] }
 0x254   :  { %3436 = vmatmul.bf16.vlgmr.msrb.gmra.mxu1 %v6497_v57  ;;  %v5272_v57 = vld [vmem:[%s9685_s1 + $0x4d8] sm:$0xf0]  ;;  %3562 = vmatpush.bf16.msra.mxu0 %v5083_v36  ;;  %v5203_v30 = vor.u32 %v6066_v21, %v5200_v7  ;;  %v5264_v36 = vld [vmem:[%s9685_s1 + $0x4c8] sm:$0xf0]  ;;  %v6032_v7 = vld [vmem:[%s9685_s1 + $0x334] sm:$0xf] }
 0x255   :  { %3480 = vmatmul.bf16.vlgmr.msrb.gmra.mxu2 %v6947_v32  ;;  %v6052_v32 = vld [vmem:[%s9685_s1 + $0x3d4] sm:$0xf]  ;;  %v5275_v51 = vor.u32 %v6084_v54, %v5272_v57  ;;  %v6218_v57 = vld [vmem:[%s9687_s2] sm:$0x3] }
 0x256   :  { %3524 = vmatmul.bf16.vlgmr.msrb.gmra.mxu3 %v6949_v33  ;;  %v5144_v33 = vld [vmem:[%s9685_s1 + $0x3d8] sm:$0xf0]  ;;  %3651 = vmatpush.bf16.msra.mxu2 %v5203_v30  ;;  %v6080_v30 = vld [vmem:[%s9685_s1 + $0x4b4] sm:$0xf] }
 0x257   :  { %v5147_v58 = vor.u32 %v6052_v32, %v5144_v33  ;;  %3694 = vmatpush.bf16.msra.mxu3 %v5275_v51  ;;  %v8815_v32 = vperm.slane %v6218_v57, 1  ;;  %v5267_v33 = vor.u32 %v6082_v47, %v5264_v36  ;;  %v6048_v36 = vld [vmem:[%s9685_s1 + $0x3b4] sm:$0xf]  ;;  %v5128_v57 = vld [vmem:[%s9685_s1 + $0x3b8] sm:$0xf0] }
 0x258   :  { %v3159_v37 = vpop.f32.mrf.mxu2  ;;  %v3073_v40 = vpop.f32.mrf.mxu0 }
 0x259   :  { %v3160_v27 = vadd.f32 %v3159_v37, %v3116_v60  ;;  %v3203_v41 = vpop.f32.mrf.mxu3  ;;  %v3074_v56 = vadd.f32 %v3073_v40, %v8451_v8  ;;  %v3117_v4 = vpop.f32.mrf.mxu1  ;;  %3606 = vmatpush.bf16.msra.mxu1 %v5147_v58 }
 0x25b   :  { %v8784_v28 = vadd.f32 %v3203_v41, %v3160_v27  ;;  %v3118_v35 = vadd.f32 %v3117_v4, %v3074_v56  ;;  %3695 = vmatpush.bf16.msra.mxu3 %v5267_v33  ;;  %v6064_v4 = vld [vmem:[%s9685_s1 + $0x434] sm:$0xf] }
 0x260   :  { %v3161_v23 = vpop.f32.mrf.mxu2  ;;  %v3217_v62 = vpop.f32.mrf.mxu0 }
 0x261   :  { %v3162_v46 = vadd.f32 %v3161_v23, %v3118_v35  ;;  %v3205_v0 = vpop.f32.mrf.mxu3  ;;  %v3218_v8 = vadd.f32 %v3217_v62, %v8476_v5  ;;  %v3261_v49 = vpop.f32.mrf.mxu1  ;;  %v5075_v5 = vor.u32 %v6034_v61, %v5072_v9  ;;  %v5192_v35 = vld [vmem:[%s9685_s1 + $0x438] sm:$0xf0] }
 0x262   :  { %v5195_v21 = vor.u32 %v6064_v4, %v5192_v35 }
 0x263   :  { %v8793_v60 = vadd.f32 %v3205_v0, %v3162_v46  ;;  %v8804_v54 = vadd.f32 %v3261_v49, %v3218_v8  ;;  %3397 = vmatmul.bf16.gmra.mxu0 %v6591_v38  ;;  %v6050_v38 = vld [vmem:[%s9685_s1 + $0x3c4] sm:$0xf]  ;;  %v5256_v0 = vld [vmem:[%s9685_s1 + $0x4b8] sm:$0xf0] }
 0x264   :  { %3441 = vmatmul.bf16.gmra.mxu1 %v6593_v39  ;;  %3563 = vmatpush.bf16.msra.mxu0 %v5075_v5  ;;  %v5136_v39 = vld [vmem:[%s9685_s1 + $0x3c8] sm:$0xf0]  ;;  %v5259_v61 = vor.u32 %v6080_v30, %v5256_v0 }
 0x265   :  { %3485 = vmatmul.bf16.gmra.mxu2 %v7018_v17  ;;  %v5139_v17 = vor.u32 %v6050_v38, %v5136_v39  ;;  %v5131_v38 = vor.u32 %v6048_v36, %v5128_v57  ;;  %v9858_v36 = vld [vmem:[#allocation3_spill] sm:$0xff]  ;;  %v9859_v57 = vld [vmem:[#allocation16_spill] sm:$0xff] }
 0x266   :  { %3529 = vmatmul.bf16.gmra.mxu3 %v7020_v19  ;;  %3652 = vmatpush.bf16.msra.mxu2 %v5195_v21  ;;  %v5248_v21 = vld [vmem:[%s9685_s1 + $0x4a8] sm:$0xf0] }
 0x267   :  { %3607 = vmatpush.bf16.msra.mxu1 %v5139_v17  ;;  %3696 = vmatpush.bf16.msra.mxu3 %v5259_v61 }
 0x268   :  { %v3305_v37 = vpop.f32.mrf.mxu2  ;;  %v3219_v27 = vpop.f32.mrf.mxu0 }
 0x269   :  { %v3306_v51 = vadd.f32 %v3305_v37, %v8815_v32  ;;  %v3349_v58 = vpop.f32.mrf.mxu3  ;;  %v3220_v41 = vadd.f32 %v3219_v27, %v8513_v31  ;;  %v3263_v19 = vpop.f32.mrf.mxu1  ;;  %v5064_v31 = vld [vmem:[%s9685_s1 + $0x338] sm:$0xf0] }
 0x26a   :  { %v5067_v46 = vor.u32 %v6032_v7, %v5064_v31  ;;  %v6046_v7 = vld [vmem:[%s9685_s1 + $0x3a4] sm:$0xf]  ;;  %v5120_v31 = vld [vmem:[%s9685_s1 + $0x3a8] sm:$0xf0] }
 0x26b   :  { %v8826_v40 = vadd.f32 %v3349_v58, %v3306_v51  ;;  %v8828_v56 = vadd.f32 %v3263_v19, %v3220_v41  ;;  %3608 = vmatpush.bf16.msra.mxu1 %v5131_v38  ;;  %v6078_v19 = vld [vmem:[%s9685_s1 + $0x4a4] sm:$0xf]  ;;  %v9860_v38 = vld [vmem:[#allocation17_spill] sm:$0xff] }
 0x26c   :  { %3564 = vmatpush.bf16.msra.mxu0 %v5067_v46  ;;  %v5251_v0 = vor.u32 %v6078_v19, %v5248_v21  ;;  %v6044_v21 = vld [vmem:[%s9685_s1 + $0x394] sm:$0xf] }
 0x26e   :  { %3697 = vmatpush.bf16.msra.mxu3 %v5251_v0 }
 0x270   :  { %v3307_v23 = vpop.f32.mrf.mxu2  ;;  %v3222_v49 = vpop.f32.mrf.mxu0 }
 0x271   :  { %v3308_v62 = vadd.f32 %v3307_v23, %v8815_v32  ;;  %v3351_v8 = vpop.f32.mrf.mxu3  ;;  %v3223_v9 = vadd.f32 %v3222_v49, %v8526_v45  ;;  %v3266_v47 = vpop.f32.mrf.mxu1 }
 0x273   :  { %v8850_v5 = vadd.f32 %v3351_v8, %v3308_v62  ;;  %v8858_v33 = vadd.f32 %v3266_v47, %v3223_v9  ;;  %3402 = vmatmul.bf16.gmra.mxu0 %v6651_v2  ;;  %v6062_v2 = vld [vmem:[%s9685_s1 + $0x424] sm:$0xf]  ;;  %v5123_v62 = vor.u32 %v6046_v7, %v5120_v31 }
 0x274   :  { %3446 = vmatmul.bf16.gmra.mxu1 %v6653_v3  ;;  %v5184_v3 = vld [vmem:[%s9685_s1 + $0x428] sm:$0xf0]  ;;  %v9857_v47 = vld [vmem:[#allocation2_spill] sm:$0xff] }
 0x275   :  { %3490 = vmatmul.bf16.gmra.mxu2 %v7094_v50  ;;  %v5187_v50 = vor.u32 %v6062_v2, %v5184_v3  ;;  %3609 = vmatpush.bf16.msra.mxu1 %v5123_v62  ;;  %v6060_v2 = vld [vmem:[%s9685_s1 + $0x414] sm:$0xf]  ;;  %v5176_v3 = vld [vmem:[%s9685_s1 + $0x418] sm:$0xf0] }
 0x276   :  { %3534 = vmatmul.bf16.gmra.mxu3 %v7096_v6  ;;  %v6030_v6 = vld [vmem:[%s9685_s1 + $0x324] sm:$0xf] }
 0x277   :  { %3653 = vmatpush.bf16.msra.mxu2 %v5187_v50 }
 0x278   :  { %v3310_v45 = vpop.f32.mrf.mxu2  ;;  %v3224_v37 = vpop.f32.mrf.mxu0 }
 0x279   :  { %v3311_v39 = vadd.f32 %v3310_v45, %v8815_v32  ;;  %v3354_v17 = vpop.f32.mrf.mxu3  ;;  %v3225_v51 = vadd.f32 %v3224_v37, %v8569_v34  ;;  %v3268_v58 = vpop.f32.mrf.mxu1  ;;  %v5056_v34 = vld [vmem:[%s9685_s1 + $0x328] sm:$0xf0] }
 0x27a   :  { %v5059_v35 = vor.u32 %v6030_v6, %v5056_v34  ;;  %v5179_v6 = vor.u32 %v6060_v2, %v5176_v3  ;;  %v6028_v34 = vld [vmem:[%s9685_s1 + $0x314] sm:$0xf] }
 0x27b   :  { %v8866_v27 = vadd.f32 %v3354_v17, %v3311_v39  ;;  %v8868_v41 = vadd.f32 %v3268_v58, %v3225_v51 }
 0x27c   :  { %3565 = vmatpush.bf16.msra.mxu0 %v5059_v35  ;;  %3654 = vmatpush.bf16.msra.mxu2 %v5179_v6  ;;  %v5240_v35 = vld [vmem:[%s9685_s1 + $0x498] sm:$0xf0] }
 0x280   :  { %v3312_v4 = vpop.f32.mrf.mxu2  ;;  %v3227_v46 = vpop.f32.mrf.mxu0 }
 0x281   :  { %v3313_v30 = vadd.f32 %v3312_v4, %v8815_v32  ;;  %v3356_v23 = vpop.f32.mrf.mxu3  ;;  %v3228_v8 = vadd.f32 %v3227_v46, %v8576_v29  ;;  %v3271_v49 = vpop.f32.mrf.mxu1  ;;  %v6076_v4 = vld [vmem:[%s9685_s1 + $0x494] sm:$0xf] }
 0x282   :  { %v5243_v31 = vor.u32 %v6076_v4, %v5240_v35  ;;  %v5040_v4 = vld [vmem:[%s9685_s1 + $0x308] sm:$0xf0]  ;;  %v6074_v35 = vld [vmem:[%s9685_s1 + $0x484] sm:$0xf] }
 0x283   :  { %v8896_v61 = vadd.f32 %v3356_v23, %v3313_v30  ;;  %v8898_v9 = vadd.f32 %v3271_v49, %v3228_v8  ;;  %3407 = vmatmul.bf16.gmra.mxu0 %v9857_v47  ;;  %v5112_v30 = vld [vmem:[%s9685_s1 + $0x398] sm:$0xf0] }
 0x284   :  { %3451 = vmatmul.bf16.gmra.mxu1 %v9858_v36  ;;  %v5115_v62 = vor.u32 %v6044_v21, %v5112_v30  ;;  %3698 = vmatpush.bf16.msra.mxu3 %v5243_v31  ;;  %v6042_v30 = vld [vmem:[%s9685_s1 + $0x384] sm:$0xf] }
 0x285   :  { %3495 = vmatmul.bf16.gmra.mxu2 %v9859_v57  ;;  %v9861_v57 = vld [vmem:[#allocation4_spill] sm:$0xff] }
 0x286   :  { %3539 = vmatmul.bf16.gmra.mxu3 %v9860_v38  ;;  %3610 = vmatpush.bf16.msra.mxu1 %v5115_v62  ;;  %v9862_v38 = vld [vmem:[#allocation5_spill] sm:$0xff] }
 0x288   :  { %v3315_v45 = vpop.f32.mrf.mxu2  ;;  %v3229_v17 = vpop.f32.mrf.mxu0 }
 0x289   :  { %v3316_v39 = vadd.f32 %v3315_v45, %v8815_v32  ;;  %v3359_v29 = vpop.f32.mrf.mxu3  ;;  %v3230_v37 = vadd.f32 %v3229_v17, %v8619_v48  ;;  %v3273_v51 = vpop.f32.mrf.mxu1  ;;  %v5048_v48 = vld [vmem:[%s9685_s1 + $0x318] sm:$0xf0]  ;;  %v9863_v45 = vld [vmem:[#allocation20_spill] sm:$0xff] }
 0x28a   :  { %v5051_v19 = vor.u32 %v6028_v34, %v5048_v48 }
 0x28b   :  { %v8906_v58 = vadd.f32 %v3359_v29, %v3316_v39  ;;  %v8914_v50 = vadd.f32 %v3273_v51, %v3230_v37  ;;  %v9864_v39 = vld [vmem:[#allocation21_spill] sm:$0xff]  ;;  %v6058_v29 = vld [vmem:[%s9685_s1 + $0x404] sm:$0xf] }
 0x28c   :  { %3566 = vmatpush.bf16.msra.mxu0 %v5051_v19  ;;  %v6026_v19 = vld [vmem:[%s9685_s1 + $0x304] sm:$0xf] }
 0x290   :  { %v3317_v7 = vpop.f32.mrf.mxu2  ;;  %v3232_v0 = vpop.f32.mrf.mxu0 }
 0x291   :  { %v3318_v23 = vadd.f32 %v3317_v7, %v8815_v32  ;;  %v3361_v46 = vpop.f32.mrf.mxu3  ;;  %v3233_v8 = vadd.f32 %v3232_v0, %v8632_v55  ;;  %v3276_v49 = vpop.f32.mrf.mxu1  ;;  %v5168_v55 = vld [vmem:[%s9685_s1 + $0x408] sm:$0xf0]  ;;  %v5043_v7 = vor.u32 %v6026_v19, %v5040_v4 }
 0x292   :  { %v5171_v17 = vor.u32 %v6058_v29, %v5168_v55  ;;  %v9865_v29 = vld [vmem:[#allocation6_spill] sm:$0xff]  ;;  %v9866_v55 = vld [vmem:[#allocation7_spill] sm:$0xff] }
 0x293   :  { %v8936_v47 = vadd.f32 %v3361_v46, %v3318_v23  ;;  %v8938_v36 = vadd.f32 %v3276_v49, %v3233_v8  ;;  %3412 = vmatmul.bf16.gmra.mxu0 %v9861_v57  ;;  %v5104_v23 = vld [vmem:[%s9685_s1 + $0x388] sm:$0xf0] }
 0x294   :  { %3456 = vmatmul.bf16.gmra.mxu1 %v9862_v38  ;;  %3655 = vmatpush.bf16.msra.mxu2 %v5171_v17  ;;  %v5107_v46 = vor.u32 %v6042_v30, %v5104_v23  ;;  %v9867_v17 = vld [vmem:[#allocation24_spill] sm:$0xff] }
 0x295   :  { %3500 = vmatmul.bf16.gmra.mxu2 %v9863_v45  ;;  %3567 = vmatpush.bf16.msra.mxu0 %v5043_v7 }
 0x296   :  { %3544 = vmatmul.bf16.gmra.mxu3 %v9864_v39  ;;  %3611 = vmatpush.bf16.msra.mxu1 %v5107_v46 }
 0x298   :  { %v3320_v37 = vpop.f32.mrf.mxu2  ;;  %v3234_v3 = vpop.f32.mrf.mxu0 }
 0x299   :  { %v3321_v51 = vadd.f32 %v3320_v37, %v8815_v32  ;;  %v3364_v2 = vpop.f32.mrf.mxu3  ;;  %v3235_v6 = vadd.f32 %v3234_v3, %v8669_v63  ;;  %v3278_v34 = vpop.f32.mrf.mxu1  ;;  %v5232_v63 = vld [vmem:[%s9685_s1 + $0x488] sm:$0xf0]  ;;  %v9868_v37 = vld [vmem:[#allocation25_spill] sm:$0xff]  ;;  %v6104_v3 = vld [vmem:[%s9685_s1 + $0x574] sm:$0xf] }
 0x29a   :  { %v5235_v31 = vor.u32 %v6074_v35, %v5232_v63  ;;  %v5544_v35 = vld [vmem:[%s9685_s1 + $0x6f8] sm:$0xf0] }
 0x29b   :  { %v8952_v48 = vadd.f32 %v3364_v2, %v3321_v51  ;;  %v8963_v21 = vadd.f32 %v3278_v34, %v3235_v6  ;;  %v6136_v51 = vld [vmem:[%s9685_s1 + $0x674] sm:$0xf]  ;;  %v5352_v6 = vld [vmem:[%s9685_s1 + $0x578] sm:$0xf0] }
 0x29c   :  { %3699 = vmatpush.bf16.msra.mxu3 %v5235_v31  ;;  %v6152_v34 = vld [vmem:[%s9685_s1 + $0x6f4] sm:$0xf]  ;;  %v5355_v4 = vor.u32 %v6104_v3, %v5352_v6  ;;  %v6134_v3 = vld [vmem:[%s9685_s1 + $0x664] sm:$0xf]  ;;  %v5472_v6 = vld [vmem:[%s9685_s1 + $0x668] sm:$0xf0] }
 0x29d   :  { %v5547_v30 = vor.u32 %v6152_v34, %v5544_v35  ;;  %v9870_v34 = vld [vmem:[#allocation9_spill] sm:$0xff]  ;;  %v6102_v35 = vld [vmem:[%s9685_s1 + $0x564] sm:$0xf] }
 0x29e   :  { %3736 = vmatpush.bf16.msrb.mxu0 %v5355_v4  ;;  %v9872_v4 = vld [vmem:[#allocation29_spill] sm:$0xff] }
 0x2a0   :  { %v3322_v0 = vpop.f32.mrf.mxu2  ;;  %v3237_v49 = vpop.f32.mrf.mxu0  ;;  %3868 = vmatpush.bf16.msrb.mxu3 %v5547_v30  ;;  %v5536_v30 = vld [vmem:[%s9685_s1 + $0x6e8] sm:$0xf0] }
 0x2a1   :  { %v3323_v62 = vadd.f32 %v3322_v0, %v8815_v32  ;;  %v3366_v8 = vpop.f32.mrf.mxu3  ;;  %v3238_v57 = vadd.f32 %v3237_v49, %v8694_v44  ;;  %v3281_v38 = vpop.f32.mrf.mxu1  ;;  %v5480_v44 = vld [vmem:[%s9685_s1 + $0x678] sm:$0xf0] }
 0x2a2   :  { %v5483_v2 = vor.u32 %v6136_v51, %v5480_v44 }
 0x2a3   :  { %v8976_v45 = vadd.f32 %v3366_v8, %v3323_v62  ;;  %v8978_v39 = vadd.f32 %v3281_v38, %v3238_v57  ;;  %3417 = vmatmul.bf16.gmra.mxu0 %v9865_v29  ;;  %v6120_v62 = vld [vmem:[%s9685_s1 + $0x5f4] sm:$0xf]  ;;  %v5416_v8 = vld [vmem:[%s9685_s1 + $0x5f8] sm:$0xf0] }
 0x2a4   :  { %3461 = vmatmul.bf16.gmra.mxu1 %v9866_v55  ;;  %3824 = vmatpush.bf16.msrb.mxu2 %v5483_v2  ;;  %v5419_v57 = vor.u32 %v6120_v62, %v5416_v8  ;;  %v9869_v2 = vld [vmem:[#allocation8_spill] sm:$0xff]  ;;  %v5408_v8 = vld [vmem:[%s9685_s1 + $0x5e8] sm:$0xf0] }
 0x2a5   :  { %3505 = vmatmul.bf16.gmra.mxu2 %v9867_v17 }
 0x2a6   :  { %3549 = vmatmul.bf16.gmra.mxu3 %v9868_v37  ;;  %3780 = vmatpush.bf16.msrb.mxu1 %v5419_v57 }
 0x2a8   :  { %v3325_v19 = vpop.f32.mrf.mxu2  ;;  %v3239_v31 = vpop.f32.mrf.mxu0 }
 0x2a9   :  { %v3326_v7 = vadd.f32 %v3325_v19, %v8815_v32  ;;  %v3369_v63 = vpop.f32.mrf.mxu3  ;;  %v3240_v23 = vadd.f32 %v3239_v31, %v8719_v14  ;;  %v3283_v46 = vpop.f32.mrf.mxu1  ;;  %v9871_v19 = vld [vmem:[#allocation28_spill] sm:$0xff]  ;;  %v6150_v31 = vld [vmem:[%s9685_s1 + $0x6e4] sm:$0xf] }
 0x2aa   :  { %v5539_v62 = vor.u32 %v6150_v31, %v5536_v30  ;;  %v9873_v31 = vld [vmem:[#allocation10_spill] sm:$0xff] }
 0x2ab   :  { %v9004_v0 = vadd.f32 %v3369_v63, %v3326_v7  ;;  %v9012_v49 = vadd.f32 %v3283_v46, %v3240_v23  ;;  %v5344_v7 = vld [vmem:[%s9685_s1 + $0x568] sm:$0xf0]  ;;  %v6118_v23 = vld [vmem:[%s9685_s1 + $0x5e4] sm:$0xf] }
 0x2ac   :  { %v5347_v63 = vor.u32 %v6102_v35, %v5344_v7  ;;  %3869 = vmatpush.bf16.msrb.mxu3 %v5539_v62  ;;  %v5464_v7 = vld [vmem:[%s9685_s1 + $0x658] sm:$0xf0]  ;;  %v9874_v62 = vld [vmem:[#allocation11_spill] sm:$0xff] }
 0x2ae   :  { %3737 = vmatpush.bf16.msrb.mxu0 %v5347_v63 }
 0x2b0   :  { %v3327_v38 = vpop.f32.mrf.mxu2  ;;  %v3242_v55 = vpop.f32.mrf.mxu0 }
 0x2b1   :  { %v3328_v14 = vadd.f32 %v3327_v38, %v8815_v32  ;;  %v3371_v29 = vpop.f32.mrf.mxu3  ;;  %v3243_v17 = vadd.f32 %v3242_v55, %v8750_v10  ;;  %v3286_v37 = vpop.f32.mrf.mxu1  ;;  %v5475_v10 = vor.u32 %v6134_v3, %v5472_v6 }
 0x2b3   :  { %v9016_v51 = vadd.f32 %v3371_v29, %v3328_v14  ;;  %v9018_v44 = vadd.f32 %v3286_v37, %v3243_v17  ;;  %3422 = vmatmul.bf16.gmra.mxu0 %v9869_v2  ;;  %3825 = vmatpush.bf16.msrb.mxu2 %v5475_v10  ;;  %v5411_v29 = vor.u32 %v6118_v23, %v5408_v8  ;;  %v5336_v23 = vld [vmem:[%s9685_s1 + $0x558] sm:$0xf0]  ;;  %v9875_v8 = vld [vmem:[#allocation32_spill] sm:$0xff] }
 0x2b4   :  { %3466 = vmatmul.bf16.gmra.mxu1 %v9870_v34 }
 0x2b5   :  { %3510 = vmatmul.bf16.gmra.mxu2 %v9871_v19  ;;  %3781 = vmatpush.bf16.msrb.mxu1 %v5411_v29 }
 0x2b6   :  { %3554 = vmatmul.bf16.gmra.mxu3 %v9872_v4 }
 0x2b8   :  { %v3330_v46 = vpop.f32.mrf.mxu2  ;;  %v3244_v14 = vpop.f32.mrf.mxu0 }
 0x2b9   :  { %v3331_v57 = vadd.f32 %v3330_v46, %v8815_v32  ;;  %v3374_v38 = vpop.f32.mrf.mxu3  ;;  %v3245_v55 = vadd.f32 %v3244_v14, %v8753_v24  ;;  %v3288_v17 = vpop.f32.mrf.mxu1  ;;  %v6132_v24 = vld [vmem:[%s9685_s1 + $0x654] sm:$0xf]  ;;  %v9876_v14 = vld [vmem:[#allocation33_spill] sm:$0xff] }
 0x2ba   :  { %v5467_v30 = vor.u32 %v6132_v24, %v5464_v7  ;;  %v6148_v46 = vld [vmem:[%s9685_s1 + $0x6d4] sm:$0xf] }
 0x2bb   :  { %v9050_v37 = vadd.f32 %v3374_v38, %v3331_v57  ;;  %v9052_v2 = vadd.f32 %v3288_v17, %v3245_v55  ;;  %v5528_v38 = vld [vmem:[%s9685_s1 + $0x6d8] sm:$0xf0]  ;;  %v6116_v55 = vld [vmem:[%s9685_s1 + $0x5d4] sm:$0xf] }
 0x2bc   :  { %3826 = vmatpush.bf16.msrb.mxu2 %v5467_v30  ;;  %v5531_v29 = vor.u32 %v6148_v46, %v5528_v38  ;;  %v5400_v17 = vld [vmem:[%s9685_s1 + $0x5d8] sm:$0xf0]  ;;  %v6130_v30 = vld [vmem:[%s9685_s1 + $0x644] sm:$0xf] }
 0x2be   :  { %3870 = vmatpush.bf16.msrb.mxu3 %v5531_v29  ;;  %v6098_v29 = vld [vmem:[%s9685_s1 + $0x544] sm:$0xf] }
 0x2c0   :  { %v3332_v3 = vpop.f32.mrf.mxu2  ;;  %v3247_v19 = vpop.f32.mrf.mxu0 }
 0x2c1   :  { %v3333_v6 = vadd.f32 %v3332_v3, %v8815_v32  ;;  %v3376_v34 = vpop.f32.mrf.mxu3  ;;  %v3248_v10 = vadd.f32 %v3247_v19, %v8784_v28  ;;  %v3291_v4 = vpop.f32.mrf.mxu1  ;;  %v6100_v28 = vld [vmem:[%s9685_s1 + $0x554] sm:$0xf]  ;;  %v5403_v3 = vor.u32 %v6116_v55, %v5400_v17  ;;  %v5328_v55 = vld [vmem:[%s9685_s1 + $0x548] sm:$0xf0]  ;;  %v6146_v17 = vld [vmem:[%s9685_s1 + $0x6c4] sm:$0xf] }
 0x2c2   :  { %v5339_v57 = vor.u32 %v6100_v28, %v5336_v23  ;;  %v5456_v28 = vld [vmem:[%s9685_s1 + $0x648] sm:$0xf0] }
 0x2c3   :  { %v9056_v35 = vadd.f32 %v3376_v34, %v3333_v6  ;;  %v9064_v63 = vadd.f32 %v3291_v4, %v3248_v10  ;;  %3568 = vmatmul.bf16.vlgmr.msra.gmra.mxu0 %v9873_v31  ;;  %3782 = vmatpush.bf16.msrb.mxu1 %v5403_v3  ;;  %v5459_v23 = vor.u32 %v6130_v30, %v5456_v28  ;;  %v9877_v3 = vld [vmem:[#allocation12_spill] sm:$0xff]  ;;  %v9880_v28 = vld [vmem:[#allocation37_spill] sm:$0xff] }
 0x2c4   :  { %3612 = vmatmul.bf16.vlgmr.msra.gmra.mxu1 %v9874_v62  ;;  %3738 = vmatpush.bf16.msrb.mxu0 %v5339_v57 }
 0x2c5   :  { %3656 = vmatmul.bf16.vlgmr.msra.gmra.mxu2 %v9875_v8 }
 0x2c6   :  { %3700 = vmatmul.bf16.vlgmr.msra.gmra.mxu3 %v9876_v14  ;;  %3827 = vmatpush.bf16.msrb.mxu2 %v5459_v23 }
 0x2c8   :  { %v3335_v6 = vpop.f32.mrf.mxu2  ;;  %v3249_v10 = vpop.f32.mrf.mxu0 }
 0x2c9   :  { %v3336_v34 = vadd.f32 %v3335_v6, %v8815_v32  ;;  %v3379_v19 = vpop.f32.mrf.mxu3  ;;  %v3250_v4 = vadd.f32 %v3249_v10, %v8793_v60  ;;  %v3293_v24 = vpop.f32.mrf.mxu1  ;;  %v5331_v6 = vor.u32 %v6098_v29, %v5328_v55  ;;  %v9878_v10 = vld [vmem:[#allocation13_spill] sm:$0xff]  ;;  %v6128_v55 = vld [vmem:[%s9685_s1 + $0x634] sm:$0xf] }
 0x2cb   :  { %v9090_v7 = vadd.f32 %v3379_v19, %v3336_v34  ;;  %v9092_v31 = vadd.f32 %v3293_v24, %v3250_v4  ;;  %v6114_v34 = vld [vmem:[%s9685_s1 + $0x5c4] sm:$0xf]  ;;  %v5392_v19 = vld [vmem:[%s9685_s1 + $0x5c8] sm:$0xf0]  ;;  %v9879_v4 = vld [vmem:[#allocation36_spill] sm:$0xff]  ;;  %3739 = vmatpush.bf16.msrb.mxu0 %v5331_v6 }
 0x2cc   :  { %v5395_v30 = vor.u32 %v6114_v34, %v5392_v19  ;;  %v6144_v6 = vld [vmem:[%s9685_s1 + $0x6b4] sm:$0xf] }
 0x2ce   :  { %3783 = vmatpush.bf16.msrb.mxu1 %v5395_v30 }
 0x2d0   :  { %v3337_v46 = vpop.f32.mrf.mxu2  ;;  %v3393_v60 = vpop.f32.mrf.mxu0 }
 0x2d1   :  { %v3338_v62 = vadd.f32 %v3337_v46, %v8815_v32  ;;  %v3381_v8 = vpop.f32.mrf.mxu3  ;;  %v3394_v57 = vadd.f32 %v3393_v60, %v8826_v40  ;;  %v3437_v38 = vpop.f32.mrf.mxu1  ;;  %v5520_v40 = vld [vmem:[%s9685_s1 + $0x6c8] sm:$0xf0] }
 0x2d2   :  { %v5523_v24 = vor.u32 %v6146_v17, %v5520_v40  ;;  %v5448_v17 = vld [vmem:[%s9685_s1 + $0x638] sm:$0xf0] }
 0x2d3   :  { %v9102_v14 = vadd.f32 %v3381_v8, %v3338_v62  ;;  %v3438_v32 = vadd.f32 %v3437_v38, %v3394_v57  ;;  %3573 = vmatmul.bf16.gmra.mxu0 %v9877_v3  ;;  %v5451_v3 = vor.u32 %v6128_v55, %v5448_v17  ;;  %v5512_v40 = vld [vmem:[%s9685_s1 + $0x6b8] sm:$0xf0]  ;;  %v9883_v17 = vld [vmem:[#allocation40_spill] sm:$0xff] }
 0x2d4   :  { %3617 = vmatmul.bf16.gmra.mxu1 %v9878_v10  ;;  %3871 = vmatpush.bf16.msrb.mxu3 %v5523_v24  ;;  %v5515_v19 = vor.u32 %v6144_v6, %v5512_v40 }
 0x2d5   :  { %3661 = vmatmul.bf16.gmra.mxu2 %v9879_v4 }
 0x2d6   :  { %3705 = vmatmul.bf16.gmra.mxu3 %v9880_v28  ;;  %3828 = vmatpush.bf16.msrb.mxu2 %v5451_v3 }
 0x2d8   :  { %v3481_v23 = vpop.f32.mrf.mxu2  ;;  %v3395_v8 = vpop.f32.mrf.mxu0  ;;  %3872 = vmatpush.bf16.msrb.mxu3 %v5515_v19 }
 0x2d9   :  { %v3482_v46 = vadd.f32 %v3481_v23, %v3438_v32  ;;  %v3525_v62 = vpop.f32.mrf.mxu3  ;;  %v3396_v60 = vadd.f32 %v3395_v8, %v8850_v5  ;;  %v3439_v57 = vpop.f32.mrf.mxu1  ;;  %v6096_v32 = vld [vmem:[%s9685_s1 + $0x534] sm:$0xf]  ;;  %v5320_v5 = vld [vmem:[%s9685_s1 + $0x538] sm:$0xf0] }
 0x2da   :  { %v5323_v34 = vor.u32 %v6096_v32, %v5320_v5  ;;  %v5384_v8 = vld [vmem:[%s9685_s1 + $0x5b8] sm:$0xf0] }
 0x2db   :  { %v9127_v38 = vadd.f32 %v3525_v62, %v3482_v46  ;;  %v3440_v29 = vadd.f32 %v3439_v57, %v3396_v60  ;;  %v6112_v62 = vld [vmem:[%s9685_s1 + $0x5b4] sm:$0xf]  ;;  %v9881_v57 = vld [vmem:[#allocation14_spill] sm:$0xff] }
 0x2dc   :  { %3740 = vmatpush.bf16.msrb.mxu0 %v5323_v34  ;;  %v5387_v55 = vor.u32 %v6112_v62, %v5384_v8  ;;  %v5504_v62 = vld [vmem:[%s9685_s1 + $0x6a8] sm:$0xf0] }
 0x2de   :  { %3784 = vmatpush.bf16.msrb.mxu1 %v5387_v55  ;;  %v5376_v55 = vld [vmem:[%s9685_s1 + $0x5a8] sm:$0xf0] }
 0x2e0   :  { %v3483_v10 = vpop.f32.mrf.mxu2  ;;  %v3398_v30 = vpop.f32.mrf.mxu0 }
 0x2e1   :  { %v3484_v4 = vadd.f32 %v3483_v10, %v3440_v29  ;;  %v3527_v24 = vpop.f32.mrf.mxu3  ;;  %v3399_v28 = vadd.f32 %v3398_v30, %v8866_v27  ;;  %v3442_v23 = vpop.f32.mrf.mxu1  ;;  %v9882_v29 = vld [vmem:[#allocation15_spill] sm:$0xff]  ;;  %v9884_v27 = vld [vmem:[#allocation41_spill] sm:$0xff]  ;;  %v6094_v30 = vld [vmem:[%s9685_s1 + $0x524] sm:$0xf] }
 0x2e3   :  { %v9148_v46 = vadd.f32 %v3527_v24, %v3484_v4  ;;  %v3443_v60 = vadd.f32 %v3442_v23, %v3399_v28  ;;  %3578 = vmatmul.bf16.gmra.mxu0 %v9881_v57  ;;  %v6126_v4 = vld [vmem:[%s9685_s1 + $0x624] sm:$0xf]  ;;  %v5440_v24 = vld [vmem:[%s9685_s1 + $0x628] sm:$0xf0] }
 0x2e4   :  { %3622 = vmatmul.bf16.gmra.mxu1 %v9882_v29  ;;  %v5443_v28 = vor.u32 %v6126_v4, %v5440_v24  ;;  %v6142_v23 = vld [vmem:[%s9685_s1 + $0x6a4] sm:$0xf]  ;;  %v9886_v24 = vld [vmem:[#allocation19_spill] sm:$0xff] }
 0x2e5   :  { %3666 = vmatmul.bf16.gmra.mxu2 %v9883_v17  ;;  %v6110_v57 = vld [vmem:[%s9685_s1 + $0x5a4] sm:$0xf] }
 0x2e6   :  { %3710 = vmatmul.bf16.gmra.mxu3 %v9884_v27  ;;  %3829 = vmatpush.bf16.msrb.mxu2 %v5443_v28  ;;  %v5379_v29 = vor.u32 %v6110_v57, %v5376_v55  ;;  %v9885_v4 = vld [vmem:[#allocation18_spill] sm:$0xff]  ;;  %v9888_v28 = vld [vmem:[#allocation45_spill] sm:$0xff]  ;;  %v6124_v57 = vld [vmem:[%s9685_s1 + $0x614] sm:$0xf] }
 0x2e7   :  { %v5432_v55 = vld [vmem:[%s9685_s1 + $0x618] sm:$0xf0] }
 0x2e8   :  { %v3486_v32 = vpop.f32.mrf.mxu2  ;;  %v3400_v6 = vpop.f32.mrf.mxu0  ;;  %3785 = vmatpush.bf16.msrb.mxu1 %v5379_v29 }
 0x2e9   :  { %v3487_v3 = vadd.f32 %v3486_v32, %v3443_v60  ;;  %v3530_v5 = vpop.f32.mrf.mxu3  ;;  %v3401_v40 = vadd.f32 %v3400_v6, %v8896_v61  ;;  %v3444_v34 = vpop.f32.mrf.mxu1  ;;  %v5312_v61 = vld [vmem:[%s9685_s1 + $0x528] sm:$0xf0]  ;;  %v5507_v60 = vor.u32 %v6142_v23, %v5504_v62 }
 0x2ea   :  { %v5315_v8 = vor.u32 %v6094_v30, %v5312_v61  ;;  %v9887_v30 = vld [vmem:[#allocation44_spill] sm:$0xff] }
 0x2eb   :  { %v9161_v19 = vadd.f32 %v3530_v5, %v3487_v3  ;;  %v3445_v10 = vadd.f32 %v3444_v34, %v3401_v40  ;;  %3873 = vmatpush.bf16.msrb.mxu3 %v5507_v60 }
 0x2ec   :  { %3741 = vmatpush.bf16.msrb.mxu0 %v5315_v8 }
 0x2f0   :  { %v3488_v17 = vpop.f32.mrf.mxu2  ;;  %v3403_v3 = vpop.f32.mrf.mxu0 }
 0x2f1   :  { %v3489_v27 = vadd.f32 %v3488_v17, %v3445_v10  ;;  %v3532_v32 = vpop.f32.mrf.mxu3  ;;  %v3404_v5 = vadd.f32 %v3403_v3, %v8906_v58  ;;  %v3447_v6 = vpop.f32.mrf.mxu1  ;;  %v5435_v17 = vor.u32 %v6124_v57, %v5432_v55  ;;  %v9889_v57 = vld [vmem:[#allocation22_spill] sm:$0xff]  ;;  %v9890_v55 = vld [vmem:[#allocation23_spill] sm:$0xff] }
 0x2f3   :  { %v9188_v40 = vadd.f32 %v3532_v32, %v3489_v27  ;;  %v3448_v34 = vadd.f32 %v3447_v6, %v3404_v5  ;;  %3583 = vmatmul.bf16.gmra.mxu0 %v9885_v4  ;;  %v6092_v27 = vld [vmem:[%s9685_s1 + $0x514] sm:$0xf]  ;;  %v5496_v5 = vld [vmem:[%s9685_s1 + $0x698] sm:$0xf0]  ;;  %3830 = vmatpush.bf16.msrb.mxu2 %v5435_v17 }
 0x2f4   :  { %3627 = vmatmul.bf16.gmra.mxu1 %v9886_v24  ;;  %v6140_v32 = vld [vmem:[%s9685_s1 + $0x694] sm:$0xf] }
 0x2f5   :  { %3671 = vmatmul.bf16.gmra.mxu2 %v9887_v30  ;;  %v6108_v6 = vld [vmem:[%s9685_s1 + $0x594] sm:$0xf]  ;;  %v5499_v4 = vor.u32 %v6140_v32, %v5496_v5 }
 0x2f6   :  { %3715 = vmatmul.bf16.gmra.mxu3 %v9888_v28  ;;  %v9891_v17 = vld [vmem:[#allocation48_spill] sm:$0xff] }
 0x2f7   :  { %3874 = vmatpush.bf16.msrb.mxu3 %v5499_v4 }
 0x2f8   :  { %v3491_v61 = vpop.f32.mrf.mxu2  ;;  %v3405_v62 = vpop.f32.mrf.mxu0 }
 0x2f9   :  { %v3492_v23 = vadd.f32 %v3491_v61, %v3448_v34  ;;  %v3535_v10 = vpop.f32.mrf.mxu3  ;;  %v3406_v8 = vadd.f32 %v3405_v62, %v8936_v47  ;;  %v3449_v60 = vpop.f32.mrf.mxu1  ;;  %v5304_v47 = vld [vmem:[%s9685_s1 + $0x518] sm:$0xf0] }
 0x2fa   :  { %v5307_v3 = vor.u32 %v6092_v27, %v5304_v47  ;;  %v5368_v34 = vld [vmem:[%s9685_s1 + $0x598] sm:$0xf0] }
 0x2fb   :  { %v9195_v58 = vadd.f32 %v3535_v10, %v3492_v23  ;;  %v3450_v29 = vadd.f32 %v3449_v60, %v3406_v8  ;;  %v5371_v24 = vor.u32 %v6108_v6, %v5368_v34  ;;  %v9892_v27 = vld [vmem:[#allocation49_spill] sm:$0xff] }
 0x2fc   :  { %3742 = vmatpush.bf16.msrb.mxu0 %v5307_v3 }
 0x2fd   :  { %3786 = vmatpush.bf16.msrb.mxu1 %v5371_v24 }
 0x300   :  { %v3493_v30 = vpop.f32.mrf.mxu2  ;;  %v3408_v23 = vpop.f32.mrf.mxu0 }
 0x301   :  { %v3494_v28 = vadd.f32 %v3493_v30, %v3450_v29  ;;  %v3537_v61 = vpop.f32.mrf.mxu3  ;;  %v3409_v10 = vadd.f32 %v3408_v23, %v8952_v48  ;;  %v3452_v62 = vpop.f32.mrf.mxu1  ;;  %v6122_v29 = vld [vmem:[%s9685_s1 + $0x604] sm:$0xf]  ;;  %v5424_v48 = vld [vmem:[%s9685_s1 + $0x608] sm:$0xf0] }
 0x302   :  { %v5427_v47 = vor.u32 %v6122_v29, %v5424_v48  ;;  %v6090_v30 = vld [vmem:[%s9685_s1 + $0x504] sm:$0xf] }
 0x303   :  { %v9222_v8 = vadd.f32 %v3537_v61, %v3494_v28  ;;  %v3453_v60 = vadd.f32 %v3452_v62, %v3409_v10  ;;  %3588 = vmatmul.bf16.gmra.mxu0 %v9889_v57  ;;  %v5296_v28 = vld [vmem:[%s9685_s1 + $0x508] sm:$0xf0]  ;;  %v6138_v61 = vld [vmem:[%s9685_s1 + $0x684] sm:$0xf] }
 0x304   :  { %3632 = vmatmul.bf16.gmra.mxu1 %v9890_v55  ;;  %3831 = vmatpush.bf16.msrb.mxu2 %v5427_v47  ;;  %v5299_v10 = vor.u32 %v6090_v30, %v5296_v28  ;;  %v6106_v62 = vld [vmem:[%s9685_s1 + $0x584] sm:$0xf]  ;;  %v9896_v30 = vld [vmem:[#allocation53_spill] sm:$0xff]  ;;  %v6200_v28 = vld [vmem:[%s9685_s1 + $0x874] sm:$0xf] }
 0x305   :  { %3676 = vmatmul.bf16.gmra.mxu2 %v9891_v17 }
 0x306   :  { %3720 = vmatmul.bf16.gmra.mxu3 %v9892_v27  ;;  %3743 = vmatpush.bf16.msrb.mxu0 %v5299_v10  ;;  %v5608_v10 = vld [vmem:[%s9685_s1 + $0x778] sm:$0xf0] }
 0x308   :  { %v3496_v32 = vpop.f32.mrf.mxu2  ;;  %v3410_v6 = vpop.f32.mrf.mxu0 }
 0x309   :  { %v3497_v3 = vadd.f32 %v3496_v32, %v3453_v60  ;;  %v3540_v5 = vpop.f32.mrf.mxu3  ;;  %v3411_v34 = vadd.f32 %v3410_v6, %v8976_v45  ;;  %v3454_v4 = vpop.f32.mrf.mxu1  ;;  %v5488_v45 = vld [vmem:[%s9685_s1 + $0x688] sm:$0xf0]  ;;  %v9893_v6 = vld [vmem:[#allocation26_spill] sm:$0xff] }
 0x30a   :  { %v5360_v60 = vld [vmem:[%s9685_s1 + $0x588] sm:$0xf0]  ;;  %v5491_v57 = vor.u32 %v6138_v61, %v5488_v45  ;;  %v6168_v61 = vld [vmem:[%s9685_s1 + $0x774] sm:$0xf] }
 0x30b   :  { %v9235_v24 = vadd.f32 %v3540_v5, %v3497_v3  ;;  %v3455_v23 = vadd.f32 %v3454_v4, %v3411_v34  ;;  %v5363_v55 = vor.u32 %v6106_v62, %v5360_v60  ;;  %v9894_v34 = vld [vmem:[#allocation27_spill] sm:$0xff]  ;;  %v9895_v4 = vld [vmem:[#allocation52_spill] sm:$0xff]  ;;  %v5800_v62 = vld [vmem:[%s9685_s1 + $0x8f8] sm:$0xf0] }
 0x30c   :  { %3875 = vmatpush.bf16.msrb.mxu3 %v5491_v57  ;;  %v6216_v45 = vld [vmem:[%s9685_s1 + $0x8f4] sm:$0xf]  ;;  %v5611_v57 = vor.u32 %v6168_v61, %v5608_v10 }
 0x30d   :  { %3787 = vmatpush.bf16.msrb.mxu1 %v5363_v55  ;;  %v5803_v55 = vor.u32 %v6216_v45, %v5800_v62  ;;  %v9897_v62 = vld [vmem:[#allocation30_spill] sm:$0xff] }
 0x30e   :  { %3912 = vmatpush.bf16.msra.mxu0 %v5611_v57  ;;  %v5728_v57 = vld [vmem:[%s9685_s1 + $0x868] sm:$0xf0] }
 0x310   :  { %v3498_v17 = vpop.f32.mrf.mxu2  ;;  %v3413_v48 = vpop.f32.mrf.mxu0  ;;  %4044 = vmatpush.bf16.msra.mxu3 %v5803_v55  ;;  %v9898_v55 = vld [vmem:[#allocation31_spill] sm:$0xff] }
 0x311   :  { %v3499_v27 = vadd.f32 %v3498_v17, %v3455_v23  ;;  %v3542_v29 = vpop.f32.mrf.mxu3  ;;  %v3414_v47 = vadd.f32 %v3413_v48, %v9004_v0  ;;  %v3457_v32 = vpop.f32.mrf.mxu1  ;;  %v5736_v0 = vld [vmem:[%s9685_s1 + $0x878] sm:$0xf0] }
 0x312   :  { %v5739_v23 = vor.u32 %v6200_v28, %v5736_v0 }
 0x313   :  { %v9256_v3 = vadd.f32 %v3542_v29, %v3499_v27  ;;  %v3458_v5 = vadd.f32 %v3457_v32, %v3414_v47  ;;  %3593 = vmatmul.bf16.gmra.mxu0 %v9893_v6  ;;  %v6184_v6 = vld [vmem:[%s9685_s1 + $0x7f4] sm:$0xf] }
 0x314   :  { %3637 = vmatmul.bf16.gmra.mxu1 %v9894_v34  ;;  %4000 = vmatpush.bf16.msra.mxu2 %v5739_v23  ;;  %v5672_v34 = vld [vmem:[%s9685_s1 + $0x7f8] sm:$0xf0] }
 0x315   :  { %3681 = vmatmul.bf16.gmra.mxu2 %v9895_v4 }
 0x316   :  { %3725 = vmatmul.bf16.gmra.mxu3 %v9896_v30 }
 0x318   :  { %v3501_v60 = vpop.f32.mrf.mxu2  ;;  %v3415_v29 = vpop.f32.mrf.mxu0 }
 0x319   :  { %v3502_v17 = vadd.f32 %v3501_v60, %v3458_v5  ;;  %v3545_v27 = vpop.f32.mrf.mxu3  ;;  %v3416_v48 = vadd.f32 %v3415_v29, %v9016_v51  ;;  %v3459_v47 = vpop.f32.mrf.mxu1  ;;  %v5675_v5 = vor.u32 %v6184_v6, %v5672_v34  ;;  %v6198_v60 = vld [vmem:[%s9685_s1 + $0x864] sm:$0xf]  ;;  %v5792_v34 = vld [vmem:[%s9685_s1 + $0x8e8] sm:$0xf0] }
 0x31a   :  { %v6166_v29 = vld [vmem:[%s9685_s1 + $0x764] sm:$0xf] }
 0x31b   :  { %v9281_v32 = vadd.f32 %v3545_v27, %v3502_v17  ;;  %v3460_v4 = vadd.f32 %v3459_v47, %v3416_v48  ;;  %3956 = vmatpush.bf16.msra.mxu1 %v5675_v5  ;;  %v9899_v17 = vld [vmem:[#allocation56_spill] sm:$0xff]  ;;  %v5731_v27 = vor.u32 %v6198_v60, %v5728_v57  ;;  %v5600_v48 = vld [vmem:[%s9685_s1 + $0x768] sm:$0xf0]  ;;  %v6214_v47 = vld [vmem:[%s9685_s1 + $0x8e4] sm:$0xf] }
 0x31c   :  { %v5603_v6 = vor.u32 %v6166_v29, %v5600_v48  ;;  %v5664_v5 = vld [vmem:[%s9685_s1 + $0x7e8] sm:$0xf0] }
 0x31d   :  { %4001 = vmatpush.bf16.msra.mxu2 %v5731_v27 }
 0x31e   :  { %3913 = vmatpush.bf16.msra.mxu0 %v5603_v6 }
 0x320   :  { %v3503_v30 = vpop.f32.mrf.mxu2  ;;  %v3418_v51 = vpop.f32.mrf.mxu0 }
 0x321   :  { %v3504_v28 = vadd.f32 %v3503_v30, %v3460_v4  ;;  %v3547_v0 = vpop.f32.mrf.mxu3  ;;  %v3419_v61 = vadd.f32 %v3418_v51, %v9050_v37  ;;  %v3462_v23 = vpop.f32.mrf.mxu1  ;;  %v9900_v37 = vld [vmem:[#allocation57_spill] sm:$0xff]  ;;  %v6182_v4 = vld [vmem:[%s9685_s1 + $0x7e4] sm:$0xf] }
 0x323   :  { %v9290_v10 = vadd.f32 %v3547_v0, %v3504_v28  ;;  %v3463_v45 = vadd.f32 %v3462_v23, %v3419_v61  ;;  %3598 = vmatmul.bf16.gmra.mxu0 %v9897_v62  ;;  %v5795_v28 = vor.u32 %v6214_v47, %v5792_v34  ;;  %v5667_v0 = vor.u32 %v6182_v4, %v5664_v5  ;;  %v9901_v4 = vld [vmem:[#allocation34_spill] sm:$0xff] }
 0x324   :  { %3642 = vmatmul.bf16.gmra.mxu1 %v9898_v55 }
 0x325   :  { %3686 = vmatmul.bf16.gmra.mxu2 %v9899_v17  ;;  %4045 = vmatpush.bf16.msra.mxu3 %v5795_v28  ;;  %v6212_v28 = vld [vmem:[%s9685_s1 + $0x8d4] sm:$0xf] }
 0x326   :  { %3730 = vmatmul.bf16.gmra.mxu3 %v9900_v37  ;;  %3957 = vmatpush.bf16.msra.mxu1 %v5667_v0  ;;  %v9902_v0 = vld [vmem:[#allocation35_spill] sm:$0xff] }
 0x328   :  { %v3506_v30 = vpop.f32.mrf.mxu2  ;;  %v3420_v23 = vpop.f32.mrf.mxu0 }
 0x329   :  { %v3507_v51 = vadd.f32 %v3506_v30, %v3463_v45  ;;  %v3550_v61 = vpop.f32.mrf.mxu3  ;;  %v3421_v62 = vadd.f32 %v3420_v23, %v9056_v35  ;;  %v3464_v60 = vpop.f32.mrf.mxu1  ;;  %v6196_v45 = vld [vmem:[%s9685_s1 + $0x854] sm:$0xf]  ;;  %v5720_v35 = vld [vmem:[%s9685_s1 + $0x858] sm:$0xf0] }
 0x32a   :  { %v5723_v5 = vor.u32 %v6196_v45, %v5720_v35  ;;  %v6164_v30 = vld [vmem:[%s9685_s1 + $0x754] sm:$0xf]  ;;  %v5784_v23 = vld [vmem:[%s9685_s1 + $0x8d8] sm:$0xf0] }
 0x32b   :  { %v9321_v57 = vadd.f32 %v3550_v61, %v3507_v51  ;;  %v3465_v55 = vadd.f32 %v3464_v60, %v3421_v62  ;;  %v9903_v51 = vld [vmem:[#allocation60_spill] sm:$0xff]  ;;  %v9904_v62 = vld [vmem:[#allocation61_spill] sm:$0xff]  ;;  %v5787_v60 = vor.u32 %v6212_v28, %v5784_v23 }
 0x32c   :  { %4002 = vmatpush.bf16.msra.mxu2 %v5723_v5 }
 0x32d   :  { %4046 = vmatpush.bf16.msra.mxu3 %v5787_v60  ;;  %v6162_v60 = vld [vmem:[%s9685_s1 + $0x744] sm:$0xf] }
 0x330   :  { %v3508_v17 = vpop.f32.mrf.mxu2  ;;  %v3423_v29 = vpop.f32.mrf.mxu0 }
 0x331   :  { %v3509_v27 = vadd.f32 %v3508_v17, %v3465_v55  ;;  %v3552_v37 = vpop.f32.mrf.mxu3  ;;  %v3424_v48 = vadd.f32 %v3423_v29, %v9090_v7  ;;  %v3467_v47 = vpop.f32.mrf.mxu1  ;;  %v5592_v7 = vld [vmem:[%s9685_s1 + $0x758] sm:$0xf0]  ;;  %v6180_v55 = vld [vmem:[%s9685_s1 + $0x7d4] sm:$0xf] }
 0x332   :  { %v5595_v61 = vor.u32 %v6164_v30, %v5592_v7  ;;  %v5656_v17 = vld [vmem:[%s9685_s1 + $0x7d8] sm:$0xf0]  ;;  %v6194_v30 = vld [vmem:[%s9685_s1 + $0x844] sm:$0xf]  ;;  %v5712_v7 = vld [vmem:[%s9685_s1 + $0x848] sm:$0xf0] }
 0x333   :  { %v9324_v34 = vadd.f32 %v3552_v37, %v3509_v27  ;;  %v3468_v6 = vadd.f32 %v3467_v47, %v3424_v48  ;;  %3744 = vmatmul.bf16.vlgmr.msrb.gmra.mxu0 %v9901_v4  ;;  %v5659_v27 = vor.u32 %v6180_v55, %v5656_v17  ;;  %v5715_v28 = vor.u32 %v6194_v30, %v5712_v7  ;;  %v5584_v55 = vld [vmem:[%s9685_s1 + $0x748] sm:$0xf0]  ;;  %v6210_v17 = vld [vmem:[%s9685_s1 + $0x8c4] sm:$0xf]  ;;  %v9908_v7 = vld [vmem:[#allocation65_spill] sm:$0xff] }
 0x334   :  { %3788 = vmatmul.bf16.vlgmr.msrb.gmra.mxu1 %v9902_v0  ;;  %3914 = vmatpush.bf16.msra.mxu0 %v5595_v61 }
 0x335   :  { %3832 = vmatmul.bf16.vlgmr.msrb.gmra.mxu2 %v9903_v51  ;;  %3958 = vmatpush.bf16.msra.mxu1 %v5659_v27 }
 0x336   :  { %3876 = vmatmul.bf16.vlgmr.msrb.gmra.mxu3 %v9904_v62  ;;  %4003 = vmatpush.bf16.msra.mxu2 %v5715_v28 }
 0x338   :  { %v3511_v37 = vpop.f32.mrf.mxu2  ;;  %v3425_v47 = vpop.f32.mrf.mxu0 }
 0x339   :  { %v3512_v29 = vadd.f32 %v3511_v37, %v3468_v6  ;;  %v3555_v48 = vpop.f32.mrf.mxu3  ;;  %v3426_v45 = vadd.f32 %v3425_v47, %v9102_v14  ;;  %v3469_v35 = vpop.f32.mrf.mxu1  ;;  %v9905_v37 = vld [vmem:[#allocation38_spill] sm:$0xff]  ;;  %v5648_v47 = vld [vmem:[%s9685_s1 + $0x7c8] sm:$0xf0] }
 0x33b   :  { %v9355_v4 = vadd.f32 %v3555_v48, %v3512_v29  ;;  %v3470_v5 = vadd.f32 %v3469_v35, %v3426_v45  ;;  %v5587_v29 = vor.u32 %v6162_v60, %v5584_v55  ;;  %v6178_v48 = vld [vmem:[%s9685_s1 + $0x7c4] sm:$0xf]  ;;  %v9906_v45 = vld [vmem:[#allocation39_spill] sm:$0xff]  ;;  %v9907_v35 = vld [vmem:[#allocation64_spill] sm:$0xff] }
 0x33c   :  { %v5651_v30 = vor.u32 %v6178_v48, %v5648_v47  ;;  %v6192_v55 = vld [vmem:[%s9685_s1 + $0x834] sm:$0xf] }
 0x33d   :  { %3915 = vmatpush.bf16.msra.mxu0 %v5587_v29  ;;  %v6208_v29 = vld [vmem:[%s9685_s1 + $0x8b4] sm:$0xf] }
 0x33e   :  { %3959 = vmatpush.bf16.msra.mxu1 %v5651_v30 }
 0x340   :  { %v3513_v6 = vpop.f32.mrf.mxu2  ;;  %v3569_v61 = vpop.f32.mrf.mxu0 }
 0x341   :  { %v3514_v0 = vadd.f32 %v3513_v6, %v3470_v5  ;;  %v3557_v51 = vpop.f32.mrf.mxu3  ;;  %v3570_v14 = vadd.f32 %v3569_v61, %v9127_v38  ;;  %v3613_v23 = vpop.f32.mrf.mxu1  ;;  %v5776_v38 = vld [vmem:[%s9685_s1 + $0x8c8] sm:$0xf0] }
 0x342   :  { %v5779_v5 = vor.u32 %v6210_v17, %v5776_v38  ;;  %v5704_v17 = vld [vmem:[%s9685_s1 + $0x838] sm:$0xf0] }
 0x343   :  { %v9364_v62 = vadd.f32 %v3557_v51, %v3514_v0  ;;  %v3614_v27 = vadd.f32 %v3613_v23, %v3570_v14  ;;  %3749 = vmatmul.bf16.gmra.mxu0 %v9905_v37  ;;  %v5707_v37 = vor.u32 %v6192_v55, %v5704_v17  ;;  %v5768_v38 = vld [vmem:[%s9685_s1 + $0x8b8] sm:$0xf0]  ;;  %v9911_v17 = vld [vmem:[#allocation68_spill] sm:$0xff] }
 0x344   :  { %3793 = vmatmul.bf16.gmra.mxu1 %v9906_v45  ;;  %4047 = vmatpush.bf16.msra.mxu3 %v5779_v5  ;;  %v5771_v47 = vor.u32 %v6208_v29, %v5768_v38 }
 0x345   :  { %3837 = vmatmul.bf16.gmra.mxu2 %v9907_v35 }
 0x346   :  { %3881 = vmatmul.bf16.gmra.mxu3 %v9908_v7  ;;  %4004 = vmatpush.bf16.msra.mxu2 %v5707_v37 }
 0x348   :  { %v3657_v28 = vpop.f32.mrf.mxu2  ;;  %v3571_v51 = vpop.f32.mrf.mxu0  ;;  %4048 = vmatpush.bf16.msra.mxu3 %v5771_v47 }
 0x349   :  { %v3658_v6 = vadd.f32 %v3657_v28, %v3614_v27  ;;  %v3701_v0 = vpop.f32.mrf.mxu3  ;;  %v3572_v61 = vadd.f32 %v3571_v51, %v9148_v46  ;;  %v3615_v14 = vpop.f32.mrf.mxu1  ;;  %v6160_v27 = vld [vmem:[%s9685_s1 + $0x734] sm:$0xf]  ;;  %v5576_v46 = vld [vmem:[%s9685_s1 + $0x738] sm:$0xf0] }
 0x34a   :  { %v5579_v48 = vor.u32 %v6160_v27, %v5576_v46  ;;  %v5640_v51 = vld [vmem:[%s9685_s1 + $0x7b8] sm:$0xf0] }
 0x34b   :  { %v9389_v23 = vadd.f32 %v3701_v0, %v3658_v6  ;;  %v3616_v60 = vadd.f32 %v3615_v14, %v3572_v61  ;;  %v6176_v0 = vld [vmem:[%s9685_s1 + $0x7b4] sm:$0xf]  ;;  %v9909_v14 = vld [vmem:[#allocation42_spill] sm:$0xff] }
 0x34c   :  { %3916 = vmatpush.bf16.msra.mxu0 %v5579_v48  ;;  %v5643_v55 = vor.u32 %v6176_v0, %v5640_v51  ;;  %v5760_v0 = vld [vmem:[%s9685_s1 + $0x8a8] sm:$0xf0] }
 0x34e   :  { %3960 = vmatpush.bf16.msra.mxu1 %v5643_v55  ;;  %v5632_v55 = vld [vmem:[%s9685_s1 + $0x7a8] sm:$0xf0] }
 0x350   :  { %v3659_v45 = vpop.f32.mrf.mxu2  ;;  %v3574_v30 = vpop.f32.mrf.mxu0 }
 0x351   :  { %v3660_v35 = vadd.f32 %v3659_v45, %v3616_v60  ;;  %v3703_v5 = vpop.f32.mrf.mxu3  ;;  %v3575_v7 = vadd.f32 %v3574_v30, %v9161_v19  ;;  %v3618_v28 = vpop.f32.mrf.mxu1  ;;  %v9910_v60 = vld [vmem:[#allocation43_spill] sm:$0xff]  ;;  %v9912_v19 = vld [vmem:[#allocation69_spill] sm:$0xff]  ;;  %v6158_v30 = vld [vmem:[%s9685_s1 + $0x724] sm:$0xf] }
 0x353   :  { %v9410_v6 = vadd.f32 %v3703_v5, %v3660_v35  ;;  %v3619_v61 = vadd.f32 %v3618_v28, %v3575_v7  ;;  %3754 = vmatmul.bf16.gmra.mxu0 %v9909_v14  ;;  %v6190_v35 = vld [vmem:[%s9685_s1 + $0x824] sm:$0xf]  ;;  %v5696_v5 = vld [vmem:[%s9685_s1 + $0x828] sm:$0xf0] }
 0x354   :  { %3798 = vmatmul.bf16.gmra.mxu1 %v9910_v60  ;;  %v5699_v7 = vor.u32 %v6190_v35, %v5696_v5  ;;  %v6206_v28 = vld [vmem:[%s9685_s1 + $0x8a4] sm:$0xf]  ;;  %v9914_v5 = vld [vmem:[#allocation47_spill] sm:$0xff] }
 0x355   :  { %3842 = vmatmul.bf16.gmra.mxu2 %v9911_v17  ;;  %v6174_v14 = vld [vmem:[%s9685_s1 + $0x7a4] sm:$0xf] }
 0x356   :  { %3886 = vmatmul.bf16.gmra.mxu3 %v9912_v19  ;;  %4005 = vmatpush.bf16.msra.mxu2 %v5699_v7  ;;  %v5635_v60 = vor.u32 %v6174_v14, %v5632_v55  ;;  %v9913_v35 = vld [vmem:[#allocation46_spill] sm:$0xff]  ;;  %v6204_v55 = vld [vmem:[%s9685_s1 + $0x894] sm:$0xf] }
 0x358   :  { %v3662_v27 = vpop.f32.mrf.mxu2  ;;  %v3576_v29 = vpop.f32.mrf.mxu0  ;;  %3961 = vmatpush.bf16.msra.mxu1 %v5635_v60 }
 0x359   :  { %v3663_v37 = vadd.f32 %v3662_v27, %v3619_v61  ;;  %v3706_v46 = vpop.f32.mrf.mxu3  ;;  %v3577_v38 = vadd.f32 %v3576_v29, %v9188_v40  ;;  %v3620_v48 = vpop.f32.mrf.mxu1  ;;  %v5568_v40 = vld [vmem:[%s9685_s1 + $0x728] sm:$0xf0]  ;;  %v5763_v61 = vor.u32 %v6206_v28, %v5760_v0 }
 0x35a   :  { %v5571_v51 = vor.u32 %v6158_v30, %v5568_v40 }
 0x35b   :  { %v9423_v47 = vadd.f32 %v3706_v46, %v3663_v37  ;;  %v3621_v45 = vadd.f32 %v3620_v48, %v3577_v38  ;;  %4049 = vmatpush.bf16.msra.mxu3 %v5763_v61  ;;  %v5688_v61 = vld [vmem:[%s9685_s1 + $0x818] sm:$0xf0] }
 0x35c   :  { %3917 = vmatpush.bf16.msra.mxu0 %v5571_v51  ;;  %v6188_v51 = vld [vmem:[%s9685_s1 + $0x814] sm:$0xf] }
 0x35d   :  { %v5691_v14 = vor.u32 %v6188_v51, %v5688_v61  ;;  %v9917_v51 = vld [vmem:[#allocation74_spill] sm:$0xff]  ;;  %v9918_v61 = vld [vmem:[#allocation75_spill] sm:$0xff] }
 0x35f   :  { %4006 = vmatpush.bf16.msra.mxu2 %v5691_v14 }
 0x360   :  { %v3664_v17 = vpop.f32.mrf.mxu2  ;;  %v3579_v37 = vpop.f32.mrf.mxu0 }
 0x361   :  { %v3665_v19 = vadd.f32 %v3664_v17, %v3621_v45  ;;  %v3708_v27 = vpop.f32.mrf.mxu3  ;;  %v3580_v46 = vadd.f32 %v3579_v37, %v9195_v58  ;;  %v3623_v29 = vpop.f32.mrf.mxu1  ;;  %v5752_v17 = vld [vmem:[%s9685_s1 + $0x898] sm:$0xf0] }
 0x362   :  { %v5755_v37 = vor.u32 %v6204_v55, %v5752_v17 }
 0x363   :  { %v9450_v38 = vadd.f32 %v3708_v27, %v3665_v19  ;;  %v3624_v48 = vadd.f32 %v3623_v29, %v3580_v46  ;;  %3759 = vmatmul.bf16.gmra.mxu0 %v9913_v35  ;;  %v6172_v19 = vld [vmem:[%s9685_s1 + $0x794] sm:$0xf]  ;;  %v5624_v27 = vld [vmem:[%s9685_s1 + $0x798] sm:$0xf0] }
 0x364   :  { %3803 = vmatmul.bf16.gmra.mxu1 %v9914_v5  ;;  %v5627_v46 = vor.u32 %v6172_v19, %v5624_v27  ;;  %4050 = vmatpush.bf16.msra.mxu3 %v5755_v37  ;;  %v6154_v37 = vld [vmem:[%s9685_s1 + $0x704] sm:$0xf] }
 0x365   :  { %3847 = vmatmul.bf16.gmra.mxu2 %v8138_v18 }
 0x366   :  { %3891 = vmatmul.bf16.gmra.mxu3 %v8140_v43  ;;  %v6156_v43 = vld [vmem:[%s9685_s1 + $0x714] sm:$0xf]  ;;  %3962 = vmatpush.bf16.msra.mxu1 %v5627_v46  ;;  %v5552_v46 = vld [vmem:[%s9685_s1 + $0x708] sm:$0xf0] }
 0x368   :  { %v3667_v30 = vpop.f32.mrf.mxu2  ;;  %v3581_v40 = vpop.f32.mrf.mxu0 }
 0x369   :  { %v3668_v7 = vadd.f32 %v3667_v30, %v3624_v48  ;;  %v3711_v45 = vpop.f32.mrf.mxu3  ;;  %v3582_v28 = vadd.f32 %v3581_v40, %v9222_v8  ;;  %v3625_v0 = vpop.f32.mrf.mxu1  ;;  %v5560_v8 = vld [vmem:[%s9685_s1 + $0x718] sm:$0xf0] }
 0x36a   :  { %v5563_v60 = vor.u32 %v6156_v43, %v5560_v8 }
 0x36b   :  { %v9457_v58 = vadd.f32 %v3711_v45, %v3668_v7  ;;  %v3626_v18 = vadd.f32 %v3625_v0, %v3582_v28  ;;  %v9915_v28 = vld [vmem:[#allocation50_spill] sm:$0xff]  ;;  %v9916_v0 = vld [vmem:[#allocation51_spill] sm:$0xff] }
 0x36c   :  { %3918 = vmatpush.bf16.msra.mxu0 %v5563_v60 }
 0x370   :  { %v3669_v29 = vpop.f32.mrf.mxu2  ;;  %v3584_v5 = vpop.f32.mrf.mxu0 }
 0x371   :  { %v3670_v48 = vadd.f32 %v3669_v29, %v3626_v18  ;;  %v3713_v35 = vpop.f32.mrf.mxu3  ;;  %v3585_v30 = vadd.f32 %v3584_v5, %v9235_v24  ;;  %v3628_v7 = vpop.f32.mrf.mxu1  ;;  %v6186_v18 = vld [vmem:[%s9685_s1 + $0x804] sm:$0xf]  ;;  %v5680_v24 = vld [vmem:[%s9685_s1 + $0x808] sm:$0xf0] }
 0x372   :  { %v5683_v14 = vor.u32 %v6186_v18, %v5680_v24  ;;  %v6202_v29 = vld [vmem:[%s9685_s1 + $0x884] sm:$0xf] }
 0x373   :  { %v9484_v45 = vadd.f32 %v3713_v35, %v3670_v48  ;;  %v3629_v40 = vadd.f32 %v3628_v7, %v3585_v30  ;;  %3764 = vmatmul.bf16.gmra.mxu0 %v9915_v28  ;;  %v5555_v35 = vor.u32 %v6154_v37, %v5552_v46  ;;  %v6170_v5 = vld [vmem:[%s9685_s1 + $0x784] sm:$0xf]  ;;  %v5616_v30 = vld [vmem:[%s9685_s1 + $0x788] sm:$0xf0] }
 0x374   :  { %3808 = vmatmul.bf16.gmra.mxu1 %v9916_v0  ;;  %4007 = vmatpush.bf16.msra.mxu2 %v5683_v14 }
 0x375   :  { %3852 = vmatmul.bf16.gmra.mxu2 %v9917_v51  ;;  %3919 = vmatpush.bf16.msra.mxu0 %v5555_v35 }
 0x376   :  { %3896 = vmatmul.bf16.gmra.mxu3 %v9918_v61 }
 0x378   :  { %v3672_v43 = vpop.f32.mrf.mxu2  ;;  %v3586_v60 = vpop.f32.mrf.mxu0 }
 0x379   :  { %v3673_v8 = vadd.f32 %v3672_v43, %v3629_v40  ;;  %v3716_v55 = vpop.f32.mrf.mxu3  ;;  %v3587_v17 = vadd.f32 %v3586_v60, %v9256_v3  ;;  %v3630_v19 = vpop.f32.mrf.mxu1  ;;  %v5744_v3 = vld [vmem:[%s9685_s1 + $0x888] sm:$0xf0]  ;;  %v5619_v40 = vor.u32 %v6170_v5, %v5616_v30 }
 0x37a   :  { %v5747_v7 = vor.u32 %v6202_v29, %v5744_v3 }
 0x37b   :  { %v9497_v27 = vadd.f32 %v3716_v55, %v3673_v8  ;;  %v3631_v48 = vadd.f32 %v3630_v19, %v3587_v17  ;;  %3963 = vmatpush.bf16.msra.mxu1 %v5619_v40  ;;  %v9919_v8 = vld [vmem:[#allocation54_spill] sm:$0xff]  ;;  %v9920_v55 = vld [vmem:[#allocation55_spill] sm:$0xff] }
 0x37c   :  { %4051 = vmatpush.bf16.msra.mxu3 %v5747_v7 }
 0x380   :  { %v3674_v28 = vpop.f32.mrf.mxu2  ;;  %v3589_v61 = vpop.f32.mrf.mxu0 }
 0x381   :  { %v3675_v0 = vadd.f32 %v3674_v28, %v3631_v48  ;;  %v3718_v51 = vpop.f32.mrf.mxu3  ;;  %v3590_v18 = vadd.f32 %v3589_v61, %v9281_v32  ;;  %v3633_v24 = vpop.f32.mrf.mxu1  ;;  %v9921_v28 = vld [vmem:[#allocation58_spill] sm:$0xff] }
 0x383   :  { %v9518_v14 = vadd.f32 %v3718_v51, %v3675_v0  ;;  %v3634_v43 = vadd.f32 %v3633_v24, %v3590_v18  ;;  %3769 = vmatmul.bf16.gmra.mxu0 %v9919_v8  ;;  %v9922_v0 = vld [vmem:[#allocation59_spill] sm:$0xff] }
 0x384   :  { %3813 = vmatmul.bf16.gmra.mxu1 %v9920_v55 }
 0x385   :  { %3857 = vmatmul.bf16.gmra.mxu2 %v8270_v11 }
 0x386   :  { %3901 = vmatmul.bf16.gmra.mxu3 %v8272_v26 }
 0x388   :  { %v3677_v60 = vpop.f32.mrf.mxu2  ;;  %v3591_v37 = vpop.f32.mrf.mxu0 }
 0x389   :  { %v3678_v17 = vadd.f32 %v3677_v60, %v3634_v43  ;;  %v3721_v19 = vpop.f32.mrf.mxu3  ;;  %v3592_v46 = vadd.f32 %v3591_v37, %v9290_v10  ;;  %v3635_v29 = vpop.f32.mrf.mxu1 }
 0x38b   :  { %v9525_v32 = vadd.f32 %v3721_v19, %v3678_v17  ;;  %v3636_v48 = vadd.f32 %v3635_v29, %v3592_v46  ;;  %v9923_v29 = vld [vmem:[#allocation62_spill] sm:$0xff] }
 0x390   :  { %v3679_v35 = vpop.f32.mrf.mxu2  ;;  %v3594_v30 = vpop.f32.mrf.mxu0 }
 0x391   :  { %v3680_v3 = vadd.f32 %v3679_v35, %v3636_v48  ;;  %v3723_v5 = vpop.f32.mrf.mxu3  ;;  %v3595_v7 = vadd.f32 %v3594_v30, %v9321_v57  ;;  %v3638_v40 = vpop.f32.mrf.mxu1  ;;  %v9924_v48 = vld [vmem:[#allocation63_spill] sm:$0xff] }
 0x393   :  { %v9528_v11 = vadd.f32 %v3723_v5, %v3680_v3  ;;  %v3639_v26 = vadd.f32 %v3638_v40, %v3595_v7  ;;  %3774 = vmatmul.bf16.gmra.mxu0 %v9921_v28 }
 0x394   :  { %3818 = vmatmul.bf16.gmra.mxu1 %v9922_v0 }
 0x395   :  { %3862 = vmatmul.bf16.gmra.mxu2 %v8336_v15 }
 0x396   :  { %3906 = vmatmul.bf16.gmra.mxu3 %v8338_v52 }
 0x398   :  { %v3682_v10 = vpop.f32.mrf.mxu2  ;;  %v3596_v18 = vpop.f32.mrf.mxu0 }
 0x399   :  { %v3683_v51 = vadd.f32 %v3682_v10, %v3639_v26  ;;  %v3726_v61 = vpop.f32.mrf.mxu3  ;;  %v3597_v24 = vadd.f32 %v3596_v18, %v9324_v34  ;;  %v3640_v43 = vpop.f32.mrf.mxu1  ;;  %v9925_v18 = vld [vmem:[#allocation66_spill] sm:$0xff] }
 0x39b   :  { %v9535_v57 = vadd.f32 %v3726_v61, %v3683_v51  ;;  %v3641_v8 = vadd.f32 %v3640_v43, %v3597_v24  ;;  %v9926_v24 = vld [vmem:[#allocation67_spill] sm:$0xff]  ;;  %v9927_v43 = vld [vmem:[#allocation82_spill] sm:$0xff] }
 0x3a0   :  { %v3684_v55 = vpop.f32.mrf.mxu2  ;;  %v3599_v19 = vpop.f32.mrf.mxu0 }
 0x3a1   :  { %v3685_v60 = vadd.f32 %v3684_v55, %v3641_v8  ;;  %v3728_v17 = vpop.f32.mrf.mxu3  ;;  %v3600_v37 = vadd.f32 %v3599_v19, %v9355_v4  ;;  %v3643_v46 = vpop.f32.mrf.mxu1 }
 0x3a3   :  { %v9538_v15 = vadd.f32 %v3728_v17, %v3685_v60  ;;  %v3644_v52 = vadd.f32 %v3643_v46, %v3600_v37  ;;  %3920 = vmatmul.bf16.vlgmr.msra.gmra.mxu0 %v9923_v29 }
 0x3a4   :  { %3964 = vmatmul.bf16.vlgmr.msra.gmra.mxu1 %v9924_v48 }
 0x3a5   :  { %4008 = vmatmul.bf16.vlgmr.msra.gmra.mxu2 %v8390_v59 }
 0x3a6   :  { %4052 = vmatmul.bf16.vlgmr.msra.gmra.mxu3 %v8392_v42 }
 0x3a8   :  { %v3687_v34 = vpop.f32.mrf.mxu2  ;;  %v3601_v5 = vpop.f32.mrf.mxu0 }
 0x3a9   :  { %v3688_v35 = vadd.f32 %v3687_v34, %v3644_v52  ;;  %v3731_v3 = vpop.f32.mrf.mxu3  ;;  %v3602_v30 = vadd.f32 %v3601_v5, %v9364_v62  ;;  %v3645_v7 = vpop.f32.mrf.mxu1  ;;  %v9928_v62 = vld [vmem:[#allocation83_spill] sm:$0xff] }
 0x3ab   :  { %v9545_v4 = vadd.f32 %v3731_v3, %v3688_v35  ;;  %v3646_v40 = vadd.f32 %v3645_v7, %v3602_v30  ;;  %v9929_v7 = vld [vmem:[#allocation70_spill] sm:$0xff] }
 0x3b0   :  { %v3689_v26 = vpop.f32.mrf.mxu2  ;;  %v3745_v10 = vpop.f32.mrf.mxu0 }
 0x3b1   :  { %v3690_v28 = vadd.f32 %v3689_v26, %v3646_v40  ;;  %v3733_v0 = vpop.f32.mrf.mxu3  ;;  %v3746_v51 = vadd.f32 %v3745_v10, %v9389_v23  ;;  %v3789_v61 = vpop.f32.mrf.mxu1  ;;  %v9930_v40 = vld [vmem:[#allocation71_spill] sm:$0xff] }
 0x3b3   :  { %v9548_v59 = vadd.f32 %v3733_v0, %v3690_v28  ;;  %v3790_v42 = vadd.f32 %v3789_v61, %v3746_v51  ;;  %3925 = vmatmul.bf16.gmra.mxu0 %v9925_v18 }
 0x3b4   :  { %3969 = vmatmul.bf16.gmra.mxu1 %v9926_v24 }
 0x3b5   :  { %4013 = vmatmul.bf16.gmra.mxu2 %v9927_v43 }
 0x3b6   :  { %4057 = vmatmul.bf16.gmra.mxu3 %v9928_v62 }
 0x3b8   :  { %v3833_v8 = vpop.f32.mrf.mxu2  ;;  %v3747_v17 = vpop.f32.mrf.mxu0 }
 0x3b9   :  { %v3834_v55 = vadd.f32 %v3833_v8, %v3790_v42  ;;  %v3877_v60 = vpop.f32.mrf.mxu3  ;;  %v3748_v19 = vadd.f32 %v3747_v17, %v9410_v6  ;;  %v3791_v37 = vpop.f32.mrf.mxu1  ;;  %v9933_v17 = vld [vmem:[#allocation84_spill] sm:$0xff] }
 0x3bb   :  { %v9555_v23 = vadd.f32 %v3877_v60, %v3834_v55  ;;  %v3792_v46 = vadd.f32 %v3791_v37, %v3748_v19  ;;  %v9931_v55 = vld [vmem:[#allocation72_spill] sm:$0xff]  ;;  %v9932_v60 = vld [vmem:[#allocation73_spill] sm:$0xff] }
 0x3c0   :  { %v3835_v52 = vpop.f32.mrf.mxu2  ;;  %v3750_v34 = vpop.f32.mrf.mxu0 }
 0x3c1   :  { %v3836_v29 = vadd.f32 %v3835_v52, %v3792_v46  ;;  %v3879_v48 = vpop.f32.mrf.mxu3  ;;  %v3751_v35 = vadd.f32 %v3750_v34, %v9423_v47  ;;  %v3794_v3 = vpop.f32.mrf.mxu1 }
 0x3c3   :  { %v9558_v5 = vadd.f32 %v3879_v48, %v3836_v29  ;;  %v3795_v30 = vadd.f32 %v3794_v3, %v3751_v35  ;;  %3930 = vmatmul.bf16.gmra.mxu0 %v9929_v7 }
 0x3c4   :  { %3974 = vmatmul.bf16.gmra.mxu1 %v9930_v40 }
 0x3c5   :  { %4018 = vmatmul.bf16.gmra.mxu2 %v8508_v53 }
 0x3c6   :  { %4062 = vmatmul.bf16.gmra.mxu3 %v8510_v12 }
 0x3c8   :  { %v3838_v6 = vpop.f32.mrf.mxu2  ;;  %v3752_v0 = vpop.f32.mrf.mxu0 }
 0x3c9   :  { %v3839_v26 = vadd.f32 %v3838_v6, %v3795_v30  ;;  %v3882_v28 = vpop.f32.mrf.mxu3  ;;  %v3753_v10 = vadd.f32 %v3752_v0, %v9450_v38  ;;  %v3796_v51 = vpop.f32.mrf.mxu1  ;;  %v9934_v38 = vld [vmem:[#allocation85_spill] sm:$0xff]  ;;  %v9935_v0 = vld [vmem:[#allocation76_spill] sm:$0xff] }
 0x3cb   :  { %v9565_v47 = vadd.f32 %v3882_v28, %v3839_v26  ;;  %v3797_v61 = vadd.f32 %v3796_v51, %v3753_v10  ;;  %v9936_v10 = vld [vmem:[#allocation77_spill] sm:$0xff] }
 0x3d0   :  { %v3840_v42 = vpop.f32.mrf.mxu2  ;;  %v3755_v43 = vpop.f32.mrf.mxu0 }
 0x3d1   :  { %v3841_v18 = vadd.f32 %v3840_v42, %v3797_v61  ;;  %v3884_v24 = vpop.f32.mrf.mxu3  ;;  %v3756_v62 = vadd.f32 %v3755_v43, %v9457_v58  ;;  %v3799_v8 = vpop.f32.mrf.mxu1 }
 0x3d3   :  { %v9568_v53 = vadd.f32 %v3884_v24, %v3841_v18  ;;  %v3800_v12 = vadd.f32 %v3799_v8, %v3756_v62  ;;  %3935 = vmatmul.bf16.gmra.mxu0 %v9931_v55 }
 0x3d4   :  { %3979 = vmatmul.bf16.gmra.mxu1 %v9932_v60 }
 0x3d5   :  { %4023 = vmatmul.bf16.gmra.mxu2 %v9933_v17 }
 0x3d6   :  { %4067 = vmatmul.bf16.gmra.mxu3 %v9934_v38  ;;  %v9937_v38 = vld [vmem:[#allocation78_spill] sm:$0xff] }
 0x3d8   :  { %v3843_v19 = vpop.f32.mrf.mxu2  ;;  %v3757_v52 = vpop.f32.mrf.mxu0 }
 0x3d9   :  { %v3844_v37 = vadd.f32 %v3843_v19, %v3800_v12  ;;  %v3887_v46 = vpop.f32.mrf.mxu3  ;;  %v3758_v29 = vadd.f32 %v3757_v52, %v9484_v45  ;;  %v3801_v48 = vpop.f32.mrf.mxu1  ;;  %v9938_v19 = vld [vmem:[#allocation79_spill] sm:$0xff] }
 0x3db   :  { %v9575_v58 = vadd.f32 %v3887_v46, %v3844_v37  ;;  %v3802_v34 = vadd.f32 %v3801_v48, %v3758_v29 }
 0x3e0   :  { %v3845_v35 = vpop.f32.mrf.mxu2  ;;  %v3760_v7 = vpop.f32.mrf.mxu0 }
 0x3e1   :  { %v3846_v3 = vadd.f32 %v3845_v35, %v3802_v34  ;;  %v3889_v30 = vpop.f32.mrf.mxu3  ;;  %v3761_v40 = vadd.f32 %v3760_v7, %v9497_v27  ;;  %v3804_v6 = vpop.f32.mrf.mxu1 }
 0x3e3   :  { %v9578_v26 = vadd.f32 %v3889_v30, %v3846_v3  ;;  %v3805_v28 = vadd.f32 %v3804_v6, %v3761_v40  ;;  %3940 = vmatmul.bf16.gmra.mxu0 %v9935_v0  ;;  %v9940_v0 = vld [vmem:[#allocation81_spill] sm:$0xff] }
 0x3e4   :  { %3984 = vmatmul.bf16.gmra.mxu1 %v9936_v10 }
 0x3e5   :  { %4028 = vmatmul.bf16.gmra.mxu2 %v8614_v1 }
 0x3e6   :  { %4072 = vmatmul.bf16.gmra.mxu3 %v8616_v25 }
 0x3e8   :  { %v3848_v45 = vpop.f32.mrf.mxu2  ;;  %v3762_v42 = vpop.f32.mrf.mxu0 }
 0x3e9   :  { %v3849_v51 = vadd.f32 %v3848_v45, %v3805_v28  ;;  %v3892_v61 = vpop.f32.mrf.mxu3  ;;  %v3763_v18 = vadd.f32 %v3762_v42, %v9518_v14  ;;  %v3806_v24 = vpop.f32.mrf.mxu1  ;;  %v9939_v28 = vld [vmem:[#allocation80_spill] sm:$0xff] }
 0x3eb   :  { %v9585_v27 = vadd.f32 %v3892_v61, %v3849_v51  ;;  %v3807_v43 = vadd.f32 %v3806_v24, %v3763_v18 }
 0x3f0   :  { %v3850_v62 = vpop.f32.mrf.mxu2  ;;  %v3765_v55 = vpop.f32.mrf.mxu0 }
 0x3f1   :  { %v3851_v8 = vadd.f32 %v3850_v62, %v3807_v43  ;;  %v3894_v12 = vpop.f32.mrf.mxu3  ;;  %v3766_v60 = vadd.f32 %v3765_v55, %v9525_v32  ;;  %v3809_v17 = vpop.f32.mrf.mxu1 }
 0x3f3   :  { %v9588_v1 = vadd.f32 %v3894_v12, %v3851_v8  ;;  %v3810_v25 = vadd.f32 %v3809_v17, %v3766_v60  ;;  %3945 = vmatmul.bf16.gmra.mxu0 %v9937_v38 }
 0x3f4   :  { %3989 = vmatmul.bf16.gmra.mxu1 %v9938_v19 }
 0x3f5   :  { %4033 = vmatmul.bf16.gmra.mxu2 %v8664_v22 }
 0x3f6   :  { %4077 = vmatmul.bf16.gmra.mxu3 %v8666_v13 }
 0x3f8   :  { %v3853_v14 = vpop.f32.mrf.mxu2  ;;  %v3767_v52 = vpop.f32.mrf.mxu0 }
 0x3f9   :  { %v3854_v37 = vadd.f32 %v3853_v14, %v3810_v25  ;;  %v3897_v46 = vpop.f32.mrf.mxu3  ;;  %v3768_v29 = vadd.f32 %v3767_v52, %v9528_v11  ;;  %v3811_v48 = vpop.f32.mrf.mxu1 }
 0x3fb   :  { %v9595_v32 = vadd.f32 %v3897_v46, %v3854_v37  ;;  %v3812_v34 = vadd.f32 %v3811_v48, %v3768_v29 }
 0x400   :  { %v3855_v35 = vpop.f32.mrf.mxu2  ;;  %v3770_v7 = vpop.f32.mrf.mxu0 }
 0x401   :  { %v3856_v3 = vadd.f32 %v3855_v35, %v3812_v34  ;;  %v3899_v30 = vpop.f32.mrf.mxu3  ;;  %v3771_v40 = vadd.f32 %v3770_v7, %v9535_v57  ;;  %v3814_v6 = vpop.f32.mrf.mxu1 }
 0x403   :  { %v9598_v22 = vadd.f32 %v3899_v30, %v3856_v3  ;;  %v3815_v13 = vadd.f32 %v3814_v6, %v3771_v40  ;;  %3950 = vmatmul.bf16.gmra.mxu0 %v9939_v28 }
 0x404   :  { %3994 = vmatmul.bf16.gmra.mxu1 %v9940_v0  ;;  %v4088_v0 = vmax.f32 %v8804_v54, 0.0 }
 0x405   :  { %4038 = vmatmul.bf16.gmra.mxu2 %v8714_v16 }
 0x406   :  { %4082 = vmatmul.bf16.gmra.mxu3 %v8716_v20 }
 0x408   :  { %v3858_v11 = vpop.f32.mrf.mxu2  ;;  %v3772_v51 = vpop.f32.mrf.mxu0 }
 0x409   :  { %v3859_v10 = vadd.f32 %v3858_v11, %v3815_v13  ;;  %v3902_v45 = vpop.f32.mrf.mxu3  ;;  %v3773_v61 = vadd.f32 %v3772_v51, %v9538_v15  ;;  %v3816_v42 = vpop.f32.mrf.mxu1 }
 0x40b   :  { %v9605_v57 = vadd.f32 %v3902_v45, %v3859_v10  ;;  %v3817_v18 = vadd.f32 %v3816_v42, %v3773_v61 }
 0x410   :  { %v3860_v24 = vpop.f32.mrf.mxu2  ;;  %v3775_v8 = vpop.f32.mrf.mxu0 }
 0x411   :  { %v3861_v43 = vadd.f32 %v3860_v24, %v3817_v18  ;;  %v3904_v62 = vpop.f32.mrf.mxu3  ;;  %v3776_v12 = vadd.f32 %v3775_v8, %v9545_v4  ;;  %v3819_v55 = vpop.f32.mrf.mxu1 }
 0x413   :  { %v9608_v16 = vadd.f32 %v3904_v62, %v3861_v43  ;;  %v3820_v20 = vadd.f32 %v3819_v55, %v3776_v12  ;;  %v4090_v62 = vmax.f32 %v8828_v56, 0.0 }
 0x418   :  { %v3863_v60 = vpop.f32.mrf.mxu2  ;;  %v3777_v38 = vpop.f32.mrf.mxu0 }
 0x419   :  { %v3864_v17 = vadd.f32 %v3863_v60, %v3820_v20  ;;  %v3907_v25 = vpop.f32.mrf.mxu3  ;;  %v3778_v15 = vadd.f32 %v3777_v38, %v9548_v59  ;;  %v3821_v19 = vpop.f32.mrf.mxu1 }
 0x41b   :  { %v9611_v14 = vadd.f32 %v3907_v25, %v3864_v17  ;;  %v3822_v37 = vadd.f32 %v3821_v19, %v3778_v15  ;;  %v4092_v15 = vmax.f32 %v8858_v33, 0.0 }
 0x420   :  { %v3865_v46 = vpop.f32.mrf.mxu2  ;;  %v3921_v48 = vpop.f32.mrf.mxu0 }
 0x421   :  { %v3866_v52 = vadd.f32 %v3865_v46, %v3822_v37  ;;  %v3909_v29 = vpop.f32.mrf.mxu3  ;;  %v3965_v34 = vpop.f32.mrf.mxu1  ;;  %v3922_v35 = vadd.f32 %v3921_v48, %v9555_v23 }
 0x423   :  { %v9613_v4 = vadd.f32 %v3909_v29, %v3866_v52  ;;  %v3966_v3 = vadd.f32 %v3965_v34, %v3922_v35 }
 0x428   :  { %v4009_v30 = vpop.f32.mrf.mxu2  ;;  %v3923_v6 = vpop.f32.mrf.mxu0 }
 0x429   :  { %v4010_v7 = vadd.f32 %v4009_v30, %v3966_v3  ;;  %v4053_v40 = vpop.f32.mrf.mxu3  ;;  %v3967_v13 = vpop.f32.mrf.mxu1  ;;  %v3924_v28 = vadd.f32 %v3923_v6, %v9558_v5  ;;  %v4094_v3 = vmax.f32 %v8868_v41, 0.0 }
 0x42b   :  { %v4054_v59 = vadd.f32 %v4053_v40, %v4010_v7  ;;  %v3968_v45 = vadd.f32 %v3967_v13, %v3924_v28 }
 0x42d   :  { %v4089_v11 = vmax.f32 %v4054_v59, 0.0 }
 0x42f   :  { %v4116_v10 = vpack.c.bf16 %v4089_v11, %v4088_v0  ;;  %v4096_v11 = vmax.f32 %v8898_v9, 0.0 }
 0x430   :  { %v4011_v51 = vpop.f32.mrf.mxu2  ;;  %v3926_v42 = vpop.f32.mrf.mxu0 }
 0x431   :  { %4130 = vst [vmem:[%s9688_s3] sm:$0xff] %v4116_v10  ;;  %v4012_v23 = vadd.f32 %v4011_v51, %v3968_v45  ;;  %v4055_v61 = vpop.f32.mrf.mxu3  ;;  %v3970_v18 = vpop.f32.mrf.mxu1  ;;  %v3927_v43 = vadd.f32 %v3926_v42, %v9565_v47 }
 0x433   :  { %v4056_v24 = vadd.f32 %v4055_v61, %v4012_v23  ;;  %v3971_v54 = vadd.f32 %v3970_v18, %v3927_v43  ;;  %v4098_v43 = vmax.f32 %v8914_v50, 0.0 }
 0x435   :  { %v4091_v5 = vmax.f32 %v4056_v24, 0.0 }
 0x437   :  { %v4117_v8 = vpack.c.bf16 %v4091_v5, %v4090_v62 }
 0x438   :  { %v4014_v12 = vpop.f32.mrf.mxu2  ;;  %v3928_v60 = vpop.f32.mrf.mxu0 }
 0x439   :  { %4131 = vst [vmem:[%s9688_s3 + $0x8] sm:$0xff] %v4117_v8  ;;  %v4015_v55 = vadd.f32 %v4014_v12, %v3971_v54  ;;  %v4058_v20 = vpop.f32.mrf.mxu3  ;;  %v3972_v17 = vpop.f32.mrf.mxu1  ;;  %v3929_v38 = vadd.f32 %v3928_v60, %v9568_v53 }
 0x43b   :  { %v4059_v25 = vadd.f32 %v4058_v20, %v4015_v55  ;;  %v3973_v56 = vadd.f32 %v3972_v17, %v3929_v38  ;;  %v4100_v17 = vmax.f32 %v8938_v36, 0.0 }
 0x43d   :  { %v4093_v47 = vmax.f32 %v4059_v25, 0.0 }
 0x43f   :  { %v4118_v19 = vpack.c.bf16 %v4093_v47, %v4092_v15 }
 0x440   :  { %v4016_v37 = vpop.f32.mrf.mxu2  ;;  %v3931_v29 = vpop.f32.mrf.mxu0 }
 0x441   :  { %4132 = vst [vmem:[%s9688_s3 + $0x10] sm:$0xff] %v4118_v19  ;;  %v4017_v46 = vadd.f32 %v4016_v37, %v3973_v56  ;;  %v4060_v52 = vpop.f32.mrf.mxu3  ;;  %v3975_v48 = vpop.f32.mrf.mxu1  ;;  %v3932_v35 = vadd.f32 %v3931_v29, %v9575_v58 }
 0x443   :  { %v4061_v34 = vadd.f32 %v4060_v52, %v4017_v46  ;;  %v3976_v33 = vadd.f32 %v3975_v48, %v3932_v35  ;;  %v4102_v52 = vmax.f32 %v8963_v21, 0.0 }
 0x445   :  { %v4095_v53 = vmax.f32 %v4061_v34, 0.0 }
 0x447   :  { %v4119_v30 = vpack.c.bf16 %v4095_v53, %v4094_v3 }
 0x448   :  { %v4019_v7 = vpop.f32.mrf.mxu2  ;;  %v3933_v13 = vpop.f32.mrf.mxu0 }
 0x449   :  { %4133 = vst [vmem:[%s9688_s3 + $0x18] sm:$0xff] %v4119_v30  ;;  %v4020_v40 = vadd.f32 %v4019_v7, %v3976_v33  ;;  %v4063_v6 = vpop.f32.mrf.mxu3  ;;  %v3977_v59 = vpop.f32.mrf.mxu1  ;;  %v3934_v0 = vadd.f32 %v3933_v13, %v9578_v26  ;;  %v4104_v7 = vmax.f32 %v8978_v39, 0.0 }
 0x44b   :  { %v4064_v28 = vadd.f32 %v4063_v6, %v4020_v40  ;;  %v3978_v41 = vadd.f32 %v3977_v59, %v3934_v0 }
 0x44d   :  { %v4097_v58 = vmax.f32 %v4064_v28, 0.0 }
 0x44f   :  { %v4120_v10 = vpack.c.bf16 %v4097_v58, %v4096_v11 }
 0x450   :  { %v4021_v45 = vpop.f32.mrf.mxu2  ;;  %v3936_v61 = vpop.f32.mrf.mxu0 }
 0x451   :  { %4134 = vst [vmem:[%s9688_s3 + $0x20] sm:$0xff] %v4120_v10  ;;  %v4022_v51 = vadd.f32 %v4021_v45, %v3978_v41  ;;  %v4065_v23 = vpop.f32.mrf.mxu3  ;;  %v3980_v42 = vpop.f32.mrf.mxu1  ;;  %v3937_v24 = vadd.f32 %v3936_v61, %v9585_v27  ;;  %v4106_v10 = vmax.f32 %v9012_v49, 0.0 }
 0x453   :  { %v4066_v18 = vadd.f32 %v4065_v23, %v4022_v51  ;;  %v3981_v9 = vadd.f32 %v3980_v42, %v3937_v24 }
 0x455   :  { %v4099_v26 = vmax.f32 %v4066_v18, 0.0 }
 0x457   :  { %v4121_v62 = vpack.c.bf16 %v4099_v26, %v4098_v43  ;;  %v4108_v43 = vmax.f32 %v9018_v44, 0.0 }
 0x458   :  { %v4024_v5 = vpop.f32.mrf.mxu2  ;;  %v3938_v12 = vpop.f32.mrf.mxu0 }
 0x459   :  { %4135 = vst [vmem:[%s9688_s3 + $0x28] sm:$0xff] %v4121_v62  ;;  %v4025_v8 = vadd.f32 %v4024_v5, %v3981_v9  ;;  %v4068_v54 = vpop.f32.mrf.mxu3  ;;  %v3982_v55 = vpop.f32.mrf.mxu1  ;;  %v3939_v60 = vadd.f32 %v3938_v12, %v9588_v1 }
 0x45b   :  { %v4069_v20 = vadd.f32 %v4068_v54, %v4025_v8  ;;  %v3983_v50 = vadd.f32 %v3982_v55, %v3939_v60 }
 0x45d   :  { %v4101_v27 = vmax.f32 %v4069_v20, 0.0  ;;  %v4110_v20 = vmax.f32 %v9052_v2, 0.0 }
 0x45f   :  { %v4122_v25 = vpack.c.bf16 %v4101_v27, %v4100_v17 }
 0x460   :  { %v4026_v38 = vpop.f32.mrf.mxu2  ;;  %v3941_v19 = vpop.f32.mrf.mxu0 }
 0x461   :  { %4136 = vst [vmem:[%s9688_s3 + $0x30] sm:$0xff] %v4122_v25  ;;  %v4027_v15 = vadd.f32 %v4026_v38, %v3983_v50  ;;  %v4070_v47 = vpop.f32.mrf.mxu3  ;;  %v3985_v56 = vpop.f32.mrf.mxu1  ;;  %v3942_v46 = vadd.f32 %v3941_v19, %v9595_v32 }
 0x463   :  { %v4071_v37 = vadd.f32 %v4070_v47, %v4027_v15  ;;  %v3986_v36 = vadd.f32 %v3985_v56, %v3942_v46  ;;  %v4112_v47 = vmax.f32 %v9064_v63, 0.0 }
 0x465   :  { %v4103_v1 = vmax.f32 %v4071_v37, 0.0 }
 0x467   :  { %v4123_v29 = vpack.c.bf16 %v4103_v1, %v4102_v52 }
 0x468   :  { %v4029_v48 = vpop.f32.mrf.mxu2  ;;  %v3943_v3 = vpop.f32.mrf.mxu0 }
 0x469   :  { %4137 = vst [vmem:[%s9688_s3 + $0x38] sm:$0xff] %v4123_v29  ;;  %v4030_v34 = vadd.f32 %v4029_v48, %v3986_v36  ;;  %v4073_v35 = vpop.f32.mrf.mxu3  ;;  %v3987_v53 = vpop.f32.mrf.mxu1  ;;  %v3944_v33 = vadd.f32 %v3943_v3, %v9598_v22  ;;  %v4114_v29 = vmax.f32 %v9092_v31, 0.0 }
 0x46b   :  { %v4074_v30 = vadd.f32 %v4073_v35, %v4030_v34  ;;  %v3988_v21 = vadd.f32 %v3987_v53, %v3944_v33 }
 0x46d   :  { %v4105_v32 = vmax.f32 %v4074_v30, 0.0 }
 0x46f   :  { %v4124_v40 = vpack.c.bf16 %v4105_v32, %v4104_v7 }
 0x470   :  { %v4031_v6 = vpop.f32.mrf.mxu2  ;;  %v3946_v28 = vpop.f32.mrf.mxu0 }
 0x471   :  { %4138 = vst [vmem:[%s9688_s3 + $0x40] sm:$0xff] %v4124_v40  ;;  %v4032_v13 = vadd.f32 %v4031_v6, %v3988_v21  ;;  %v4075_v59 = vpop.f32.mrf.mxu3  ;;  %v3990_v0 = vpop.f32.mrf.mxu1  ;;  %v3947_v58 = vadd.f32 %v3946_v28, %v9605_v57 }
 0x473   :  { %v4076_v11 = vadd.f32 %v4075_v59, %v4032_v13  ;;  %v3991_v39 = vadd.f32 %v3990_v0, %v3947_v58 }
 0x475   :  { %v4107_v22 = vmax.f32 %v4076_v11, 0.0 }
 0x477   :  { %v4125_v41 = vpack.c.bf16 %v4107_v22, %v4106_v10 }
 0x478   :  { %v4034_v45 = vpop.f32.mrf.mxu2  ;;  %v3948_v61 = vpop.f32.mrf.mxu0 }
 0x479   :  { %4139 = vst [vmem:[%s9688_s3 + $0x48] sm:$0xff] %v4125_v41  ;;  %v4035_v51 = vadd.f32 %v4034_v45, %v3991_v39  ;;  %v4078_v23 = vpop.f32.mrf.mxu3  ;;  %v3992_v42 = vpop.f32.mrf.mxu1  ;;  %v3949_v24 = vadd.f32 %v3948_v61, %v9608_v16 }
 0x47b   :  { %v4079_v18 = vadd.f32 %v4078_v23, %v4035_v51  ;;  %v3993_v49 = vadd.f32 %v3992_v42, %v3949_v24 }
 0x47d   :  { %v4109_v57 = vmax.f32 %v4079_v18, 0.0 }
 0x47f   :  { %v4126_v26 = vpack.c.bf16 %v4109_v57, %v4108_v43 }
 0x480   :  { %v4036_v62 = vpop.f32.mrf.mxu2  ;;  %v3951_v8 = vpop.f32.mrf.mxu0 }
 0x481   :  { %4140 = vst [vmem:[%s9688_s3 + $0x50] sm:$0xff] %v4126_v26  ;;  %v4037_v9 = vadd.f32 %v4036_v62, %v3993_v49  ;;  %v4080_v5 = vpop.f32.mrf.mxu3  ;;  %v3952_v12 = vadd.f32 %v3951_v8, %v9611_v14  ;;  %v3995_v55 = vpop.f32.mrf.mxu1 }
 0x483   :  { %v4081_v54 = vadd.f32 %v4080_v5, %v4037_v9  ;;  %v3996_v44 = vadd.f32 %v3995_v55, %v3952_v12 }
 0x485   :  { %v4111_v16 = vmax.f32 %v4081_v54, 0.0 }
 0x487   :  { %v4127_v60 = vpack.c.bf16 %v4111_v16, %v4110_v20 }
 0x488   :  { %v4039_v17 = vpop.f32.mrf.mxu2  ;;  %v3953_v50 = vpop.f32.mrf.mxu0 }
 0x489   :  { %4141 = vst [vmem:[%s9688_s3 + $0x58] sm:$0xff] %v4127_v60  ;;  %v4040_v27 = vadd.f32 %v4039_v17, %v3996_v44  ;;  %v4083_v25 = vpop.f32.mrf.mxu3  ;;  %v3954_v15 = vadd.f32 %v3953_v50, %v9613_v4  ;;  %v3997_v19 = vpop.f32.mrf.mxu1 }
 0x48b   :  { %v4084_v38 = vadd.f32 %v4083_v25, %v4040_v27  ;;  %v3998_v2 = vadd.f32 %v3997_v19, %v3954_v15 }
 0x48d   :  { %v4113_v14 = vmax.f32 %v4084_v38, 0.0 }
 0x48f   :  { %v4128_v56 = vpack.c.bf16 %v4113_v14, %v4112_v47 }
 0x490   :  { %v4041_v37 = vpop.f32.mrf.mxu2 }
 0x491   :  { %4142 = vst [vmem:[%s9688_s3 + $0x60] sm:$0xff] %v4128_v56  ;;  %v4042_v46 = vadd.f32 %v4041_v37, %v3998_v2  ;;  %v4085_v52 = vpop.f32.mrf.mxu3 }
 0x493   :  { %v4086_v1 = vadd.f32 %v4085_v52, %v4042_v46 }
 0x495   :  { %v4115_v36 = vmax.f32 %v4086_v1, 0.0 }
 0x497   :  { %v4129_v48 = vpack.c.bf16 %v4115_v36, %v4114_v29 }
 0x499   :  { %4143 = vst [vmem:[%s9688_s3 + $0x68] sm:$0xff] %v4129_v48 }

// kernel: encoder_stn_forward.8
= control target key start
LH: loop header
LB: loop body
LE: loop exit
PB: predicated region body
PF: predicated region fallthrough
CT: control target
= control target key end

     0   :  { %s6472_s1 = inlined_call_operand.vmem [shape: bf16[2304,256], index: 1, kind: input, shape index: {}]   ;;  %s6473_s0 = inlined_call_operand.vmem [shape: bf16[32,2304], index: 0, kind: input, shape index: {}]   ;;  %s6474_s2 = inlined_call_operand.vmem [shape: f32[1,256], index: 2, kind: input, shape index: {}]   ;;  %s6475_s3 = inlined_call_operand.vmem [shape: bf16[32,256], index: 3, kind: output, shape index: {}]  }
   0x1   :  { %v2870_v0 = vld [vmem:[%s6472_s1 + $0x70] sm:$0xf]  ;;  %v4015_v1 = vld [vmem:[%s6472_s1 + $0x74] sm:$0xf0]  ;;  %v2862_v11 = vld [vmem:[%s6472_s1 + $0x60] sm:$0xf] }
   0x2   :  { %v2934_v2 = vld [vmem:[%s6472_s1 + $0xf0] sm:$0xf]  ;;  %v2871_v3 = vor.u32 %v4015_v1, %v2870_v0  ;;  %v4031_v4 = vld [vmem:[%s6472_s1 + $0xf4] sm:$0xf0]  ;;  %v4013_v13 = vld [vmem:[%s6472_s1 + $0x64] sm:$0xf0] }
   0x3   :  { %v2998_v5 = vld [vmem:[%s6472_s1 + $0x170] sm:$0xf]  ;;  %v4047_v6 = vld [vmem:[%s6472_s1 + $0x174] sm:$0xf0]  ;;  %v2935_v7 = vor.u32 %v4031_v4, %v2934_v2  ;;  %v2926_v14 = vld [vmem:[%s6472_s1 + $0xe0] sm:$0xf]  ;;  %v2863_v16 = vor.u32 %v4013_v13, %v2862_v11 }
   0x4   :  { %v2999_v8 = vor.u32 %v4047_v6, %v2998_v5  ;;  %v3062_v9 = vld [vmem:[%s6472_s1 + $0x1f0] sm:$0xf]  ;;  %v4063_v10 = vld [vmem:[%s6472_s1 + $0x1f4] sm:$0xf0]  ;;  %1964 = vmatpush.bf16.msra.mxu0 %v2871_v3  ;;  %v4029_v15 = vld [vmem:[%s6472_s1 + $0xe4] sm:$0xf0] }
   0x5   :  { %v3063_v12 = vor.u32 %v4063_v10, %v3062_v9  ;;  %1983 = vmatpush.bf16.msra.mxu1 %v2935_v7  ;;  %v2927_v17 = vor.u32 %v4029_v15, %v2926_v14  ;;  %v2990_v18 = vld [vmem:[%s6472_s1 + $0x160] sm:$0xf]  ;;  %v4045_v19 = vld [vmem:[%s6472_s1 + $0x164] sm:$0xf0]  ;;  %v2854_v23 = vld [vmem:[%s6472_s1 + $0x50] sm:$0xf] }
   0x6   :  { %2002 = vmatpush.bf16.msra.mxu2 %v2999_v8  ;;  %v3054_v20 = vld [vmem:[%s6472_s1 + $0x1e0] sm:$0xf]  ;;  %v2991_v21 = vor.u32 %v4045_v19, %v2990_v18  ;;  %v4061_v22 = vld [vmem:[%s6472_s1 + $0x1e4] sm:$0xf0]  ;;  %v4011_v24 = vld [vmem:[%s6472_s1 + $0x54] sm:$0xf0] }
   0x7   :  { %2021 = vmatpush.bf16.msra.mxu3 %v3063_v12  ;;  %v3055_v25 = vor.u32 %v4061_v22, %v3054_v20  ;;  %v2918_v26 = vld [vmem:[%s6472_s1 + $0xd0] sm:$0xf]  ;;  %v4027_v27 = vld [vmem:[%s6472_s1 + $0xd4] sm:$0xf0]  ;;  %v2855_v29 = vor.u32 %v4011_v24, %v2854_v23  ;;  %v2846_v35 = vld [vmem:[%s6472_s1 + $0x40] sm:$0xf] }
   0x8   :  { %v2982_v28 = vld [vmem:[%s6472_s1 + $0x150] sm:$0xf]  ;;  %1965 = vmatpush.bf16.msra.mxu0 %v2863_v16  ;;  %v4043_v30 = vld [vmem:[%s6472_s1 + $0x154] sm:$0xf0]  ;;  %v2919_v33 = vor.u32 %v4027_v27, %v2918_v26  ;;  %v4009_v36 = vld [vmem:[%s6472_s1 + $0x44] sm:$0xf0] }
   0x9   :  { %v3046_v31 = vld [vmem:[%s6472_s1 + $0x1d0] sm:$0xf]  ;;  %v4059_v32 = vld [vmem:[%s6472_s1 + $0x1d4] sm:$0xf0]  ;;  %1984 = vmatpush.bf16.msra.mxu1 %v2927_v17  ;;  %v2983_v34 = vor.u32 %v4043_v30, %v2982_v28  ;;  %v2910_v37 = vld [vmem:[%s6472_s1 + $0xc0] sm:$0xf]  ;;  %v2847_v44 = vor.u32 %v4009_v36, %v2846_v35 }
   0xa   :  { %2003 = vmatpush.bf16.msra.mxu2 %v2991_v21  ;;  %v3047_v38 = vor.u32 %v4059_v32, %v3046_v31  ;;  %v4025_v39 = vld [vmem:[%s6472_s1 + $0xc4] sm:$0xf0]  ;;  %v2974_v40 = vld [vmem:[%s6472_s1 + $0x140] sm:$0xf]  ;;  %v2838_v47 = vld [vmem:[%s6472_s1 + $0x30] sm:$0xf] }
   0xb   :  { %2022 = vmatpush.bf16.msra.mxu3 %v3055_v25  ;;  %v4041_v41 = vld [vmem:[%s6472_s1 + $0x144] sm:$0xf0]  ;;  %v3038_v42 = vld [vmem:[%s6472_s1 + $0x1c0] sm:$0xf]  ;;  %v2911_v45 = vor.u32 %v4025_v39, %v2910_v37  ;;  %v4007_v48 = vld [vmem:[%s6472_s1 + $0x34] sm:$0xf0] }
   0xc   :  { %v4057_v43 = vld [vmem:[%s6472_s1 + $0x1c4] sm:$0xf0]  ;;  %1966 = vmatpush.bf16.msra.mxu0 %v2855_v29  ;;  %v2975_v46 = vor.u32 %v4041_v41, %v2974_v40  ;;  %v2902_v49 = vld [vmem:[%s6472_s1 + $0xb0] sm:$0xf]  ;;  %v4023_v51 = vld [vmem:[%s6472_s1 + $0xb4] sm:$0xf0]  ;;  %v2839_v56 = vor.u32 %v4007_v48, %v2838_v47 }
   0xd   :  { %1985 = vmatpush.bf16.msra.mxu1 %v2919_v33  ;;  %v3039_v50 = vor.u32 %v4057_v43, %v3038_v42  ;;  %v2966_v52 = vld [vmem:[%s6472_s1 + $0x130] sm:$0xf]  ;;  %v4039_v53 = vld [vmem:[%s6472_s1 + $0x134] sm:$0xf0]  ;;  %v2903_v57 = vor.u32 %v4023_v51, %v2902_v49  ;;  %v2830_v59 = vld [vmem:[%s6472_s1 + $0x20] sm:$0xf] }
   0xe   :  { %2004 = vmatpush.bf16.msra.mxu2 %v2983_v34  ;;  %v3030_v54 = vld [vmem:[%s6472_s1 + $0x1b0] sm:$0xf]  ;;  %v4055_v55 = vld [vmem:[%s6472_s1 + $0x1b4] sm:$0xf0]  ;;  %v2967_v58 = vor.u32 %v4039_v53, %v2966_v52  ;;  %v4005_v60 = vld [vmem:[%s6472_s1 + $0x24] sm:$0xf0] }
   0xf   :  { %2023 = vmatpush.bf16.msra.mxu3 %v3047_v38  ;;  %v2894_v61 = vld [vmem:[%s6472_s1 + $0xa0] sm:$0xf]  ;;  %v3031_v62 = vor.u32 %v4055_v55, %v3030_v54  ;;  %v4021_v63 = vld [vmem:[%s6472_s1 + $0xa4] sm:$0xf0]  ;;  %v2831_v4 = vor.u32 %v4005_v60, %v2830_v59  ;;  %v2822_v7 = vld [vmem:[%s6472_s1 + $0x10] sm:$0xf] }
  0x10   :  { %1967 = vmatpush.bf16.msra.mxu0 %v2847_v44  ;;  %v2958_v0 = vld [vmem:[%s6472_s1 + $0x120] sm:$0xf]  ;;  %v4037_v1 = vld [vmem:[%s6472_s1 + $0x124] sm:$0xf0]  ;;  %v2895_v5 = vor.u32 %v4021_v63, %v2894_v61  ;;  %v4003_v8 = vld [vmem:[%s6472_s1 + $0x14] sm:$0xf0] }
  0x11   :  { %1986 = vmatpush.bf16.msra.mxu1 %v2911_v45  ;;  %v3022_v2 = vld [vmem:[%s6472_s1 + $0x1a0] sm:$0xf]  ;;  %v4053_v3 = vld [vmem:[%s6472_s1 + $0x1a4] sm:$0xf0]  ;;  %v2959_v6 = vor.u32 %v4037_v1, %v2958_v0  ;;  %v2886_v9 = vld [vmem:[%s6472_s1 + $0x90] sm:$0xf]  ;;  %v2823_v17 = vor.u32 %v4003_v8, %v2822_v7 }
  0x12   :  { %2005 = vmatpush.bf16.msra.mxu2 %v2975_v46  ;;  %v3023_v10 = vor.u32 %v4053_v3, %v3022_v2  ;;  %v4019_v11 = vld [vmem:[%s6472_s1 + $0x94] sm:$0xf0]  ;;  %v2950_v12 = vld [vmem:[%s6472_s1 + $0x110] sm:$0xf]  ;;  %v2814_v16 = vld [vmem:[%s6472_s1] sm:$0xf] }
  0x13   :  { %2024 = vmatpush.bf16.msra.mxu3 %v3039_v50  ;;  %v4035_v13 = vld [vmem:[%s6472_s1 + $0x114] sm:$0xf0]  ;;  %v3014_v14 = vld [vmem:[%s6472_s1 + $0x190] sm:$0xf]  ;;  %v4001_v18 = vld [vmem:[%s6472_s1 + $0x4] sm:$0xf0]  ;;  %v2887_v21 = vor.u32 %v4019_v11, %v2886_v9 }
  0x14   :  { %1968 = vmatpush.bf16.msra.mxu0 %v2839_v56  ;;  %v4051_v15 = vld [vmem:[%s6472_s1 + $0x194] sm:$0xf0]  ;;  %v2878_v19 = vld [vmem:[%s6472_s1 + $0x80] sm:$0xf]  ;;  %v4017_v20 = vld [vmem:[%s6472_s1 + $0x84] sm:$0xf0]  ;;  %v2951_v22 = vor.u32 %v4035_v13, %v2950_v12  ;;  %v2815_v34 = vor.u32 %v4001_v18, %v2814_v16 }
  0x15   :  { %1987 = vmatpush.bf16.msra.mxu1 %v2903_v57  ;;  %v2942_v23 = vld [vmem:[%s6472_s1 + $0x100] sm:$0xf]  ;;  %v4033_v24 = vld [vmem:[%s6472_s1 + $0x104] sm:$0xf0]  ;;  %v3015_v26 = vor.u32 %v4051_v15, %v3014_v14  ;;  %v3964_v30 = vld [vmem:[%s6473_s0 + $0x4] sm:$0xf]  ;;  %v2879_v38 = vor.u32 %v4017_v20, %v2878_v19 }
  0x16   :  { %2006 = vmatpush.bf16.msra.mxu2 %v2967_v58  ;;  %v3006_v25 = vld [vmem:[%s6472_s1 + $0x180] sm:$0xf]  ;;  %v4049_v27 = vld [vmem:[%s6472_s1 + $0x184] sm:$0xf0]  ;;  %v2672_v31 = vld [vmem:[%s6473_s0 + $0x48] sm:$0xf0]  ;;  %v2943_v39 = vor.u32 %v4033_v24, %v2942_v23 }
  0x17   :  { %2025 = vmatpush.bf16.msra.mxu3 %v3031_v62  ;;  %v2670_v28 = vld [vmem:[%s6473_s0] sm:$0xf]  ;;  %v3973_v29 = vld [vmem:[%s6473_s0 + $0x44] sm:$0xf0]  ;;  %v3254_v32 = vld [vmem:[%s6472_s1 + $0x370] sm:$0xf]  ;;  %v3007_v43 = vor.u32 %v4049_v27, %v3006_v25  ;;  %v4557_v53 = vor.u32 %v3964_v30, %v2672_v31 }
  0x18   :  { %1969 = vmatpush.bf16.msra.mxu0 %v2831_v4  ;;  %v4111_v33 = vld [vmem:[%s6472_s1 + $0x374] sm:$0xf0]  ;;  %v2678_v35 = vld [vmem:[%s6473_s0 + $0x8] sm:$0xf]  ;;  %v3190_v36 = vld [vmem:[%s6472_s1 + $0x2f0] sm:$0xf]  ;;  %v4546_v48 = vor.u32 %v3973_v29, %v2670_v28 }
  0x19   :  { %1988 = vmatpush.bf16.msra.mxu1 %v2895_v5  ;;  %v4095_v37 = vld [vmem:[%s6472_s1 + $0x2f4] sm:$0xf0]  ;;  %v3974_v40 = vld [vmem:[%s6473_s0 + $0x4c] sm:$0xf0]  ;;  %v3965_v41 = vld [vmem:[%s6473_s0 + $0xc] sm:$0xf]  ;;  %v3255_v44 = vor.u32 %v4111_v33, %v3254_v32 }
  0x1a   :  { %2007 = vmatpush.bf16.msra.mxu2 %v2959_v6  ;;  %v2680_v42 = vld [vmem:[%s6473_s0 + $0x50] sm:$0xf0]  ;;  %v3126_v45 = vld [vmem:[%s6472_s1 + $0x270] sm:$0xf]  ;;  %v4079_v46 = vld [vmem:[%s6472_s1 + $0x274] sm:$0xf0]  ;;  %v3191_v49 = vor.u32 %v4095_v37, %v3190_v36  ;;  %v4559_v54 = vor.u32 %v3974_v40, %v2678_v35 }
  0x1b   :  { %2026 = vmatpush.bf16.msra.mxu3 %v3023_v10  ;;  %v3318_v47 = vld [vmem:[%s6472_s1 + $0x3f0] sm:$0xf]  ;;  %v4127_v50 = vld [vmem:[%s6472_s1 + $0x3f4] sm:$0xf0]  ;;  %v3246_v51 = vld [vmem:[%s6472_s1 + $0x360] sm:$0xf]  ;;  %v4567_v57 = vor.u32 %v3965_v41, %v2680_v42  ;;  %v3127_v58 = vor.u32 %v4079_v46, %v3126_v45 }
  0x1c   :  { %1970 = vmatpush.bf16.msra.mxu0 %v2823_v17  ;;  %v4109_v52 = vld [vmem:[%s6472_s1 + $0x364] sm:$0xf0]  ;;  %v3182_v55 = vld [vmem:[%s6472_s1 + $0x2e0] sm:$0xf]  ;;  %v3319_v59 = vor.u32 %v4127_v50, %v3318_v47  ;;  %v3238_v2 = vld [vmem:[%s6472_s1 + $0x350] sm:$0xf] }
  0x1d   :  { %1989 = vmatpush.bf16.msra.mxu1 %v2887_v21  ;;  %v4093_v56 = vld [vmem:[%s6472_s1 + $0x2e4] sm:$0xf0]  ;;  %v3247_v60 = vor.u32 %v4109_v52, %v3246_v51  ;;  %v3118_v61 = vld [vmem:[%s6472_s1 + $0x260] sm:$0xf]  ;;  %v4107_v3 = vld [vmem:[%s6472_s1 + $0x354] sm:$0xf0] }
  0x1e   :  { %2008 = vmatpush.bf16.msra.mxu2 %v2951_v22  ;;  %v4077_v62 = vld [vmem:[%s6472_s1 + $0x264] sm:$0xf0]  ;;  %v3310_v63 = vld [vmem:[%s6472_s1 + $0x3e0] sm:$0xf]  ;;  %v3183_v0 = vor.u32 %v4093_v56, %v3182_v55  ;;  %v3174_v4 = vld [vmem:[%s6472_s1 + $0x2d0] sm:$0xf]  ;;  %v3239_v8 = vor.u32 %v4107_v3, %v3238_v2 }
  0x1f   :  { %2027 = vmatpush.bf16.msra.mxu3 %v3015_v26  ;;  %v4125_v1 = vld [vmem:[%s6472_s1 + $0x3e4] sm:$0xf0]  ;;  %v4091_v5 = vld [vmem:[%s6472_s1 + $0x2d4] sm:$0xf0]  ;;  %v3119_v6 = vor.u32 %v4077_v62, %v3118_v61  ;;  %v3110_v9 = vld [vmem:[%s6472_s1 + $0x250] sm:$0xf] }
  0x20   :  { %1971 = vmatpush.bf16.msra.mxu0 %v2815_v34  ;;  %v3311_v7 = vor.u32 %v4125_v1, %v3310_v63  ;;  %v4075_v10 = vld [vmem:[%s6472_s1 + $0x254] sm:$0xf0]  ;;  %v3302_v11 = vld [vmem:[%s6472_s1 + $0x3d0] sm:$0xf]  ;;  %v3175_v12 = vor.u32 %v4091_v5, %v3174_v4  ;;  %v3230_v14 = vld [vmem:[%s6472_s1 + $0x340] sm:$0xf] }
  0x21   :  { %1990 = vmatpush.bf16.msra.mxu1 %v2879_v38  ;;  %v4123_v13 = vld [vmem:[%s6472_s1 + $0x3d4] sm:$0xf0]  ;;  %v4105_v15 = vld [vmem:[%s6472_s1 + $0x344] sm:$0xf0]  ;;  %v3166_v16 = vld [vmem:[%s6472_s1 + $0x2c0] sm:$0xf]  ;;  %v3111_v18 = vor.u32 %v4075_v10, %v3110_v9 }
  0x22   :  { %2009 = vmatpush.bf16.msra.mxu2 %v2943_v39  ;;  %v4089_v17 = vld [vmem:[%s6472_s1 + $0x2c4] sm:$0xf0]  ;;  %v3102_v19 = vld [vmem:[%s6472_s1 + $0x240] sm:$0xf]  ;;  %v3303_v22 = vor.u32 %v4123_v13, %v3302_v11  ;;  %v3231_v23 = vor.u32 %v4105_v15, %v3230_v14  ;;  %v2742_v25 = vld [vmem:[%s6473_s0 + $0x90] sm:$0xf] }
  0x23   :  { %2028 = vmatpush.bf16.msra.mxu3 %v3007_v43  ;;  %1972 = vmatmul.bf16.vlgmr.msra.gmra.mxu0 %v4546_v48  ;;  %v4073_v20 = vld [vmem:[%s6472_s1 + $0x244] sm:$0xf0]  ;;  %v3294_v21 = vld [vmem:[%s6472_s1 + $0x3c0] sm:$0xf]  ;;  %v3991_v26 = vld [vmem:[%s6473_s0 + $0xd4] sm:$0xf0]  ;;  %v3167_v27 = vor.u32 %v4089_v17, %v3166_v16 }
  0x24   :  { %1991 = vmatmul.bf16.vlgmr.msra.gmra.mxu1 %v4557_v53  ;;  %2040 = vmatpush.bf16.msrb.mxu0 %v3127_v58  ;;  %v4121_v24 = vld [vmem:[%s6472_s1 + $0x3c4] sm:$0xf0]  ;;  %v3982_v28 = vld [vmem:[%s6473_s0 + $0x94] sm:$0xf]  ;;  %v2744_v29 = vld [vmem:[%s6473_s0 + $0xd8] sm:$0xf0]  ;;  %v3103_v35 = vor.u32 %v4073_v20, %v3102_v19 }
  0x25   :  { %2059 = vmatpush.bf16.msrb.mxu1 %v3191_v49  ;;  %2010 = vmatmul.bf16.vlgmr.msra.gmra.mxu2 %v4559_v54  ;;  %v3222_v30 = vld [vmem:[%s6472_s1 + $0x330] sm:$0xf]  ;;  %v4103_v31 = vld [vmem:[%s6472_s1 + $0x334] sm:$0xf0]  ;;  %v3992_v36 = vld [vmem:[%s6473_s0 + $0xdc] sm:$0xf0]  ;;  %v3295_v39 = vor.u32 %v4121_v24, %v3294_v21  ;;  %v4689_v50 = vor.u32 %v3982_v28, %v2744_v29 }
  0x26   :  { %2078 = vmatpush.bf16.msrb.mxu2 %v3255_v44  ;;  %2029 = vmatmul.bf16.vlgmr.msra.gmra.mxu3 %v4567_v57  ;;  %v2750_v32 = vld [vmem:[%s6473_s0 + $0x98] sm:$0xf]  ;;  %v3158_v33 = vld [vmem:[%s6472_s1 + $0x2b0] sm:$0xf]  ;;  %v3983_v37 = vld [vmem:[%s6473_s0 + $0x9c] sm:$0xf]  ;;  %v3223_v40 = vor.u32 %v4103_v31, %v3222_v30  ;;  %v4678_v44 = vor.u32 %v3991_v26, %v2742_v25 }
  0x27   :  { %2097 = vmatpush.bf16.msrb.mxu3 %v3319_v59  ;;  %v4087_v34 = vld [vmem:[%s6472_s1 + $0x2b4] sm:$0xf0]  ;;  %v2752_v38 = vld [vmem:[%s6473_s0 + $0xe0] sm:$0xf0]  ;;  %v3094_v41 = vld [vmem:[%s6472_s1 + $0x230] sm:$0xf]  ;;  %v4691_v51 = vor.u32 %v3992_v36, %v2750_v32 }
  0x28   :  { %2041 = vmatpush.bf16.msrb.mxu0 %v3119_v6  ;;  %v4071_v42 = vld [vmem:[%s6472_s1 + $0x234] sm:$0xf0]  ;;  %v3286_v43 = vld [vmem:[%s6472_s1 + $0x3b0] sm:$0xf]  ;;  %v3159_v45 = vor.u32 %v4087_v34, %v3158_v33  ;;  %v3214_v47 = vld [vmem:[%s6472_s1 + $0x320] sm:$0xf]  ;;  %v4699_v56 = vor.u32 %v3983_v37, %v2752_v38 }
  0x29   :  { %2060 = vmatpush.bf16.msrb.mxu1 %v3183_v0  ;;  %v4119_v46 = vld [vmem:[%s6472_s1 + $0x3b4] sm:$0xf0]  ;;  %v4101_v49 = vld [vmem:[%s6472_s1 + $0x324] sm:$0xf0]  ;;  %v3150_v52 = vld [vmem:[%s6472_s1 + $0x2a0] sm:$0xf]  ;;  %v3095_v58 = vor.u32 %v4071_v42, %v3094_v41 }
  0x2a   :  { %2079 = vmatpush.bf16.msrb.mxu2 %v3247_v60  ;;  %v4085_v55 = vld [vmem:[%s6472_s1 + $0x2a4] sm:$0xf0]  ;;  %v3287_v59 = vor.u32 %v4119_v46, %v3286_v43  ;;  %v3215_v60 = vor.u32 %v4101_v49, %v3214_v47  ;;  %v3086_v61 = vld [vmem:[%s6472_s1 + $0x220] sm:$0xf]  ;;  %v3206_v2 = vld [vmem:[%s6472_s1 + $0x310] sm:$0xf] }
  0x2b   :  { %2098 = vmatpush.bf16.msrb.mxu3 %v3311_v7  ;;  %v4069_v62 = vld [vmem:[%s6472_s1 + $0x224] sm:$0xf0]  ;;  %v3278_v63 = vld [vmem:[%s6472_s1 + $0x3a0] sm:$0xf]  ;;  %v3151_v0 = vor.u32 %v4085_v55, %v3150_v52  ;;  %v4099_v3 = vld [vmem:[%s6472_s1 + $0x314] sm:$0xf0] }
  0x2c   :  { %2042 = vmatpush.bf16.msrb.mxu0 %v3111_v18  ;;  %v4117_v1 = vld [vmem:[%s6472_s1 + $0x3a4] sm:$0xf0]  ;;  %v3142_v4 = vld [vmem:[%s6472_s1 + $0x290] sm:$0xf]  ;;  %v4083_v5 = vld [vmem:[%s6472_s1 + $0x294] sm:$0xf0]  ;;  %v3087_v6 = vor.u32 %v4069_v62, %v3086_v61  ;;  %v3207_v9 = vor.u32 %v4099_v3, %v3206_v2 }
  0x2d   :  { %2061 = vmatpush.bf16.msrb.mxu1 %v3175_v12  ;;  %v3078_v7 = vld [vmem:[%s6472_s1 + $0x210] sm:$0xf]  ;;  %v4067_v10 = vld [vmem:[%s6472_s1 + $0x214] sm:$0xf0]  ;;  %v3143_v13 = vor.u32 %v4083_v5, %v3142_v4  ;;  %v3198_v14 = vld [vmem:[%s6472_s1 + $0x300] sm:$0xf] }
  0x2e   :  { %2080 = vmatpush.bf16.msrb.mxu2 %v3239_v8  ;;  %v3279_v8 = vor.u32 %v4117_v1, %v3278_v63  ;;  %v3270_v11 = vld [vmem:[%s6472_s1 + $0x390] sm:$0xf]  ;;  %v4115_v12 = vld [vmem:[%s6472_s1 + $0x394] sm:$0xf0]  ;;  %v4097_v15 = vld [vmem:[%s6472_s1 + $0x304] sm:$0xf0]  ;;  %v3079_v20 = vor.u32 %v4067_v10, %v3078_v7 }
  0x2f   :  { %2099 = vmatpush.bf16.msrb.mxu3 %v3303_v22  ;;  %v3134_v16 = vld [vmem:[%s6472_s1 + $0x280] sm:$0xf]  ;;  %v4081_v17 = vld [vmem:[%s6472_s1 + $0x284] sm:$0xf0]  ;;  %v3510_v18 = vld [vmem:[%s6472_s1 + $0x570] sm:$0xf]  ;;  %v3271_v24 = vor.u32 %v4115_v12, %v3270_v11  ;;  %v3199_v25 = vor.u32 %v4097_v15, %v3198_v14 }
  0x30   :  { %2043 = vmatpush.bf16.msrb.mxu0 %v3103_v35  ;;  %v4175_v19 = vld [vmem:[%s6472_s1 + $0x574] sm:$0xf0]  ;;  %v3070_v21 = vld [vmem:[%s6472_s1 + $0x200] sm:$0xf]  ;;  %v3446_v22 = vld [vmem:[%s6472_s1 + $0x4f0] sm:$0xf]  ;;  %v3135_v29 = vor.u32 %v4081_v17, %v3134_v16 }
  0x31   :  { %2062 = vmatpush.bf16.msrb.mxu1 %v3167_v27  ;;  %v4065_v26 = vld [vmem:[%s6472_s1 + $0x204] sm:$0xf0]  ;;  %v3262_v27 = vld [vmem:[%s6472_s1 + $0x380] sm:$0xf]  ;;  %v2686_v30 = vld [vmem:[%s6473_s0 + $0x10] sm:$0xf]  ;;  %v3511_v34 = vor.u32 %v4175_v19, %v3510_v18 }
  0x32   :  { %2081 = vmatpush.bf16.msrb.mxu2 %v3231_v23  ;;  %v4159_v23 = vld [vmem:[%s6472_s1 + $0x4f4] sm:$0xf0]  ;;  %v4113_v28 = vld [vmem:[%s6472_s1 + $0x384] sm:$0xf0]  ;;  %v3966_v32 = vld [vmem:[%s6473_s0 + $0x14] sm:$0xf]  ;;  %v3071_v42 = vor.u32 %v4065_v26, %v3070_v21 }
  0x33   :  { %2100 = vmatpush.bf16.msrb.mxu3 %v3295_v39  ;;  %1977 = vmatmul.bf16.gmra.mxu0 %v4678_v44  ;;  %v3975_v31 = vld [vmem:[%s6473_s0 + $0x54] sm:$0xf0]  ;;  %v2688_v33 = vld [vmem:[%s6473_s0 + $0x58] sm:$0xf0]  ;;  %v3382_v35 = vld [vmem:[%s6472_s1 + $0x470] sm:$0xf]  ;;  %v3447_v38 = vor.u32 %v4159_v23, %v3446_v22  ;;  %v3263_v47 = vor.u32 %v4113_v28, %v3262_v27 }
  0x34   :  { %1996 = vmatmul.bf16.gmra.mxu1 %v4689_v50  ;;  %2044 = vmatpush.bf16.msrb.mxu0 %v3095_v58  ;;  %v4143_v36 = vld [vmem:[%s6472_s1 + $0x474] sm:$0xf0]  ;;  %v3574_v37 = vld [vmem:[%s6472_s1 + $0x5f0] sm:$0xf]  ;;  %v4173_v41 = vld [vmem:[%s6472_s1 + $0x564] sm:$0xf0]  ;;  %v4836_v1 = vor.u32 %v3966_v32, %v2688_v33 }
  0x35   :  { %2063 = vmatpush.bf16.msrb.mxu1 %v3159_v45  ;;  %2015 = vmatmul.bf16.gmra.mxu2 %v4691_v51  ;;  %v4191_v39 = vld [vmem:[%s6472_s1 + $0x5f4] sm:$0xf0]  ;;  %v3976_v45 = vld [vmem:[%s6473_s0 + $0x5c] sm:$0xf0]  ;;  %v3967_v46 = vld [vmem:[%s6473_s0 + $0x1c] sm:$0xf]  ;;  %v3383_v52 = vor.u32 %v4143_v36, %v3382_v35 }
  0x36   :  { %2082 = vmatpush.bf16.msrb.mxu2 %v3223_v40  ;;  %2034 = vmatmul.bf16.gmra.mxu3 %v4699_v56  ;;  %v3502_v40 = vld [vmem:[%s6472_s1 + $0x560] sm:$0xf]  ;;  %v2694_v43 = vld [vmem:[%s6473_s0 + $0x18] sm:$0xf]  ;;  %v2696_v49 = vld [vmem:[%s6473_s0 + $0x60] sm:$0xf0] }
  0x37   :  { %2101 = vmatpush.bf16.msrb.mxu3 %v3287_v59  ;;  %v3374_v55 = vld [vmem:[%s6472_s1 + $0x460] sm:$0xf]  ;;  %v4141_v58 = vld [vmem:[%s6472_s1 + $0x464] sm:$0xf0]  ;;  %v3575_v59 = vor.u32 %v4191_v39, %v3574_v37  ;;  %v3494_v3 = vld [vmem:[%s6472_s1 + $0x550] sm:$0xf]  ;;  %v4847_v5 = vor.u32 %v3976_v45, %v2694_v43 }
  0x38   :  { %2045 = vmatpush.bf16.msrb.mxu0 %v3087_v6  ;;  %v3438_v61 = vld [vmem:[%s6472_s1 + $0x4e0] sm:$0xf]  ;;  %v4157_v62 = vld [vmem:[%s6472_s1 + $0x4e4] sm:$0xf0]  ;;  %v4171_v4 = vld [vmem:[%s6472_s1 + $0x554] sm:$0xf0]  ;;  %v4849_v6 = vor.u32 %v3967_v46, %v2696_v49  ;;  %v3375_v7 = vor.u32 %v4141_v58, %v3374_v55 }
  0x39   :  { %2064 = vmatpush.bf16.msrb.mxu1 %v3151_v0  ;;  %v3566_v63 = vld [vmem:[%s6472_s1 + $0x5e0] sm:$0xf]  ;;  %v4834_v0 = vor.u32 %v3975_v31, %v2686_v30  ;;  %v4189_v2 = vld [vmem:[%s6472_s1 + $0x5e4] sm:$0xf0]  ;;  %v4139_v10 = vld [vmem:[%s6472_s1 + $0x454] sm:$0xf0]  ;;  %v3495_v12 = vor.u32 %v4171_v4, %v3494_v3 }
  0x3a   :  { %2083 = vmatpush.bf16.msrb.mxu2 %v3215_v60  ;;  %v3503_v60 = vor.u32 %v4173_v41, %v3502_v40  ;;  %v3567_v11 = vor.u32 %v4189_v2, %v3566_v63  ;;  %v4155_v14 = vld [vmem:[%s6472_s1 + $0x4d4] sm:$0xf0]  ;;  %v3558_v15 = vld [vmem:[%s6472_s1 + $0x5d0] sm:$0xf]  ;;  %v3486_v17 = vld [vmem:[%s6472_s1 + $0x540] sm:$0xf] }
  0x3b   :  { %2102 = vmatpush.bf16.msrb.mxu3 %v3279_v8  ;;  %v3439_v8 = vor.u32 %v4157_v62, %v3438_v61  ;;  %v4187_v16 = vld [vmem:[%s6472_s1 + $0x5d4] sm:$0xf0]  ;;  %v4169_v18 = vld [vmem:[%s6472_s1 + $0x544] sm:$0xf0]  ;;  %v3358_v21 = vld [vmem:[%s6472_s1 + $0x440] sm:$0xf] }
  0x3c   :  { %2046 = vmatpush.bf16.msrb.mxu0 %v3079_v20  ;;  %v4137_v22 = vld [vmem:[%s6472_s1 + $0x444] sm:$0xf0]  ;;  %v3559_v23 = vor.u32 %v4187_v16, %v3558_v15  ;;  %v3550_v27 = vld [vmem:[%s6472_s1 + $0x5c0] sm:$0xf]  ;;  %v4167_v30 = vld [vmem:[%s6472_s1 + $0x534] sm:$0xf0] }
  0x3d   :  { %2065 = vmatpush.bf16.msrb.mxu1 %v3143_v13  ;;  %v3430_v13 = vld [vmem:[%s6472_s1 + $0x4d0] sm:$0xf]  ;;  %v4153_v26 = vld [vmem:[%s6472_s1 + $0x4c4] sm:$0xf0]  ;;  %v3359_v31 = vor.u32 %v4137_v22, %v3358_v21  ;;  %v2758_v36 = vld [vmem:[%s6473_s0 + $0xa0] sm:$0xf] }
  0x3e   :  { %2084 = vmatpush.bf16.msrb.mxu2 %v3207_v9  ;;  %v3366_v9 = vld [vmem:[%s6472_s1 + $0x450] sm:$0xf]  ;;  %v3431_v20 = vor.u32 %v4155_v14, %v3430_v13  ;;  %v4185_v28 = vld [vmem:[%s6472_s1 + $0x5c4] sm:$0xf0]  ;;  %v2760_v39 = vld [vmem:[%s6473_s0 + $0xe8] sm:$0xf0] }
  0x3f   :  { %2103 = vmatpush.bf16.msrb.mxu3 %v3271_v24  ;;  %v3367_v19 = vor.u32 %v4139_v10, %v3366_v9  ;;  %v3487_v24 = vor.u32 %v4169_v18, %v3486_v17  ;;  %v3350_v33 = vld [vmem:[%s6472_s1 + $0x430] sm:$0xf]  ;;  %v3551_v35 = vor.u32 %v4185_v28, %v3550_v27  ;;  %v3993_v37 = vld [vmem:[%s6473_s0 + $0xe4] sm:$0xf0]  ;;  %v4183_v45 = vld [vmem:[%s6472_s1 + $0x5b4] sm:$0xf0] }
  0x40   :  { %2047 = vmatpush.bf16.msrb.mxu0 %v3071_v42  ;;  %v3414_v41 = vld [vmem:[%s6472_s1 + $0x4b0] sm:$0xf]  ;;  %v4151_v42 = vld [vmem:[%s6472_s1 + $0x4b4] sm:$0xf0]  ;;  %v3470_v46 = vld [vmem:[%s6472_s1 + $0x520] sm:$0xf] }
  0x41   :  { %2066 = vmatpush.bf16.msrb.mxu1 %v3135_v29  ;;  %v3478_v29 = vld [vmem:[%s6472_s1 + $0x530] sm:$0xf]  ;;  %v2766_v49 = vld [vmem:[%s6473_s0 + $0xa8] sm:$0xf]  ;;  %v3985_v55 = vld [vmem:[%s6473_s0 + $0xac] sm:$0xf] }
  0x42   :  { %2085 = vmatpush.bf16.msrb.mxu2 %v3199_v25  ;;  %v3422_v25 = vld [vmem:[%s6472_s1 + $0x4c0] sm:$0xf]  ;;  %v3479_v40 = vor.u32 %v4167_v30, %v3478_v29  ;;  %v3542_v43 = vld [vmem:[%s6472_s1 + $0x5b0] sm:$0xf]  ;;  %v2768_v58 = vld [vmem:[%s6473_s0 + $0xf0] sm:$0xf0] }
  0x43   :  { %2104 = vmatpush.bf16.msrb.mxu3 %v3263_v47  ;;  %2048 = vmatmul.bf16.vlgmr.msrb.gmra.mxu0 %v4834_v0  ;;  %v3423_v32 = vor.u32 %v4153_v26, %v3422_v25  ;;  %v4165_v47 = vld [vmem:[%s6472_s1 + $0x524] sm:$0xf0]  ;;  %v3342_v61 = vld [vmem:[%s6472_s1 + $0x420] sm:$0xf]  ;;  %v3543_v63 = vor.u32 %v4183_v45, %v3542_v43  ;;  %v4981_v14 = vor.u32 %v3985_v55, %v2768_v58  ;;  %v3334_v17 = vld [vmem:[%s6472_s1 + $0x410] sm:$0xf] }
  0x44   :  { %2116 = vmatpush.bf16.msra.mxu0 %v3383_v52  ;;  %2067 = vmatmul.bf16.vlgmr.msrb.gmra.mxu1 %v4836_v1  ;;  %v3994_v52 = vld [vmem:[%s6473_s0 + $0xec] sm:$0xf0]  ;;  %v4133_v62 = vld [vmem:[%s6472_s1 + $0x424] sm:$0xf0]  ;;  %v3471_v2 = vor.u32 %v4165_v47, %v3470_v46  ;;  %v3406_v3 = vld [vmem:[%s6472_s1 + $0x4a0] sm:$0xf] }
  0x45   :  { %2135 = vmatpush.bf16.msra.mxu1 %v3447_v38  ;;  %2086 = vmatmul.bf16.vlgmr.msrb.gmra.mxu2 %v4847_v5  ;;  %v3984_v38 = vld [vmem:[%s6473_s0 + $0xa4] sm:$0xf]  ;;  %v4149_v4 = vld [vmem:[%s6472_s1 + $0x4a4] sm:$0xf0]  ;;  %v4979_v13 = vor.u32 %v3994_v52, %v2766_v49  ;;  %v3343_v15 = vor.u32 %v4133_v62, %v3342_v61  ;;  %v4131_v18 = vld [vmem:[%s6472_s1 + $0x414] sm:$0xf0] }
  0x46   :  { %2154 = vmatpush.bf16.msra.mxu2 %v3511_v34  ;;  %2105 = vmatmul.bf16.vlgmr.msrb.gmra.mxu3 %v4849_v6  ;;  %v4135_v34 = vld [vmem:[%s6472_s1 + $0x434] sm:$0xf0]  ;;  %v4968_v9 = vor.u32 %v3984_v38, %v2760_v39  ;;  %v4181_v10 = vld [vmem:[%s6472_s1 + $0x5a4] sm:$0xf0]  ;;  %v3407_v16 = vor.u32 %v4149_v4, %v3406_v3  ;;  %v3398_v21 = vld [vmem:[%s6472_s1 + $0x490] sm:$0xf]  ;;  %v3335_v29 = vor.u32 %v4131_v18, %v3334_v17 }
  0x47   :  { %2173 = vmatpush.bf16.msra.mxu3 %v3575_v59  ;;  %v3351_v59 = vor.u32 %v4135_v34, %v3350_v33  ;;  %v4147_v22 = vld [vmem:[%s6472_s1 + $0x494] sm:$0xf0]  ;;  %v3454_v25 = vld [vmem:[%s6472_s1 + $0x500] sm:$0xf]  ;;  %v4161_v26 = vld [vmem:[%s6472_s1 + $0x504] sm:$0xf0] }
  0x48   :  { %2117 = vmatpush.bf16.msra.mxu0 %v3375_v7  ;;  %v3534_v7 = vld [vmem:[%s6472_s1 + $0x5a0] sm:$0xf]  ;;  %v3766_v27 = vld [vmem:[%s6472_s1 + $0x770] sm:$0xf]  ;;  %v4239_v28 = vld [vmem:[%s6472_s1 + $0x774] sm:$0xf0]  ;;  %v3399_v30 = vor.u32 %v4147_v22, %v3398_v21 }
  0x49   :  { %2136 = vmatpush.bf16.msra.mxu1 %v3439_v8  ;;  %v4966_v8 = vor.u32 %v3993_v37, %v2758_v36  ;;  %v3390_v33 = vld [vmem:[%s6472_s1 + $0x480] sm:$0xf]  ;;  %v4145_v36 = vld [vmem:[%s6472_s1 + $0x484] sm:$0xf0]  ;;  %v3767_v39 = vor.u32 %v4239_v28, %v3766_v27  ;;  %v4223_v43 = vld [vmem:[%s6472_s1 + $0x6f4] sm:$0xf0] }
  0x4a   :  { %2155 = vmatpush.bf16.msra.mxu2 %v3503_v60  ;;  %v3415_v60 = vor.u32 %v4151_v42, %v3414_v41  ;;  %v3518_v37 = vld [vmem:[%s6472_s1 + $0x580] sm:$0xf]  ;;  %v4177_v38 = vld [vmem:[%s6472_s1 + $0x584] sm:$0xf0]  ;;  %v4207_v41 = vld [vmem:[%s6472_s1 + $0x674] sm:$0xf0]  ;;  %v3391_v49 = vor.u32 %v4145_v36, %v3390_v33 }
  0x4b   :  { %2174 = vmatpush.bf16.msra.mxu3 %v3567_v11  ;;  %v3462_v11 = vld [vmem:[%s6472_s1 + $0x510] sm:$0xf]  ;;  %v4255_v46 = vld [vmem:[%s6472_s1 + $0x7f4] sm:$0xf0]  ;;  %v3758_v52 = vld [vmem:[%s6472_s1 + $0x760] sm:$0xf]  ;;  %v3519_v58 = vor.u32 %v4177_v38, %v3518_v37 }
  0x4c   :  { %2118 = vmatpush.bf16.msra.mxu0 %v3367_v19  ;;  %v3535_v19 = vor.u32 %v4181_v10, %v3534_v7  ;;  %v3702_v42 = vld [vmem:[%s6472_s1 + $0x6f0] sm:$0xf]  ;;  %v4237_v55 = vld [vmem:[%s6472_s1 + $0x764] sm:$0xf0]  ;;  %v3968_v61 = vld [vmem:[%s6473_s0 + $0x24] sm:$0xf] }
  0x4d   :  { %2137 = vmatpush.bf16.msra.mxu1 %v3431_v20  ;;  %v3830_v45 = vld [vmem:[%s6472_s1 + $0x7f0] sm:$0xf]  ;;  %v3630_v4 = vld [vmem:[%s6472_s1 + $0x660] sm:$0xf]  ;;  %v4205_v7 = vld [vmem:[%s6472_s1 + $0x664] sm:$0xf0] }
  0x4e   :  { %2156 = vmatpush.bf16.msra.mxu2 %v3495_v12  ;;  %v4163_v12 = vld [vmem:[%s6472_s1 + $0x514] sm:$0xf0]  ;;  %v3831_v3 = vor.u32 %v4255_v46, %v3830_v45  ;;  %v2710_v10 = vld [vmem:[%s6473_s0 + $0x28] sm:$0xf]  ;;  %v3694_v17 = vld [vmem:[%s6472_s1 + $0x6e0] sm:$0xf] }
  0x4f   :  { %2175 = vmatpush.bf16.msra.mxu3 %v3559_v23  ;;  %v3463_v20 = vor.u32 %v4163_v12, %v3462_v11  ;;  %v3526_v23 = vld [vmem:[%s6472_s1 + $0x590] sm:$0xf]  ;;  %v3969_v12 = vld [vmem:[%s6473_s0 + $0x2c] sm:$0xf]  ;;  %v4221_v18 = vld [vmem:[%s6472_s1 + $0x6e4] sm:$0xf0] }
  0x50   :  { %2119 = vmatpush.bf16.msra.mxu0 %v3359_v31  ;;  %v3326_v31 = vld [vmem:[%s6472_s1 + $0x400] sm:$0xf]  ;;  %v3978_v11 = vld [vmem:[%s6473_s0 + $0x6c] sm:$0xf0]  ;;  %v4253_v21 = vld [vmem:[%s6472_s1 + $0x7e4] sm:$0xf0] }
  0x51   :  { %2138 = vmatpush.bf16.msra.mxu1 %v3423_v32  ;;  %v4129_v32 = vld [vmem:[%s6472_s1 + $0x404] sm:$0xf0]  ;;  %v3750_v22 = vld [vmem:[%s6472_s1 + $0x750] sm:$0xf]  ;;  %v4203_v27 = vld [vmem:[%s6472_s1 + $0x654] sm:$0xf0]  ;;  %v5117_v28 = vor.u32 %v3978_v11, %v2710_v10 }
  0x52   :  { %2157 = vmatpush.bf16.msra.mxu2 %v3487_v24  ;;  %v4179_v24 = vld [vmem:[%s6472_s1 + $0x594] sm:$0xf0]  ;;  %v3327_v47 = vor.u32 %v4129_v32, %v3326_v31  ;;  %v3686_v32 = vld [vmem:[%s6472_s1 + $0x6d0] sm:$0xf]  ;;  %v3742_v38 = vld [vmem:[%s6472_s1 + $0x740] sm:$0xf] }
  0x53   :  { %2176 = vmatpush.bf16.msra.mxu3 %v3551_v35  ;;  %2053 = vmatmul.bf16.gmra.mxu0 %v4966_v8  ;;  %v3527_v34 = vor.u32 %v4179_v24, %v3526_v23  ;;  %v3455_v35 = vor.u32 %v4161_v26, %v3454_v25  ;;  %v4235_v25 = vld [vmem:[%s6472_s1 + $0x754] sm:$0xf0]  ;;  %v3622_v26 = vld [vmem:[%s6472_s1 + $0x650] sm:$0xf]  ;;  %v3678_v45 = vld [vmem:[%s6472_s1 + $0x6c0] sm:$0xf] }
  0x54   :  { %2120 = vmatpush.bf16.msra.mxu0 %v3351_v59  ;;  %2072 = vmatmul.bf16.gmra.mxu1 %v4968_v9  ;;  %v2702_v59 = vld [vmem:[%s6473_s0 + $0x20] sm:$0xf]  ;;  %v4219_v33 = vld [vmem:[%s6472_s1 + $0x6d4] sm:$0xf0]  ;;  %v3814_v36 = vld [vmem:[%s6472_s1 + $0x7d0] sm:$0xf] }
  0x55   :  { %2139 = vmatpush.bf16.msra.mxu1 %v3415_v60  ;;  %2091 = vmatmul.bf16.gmra.mxu2 %v4979_v13  ;;  %v3977_v60 = vld [vmem:[%s6473_s0 + $0x64] sm:$0xf0]  ;;  %v4251_v37 = vld [vmem:[%s6472_s1 + $0x7d4] sm:$0xf0]  ;;  %v3986_v10 = vld [vmem:[%s6473_s0 + $0xb4] sm:$0xf] }
  0x56   :  { %2158 = vmatpush.bf16.msra.mxu2 %v3479_v40  ;;  %2110 = vmatmul.bf16.gmra.mxu3 %v4981_v14  ;;  %v3638_v40 = vld [vmem:[%s6472_s1 + $0x670] sm:$0xf]  ;;  %v5104_v23 = vor.u32 %v3977_v60, %v2702_v59  ;;  %v4217_v46 = vld [vmem:[%s6472_s1 + $0x6c4] sm:$0xf0]  ;;  %v4231_v59 = vld [vmem:[%s6472_s1 + $0x734] sm:$0xf0] }
  0x57   :  { %2177 = vmatpush.bf16.msra.mxu3 %v3543_v63  ;;  %v3639_v62 = vor.u32 %v4207_v41, %v3638_v40  ;;  %v2704_v63 = vld [vmem:[%s6473_s0 + $0x68] sm:$0xf0]  ;;  %v3614_v40 = vld [vmem:[%s6472_s1 + $0x640] sm:$0xf]  ;;  %v4201_v41 = vld [vmem:[%s6472_s1 + $0x644] sm:$0xf0] }
  0x58   :  { %2121 = vmatpush.bf16.msra.mxu0 %v3343_v15  ;;  %v3759_v15 = vor.u32 %v4237_v55, %v3758_v52  ;;  %v5106_v24 = vor.u32 %v3968_v61, %v2704_v63  ;;  %v3806_v52 = vld [vmem:[%s6472_s1 + $0x7c0] sm:$0xf]  ;;  %v4249_v55 = vld [vmem:[%s6472_s1 + $0x7c4] sm:$0xf0]  ;;  %v3606_v60 = vld [vmem:[%s6472_s1 + $0x630] sm:$0xf] }
  0x59   :  { %2140 = vmatpush.bf16.msra.mxu1 %v3407_v16  ;;  %v2712_v16 = vld [vmem:[%s6473_s0 + $0x70] sm:$0xf0]  ;;  %v4199_v61 = vld [vmem:[%s6472_s1 + $0x634] sm:$0xf0]  ;;  %v3807_v63 = vor.u32 %v4249_v55, %v3806_v52  ;;  %v2776_v11 = vld [vmem:[%s6473_s0 + $0xf8] sm:$0xf0] }
  0x5a   :  { %2159 = vmatpush.bf16.msra.mxu2 %v3471_v2  ;;  %v3703_v2 = vor.u32 %v4223_v43, %v3702_v42  ;;  %v3687_v42 = vor.u32 %v4219_v33, %v3686_v32  ;;  %v3815_v43 = vor.u32 %v4251_v37, %v3814_v36  ;;  %v3662_v32 = vld [vmem:[%s6472_s1 + $0x6a0] sm:$0xf]  ;;  %v4213_v33 = vld [vmem:[%s6472_s1 + $0x6a4] sm:$0xf0]  ;;  %v3654_v52 = vld [vmem:[%s6472_s1 + $0x690] sm:$0xf] }
  0x5b   :  { %2178 = vmatpush.bf16.msra.mxu3 %v3535_v19  ;;  %v3631_v19 = vor.u32 %v4205_v7, %v3630_v4  ;;  %v2774_v4 = vld [vmem:[%s6473_s0 + $0xb0] sm:$0xf]  ;;  %v3995_v7 = vld [vmem:[%s6473_s0 + $0xf4] sm:$0xf0]  ;;  %v3790_v36 = vld [vmem:[%s6472_s1 + $0x7a0] sm:$0xf] }
  0x5c   :  { %2122 = vmatpush.bf16.msra.mxu0 %v3335_v29  ;;  %v5119_v29 = vor.u32 %v3969_v12, %v2712_v16  ;;  %v3798_v16 = vld [vmem:[%s6472_s1 + $0x7b0] sm:$0xf]  ;;  %v4245_v37 = vld [vmem:[%s6472_s1 + $0x7a4] sm:$0xf0]  ;;  %v4211_v55 = vld [vmem:[%s6472_s1 + $0x694] sm:$0xf0] }
  0x5d   :  { %2141 = vmatpush.bf16.msra.mxu1 %v3399_v30  ;;  %v3695_v30 = vor.u32 %v4221_v18, %v3694_v17  ;;  %v4247_v17 = vld [vmem:[%s6472_s1 + $0x7b4] sm:$0xf0]  ;;  %v3726_v18 = vld [vmem:[%s6472_s1 + $0x720] sm:$0xf] }
  0x5e   :  { %2160 = vmatpush.bf16.msra.mxu2 %v3463_v20  ;;  %v3822_v20 = vld [vmem:[%s6472_s1 + $0x7e0] sm:$0xf] }
  0x5f   :  { %2179 = vmatpush.bf16.msra.mxu3 %v3527_v34  ;;  %v3823_v31 = vor.u32 %v4253_v21, %v3822_v20  ;;  %v3751_v34 = vor.u32 %v4235_v25, %v3750_v22  ;;  %v3598_v20 = vld [vmem:[%s6472_s1 + $0x620] sm:$0xf]  ;;  %v4197_v21 = vld [vmem:[%s6472_s1 + $0x624] sm:$0xf0]  ;;  %v2782_v22 = vld [vmem:[%s6473_s0 + $0xb8] sm:$0xf] }
  0x60   :  { %2123 = vmatpush.bf16.msra.mxu0 %v3327_v47  ;;  %v3996_v25 = vld [vmem:[%s6473_s0 + $0xfc] sm:$0xf0] }
  0x61   :  { %2142 = vmatpush.bf16.msra.mxu1 %v3391_v49  ;;  %v3615_v49 = vor.u32 %v4201_v41, %v3614_v40  ;;  %v5238_v40 = vor.u32 %v3986_v10, %v2776_v11  ;;  %v4227_v41 = vld [vmem:[%s6472_s1 + $0x714] sm:$0xf0]  ;;  %v3894_v10 = vld [vmem:[%s6472_s1 + $0x870] sm:$0xf] }
  0x62   :  { %2161 = vmatpush.bf16.msra.mxu2 %v3455_v35  ;;  %v3623_v35 = vor.u32 %v4203_v27, %v3622_v26  ;;  %v3987_v26 = vld [vmem:[%s6473_s0 + $0xbc] sm:$0xf]  ;;  %v2784_v27 = vld [vmem:[%s6473_s0 + $0x100] sm:$0xf0]  ;;  %v4271_v11 = vld [vmem:[%s6472_s1 + $0x874] sm:$0xf0] }
  0x63   :  { %2180 = vmatpush.bf16.msra.mxu3 %v3519_v58  ;;  %2124 = vmatmul.bf16.vlgmr.msra.gmra.mxu0 %v5104_v23  ;;  %v3734_v58 = vld [vmem:[%s6472_s1 + $0x730] sm:$0xf] }
  0x64   :  { %2192 = vmatpush.bf16.msrb.mxu0 %v3639_v62  ;;  %2143 = vmatmul.bf16.vlgmr.msra.gmra.mxu1 %v5106_v24  ;;  %v3679_v62 = vor.u32 %v4217_v46, %v3678_v45  ;;  %v3735_v12 = vor.u32 %v4231_v59, %v3734_v58  ;;  %v5249_v45 = vor.u32 %v3996_v25, %v2782_v22  ;;  %v3782_v58 = vld [vmem:[%s6472_s1 + $0x790] sm:$0xf]  ;;  %v4287_v25 = vld [vmem:[%s6472_s1 + $0x8f4] sm:$0xf0] }
  0x65   :  { %2211 = vmatpush.bf16.msrb.mxu1 %v3703_v2  ;;  %2162 = vmatmul.bf16.vlgmr.msra.gmra.mxu2 %v5117_v28  ;;  %v3670_v2 = vld [vmem:[%s6472_s1 + $0x6b0] sm:$0xf]  ;;  %v5251_v46 = vor.u32 %v3987_v26, %v2784_v27  ;;  %v3895_v27 = vor.u32 %v4271_v11, %v3894_v10 }
  0x66   :  { %2230 = vmatpush.bf16.msrb.mxu2 %v3767_v39  ;;  %v4233_v39 = vld [vmem:[%s6472_s1 + $0x744] sm:$0xf0]  ;;  %2181 = vmatmul.bf16.vlgmr.msra.gmra.mxu3 %v5119_v29  ;;  %v3958_v22 = vld [vmem:[%s6472_s1 + $0x8f0] sm:$0xf] }
  0x67   :  { %2249 = vmatpush.bf16.msrb.mxu3 %v3831_v3  ;;  %v3743_v47 = vor.u32 %v4233_v39, %v3742_v38  ;;  %v4215_v3 = vld [vmem:[%s6472_s1 + $0x6b4] sm:$0xf0]  ;;  %v3718_v38 = vld [vmem:[%s6472_s1 + $0x710] sm:$0xf]  ;;  %v5236_v39 = vor.u32 %v3995_v7, %v2774_v4  ;;  %v4014_v4 = vld [vmem:[%s6472_s1 + $0x74] sm:$0xf] }
  0x68   :  { %2193 = vmatpush.bf16.msrb.mxu0 %v3631_v19  ;;  %v4229_v19 = vld [vmem:[%s6472_s1 + $0x724] sm:$0xf0]  ;;  %v3719_v59 = vor.u32 %v4227_v41, %v3718_v38  ;;  %v2872_v7 = vld [vmem:[%s6472_s1 + $0x78] sm:$0xf0]  ;;  %v2718_v38 = vld [vmem:[%s6473_s0 + $0x30] sm:$0xf] }
  0x69   :  { %2212 = vmatpush.bf16.msrb.mxu1 %v3695_v30  ;;  %v3671_v30 = vor.u32 %v4215_v3, %v3670_v2  ;;  %v3582_v2 = vld [vmem:[%s6472_s1 + $0x600] sm:$0xf]  ;;  %v4193_v3 = vld [vmem:[%s6472_s1 + $0x604] sm:$0xf0]  ;;  %v2875_v26 = vor.u32 %v4014_v4, %v2872_v7  ;;  %v3979_v41 = vld [vmem:[%s6473_s0 + $0x74] sm:$0xf0] }
  0x6a   :  { %2231 = vmatpush.bf16.msrb.mxu2 %v3759_v15  ;;  %v3607_v15 = vor.u32 %v4199_v61, %v3606_v60  ;;  %v4243_v61 = vld [vmem:[%s6472_s1 + $0x794] sm:$0xf0]  ;;  %v4010_v4 = vld [vmem:[%s6472_s1 + $0x54] sm:$0xf]  ;;  %v2856_v7 = vld [vmem:[%s6472_s1 + $0x58] sm:$0xf0] }
  0x6b   :  { %2250 = vmatpush.bf16.msrb.mxu3 %v3823_v31  ;;  %v3799_v31 = vor.u32 %v4247_v17, %v3798_v16  ;;  %v3646_v16 = vld [vmem:[%s6472_s1 + $0x680] sm:$0xf]  ;;  %v4209_v17 = vld [vmem:[%s6472_s1 + $0x684] sm:$0xf0] }
  0x6c   :  { %2194 = vmatpush.bf16.msrb.mxu0 %v3623_v35  ;;  %v3599_v35 = vor.u32 %v4197_v21, %v3598_v20  ;;  %v3583_v20 = vor.u32 %v4193_v3, %v3582_v2  ;;  %v4241_v21 = vld [vmem:[%s6472_s1 + $0x784] sm:$0xf0]  ;;  %v3971_v2 = vld [vmem:[%s6473_s0 + $0x3c] sm:$0xf]  ;;  %v2728_v3 = vld [vmem:[%s6473_s0 + $0x80] sm:$0xf0] }
  0x6d   :  { %2213 = vmatpush.bf16.msrb.mxu1 %v3687_v42  ;;  %v3590_v42 = vld [vmem:[%s6472_s1 + $0x610] sm:$0xf] }
  0x6e   :  { %2232 = vmatpush.bf16.msrb.mxu2 %v3751_v34  ;;  %v3727_v34 = vor.u32 %v4229_v19, %v3726_v18  ;;  %v3774_v18 = vld [vmem:[%s6472_s1 + $0x780] sm:$0xf] }
  0x6f   :  { %2251 = vmatpush.bf16.msrb.mxu3 %v3815_v43  ;;  %v4195_v43 = vld [vmem:[%s6472_s1 + $0x614] sm:$0xf0] }
  0x70   :  { %2195 = vmatpush.bf16.msrb.mxu0 %v3615_v49  ;;  %v3791_v49 = vor.u32 %v4245_v37, %v3790_v36  ;;  %v3591_v60 = vor.u32 %v4195_v43, %v3590_v42  ;;  %v3647_v36 = vor.u32 %v4209_v17, %v3646_v16  ;;  %v3775_v37 = vor.u32 %v4241_v21, %v3774_v18  ;;  %v3970_v42 = vld [vmem:[%s6473_s0 + $0x34] sm:$0xf]  ;;  %v2720_v43 = vld [vmem:[%s6473_s0 + $0x78] sm:$0xf0]  ;;  %v3942_v16 = vld [vmem:[%s6472_s1 + $0x8d0] sm:$0xf] }
  0x71   :  { %2214 = vmatpush.bf16.msrb.mxu1 %v3679_v62  ;;  %v3710_v62 = vld [vmem:[%s6472_s1 + $0x700] sm:$0xf]  ;;  %v5380_v17 = vor.u32 %v3979_v41, %v2718_v38  ;;  %v5382_v18 = vor.u32 %v3970_v42, %v2720_v43  ;;  %v2920_v21 = vld [vmem:[%s6472_s1 + $0xd8] sm:$0xf0]  ;;  %v4024_v38 = vld [vmem:[%s6472_s1 + $0xc4] sm:$0xf] }
  0x72   :  { %2233 = vmatpush.bf16.msrb.mxu2 %v3743_v47  ;;  %v3663_v47 = vor.u32 %v4213_v33, %v3662_v32  ;;  %v4012_v32 = vld [vmem:[%s6472_s1 + $0x64] sm:$0xf]  ;;  %v2864_v33 = vld [vmem:[%s6472_s1 + $0x68] sm:$0xf0] }
  0x73   :  { %2252 = vmatpush.bf16.msrb.mxu3 %v3807_v63  ;;  %v4225_v63 = vld [vmem:[%s6472_s1 + $0x704] sm:$0xf0]  ;;  %2129 = vmatmul.bf16.gmra.mxu0 %v5236_v39  ;;  %v2912_v41 = vld [vmem:[%s6472_s1 + $0xc8] sm:$0xf0] }
  0x74   :  { %2196 = vmatpush.bf16.msrb.mxu0 %v3607_v15  ;;  %2148 = vmatmul.bf16.gmra.mxu1 %v5238_v40  ;;  %v3783_v15 = vor.u32 %v4243_v61, %v3782_v58  ;;  %v3711_v19 = vor.u32 %v4225_v63, %v3710_v62  ;;  %v2928_v61 = vld [vmem:[%s6472_s1 + $0xe8] sm:$0xf0]  ;;  %v2726_v62 = vld [vmem:[%s6473_s0 + $0x38] sm:$0xf]  ;;  %v3980_v63 = vld [vmem:[%s6473_s0 + $0x7c] sm:$0xf0] }
  0x75   :  { %2215 = vmatpush.bf16.msrb.mxu1 %v3671_v30  ;;  %2167 = vmatmul.bf16.gmra.mxu2 %v5249_v45  ;;  %v4030_v30 = vld [vmem:[%s6472_s1 + $0xf4] sm:$0xf] }
  0x76   :  { %2234 = vmatpush.bf16.msrb.mxu2 %v3735_v12  ;;  %2186 = vmatmul.bf16.gmra.mxu3 %v5251_v46  ;;  %v3655_v12 = vor.u32 %v4211_v55, %v3654_v52  ;;  %v3950_v52 = vld [vmem:[%s6472_s1 + $0x8e0] sm:$0xf]  ;;  %v2867_v55 = vor.u32 %v4012_v32, %v2864_v33 }
  0x77   :  { %2253 = vmatpush.bf16.msrb.mxu3 %v3799_v31  ;;  %v2936_v31 = vld [vmem:[%s6472_s1 + $0xf8] sm:$0xf0] }
  0x78   :  { %2197 = vmatpush.bf16.msrb.mxu0 %v3599_v35  ;;  %v4269_v35 = vld [vmem:[%s6472_s1 + $0x864] sm:$0xf0] }
  0x79   :  { %2216 = vmatpush.bf16.msrb.mxu1 %v3663_v47  ;;  %v3959_v47 = vor.u32 %v4287_v25, %v3958_v22  ;;  %v5393_v22 = vor.u32 %v3980_v63, %v2726_v62  ;;  %v5395_v25 = vor.u32 %v3971_v2, %v2728_v3  ;;  %v4022_v62 = vld [vmem:[%s6472_s1 + $0xb4] sm:$0xf]  ;;  %v2904_v63 = vld [vmem:[%s6472_s1 + $0xb8] sm:$0xf0] }
  0x7a   :  { %2235 = vmatpush.bf16.msrb.mxu2 %v3727_v34  ;;  %v3886_v34 = vld [vmem:[%s6472_s1 + $0x860] sm:$0xf] }
  0x7b   :  { %2254 = vmatpush.bf16.msrb.mxu3 %v3791_v49  ;;  %v2939_v49 = vor.u32 %v4030_v30, %v2936_v31  ;;  %v3887_v58 = vor.u32 %v4269_v35, %v3886_v34  ;;  %v4008_v30 = vld [vmem:[%s6472_s1 + $0x44] sm:$0xf]  ;;  %v2848_v31 = vld [vmem:[%s6472_s1 + $0x48] sm:$0xf0]  ;;  %v3870_v34 = vld [vmem:[%s6472_s1 + $0x840] sm:$0xf] }
  0x7c   :  { %2198 = vmatpush.bf16.msrb.mxu0 %v3591_v60  ;;  %v4028_v60 = vld [vmem:[%s6472_s1 + $0xe4] sm:$0xf]  ;;  %v4265_v35 = vld [vmem:[%s6472_s1 + $0x844] sm:$0xf0]  ;;  %v2851_v42 = vor.u32 %v4008_v30, %v2848_v31  ;;  %v2896_v31 = vld [vmem:[%s6472_s1 + $0xa8] sm:$0xf0] }
  0x7d   :  { %2217 = vmatpush.bf16.msrb.mxu1 %v3655_v12  ;;  %v2931_v11 = vor.u32 %v4028_v60, %v2928_v61  ;;  %v3878_v12 = vld [vmem:[%s6472_s1 + $0x850] sm:$0xf]  ;;  %v3871_v43 = vor.u32 %v4265_v35, %v3870_v34  ;;  %v4279_v61 = vld [vmem:[%s6472_s1 + $0x8b4] sm:$0xf0]  ;;  %v4020_v30 = vld [vmem:[%s6472_s1 + $0xa4] sm:$0xf] }
  0x7e   :  { %2236 = vmatpush.bf16.msrb.mxu2 %v3719_v59  ;;  %v4285_v59 = vld [vmem:[%s6472_s1 + $0x8e4] sm:$0xf0]  ;;  %v3926_v60 = vld [vmem:[%s6472_s1 + $0x8b0] sm:$0xf]  ;;  %v3989_v34 = vld [vmem:[%s6473_s0 + $0xcc] sm:$0xf] }
  0x7f   :  { %2255 = vmatpush.bf16.msrb.mxu3 %v3783_v15  ;;  %v3951_v10 = vor.u32 %v4285_v59, %v3950_v52  ;;  %v4267_v15 = vld [vmem:[%s6472_s1 + $0x854] sm:$0xf0]  ;;  %v2800_v35 = vld [vmem:[%s6473_s0 + $0x110] sm:$0xf0] }
  0x80   :  { %2199 = vmatpush.bf16.msrb.mxu0 %v3583_v20  ;;  %v4026_v20 = vld [vmem:[%s6472_s1 + $0xd4] sm:$0xf]  ;;  %v4263_v59 = vld [vmem:[%s6472_s1 + $0x834] sm:$0xf0] }
  0x81   :  { %2218 = vmatpush.bf16.msrb.mxu1 %v3647_v36  ;;  %v2923_v33 = vor.u32 %v4026_v20, %v2920_v21  ;;  %v3934_v36 = vld [vmem:[%s6472_s1 + $0x8c0] sm:$0xf]  ;;  %v4261_v21 = vld [vmem:[%s6472_s1 + $0x824] sm:$0xf0] }
  0x82   :  { %2237 = vmatpush.bf16.msrb.mxu2 %v3711_v19  ;;  %v4283_v19 = vld [vmem:[%s6472_s1 + $0x8d4] sm:$0xf0]  ;;  %v3854_v20 = vld [vmem:[%s6472_s1 + $0x820] sm:$0xf] }
  0x83   :  { %2256 = vmatpush.bf16.msrb.mxu3 %v3775_v37  ;;  %v3943_v32 = vor.u32 %v4283_v19, %v3942_v16  ;;  %2200 = vmatmul.bf16.vlgmr.msrb.gmra.mxu0 %v5380_v17  ;;  %v4281_v37 = vld [vmem:[%s6472_s1 + $0x8c4] sm:$0xf0]  ;;  %v3927_v16 = vor.u32 %v4279_v61, %v3926_v60  ;;  %v2907_v19 = vor.u32 %v4022_v62, %v2904_v63  ;;  %v4018_v60 = vld [vmem:[%s6472_s1 + $0x94] sm:$0xf]  ;;  %v2888_v61 = vld [vmem:[%s6472_s1 + $0x98] sm:$0xf0] }
  0x84   :  { %2268 = vmatpush.bf16.msra.mxu0 %v3895_v27  ;;  %v3879_v27 = vor.u32 %v4267_v15, %v3878_v12  ;;  %2219 = vmatmul.bf16.vlgmr.msrb.gmra.mxu1 %v5382_v18  ;;  %v3935_v52 = vor.u32 %v4281_v37, %v3934_v36  ;;  %v3988_v12 = vld [vmem:[%s6473_s0 + $0xc4] sm:$0xf]  ;;  %v2792_v15 = vld [vmem:[%s6473_s0 + $0x108] sm:$0xf0]  ;;  %v3855_v37 = vor.u32 %v4261_v21, %v3854_v20 }
  0x85   :  { %2287 = vmatpush.bf16.msra.mxu1 %v3959_v47  ;;  %2238 = vmatmul.bf16.vlgmr.msrb.gmra.mxu2 %v5393_v22  ;;  %v4006_v47 = vld [vmem:[%s6472_s1 + $0x34] sm:$0xf]  ;;  %v5527_v63 = vor.u32 %v3989_v34, %v2800_v35  ;;  %v4016_v20 = vld [vmem:[%s6472_s1 + $0x84] sm:$0xf]  ;;  %v2880_v21 = vld [vmem:[%s6472_s1 + $0x88] sm:$0xf0] }
  0x86   :  { %2306 = vmatpush.bf16.msra.mxu2 %v2875_v26  ;;  %v2859_v26 = vor.u32 %v4010_v4, %v2856_v7  ;;  %2257 = vmatmul.bf16.vlgmr.msrb.gmra.mxu3 %v5395_v25  ;;  %v4004_v4 = vld [vmem:[%s6472_s1 + $0x24] sm:$0xf]  ;;  %v2832_v7 = vld [vmem:[%s6472_s1 + $0x28] sm:$0xf0]  ;;  %v3064_v35 = vld [vmem:[%s6472_s1 + $0x1f8] sm:$0xf0] }
  0x87   :  { %2325 = vmatpush.bf16.msra.mxu3 %v2939_v49  ;;  %v2840_v49 = vld [vmem:[%s6472_s1 + $0x38] sm:$0xf0]  ;;  %v2835_v36 = vor.u32 %v4004_v4, %v2832_v7  ;;  %v2816_v7 = vld [vmem:[%s6472_s1 + $0x8] sm:$0xf0] }
  0x88   :  { %2269 = vmatpush.bf16.msra.mxu0 %v3887_v58  ;;  %v3862_v58 = vld [vmem:[%s6472_s1 + $0x830] sm:$0xf]  ;;  %v2843_v2 = vor.u32 %v4006_v47, %v2840_v49  ;;  %v4259_v49 = vld [vmem:[%s6472_s1 + $0x814] sm:$0xf0] }
  0x89   :  { %2288 = vmatpush.bf16.msra.mxu1 %v3951_v10  ;;  %v3863_v3 = vor.u32 %v4263_v59, %v3862_v58  ;;  %v2790_v10 = vld [vmem:[%s6473_s0 + $0xc0] sm:$0xf]  ;;  %v3846_v47 = vld [vmem:[%s6472_s1 + $0x810] sm:$0xf]  ;;  %v5514_v58 = vor.u32 %v3988_v12, %v2792_v15  ;;  %v4275_v59 = vld [vmem:[%s6472_s1 + $0x894] sm:$0xf0]  ;;  %v2891_v15 = vor.u32 %v4018_v60, %v2888_v61 }
  0x8a   :  { %2307 = vmatpush.bf16.msra.mxu2 %v2867_v55  ;;  %v2915_v55 = vor.u32 %v4024_v38, %v2912_v41  ;;  %v4002_v38 = vld [vmem:[%s6472_s1 + $0x14] sm:$0xf]  ;;  %v2824_v41 = vld [vmem:[%s6472_s1 + $0x18] sm:$0xf0]  ;;  %v3847_v4 = vor.u32 %v4259_v49, %v3846_v47  ;;  %v4076_v49 = vld [vmem:[%s6472_s1 + $0x264] sm:$0xf] }
  0x8b   :  { %2326 = vmatpush.bf16.msra.mxu3 %v2931_v11  ;;  %v3997_v11 = vld [vmem:[%s6473_s0 + $0x104] sm:$0xf0]  ;;  %v4044_v61 = vld [vmem:[%s6472_s1 + $0x164] sm:$0xf] }
  0x8c   :  { %2270 = vmatpush.bf16.msra.mxu0 %v3879_v27  ;;  %v4277_v27 = vld [vmem:[%s6472_s1 + $0x8a4] sm:$0xf0] }
  0x8d   :  { %2289 = vmatpush.bf16.msra.mxu1 %v3943_v32  ;;  %v2798_v32 = vld [vmem:[%s6473_s0 + $0xc8] sm:$0xf] }
  0x8e   :  { %2308 = vmatpush.bf16.msra.mxu2 %v2859_v26  ;;  %v3918_v26 = vld [vmem:[%s6472_s1 + $0x8a0] sm:$0xf] }
  0x8f   :  { %2327 = vmatpush.bf16.msra.mxu3 %v2923_v33  ;;  %v3998_v33 = vld [vmem:[%s6473_s0 + $0x10c] sm:$0xf0] }
  0x90   :  { %2271 = vmatpush.bf16.msra.mxu0 %v3871_v43  ;;  %v2899_v43 = vor.u32 %v4020_v30, %v2896_v31  ;;  %v5525_v62 = vor.u32 %v3998_v33, %v2798_v32  ;;  %v4046_v30 = vld [vmem:[%s6472_s1 + $0x174] sm:$0xf]  ;;  %v3000_v31 = vld [vmem:[%s6472_s1 + $0x178] sm:$0xf0] }
  0x91   :  { %2290 = vmatpush.bf16.msra.mxu1 %v3935_v52  ;;  %v3910_v52 = vld [vmem:[%s6472_s1 + $0x890] sm:$0xf]  ;;  %v4062_v32 = vld [vmem:[%s6472_s1 + $0x1f4] sm:$0xf]  ;;  %v3003_v47 = vor.u32 %v4046_v30, %v3000_v31  ;;  %v3112_v31 = vld [vmem:[%s6472_s1 + $0x258] sm:$0xf0] }
  0x92   :  { %2309 = vmatpush.bf16.msra.mxu2 %v2851_v42  ;;  %v3919_v42 = vor.u32 %v4277_v27, %v3918_v26  ;;  %v3911_v12 = vor.u32 %v4275_v59, %v3910_v52  ;;  %v4078_v26 = vld [vmem:[%s6472_s1 + $0x274] sm:$0xf]  ;;  %v3128_v27 = vld [vmem:[%s6472_s1 + $0x278] sm:$0xf0]  ;;  %v3120_v52 = vld [vmem:[%s6472_s1 + $0x268] sm:$0xf0]  ;;  %v3067_v59 = vor.u32 %v4062_v32, %v3064_v35 }
  0x93   :  { %2328 = vmatpush.bf16.msra.mxu3 %v2915_v55  ;;  %v5512_v55 = vor.u32 %v3997_v11, %v2790_v10  ;;  %v3838_v10 = vld [vmem:[%s6472_s1 + $0x800] sm:$0xf]  ;;  %v4257_v11 = vld [vmem:[%s6472_s1 + $0x804] sm:$0xf0]  ;;  %v4074_v30 = vld [vmem:[%s6472_s1 + $0x254] sm:$0xf] }
  0x94   :  { %2272 = vmatpush.bf16.msra.mxu0 %v3863_v3  ;;  %v2827_v3 = vor.u32 %v4002_v38, %v2824_v41  ;;  %2224 = vmatmul.bf16.gmra.mxu1 %v5514_v58  ;;  %v3839_v34 = vor.u32 %v4257_v11, %v3838_v10  ;;  %v2883_v41 = vor.u32 %v4016_v20, %v2880_v21  ;;  %v3184_v10 = vld [vmem:[%s6472_s1 + $0x2e8] sm:$0xf0]  ;;  %v3972_v20 = vld [vmem:[%s6473_s0 + $0x44] sm:$0xf]  ;;  %v4042_v32 = vld [vmem:[%s6472_s1 + $0x154] sm:$0xf] }
  0x95   :  { %2291 = vmatpush.bf16.msra.mxu1 %v3927_v16  ;;  %v3902_v16 = vld [vmem:[%s6472_s1 + $0x880] sm:$0xf]  ;;  %2205 = vmatmul.bf16.gmra.mxu0 %v5512_v55  ;;  %v2736_v21 = vld [vmem:[%s6473_s0 + $0x88] sm:$0xf0] }
  0x96   :  { %2310 = vmatpush.bf16.msra.mxu2 %v2843_v2  ;;  %v4000_v2 = vld [vmem:[%s6472_s1 + $0x4] sm:$0xf]  ;;  %2262 = vmatmul.bf16.gmra.mxu3 %v5527_v63 }
  0x97   :  { %2329 = vmatpush.bf16.msra.mxu3 %v2907_v19  ;;  %v4273_v19 = vld [vmem:[%s6472_s1 + $0x884] sm:$0xf0]  ;;  %2243 = vmatmul.bf16.gmra.mxu2 %v5525_v62  ;;  %v2819_v33 = vor.u32 %v4000_v2, %v2816_v7  ;;  %v2992_v2 = vld [vmem:[%s6472_s1 + $0x168] sm:$0xf0]  ;;  %v4092_v7 = vld [vmem:[%s6472_s1 + $0x2e4] sm:$0xf] }
  0x98   :  { %2273 = vmatpush.bf16.msra.mxu0 %v3855_v37  ;;  %v3192_v37 = vld [vmem:[%s6472_s1 + $0x2f8] sm:$0xf0]  ;;  %v3903_v38 = vor.u32 %v4273_v19, %v3902_v16  ;;  %v2995_v16 = vor.u32 %v4044_v61, %v2992_v2  ;;  %v3981_v19 = vld [vmem:[%s6473_s0 + $0x84] sm:$0xf0] }
  0x99   :  { %2292 = vmatpush.bf16.msra.mxu1 %v3919_v42  ;;  %v338_v42 = vld [vmem:[%s6474_s2] sm:$0x3] }
  0x9a   :  { %2311 = vmatpush.bf16.msra.mxu2 %v2835_v36  ;;  %v4094_v36 = vld [vmem:[%s6472_s1 + $0x2f4] sm:$0xf]  ;;  %v5608_v11 = vperm.slane %v338_v42, 0  ;;  %v3176_v42 = vld [vmem:[%s6472_s1 + $0x2d8] sm:$0xf0] }
  0x9b   :  { %2330 = vmatpush.bf16.msra.mxu3 %v2899_v43  ;;  %v3131_v43 = vor.u32 %v4078_v26, %v3128_v27  ;;  %v3195_v60 = vor.u32 %v4094_v36, %v3192_v37  ;;  %v3187_v27 = vor.u32 %v4092_v7, %v3184_v10  ;;  %v5639_v37 = vor.u32 %v3972_v20, %v2736_v21  ;;  %v2976_v7 = vld [vmem:[%s6472_s1 + $0x148] sm:$0xf0]  ;;  %v4056_v10 = vld [vmem:[%s6472_s1 + $0x1c4] sm:$0xf]  ;;  %v4070_v21 = vld [vmem:[%s6472_s1 + $0x234] sm:$0xf] }
  0x9c   :  { %2274 = vmatpush.bf16.msra.mxu0 %v3847_v4  ;;  %v3056_v4 = vld [vmem:[%s6472_s1 + $0x1e8] sm:$0xf0] }
  0x9d   :  { %2293 = vmatpush.bf16.msra.mxu1 %v3911_v12  ;;  %v2734_v12 = vld [vmem:[%s6473_s0 + $0x40] sm:$0xf] }
  0x9e   :  { %2312 = vmatpush.bf16.msra.mxu2 %v2827_v3  ;;  %v4060_v3 = vld [vmem:[%s6472_s1 + $0x1e4] sm:$0xf]  ;;  %v5637_v36 = vor.u32 %v3981_v19, %v2734_v12  ;;  %v3040_v12 = vld [vmem:[%s6472_s1 + $0x1c8] sm:$0xf0] }
  0x9f   :  { %2331 = vmatpush.bf16.msra.mxu3 %v2891_v15  ;;  %v3123_v15 = vor.u32 %v4076_v49, %v3120_v52  ;;  %v3059_v26 = vor.u32 %v4060_v3, %v3056_v4  ;;  %v3115_v49 = vor.u32 %v4074_v30, %v3112_v31  ;;  %v4040_v4 = vld [vmem:[%s6472_s1 + $0x144] sm:$0xf]  ;;  %v3043_v30 = vor.u32 %v4056_v10, %v3040_v12  ;;  %v2960_v12 = vld [vmem:[%s6472_s1 + $0x128] sm:$0xf0] }
  0xa0   :  { %2275 = vmatpush.bf16.msra.mxu0 %v3839_v34  ;;  %v4058_v34 = vld [vmem:[%s6472_s1 + $0x1d4] sm:$0xf]  ;;  %v1973_v35 = vpop.f32.mrf.mxu0  ;;  %v2979_v20 = vor.u32 %v4040_v4, %v2976_v7  ;;  %v4036_v10 = vld [vmem:[%s6472_s1 + $0x124] sm:$0xf] }
  0xa1   :  { %2294 = vmatpush.bf16.msra.mxu1 %v3903_v38  ;;  %v3048_v38 = vld [vmem:[%s6472_s1 + $0x1d8] sm:$0xf0] }
  0xa2   :  { %2313 = vmatpush.bf16.msra.mxu2 %v2819_v33  ;;  %v2984_v33 = vld [vmem:[%s6472_s1 + $0x158] sm:$0xf0]  ;;  %v3051_v2 = vor.u32 %v4058_v34, %v3048_v38 }
  0xa3   :  { %2332 = vmatpush.bf16.msra.mxu3 %v2883_v41  ;;  %v4090_v41 = vld [vmem:[%s6472_s1 + $0x2d4] sm:$0xf]  ;;  %v2987_v52 = vor.u32 %v4042_v32, %v2984_v33  ;;  %v3032_v38 = vld [vmem:[%s6472_s1 + $0x1b8] sm:$0xf0] }
  0xa4   :  { %2344 = vmatpush.bf16.msrb.mxu0 %v3003_v47  ;;  %v1992_v47 = vpop.f32.mrf.mxu1  ;;  %v3179_v3 = vor.u32 %v4090_v41, %v3176_v42  ;;  %2295 = vmatmul.bf16.vlgmr.msra.gmra.mxu1 %v5639_v37  ;;  %v4054_v32 = vld [vmem:[%s6472_s1 + $0x1b4] sm:$0xf]  ;;  %v3160_v42 = vld [vmem:[%s6472_s1 + $0x2b8] sm:$0xf0] }
  0xa5   :  { %2363 = vmatpush.bf16.msrb.mxu1 %v3067_v59  ;;  %v4072_v59 = vld [vmem:[%s6472_s1 + $0x244] sm:$0xf]  ;;  %2276 = vmatmul.bf16.vlgmr.msra.gmra.mxu0 %v5637_v36  ;;  %v4086_v41 = vld [vmem:[%s6472_s1 + $0x2b4] sm:$0xf]  ;;  %v3035_v4 = vor.u32 %v4054_v32, %v3032_v38  ;;  %v2952_v38 = vld [vmem:[%s6472_s1 + $0x118] sm:$0xf0] }
  0xa6   :  { %2382 = vmatpush.bf16.msrb.mxu2 %v3131_v43  ;;  %v1974_v43 = vadd.f32 %v1973_v35, %v5608_v11  ;;  %2333 = vmatmul.bf16.vlgmr.msra.gmra.mxu3 %v4557_v53  ;;  %v2968_v53 = vld [vmem:[%s6472_s1 + $0x138] sm:$0xf0]  ;;  %v3163_v7 = vor.u32 %v4086_v41, %v3160_v42  ;;  %v4050_v41 = vld [vmem:[%s6472_s1 + $0x194] sm:$0xf] }
  0xa7   :  { %2401 = vmatpush.bf16.msrb.mxu3 %v3195_v60  ;;  %v3104_v60 = vld [vmem:[%s6472_s1 + $0x248] sm:$0xf0]  ;;  %2314 = vmatmul.bf16.vlgmr.msra.gmra.mxu2 %v4546_v48  ;;  %v4038_v48 = vld [vmem:[%s6472_s1 + $0x134] sm:$0xf] }
  0xa8   :  { %2345 = vmatpush.bf16.msrb.mxu0 %v2995_v16  ;;  %v1993_v61 = vadd.f32 %v1992_v47, %v1974_v43  ;;  %v3168_v16 = vld [vmem:[%s6472_s1 + $0x2c8] sm:$0xf0]  ;;  %v3107_v19 = vor.u32 %v4072_v59, %v3104_v60  ;;  %v1975_v35 = vpop.f32.mrf.mxu0  ;;  %v2971_v59 = vor.u32 %v4038_v48, %v2968_v53  ;;  %v4068_v60 = vld [vmem:[%s6472_s1 + $0x224] sm:$0xf]  ;;  %v4066_v48 = vld [vmem:[%s6472_s1 + $0x214] sm:$0xf] }
  0xa9   :  { %2364 = vmatpush.bf16.msrb.mxu1 %v3059_v26  ;;  %v3096_v26 = vld [vmem:[%s6472_s1 + $0x238] sm:$0xf0]  ;;  %v2030_v34 = vpop.f32.mrf.mxu3  ;;  %v1976_v43 = vadd.f32 %v1975_v35, %v5608_v11  ;;  %v4034_v35 = vld [vmem:[%s6472_s1 + $0x114] sm:$0xf] }
  0xaa   :  { %2383 = vmatpush.bf16.msrb.mxu2 %v3123_v15  ;;  %v4088_v15 = vld [vmem:[%s6472_s1 + $0x2c4] sm:$0xf]  ;;  %v3080_v53 = vld [vmem:[%s6472_s1 + $0x218] sm:$0xf0] }
  0xab   :  { %2402 = vmatpush.bf16.msrb.mxu3 %v3187_v27  ;;  %v2011_v27 = vpop.f32.mrf.mxu2  ;;  %v3171_v31 = vor.u32 %v4088_v15, %v3168_v16  ;;  %v4052_v15 = vld [vmem:[%s6472_s1 + $0x1a4] sm:$0xf]  ;;  %v3024_v16 = vld [vmem:[%s6472_s1 + $0x1a8] sm:$0xf0] }
  0xac   :  { %2346 = vmatpush.bf16.msrb.mxu0 %v2987_v52  ;;  %v2012_v33 = vadd.f32 %v2011_v27, %v1993_v61  ;;  %v1994_v47 = vpop.f32.mrf.mxu1  ;;  %v3099_v52 = vor.u32 %v4070_v21, %v3096_v26  ;;  %v3088_v61 = vld [vmem:[%s6472_s1 + $0x228] sm:$0xf0]  ;;  %v3999_v21 = vld [vmem:[%s6473_s0 + $0x114] sm:$0xf0]  ;;  %v3990_v26 = vld [vmem:[%s6473_s0 + $0xd4] sm:$0xf] }
  0xad   :  { %2365 = vmatpush.bf16.msrb.mxu1 %v3051_v2  ;;  %v1995_v2 = vadd.f32 %v1994_v47, %v1976_v43  ;;  %v2808_v27 = vld [vmem:[%s6473_s0 + $0x118] sm:$0xf0] }
  0xae   :  { %2384 = vmatpush.bf16.msrb.mxu2 %v3115_v49  ;;  %v5704_v49 = vadd.f32 %v2030_v34, %v2012_v33  ;;  %v3027_v33 = vor.u32 %v4052_v15, %v3024_v16  ;;  %v2955_v15 = vor.u32 %v4034_v35, %v2952_v38  ;;  %v3072_v16 = vld [vmem:[%s6472_s1 + $0x208] sm:$0xf0]  ;;  %v3256_v35 = vld [vmem:[%s6472_s1 + $0x378] sm:$0xf0]  ;;  %v4126_v38 = vld [vmem:[%s6472_s1 + $0x3f4] sm:$0xf] }
  0xaf   :  { %2403 = vmatpush.bf16.msrb.mxu3 %v3179_v3  ;;  %v2806_v3 = vld [vmem:[%s6473_s0 + $0xd0] sm:$0xf] }
  0xb0   :  { %2347 = vmatpush.bf16.msrb.mxu0 %v2979_v20  ;;  %v3152_v20 = vld [vmem:[%s6472_s1 + $0x2a8] sm:$0xf0]  ;;  %v1978_v47 = vpop.f32.mrf.mxu0 }
  0xb1   :  { %2366 = vmatpush.bf16.msrb.mxu1 %v3043_v30  ;;  %v3091_v30 = vor.u32 %v4068_v60, %v3088_v61  ;;  %v2032_v43 = vpop.f32.mrf.mxu3  ;;  %v3016_v60 = vld [vmem:[%s6472_s1 + $0x198] sm:$0xf0]  ;;  %v4082_v61 = vld [vmem:[%s6472_s1 + $0x294] sm:$0xf] }
  0xb2   :  { %2385 = vmatpush.bf16.msrb.mxu2 %v3107_v19  ;;  %v4084_v19 = vld [vmem:[%s6472_s1 + $0x2a4] sm:$0xf] }
  0xb3   :  { %2404 = vmatpush.bf16.msrb.mxu3 %v3171_v31  ;;  %v2963_v31 = vor.u32 %v4036_v10, %v2960_v12  ;;  %v2013_v32 = vpop.f32.mrf.mxu2  ;;  %v3155_v34 = vor.u32 %v4084_v19, %v3152_v20  ;;  %v3083_v12 = vor.u32 %v4066_v48, %v3080_v53  ;;  %v4032_v19 = vld [vmem:[%s6472_s1 + $0x104] sm:$0xf]  ;;  %v2944_v20 = vld [vmem:[%s6472_s1 + $0x108] sm:$0xf0] }
  0xb4   :  { %2348 = vmatpush.bf16.msrb.mxu0 %v2971_v59  ;;  %v2014_v42 = vadd.f32 %v2013_v32, %v1995_v2  ;;  %v5759_v59 = vor.u32 %v3990_v26, %v2808_v27  ;;  %v1979_v2 = vadd.f32 %v1978_v47, %v5608_v11  ;;  %v3019_v26 = vor.u32 %v4050_v41, %v3016_v60  ;;  %v4080_v48 = vld [vmem:[%s6472_s1 + $0x284] sm:$0xf]  ;;  %v3136_v53 = vld [vmem:[%s6472_s1 + $0x288] sm:$0xf0]  ;;  %v4142_v32 = vld [vmem:[%s6472_s1 + $0x474] sm:$0xf] }
  0xb5   :  { %2367 = vmatpush.bf16.msrb.mxu1 %v3035_v4  ;;  %v3144_v4 = vld [vmem:[%s6472_s1 + $0x298] sm:$0xf0] }
  0xb6   :  { %2386 = vmatpush.bf16.msrb.mxu2 %v3099_v52  ;;  %v5757_v52 = vor.u32 %v3999_v21, %v2806_v3  ;;  %v4064_v3 = vld [vmem:[%s6472_s1 + $0x204] sm:$0xf]  ;;  %v5774_v10 = vadd.f32 %v2032_v43, %v2014_v42  ;;  %v3147_v27 = vor.u32 %v4082_v61, %v3144_v4  ;;  %2300 = vmatmul.bf16.gmra.mxu1 %v5759_v59  ;;  %v3448_v43 = vld [vmem:[%s6472_s1 + $0x4f8] sm:$0xf0] }
  0xb7   :  { %2405 = vmatpush.bf16.msrb.mxu3 %v3163_v7  ;;  %v1997_v7 = vpop.f32.mrf.mxu1  ;;  %2319 = vmatmul.bf16.gmra.mxu2 %v4678_v44  ;;  %v3075_v41 = vor.u32 %v4064_v3, %v3072_v16  ;;  %v2947_v42 = vor.u32 %v4032_v19, %v2944_v20  ;;  %v3320_v44 = vld [vmem:[%s6472_s1 + $0x3f8] sm:$0xf0]  ;;  %v3139_v61 = vor.u32 %v4080_v48, %v3136_v53  ;;  %v3376_v16 = vld [vmem:[%s6472_s1 + $0x468] sm:$0xf0]  ;;  %v4156_v53 = vld [vmem:[%s6472_s1 + $0x4e4] sm:$0xf] }
  0xb8   :  { %2349 = vmatpush.bf16.msrb.mxu0 %v2963_v31  ;;  %v1998_v21 = vadd.f32 %v1997_v7, %v1979_v2  ;;  %v3008_v31 = vld [vmem:[%s6472_s1 + $0x188] sm:$0xf0]  ;;  %2338 = vmatmul.bf16.gmra.mxu3 %v4689_v50  ;;  %v4158_v50 = vld [vmem:[%s6472_s1 + $0x4f4] sm:$0xf]  ;;  %v1980_v7 = vpop.f32.mrf.mxu0 }
  0xb9   :  { %2368 = vmatpush.bf16.msrb.mxu1 %v3027_v33  ;;  %2281 = vmatmul.bf16.gmra.mxu0 %v5757_v52  ;;  %v3384_v33 = vld [vmem:[%s6472_s1 + $0x478] sm:$0xf0]  ;;  %v2035_v2 = vpop.f32.mrf.mxu3  ;;  %v1981_v19 = vadd.f32 %v1980_v7, %v5608_v11  ;;  %v3312_v11 = vld [vmem:[%s6472_s1 + $0x3e8] sm:$0xf0]  ;;  %v4154_v7 = vld [vmem:[%s6472_s1 + $0x4d4] sm:$0xf] }
  0xba   :  { %2387 = vmatpush.bf16.msrb.mxu2 %v3091_v30  ;;  %v4048_v30 = vld [vmem:[%s6472_s1 + $0x184] sm:$0xf]  ;;  %v3387_v3 = vor.u32 %v4142_v32, %v3384_v33  ;;  %v3440_v32 = vld [vmem:[%s6472_s1 + $0x4e8] sm:$0xf0] }
  0xbb   :  { %2406 = vmatpush.bf16.msrb.mxu3 %v3155_v34  ;;  %v4110_v34 = vld [vmem:[%s6472_s1 + $0x374] sm:$0xf]  ;;  %v2016_v47 = vpop.f32.mrf.mxu2  ;;  %v3011_v60 = vor.u32 %v4048_v30, %v3008_v31  ;;  %v3248_v30 = vld [vmem:[%s6472_s1 + $0x368] sm:$0xf0]  ;;  %v4124_v31 = vld [vmem:[%s6472_s1 + $0x3e4] sm:$0xf] }
  0xbc   :  { %2350 = vmatpush.bf16.msrb.mxu0 %v2955_v15  ;;  %v2017_v4 = vadd.f32 %v2016_v47, %v1998_v21  ;;  %v4140_v15 = vld [vmem:[%s6472_s1 + $0x464] sm:$0xf]  ;;  %v3240_v47 = vld [vmem:[%s6472_s1 + $0x358] sm:$0xf0] }
  0xbd   :  { %2369 = vmatpush.bf16.msrb.mxu1 %v3019_v26  ;;  %v3323_v26 = vor.u32 %v4126_v38, %v3320_v44  ;;  %v4108_v21 = vld [vmem:[%s6472_s1 + $0x364] sm:$0xf]  ;;  %v3315_v38 = vor.u32 %v4124_v31, %v3312_v11  ;;  %v3368_v44 = vld [vmem:[%s6472_s1 + $0x458] sm:$0xf0] }
  0xbe   :  { %2388 = vmatpush.bf16.msrb.mxu2 %v3083_v12  ;;  %v3259_v12 = vor.u32 %v4110_v34, %v3256_v35  ;;  %v5841_v48 = vadd.f32 %v2035_v2, %v2017_v4  ;;  %v3379_v34 = vor.u32 %v4140_v15, %v3376_v16  ;;  %v3251_v35 = vor.u32 %v4108_v21, %v3248_v30  ;;  %v3304_v2 = vld [vmem:[%s6472_s1 + $0x3d8] sm:$0xf0]  ;;  %v3360_v21 = vld [vmem:[%s6472_s1 + $0x448] sm:$0xf0]  ;;  %v4104_v11 = vld [vmem:[%s6472_s1 + $0x344] sm:$0xf] }
  0xbf   :  { %2407 = vmatpush.bf16.msrb.mxu3 %v3147_v27  ;;  %v1999_v20 = vpop.f32.mrf.mxu1  ;;  %v3451_v27 = vor.u32 %v4158_v50, %v3448_v43  ;;  %v4106_v43 = vld [vmem:[%s6472_s1 + $0x354] sm:$0xf] }
  0xc0   :  { %2351 = vmatpush.bf16.msrb.mxu0 %v2947_v42  ;;  %v2000_v33 = vadd.f32 %v1999_v20, %v1981_v19  ;;  %v4138_v42 = vld [vmem:[%s6472_s1 + $0x454] sm:$0xf] }
  0xc1   :  { %2370 = vmatpush.bf16.msrb.mxu1 %v3011_v60  ;;  %v4122_v60 = vld [vmem:[%s6472_s1 + $0x3d4] sm:$0xf]  ;;  %v2037_v4 = vpop.f32.mrf.mxu3  ;;  %v3371_v20 = vor.u32 %v4138_v42, %v3368_v44 }
  0xc2   :  { %2389 = vmatpush.bf16.msrb.mxu2 %v3075_v41  ;;  %v3443_v41 = vor.u32 %v4156_v53, %v3440_v32  ;;  %v3307_v30 = vor.u32 %v4122_v60, %v3304_v2  ;;  %v4120_v53 = vld [vmem:[%s6472_s1 + $0x3c4] sm:$0xf]  ;;  %v3288_v60 = vld [vmem:[%s6472_s1 + $0x3b8] sm:$0xf0] }
  0xc3   :  { %2408 = vmatpush.bf16.msrb.mxu3 %v3139_v61  ;;  %v2018_v50 = vpop.f32.mrf.mxu2 }
  0xc4   :  { %2420 = vmatpush.bf16.msra.mxu0 %v3259_v12  ;;  %v2019_v61 = vadd.f32 %v2018_v50, %v2000_v33  ;;  %v2049_v12 = vpop.f32.mrf.mxu0  ;;  %v3296_v33 = vld [vmem:[%s6472_s1 + $0x3c8] sm:$0xf0]  ;;  %v4118_v50 = vld [vmem:[%s6472_s1 + $0x3b4] sm:$0xf] }
  0xc5   :  { %2439 = vmatpush.bf16.msra.mxu1 %v3323_v26  ;;  %v2050_v19 = vadd.f32 %v2049_v12, %v5704_v49  ;;  %v3243_v26 = vor.u32 %v4106_v43, %v3240_v47  ;;  %v3232_v49 = vld [vmem:[%s6472_s1 + $0x348] sm:$0xf0]  ;;  %v3299_v42 = vor.u32 %v4120_v53, %v3296_v33 }
  0xc6   :  { %2458 = vmatpush.bf16.msra.mxu2 %v3387_v3  ;;  %v3432_v3 = vld [vmem:[%s6472_s1 + $0x4d8] sm:$0xf0]  ;;  %v5876_v16 = vadd.f32 %v2037_v4, %v2019_v61  ;;  %2371 = vmatmul.bf16.vlgmr.msrb.gmra.mxu1 %v4567_v57  ;;  %v3235_v57 = vor.u32 %v4104_v11, %v3232_v49  ;;  %v4150_v61 = vld [vmem:[%s6472_s1 + $0x4b4] sm:$0xf]  ;;  %v4116_v11 = vld [vmem:[%s6472_s1 + $0x3a4] sm:$0xf] }
  0xc7   :  { %2477 = vmatpush.bf16.msra.mxu3 %v3451_v27  ;;  %v2068_v15 = vpop.f32.mrf.mxu1  ;;  %v4136_v27 = vld [vmem:[%s6472_s1 + $0x444] sm:$0xf]  ;;  %v3435_v31 = vor.u32 %v4154_v7, %v3432_v3  ;;  %2390 = vmatmul.bf16.vlgmr.msrb.gmra.mxu2 %v4834_v0  ;;  %v4102_v0 = vld [vmem:[%s6472_s1 + $0x334] sm:$0xf]  ;;  %v3416_v4 = vld [vmem:[%s6472_s1 + $0x4b8] sm:$0xf0] }
  0xc8   :  { %2421 = vmatpush.bf16.msra.mxu0 %v3251_v35  ;;  %v2069_v32 = vadd.f32 %v2068_v15, %v2050_v19  ;;  %v3424_v35 = vld [vmem:[%s6472_s1 + $0x4c8] sm:$0xf0]  ;;  %2409 = vmatmul.bf16.vlgmr.msrb.gmra.mxu3 %v4836_v1  ;;  %v3224_v1 = vld [vmem:[%s6472_s1 + $0x338] sm:$0xf0] }
  0xc9   :  { %2440 = vmatpush.bf16.msra.mxu1 %v3315_v38  ;;  %2352 = vmatmul.bf16.vlgmr.msrb.gmra.mxu0 %v4559_v54  ;;  %v3363_v54 = vor.u32 %v4136_v27, %v3360_v21  ;;  %v4134_v38 = vld [vmem:[%s6472_s1 + $0x434] sm:$0xf]  ;;  %v2106_v47 = vpop.f32.mrf.mxu3  ;;  %v3227_v19 = vor.u32 %v4102_v0, %v3224_v1  ;;  %v3291_v21 = vor.u32 %v4118_v50, %v3288_v60  ;;  %v3280_v53 = vld [vmem:[%s6472_s1 + $0x3a8] sm:$0xf0]  ;;  %v3400_v60 = vld [vmem:[%s6472_s1 + $0x498] sm:$0xf0] }
  0xca   :  { %2459 = vmatpush.bf16.msra.mxu2 %v3379_v34  ;;  %v4152_v34 = vld [vmem:[%s6472_s1 + $0x4c4] sm:$0xf]  ;;  %v3408_v33 = vld [vmem:[%s6472_s1 + $0x4a8] sm:$0xf0]  ;;  %v4114_v0 = vld [vmem:[%s6472_s1 + $0x394] sm:$0xf] }
  0xcb   :  { %2478 = vmatpush.bf16.msra.mxu3 %v3443_v41  ;;  %v3352_v41 = vld [vmem:[%s6472_s1 + $0x438] sm:$0xf0]  ;;  %v3427_v44 = vor.u32 %v4152_v34, %v3424_v35  ;;  %v2087_v43 = vpop.f32.mrf.mxu2 }
  0xcc   :  { %2422 = vmatpush.bf16.msra.mxu0 %v3243_v26  ;;  %v2088_v2 = vadd.f32 %v2087_v43, %v2069_v32  ;;  %v2051_v7 = vpop.f32.mrf.mxu0  ;;  %v3355_v15 = vor.u32 %v4134_v38, %v3352_v41  ;;  %v3344_v26 = vld [vmem:[%s6472_s1 + $0x428] sm:$0xf0]  ;;  %v4148_v32 = vld [vmem:[%s6472_s1 + $0x4a4] sm:$0xf]  ;;  %v3283_v38 = vor.u32 %v4116_v11, %v3280_v53  ;;  %v3272_v43 = vld [vmem:[%s6472_s1 + $0x398] sm:$0xf0] }
  0xcd   :  { %2441 = vmatpush.bf16.msra.mxu1 %v3307_v30  ;;  %v2052_v12 = vadd.f32 %v2051_v7, %v5774_v10  ;;  %v3419_v30 = vor.u32 %v4150_v61, %v3416_v4  ;;  %v4100_v10 = vld [vmem:[%s6472_s1 + $0x324] sm:$0xf]  ;;  %v3411_v41 = vor.u32 %v4148_v32, %v3408_v33  ;;  %v3392_v53 = vld [vmem:[%s6472_s1 + $0x488] sm:$0xf0]  ;;  %v4206_v32 = vld [vmem:[%s6472_s1 + $0x674] sm:$0xf] }
  0xce   :  { %2460 = vmatpush.bf16.msra.mxu2 %v3371_v20  ;;  %v4132_v20 = vld [vmem:[%s6472_s1 + $0x424] sm:$0xf]  ;;  %v5938_v27 = vadd.f32 %v2106_v47, %v2088_v2  ;;  %v4146_v47 = vld [vmem:[%s6472_s1 + $0x494] sm:$0xf]  ;;  %v3640_v33 = vld [vmem:[%s6472_s1 + $0x678] sm:$0xf0] }
  0xcf   :  { %2479 = vmatpush.bf16.msra.mxu3 %v3435_v31  ;;  %v2070_v3 = vpop.f32.mrf.mxu1  ;;  %v3216_v31 = vld [vmem:[%s6472_s1 + $0x328] sm:$0xf0]  ;;  %v3347_v34 = vor.u32 %v4132_v20, %v3344_v26  ;;  %v4128_v7 = vld [vmem:[%s6472_s1 + $0x404] sm:$0xf] }
  0xd0   :  { %2423 = vmatpush.bf16.msra.mxu0 %v3235_v57  ;;  %v2071_v49 = vadd.f32 %v2070_v3, %v2052_v12  ;;  %v3219_v35 = vor.u32 %v4100_v10, %v3216_v31  ;;  %v3336_v57 = vld [vmem:[%s6472_s1 + $0x418] sm:$0xf0]  ;;  %v4096_v20 = vld [vmem:[%s6472_s1 + $0x304] sm:$0xf]  ;;  %v3200_v26 = vld [vmem:[%s6472_s1 + $0x308] sm:$0xf0] }
  0xd1   :  { %2442 = vmatpush.bf16.msra.mxu1 %v3299_v42  ;;  %v4098_v42 = vld [vmem:[%s6472_s1 + $0x314] sm:$0xf]  ;;  %v2108_v50 = vpop.f32.mrf.mxu3  ;;  %v4112_v10 = vld [vmem:[%s6472_s1 + $0x384] sm:$0xf]  ;;  %v3264_v31 = vld [vmem:[%s6472_s1 + $0x388] sm:$0xf0] }
  0xd2   :  { %2461 = vmatpush.bf16.msra.mxu2 %v3363_v54  ;;  %v4130_v54 = vld [vmem:[%s6472_s1 + $0x414] sm:$0xf]  ;;  %v4144_v11 = vld [vmem:[%s6472_s1 + $0x484] sm:$0xf] }
  0xd3   :  { %2480 = vmatpush.bf16.msra.mxu3 %v3427_v44  ;;  %v3208_v44 = vld [vmem:[%s6472_s1 + $0x318] sm:$0xf0]  ;;  %v2089_v1 = vpop.f32.mrf.mxu2  ;;  %v3339_v12 = vor.u32 %v4130_v54, %v3336_v57  ;;  %v3203_v54 = vor.u32 %v4096_v20, %v3200_v26  ;;  %v4220_v20 = vld [vmem:[%s6472_s1 + $0x6e4] sm:$0xf]  ;;  %v3696_v26 = vld [vmem:[%s6472_s1 + $0x6e8] sm:$0xf0] }
  0xd4   :  { %2424 = vmatpush.bf16.msra.mxu0 %v3227_v19  ;;  %v2090_v61 = vadd.f32 %v2089_v1, %v2071_v49  ;;  %v2054_v4 = vpop.f32.mrf.mxu0  ;;  %v3328_v19 = vld [vmem:[%s6472_s1 + $0x408] sm:$0xf0]  ;;  %v3704_v57 = vld [vmem:[%s6472_s1 + $0x6f8] sm:$0xf0] }
  0xd5   :  { %2443 = vmatpush.bf16.msra.mxu1 %v3291_v21  ;;  %v2055_v3 = vadd.f32 %v2054_v4, %v5841_v48  ;;  %v3275_v48 = vor.u32 %v4114_v0, %v3272_v43  ;;  %v3643_v0 = vor.u32 %v4206_v32, %v3640_v33  ;;  %v3632_v43 = vld [vmem:[%s6472_s1 + $0x668] sm:$0xf0]  ;;  %v4170_v32 = vld [vmem:[%s6472_s1 + $0x554] sm:$0xf]  ;;  %v3496_v33 = vld [vmem:[%s6472_s1 + $0x558] sm:$0xf0] }
  0xd6   :  { %2462 = vmatpush.bf16.msra.mxu2 %v3355_v15  ;;  %v3211_v15 = vor.u32 %v4098_v42, %v3208_v44  ;;  %v5995_v21 = vadd.f32 %v2108_v50, %v2090_v61  ;;  %2376 = vmatmul.bf16.gmra.mxu1 %v4699_v56  ;;  %v3512_v56 = vld [vmem:[%s6472_s1 + $0x578] sm:$0xf0]  ;;  %v4204_v50 = vld [vmem:[%s6472_s1 + $0x664] sm:$0xf] }
  0xd7   :  { %2481 = vmatpush.bf16.msra.mxu3 %v3419_v30  ;;  %v2073_v2 = vpop.f32.mrf.mxu1  ;;  %v3403_v30 = vor.u32 %v4146_v47, %v3400_v60  ;;  %2395 = vmatmul.bf16.gmra.mxu2 %v4966_v8  ;;  %v3576_v8 = vld [vmem:[%s6472_s1 + $0x5f8] sm:$0xf0] }
  0xd8   :  { %2425 = vmatpush.bf16.msra.mxu0 %v3219_v35  ;;  %v2074_v49 = vadd.f32 %v2073_v2, %v2055_v3  ;;  %2414 = vmatmul.bf16.gmra.mxu3 %v4968_v9  ;;  %v3331_v35 = vor.u32 %v4128_v7, %v3328_v19  ;;  %v4222_v9 = vld [vmem:[%s6472_s1 + $0x6f4] sm:$0xf]  ;;  %v4172_v7 = vld [vmem:[%s6472_s1 + $0x564] sm:$0xf]  ;;  %v3504_v3 = vld [vmem:[%s6472_s1 + $0x568] sm:$0xf0] }
  0xd9   :  { %2444 = vmatpush.bf16.msra.mxu1 %v3283_v38  ;;  %2357 = vmatmul.bf16.gmra.mxu0 %v4691_v51  ;;  %v4174_v51 = vld [vmem:[%s6472_s1 + $0x574] sm:$0xf]  ;;  %v3267_v38 = vor.u32 %v4112_v10, %v3264_v31  ;;  %v2111_v44 = vpop.f32.mrf.mxu3  ;;  %v3707_v2 = vor.u32 %v4222_v9, %v3704_v57  ;;  %v3568_v19 = vld [vmem:[%s6472_s1 + $0x5e8] sm:$0xf0]  ;;  %v3507_v10 = vor.u32 %v4172_v7, %v3504_v3  ;;  %v4216_v7 = vld [vmem:[%s6472_s1 + $0x6c4] sm:$0xf] }
  0xda   :  { %2463 = vmatpush.bf16.msra.mxu2 %v3347_v34  ;;  %v4190_v34 = vld [vmem:[%s6472_s1 + $0x5f4] sm:$0xf]  ;;  %v3515_v1 = vor.u32 %v4174_v51, %v3512_v56  ;;  %v3680_v3 = vld [vmem:[%s6472_s1 + $0x6c8] sm:$0xf0] }
  0xdb   :  { %2482 = vmatpush.bf16.msra.mxu3 %v3411_v41  ;;  %v3395_v41 = vor.u32 %v4144_v11, %v3392_v53  ;;  %v2092_v42 = vpop.f32.mrf.mxu2  ;;  %v3579_v4 = vor.u32 %v4190_v34, %v3576_v8  ;;  %v3699_v11 = vor.u32 %v4220_v20, %v3696_v26  ;;  %v3624_v53 = vld [vmem:[%s6472_s1 + $0x658] sm:$0xf0]  ;;  %v4186_v51 = vld [vmem:[%s6472_s1 + $0x5d4] sm:$0xf]  ;;  %v3683_v20 = vor.u32 %v4216_v7, %v3680_v3 }
  0xdc   :  { %2426 = vmatpush.bf16.msra.mxu0 %v3211_v15  ;;  %v2093_v47 = vadd.f32 %v2092_v42, %v2074_v49  ;;  %v2056_v60 = vpop.f32.mrf.mxu0  ;;  %v4202_v49 = vld [vmem:[%s6472_s1 + $0x654] sm:$0xf]  ;;  %v3688_v8 = vld [vmem:[%s6472_s1 + $0x6d8] sm:$0xf0] }
  0xdd   :  { %2445 = vmatpush.bf16.msra.mxu1 %v3275_v48  ;;  %v2057_v15 = vadd.f32 %v2056_v60, %v5876_v16  ;;  %v3635_v16 = vor.u32 %v4204_v50, %v3632_v43  ;;  %v3627_v42 = vor.u32 %v4202_v49, %v3624_v53  ;;  %v4168_v60 = vld [vmem:[%s6472_s1 + $0x544] sm:$0xf]  ;;  %v4182_v26 = vld [vmem:[%s6472_s1 + $0x5b4] sm:$0xf] }
  0xde   :  { %2464 = vmatpush.bf16.msra.mxu2 %v3339_v12  ;;  %v4188_v12 = vld [vmem:[%s6472_s1 + $0x5e4] sm:$0xf]  ;;  %v6062_v48 = vadd.f32 %v2111_v44, %v2093_v47  ;;  %v3499_v44 = vor.u32 %v4170_v32, %v3496_v33  ;;  %v4178_v7 = vld [vmem:[%s6472_s1 + $0x594] sm:$0xf] }
  0xdf   :  { %2483 = vmatpush.bf16.msra.mxu3 %v3403_v30  ;;  %v2075_v61 = vpop.f32.mrf.mxu1  ;;  %v3571_v31 = vor.u32 %v4188_v12, %v3568_v19  ;;  %v4198_v12 = vld [vmem:[%s6472_s1 + $0x634] sm:$0xf] }
  0xe0   :  { %2427 = vmatpush.bf16.msra.mxu0 %v3203_v54  ;;  %v2076_v30 = vadd.f32 %v2075_v61, %v2057_v15  ;;  %v4218_v54 = vld [vmem:[%s6472_s1 + $0x6d4] sm:$0xf]  ;;  %v4184_v61 = vld [vmem:[%s6472_s1 + $0x5c4] sm:$0xf]  ;;  %v3608_v15 = vld [vmem:[%s6472_s1 + $0x638] sm:$0xf0] }
  0xe1   :  { %2446 = vmatpush.bf16.msra.mxu1 %v3267_v38  ;;  %v2113_v34 = vpop.f32.mrf.mxu3  ;;  %v3691_v47 = vor.u32 %v4218_v54, %v3688_v8 }
  0xe2   :  { %2465 = vmatpush.bf16.msra.mxu2 %v3331_v35  ;;  %v3560_v35 = vld [vmem:[%s6472_s1 + $0x5d8] sm:$0xf0] }
  0xe3   :  { %2484 = vmatpush.bf16.msra.mxu3 %v3395_v41  ;;  %v2094_v56 = vpop.f32.mrf.mxu2  ;;  %v3563_v43 = vor.u32 %v4186_v51, %v3560_v35  ;;  %v3611_v51 = vor.u32 %v4198_v12, %v3608_v15  ;;  %v3600_v35 = vld [vmem:[%s6472_s1 + $0x628] sm:$0xf0]  ;;  %v4210_v12 = vld [vmem:[%s6472_s1 + $0x694] sm:$0xf]  ;;  %v3656_v15 = vld [vmem:[%s6472_s1 + $0x698] sm:$0xf0] }
  0xe4   :  { %2496 = vmatpush.bf16.msrb.mxu0 %v3515_v1  ;;  %v2095_v9 = vadd.f32 %v2094_v56, %v2076_v30  ;;  %v2125_v57 = vpop.f32.mrf.mxu0  ;;  %v3616_v1 = vld [vmem:[%s6472_s1 + $0x648] sm:$0xf0] }
  0xe5   :  { %2515 = vmatpush.bf16.msrb.mxu1 %v3579_v4  ;;  %v2126_v41 = vadd.f32 %v2125_v57, %v5938_v27  ;;  %v3488_v27 = vld [vmem:[%s6472_s1 + $0x548] sm:$0xf0] }
  0xe6   :  { %2534 = vmatpush.bf16.msrb.mxu2 %v3643_v0  ;;  %v4200_v0 = vld [vmem:[%s6472_s1 + $0x644] sm:$0xf]  ;;  %v6095_v50 = vadd.f32 %v2113_v34, %v2095_v9  ;;  %2447 = vmatmul.bf16.vlgmr.msra.gmra.mxu1 %v4849_v6  ;;  %v3491_v6 = vor.u32 %v4168_v60, %v3488_v27  ;;  %v3472_v57 = vld [vmem:[%s6472_s1 + $0x528] sm:$0xf0]  ;;  %v3592_v60 = vld [vmem:[%s6472_s1 + $0x618] sm:$0xf0] }
  0xe7   :  { %2553 = vmatpush.bf16.msrb.mxu3 %v3707_v2  ;;  %v2144_v38 = vpop.f32.mrf.mxu1  ;;  %v3552_v2 = vld [vmem:[%s6472_s1 + $0x5c8] sm:$0xf0]  ;;  %2466 = vmatmul.bf16.vlgmr.msra.gmra.mxu2 %v5104_v23  ;;  %v4166_v23 = vld [vmem:[%s6472_s1 + $0x534] sm:$0xf]  ;;  %v4196_v34 = vld [vmem:[%s6472_s1 + $0x624] sm:$0xf] }
  0xe8   :  { %2497 = vmatpush.bf16.msrb.mxu0 %v3507_v10  ;;  %v2145_v4 = vadd.f32 %v2144_v38, %v2126_v41  ;;  %2485 = vmatmul.bf16.vlgmr.msra.gmra.mxu3 %v5106_v24  ;;  %v3555_v19 = vor.u32 %v4184_v61, %v3552_v2  ;;  %v3480_v24 = vld [vmem:[%s6472_s1 + $0x538] sm:$0xf0]  ;;  %v4180_v38 = vld [vmem:[%s6472_s1 + $0x5a4] sm:$0xf] }
  0xe9   :  { %2516 = vmatpush.bf16.msrb.mxu1 %v3571_v31  ;;  %2428 = vmatmul.bf16.vlgmr.msra.gmra.mxu0 %v4847_v5  ;;  %v3619_v5 = vor.u32 %v4200_v0, %v3616_v1  ;;  %v3544_v10 = vld [vmem:[%s6472_s1 + $0x5b8] sm:$0xf0]  ;;  %v4214_v31 = vld [vmem:[%s6472_s1 + $0x6b4] sm:$0xf]  ;;  %v3483_v56 = vor.u32 %v4166_v23, %v3480_v24  ;;  %v3664_v0 = vld [vmem:[%s6472_s1 + $0x6a8] sm:$0xf0]  ;;  %v3603_v1 = vor.u32 %v4196_v34, %v3600_v35 }
  0xea   :  { %2535 = vmatpush.bf16.msrb.mxu2 %v3635_v16  ;;  %v2182_v16 = vpop.f32.mrf.mxu3  ;;  %v3547_v8 = vor.u32 %v4182_v26, %v3544_v10  ;;  %v3464_v2 = vld [vmem:[%s6472_s1 + $0x518] sm:$0xf0]  ;;  %v4192_v24 = vld [vmem:[%s6472_s1 + $0x604] sm:$0xf]  ;;  %v3584_v10 = vld [vmem:[%s6472_s1 + $0x608] sm:$0xf0] }
  0xeb   :  { %2554 = vmatpush.bf16.msrb.mxu3 %v3699_v11  ;;  %v2163_v30 = vpop.f32.mrf.mxu2  ;;  %v3672_v11 = vld [vmem:[%s6472_s1 + $0x6b8] sm:$0xf0]  ;;  %v3648_v34 = vld [vmem:[%s6472_s1 + $0x688] sm:$0xf0]  ;;  %v4270_v35 = vld [vmem:[%s6472_s1 + $0x874] sm:$0xf] }
  0xec   :  { %2498 = vmatpush.bf16.msrb.mxu0 %v3499_v44  ;;  %v2164_v49 = vadd.f32 %v2163_v30, %v2145_v4  ;;  %v2127_v53 = vpop.f32.mrf.mxu0  ;;  %v3675_v9 = vor.u32 %v4214_v31, %v3672_v11  ;;  %v4212_v44 = vld [vmem:[%s6472_s1 + $0x6a4] sm:$0xf]  ;;  %v4162_v4 = vld [vmem:[%s6472_s1 + $0x514] sm:$0xf]  ;;  %v3456_v11 = vld [vmem:[%s6472_s1 + $0x508] sm:$0xf0] }
  0xed   :  { %2517 = vmatpush.bf16.msrb.mxu1 %v3563_v43  ;;  %v2128_v33 = vadd.f32 %v2127_v53, %v5995_v21  ;;  %v4164_v21 = vld [vmem:[%s6472_s1 + $0x524] sm:$0xf]  ;;  %v3667_v61 = vor.u32 %v4212_v44, %v3664_v0  ;;  %v3659_v53 = vor.u32 %v4210_v12, %v3656_v15  ;;  %v3824_v15 = vld [vmem:[%s6472_s1 + $0x7e8] sm:$0xf0] }
  0xee   :  { %2536 = vmatpush.bf16.msrb.mxu2 %v3627_v42  ;;  %v6150_v54 = vadd.f32 %v2182_v16, %v2164_v49  ;;  %v3536_v42 = vld [vmem:[%s6472_s1 + $0x5a8] sm:$0xf0]  ;;  %v3475_v43 = vor.u32 %v4164_v21, %v3472_v57  ;;  %v3467_v16 = vor.u32 %v4162_v4, %v3464_v2  ;;  %v4160_v31 = vld [vmem:[%s6472_s1 + $0x504] sm:$0xf]  ;;  %v3587_v21 = vor.u32 %v4192_v24, %v3584_v10  ;;  %v4266_v10 = vld [vmem:[%s6472_s1 + $0x854] sm:$0xf] }
  0xef   :  { %2555 = vmatpush.bf16.msrb.mxu3 %v3691_v47  ;;  %v2146_v32 = vpop.f32.mrf.mxu1  ;;  %v4194_v47 = vld [vmem:[%s6472_s1 + $0x614] sm:$0xf]  ;;  %v3539_v27 = vor.u32 %v4180_v38, %v3536_v42  ;;  %v3459_v57 = vor.u32 %v4160_v31, %v3456_v11  ;;  %v3960_v38 = vld [vmem:[%s6472_s1 + $0x8f8] sm:$0xf0] }
  0xf0   :  { %2499 = vmatpush.bf16.msrb.mxu0 %v3491_v6  ;;  %v2147_v41 = vadd.f32 %v2146_v32, %v2128_v33  ;;  %v3528_v6 = vld [vmem:[%s6472_s1 + $0x598] sm:$0xf0]  ;;  %v3595_v30 = vor.u32 %v4194_v47, %v3592_v60  ;;  %v4176_v32 = vld [vmem:[%s6472_s1 + $0x584] sm:$0xf]  ;;  %v3520_v33 = vld [vmem:[%s6472_s1 + $0x588] sm:$0xf0] }
  0xf1   :  { %2518 = vmatpush.bf16.msrb.mxu1 %v3555_v19  ;;  %v4268_v47 = vld [vmem:[%s6472_s1 + $0x864] sm:$0xf]  ;;  %v3888_v60 = vld [vmem:[%s6472_s1 + $0x868] sm:$0xf0]  ;;  %v3880_v31 = vld [vmem:[%s6472_s1 + $0x858] sm:$0xf0] }
  0xf2   :  { %2537 = vmatpush.bf16.msrb.mxu2 %v3619_v5  ;;  %v2184_v5 = vpop.f32.mrf.mxu3  ;;  %v4234_v11 = vld [vmem:[%s6472_s1 + $0x754] sm:$0xf] }
  0xf3   :  { %2556 = vmatpush.bf16.msrb.mxu3 %v3683_v20  ;;  %v2165_v3 = vpop.f32.mrf.mxu2 }
  0xf4   :  { %2500 = vmatpush.bf16.msrb.mxu0 %v3483_v56  ;;  %v2166_v19 = vadd.f32 %v2165_v3, %v2147_v41  ;;  %v2130_v20 = vpop.f32.mrf.mxu0  ;;  %v3523_v41 = vor.u32 %v4176_v32, %v3520_v33  ;;  %v4236_v3 = vld [vmem:[%s6472_s1 + $0x764] sm:$0xf] }
  0xf5   :  { %2519 = vmatpush.bf16.msrb.mxu1 %v3547_v8  ;;  %v2131_v26 = vadd.f32 %v2130_v20, %v6062_v48  ;;  %v3531_v48 = vor.u32 %v4178_v7, %v3528_v6  ;;  %v3896_v8 = vld [vmem:[%s6472_s1 + $0x878] sm:$0xf0]  ;;  %v4252_v6 = vld [vmem:[%s6472_s1 + $0x7e4] sm:$0xf]  ;;  %v3952_v20 = vld [vmem:[%s6472_s1 + $0x8e8] sm:$0xf0] }
  0xf6   :  { %2538 = vmatpush.bf16.msrb.mxu2 %v3611_v51  ;;  %v6207_v49 = vadd.f32 %v2184_v5, %v2166_v19  ;;  %v4208_v51 = vld [vmem:[%s6472_s1 + $0x684] sm:$0xf]  ;;  %2452 = vmatmul.bf16.gmra.mxu1 %v4981_v14  ;;  %v3768_v14 = vld [vmem:[%s6472_s1 + $0x778] sm:$0xf0]  ;;  %v3760_v5 = vld [vmem:[%s6472_s1 + $0x768] sm:$0xf0] }
  0xf7   :  { %2557 = vmatpush.bf16.msrb.mxu3 %v3675_v9  ;;  %v2149_v23 = vpop.f32.mrf.mxu1  ;;  %2471 = vmatmul.bf16.gmra.mxu2 %v5236_v39  ;;  %v4254_v9 = vld [vmem:[%s6472_s1 + $0x7f4] sm:$0xf]  ;;  %v3832_v39 = vld [vmem:[%s6472_s1 + $0x7f8] sm:$0xf0]  ;;  %v3651_v42 = vor.u32 %v4208_v51, %v3648_v34  ;;  %v4284_v19 = vld [vmem:[%s6472_s1 + $0x8e4] sm:$0xf] }
  0xf8   :  { %2501 = vmatpush.bf16.msrb.mxu0 %v3475_v43  ;;  %v2150_v56 = vadd.f32 %v2149_v23, %v2131_v26  ;;  %2490 = vmatmul.bf16.gmra.mxu3 %v5238_v40  ;;  %v4286_v40 = vld [vmem:[%s6472_s1 + $0x8f4] sm:$0xf]  ;;  %v3835_v2 = vor.u32 %v4254_v9, %v3832_v39  ;;  %v3763_v26 = vor.u32 %v4236_v3, %v3760_v5  ;;  %v3816_v51 = vld [vmem:[%s6472_s1 + $0x7d8] sm:$0xf0]  ;;  %v3872_v39 = vld [vmem:[%s6472_s1 + $0x848] sm:$0xf0] }
  0xf9   :  { %2520 = vmatpush.bf16.msrb.mxu1 %v3539_v27  ;;  %2433 = vmatmul.bf16.gmra.mxu0 %v4979_v13  ;;  %v4238_v13 = vld [vmem:[%s6472_s1 + $0x774] sm:$0xf]  ;;  %v3963_v7 = vor.u32 %v4286_v40, %v3960_v38  ;;  %v3944_v34 = vld [vmem:[%s6472_s1 + $0x8d8] sm:$0xf0]  ;;  %v3883_v9 = vor.u32 %v4266_v10, %v3880_v31 }
  0xfa   :  { %2539 = vmatpush.bf16.msrb.mxu2 %v3603_v1  ;;  %v2187_v0 = vpop.f32.mrf.mxu3  ;;  %v3899_v1 = vor.u32 %v4270_v35, %v3896_v8  ;;  %v3771_v43 = vor.u32 %v4238_v13, %v3768_v14  ;;  %v3800_v5 = vld [vmem:[%s6472_s1 + $0x7b8] sm:$0xf0] }
  0xfb   :  { %2558 = vmatpush.bf16.msrb.mxu3 %v3667_v61  ;;  %v2168_v44 = vpop.f32.mrf.mxu2 }
  0xfc   :  { %2502 = vmatpush.bf16.msrb.mxu0 %v3467_v16  ;;  %v2169_v27 = vadd.f32 %v2168_v44, %v2150_v56  ;;  %v2132_v61 = vpop.f32.mrf.mxu0  ;;  %v3955_v16 = vor.u32 %v4284_v19, %v3952_v20  ;;  %v4282_v56 = vld [vmem:[%s6472_s1 + $0x8d4] sm:$0xf]  ;;  %v4248_v44 = vld [vmem:[%s6472_s1 + $0x7c4] sm:$0xf] }
  0xfd   :  { %2521 = vmatpush.bf16.msrb.mxu1 %v3531_v48  ;;  %v2133_v12 = vadd.f32 %v2132_v61, %v6095_v50  ;;  %v3891_v50 = vor.u32 %v4268_v47, %v3888_v60  ;;  %v3752_v48 = vld [vmem:[%s6472_s1 + $0x758] sm:$0xf0]  ;;  %v3936_v47 = vld [vmem:[%s6472_s1 + $0x8c8] sm:$0xf0]  ;;  %v4262_v60 = vld [vmem:[%s6472_s1 + $0x834] sm:$0xf] }
  0xfe   :  { %2540 = vmatpush.bf16.msrb.mxu2 %v3595_v30  ;;  %v6274_v23 = vadd.f32 %v2187_v0, %v2169_v27  ;;  %v3827_v30 = vor.u32 %v4252_v6, %v3824_v15  ;;  %v3864_v27 = vld [vmem:[%s6472_s1 + $0x838] sm:$0xf0]  ;;  %v4278_v6 = vld [vmem:[%s6472_s1 + $0x8b4] sm:$0xf] }
  0xff   :  { %2559 = vmatpush.bf16.msrb.mxu3 %v3659_v53  ;;  %v2151_v4 = vpop.f32.mrf.mxu1  ;;  %v4250_v53 = vld [vmem:[%s6472_s1 + $0x7d4] sm:$0xf] }
 0x100   :  { %2503 = vmatpush.bf16.msrb.mxu0 %v3459_v57  ;;  %v2152_v24 = vadd.f32 %v2151_v4, %v2133_v12  ;;  %v4264_v57 = vld [vmem:[%s6472_s1 + $0x844] sm:$0xf]  ;;  %v3819_v38 = vor.u32 %v4250_v53, %v3816_v51  ;;  %v3928_v12 = vld [vmem:[%s6472_s1 + $0x8b8] sm:$0xf0] }
 0x101   :  { %2522 = vmatpush.bf16.msrb.mxu1 %v3523_v41  ;;  %v3947_v41 = vor.u32 %v4282_v56, %v3944_v34  ;;  %v4244_v53 = vld [vmem:[%s6472_s1 + $0x7a4] sm:$0xf]  ;;  %v3920_v56 = vld [vmem:[%s6472_s1 + $0x8a8] sm:$0xf0] }
 0x102   :  { %2541 = vmatpush.bf16.msrb.mxu2 %v3587_v21  ;;  %v2189_v33 = vpop.f32.mrf.mxu3  ;;  %v3755_v21 = vor.u32 %v4234_v11, %v3752_v48  ;;  %v3931_v11 = vor.u32 %v4278_v6, %v3928_v12  ;;  %v3728_v48 = vld [vmem:[%s6472_s1 + $0x728] sm:$0xf0]  ;;  %v4276_v51 = vld [vmem:[%s6472_s1 + $0x8a4] sm:$0xf] }
 0x103   :  { %2560 = vmatpush.bf16.msrb.mxu3 %v3651_v42  ;;  %v2170_v32 = vpop.f32.mrf.mxu2  ;;  %v4232_v42 = vld [vmem:[%s6472_s1 + $0x744] sm:$0xf]  ;;  %v3904_v6 = vld [vmem:[%s6472_s1 + $0x888] sm:$0xf0] }
 0x104   :  { %2572 = vmatpush.bf16.msra.mxu0 %v3771_v43  ;;  %v2171_v35 = vadd.f32 %v2170_v32, %v2152_v24  ;;  %v2201_v8 = vpop.f32.mrf.mxu0  ;;  %v4280_v43 = vld [vmem:[%s6472_s1 + $0x8c4] sm:$0xf] }
 0x105   :  { %2591 = vmatpush.bf16.msra.mxu1 %v3835_v2  ;;  %v2202_v14 = vadd.f32 %v2201_v8, %v6150_v54  ;;  %v3744_v54 = vld [vmem:[%s6472_s1 + $0x748] sm:$0xf0]  ;;  %v3939_v4 = vor.u32 %v4280_v43, %v3936_v47  ;;  %v4246_v2 = vld [vmem:[%s6472_s1 + $0x7b4] sm:$0xf] }
 0x106   :  { %2610 = vmatpush.bf16.msra.mxu2 %v3899_v1  ;;  %v6307_v40 = vadd.f32 %v2189_v33, %v2171_v35  ;;  %2523 = vmatmul.bf16.vlgmr.msrb.gmra.mxu1 %v5119_v29  ;;  %v3808_v1 = vld [vmem:[%s6472_s1 + $0x7c8] sm:$0xf0]  ;;  %v3747_v29 = vor.u32 %v4232_v42, %v3744_v54  ;;  %v3803_v31 = vor.u32 %v4246_v2, %v3800_v5  ;;  %v4258_v8 = vld [vmem:[%s6472_s1 + $0x814] sm:$0xf]  ;;  %v3784_v42 = vld [vmem:[%s6472_s1 + $0x798] sm:$0xf0] }
 0x107   :  { %2629 = vmatpush.bf16.msra.mxu3 %v3963_v7  ;;  %v2220_v13 = vpop.f32.mrf.mxu1  ;;  %2542 = vmatmul.bf16.vlgmr.msrb.gmra.mxu2 %v5380_v17  ;;  %v3811_v61 = vor.u32 %v4248_v44, %v3808_v1  ;;  %v4230_v17 = vld [vmem:[%s6472_s1 + $0x734] sm:$0xf]  ;;  %v3792_v33 = vld [vmem:[%s6472_s1 + $0x7a8] sm:$0xf0]  ;;  %v3912_v44 = vld [vmem:[%s6472_s1 + $0x898] sm:$0xf0] }
 0x108   :  { %2573 = vmatpush.bf16.msra.mxu0 %v3763_v26  ;;  %v2221_v0 = vadd.f32 %v2220_v13, %v2202_v14  ;;  %2561 = vmatmul.bf16.vlgmr.msrb.gmra.mxu3 %v5382_v18  ;;  %v3736_v18 = vld [vmem:[%s6472_s1 + $0x738] sm:$0xf0]  ;;  %v3795_v14 = vor.u32 %v4244_v53, %v3792_v33  ;;  %v4274_v54 = vld [vmem:[%s6472_s1 + $0x894] sm:$0xf]  ;;  %v4240_v2 = vld [vmem:[%s6472_s1 + $0x784] sm:$0xf] }
 0x109   :  { %2592 = vmatpush.bf16.msra.mxu1 %v3827_v30  ;;  %2504 = vmatmul.bf16.vlgmr.msrb.gmra.mxu0 %v5117_v28  ;;  %v3875_v28 = vor.u32 %v4264_v57, %v3872_v39  ;;  %v3739_v26 = vor.u32 %v4230_v17, %v3736_v18  ;;  %v4260_v30 = vld [vmem:[%s6472_s1 + $0x824] sm:$0xf]  ;;  %v3848_v13 = vld [vmem:[%s6472_s1 + $0x818] sm:$0xf0]  ;;  %v4242_v39 = vld [vmem:[%s6472_s1 + $0x794] sm:$0xf]  ;;  %v3915_v17 = vor.u32 %v4274_v54, %v3912_v44 }
 0x10a   :  { %2611 = vmatpush.bf16.msra.mxu2 %v3891_v50  ;;  %v2258_v3 = vpop.f32.mrf.mxu3  ;;  %v3867_v50 = vor.u32 %v4262_v60, %v3864_v27  ;;  %v3720_v57 = vld [vmem:[%s6472_s1 + $0x718] sm:$0xf0]  ;;  %v4256_v60 = vld [vmem:[%s6472_s1 + $0x804] sm:$0xf]  ;;  %v3840_v27 = vld [vmem:[%s6472_s1 + $0x808] sm:$0xf0] }
 0x10b   :  { %2630 = vmatpush.bf16.msra.mxu3 %v3955_v16  ;;  %v2239_v7 = vpop.f32.mrf.mxu2  ;;  %v3856_v16 = vld [vmem:[%s6472_s1 + $0x828] sm:$0xf0]  ;;  %v4272_v5 = vld [vmem:[%s6472_s1 + $0x884] sm:$0xf] }
 0x10c   :  { %2574 = vmatpush.bf16.msra.mxu0 %v3755_v21  ;;  %v2240_v15 = vadd.f32 %v2239_v7, %v2221_v0  ;;  %v2203_v19 = vpop.f32.mrf.mxu0  ;;  %v3859_v34 = vor.u32 %v4260_v30, %v3856_v16  ;;  %v4226_v21 = vld [vmem:[%s6472_s1 + $0x714] sm:$0xf]  ;;  %v3712_v18 = vld [vmem:[%s6472_s1 + $0x708] sm:$0xf0] }
 0x10d   :  { %2593 = vmatpush.bf16.msra.mxu1 %v3819_v38  ;;  %v2204_v24 = vadd.f32 %v2203_v19, %v6207_v49  ;;  %v4228_v49 = vld [vmem:[%s6472_s1 + $0x724] sm:$0xf] }
 0x10e   :  { %2612 = vmatpush.bf16.msra.mxu2 %v3883_v9  ;;  %v6362_v10 = vadd.f32 %v2258_v3, %v2240_v15  ;;  %v3731_v35 = vor.u32 %v4228_v49, %v3728_v48  ;;  %v3923_v9 = vor.u32 %v4276_v51, %v3920_v56  ;;  %v3776_v3 = vld [vmem:[%s6472_s1 + $0x788] sm:$0xf0]  ;;  %v3907_v15 = vor.u32 %v4272_v5, %v3904_v6 }
 0x10f   :  { %2631 = vmatpush.bf16.msra.mxu3 %v3947_v41  ;;  %v2222_v20 = vpop.f32.mrf.mxu1  ;;  %v3779_v12 = vor.u32 %v4240_v2, %v3776_v3 }
 0x110   :  { %2575 = vmatpush.bf16.msra.mxu0 %v3747_v29  ;;  %v2223_v32 = vadd.f32 %v2222_v20, %v2204_v24  ;;  %v3723_v29 = vor.u32 %v4226_v21, %v3720_v57 }
 0x111   :  { %2594 = vmatpush.bf16.msra.mxu1 %v3811_v61 }
 0x112   :  { %2613 = vmatpush.bf16.msra.mxu2 %v3875_v28  ;;  %v2260_v41 = vpop.f32.mrf.mxu3  ;;  %v3851_v28 = vor.u32 %v4258_v8, %v3848_v13 }
 0x113   :  { %2632 = vmatpush.bf16.msra.mxu3 %v3939_v4  ;;  %v2241_v38 = vpop.f32.mrf.mxu2  ;;  %v3787_v4 = vor.u32 %v4242_v39, %v3784_v42 }
 0x114   :  { %2576 = vmatpush.bf16.msra.mxu0 %v3739_v26  ;;  %v2242_v0 = vadd.f32 %v2241_v38, %v2223_v32  ;;  %v2206_v1 = vpop.f32.mrf.mxu0 }
 0x115   :  { %2595 = vmatpush.bf16.msra.mxu1 %v3803_v31  ;;  %v2207_v47 = vadd.f32 %v2206_v1, %v6274_v23  ;;  %v4224_v23 = vld [vmem:[%s6472_s1 + $0x704] sm:$0xf] }
 0x116   :  { %2614 = vmatpush.bf16.msra.mxu2 %v3867_v50  ;;  %v2261_v61 = vadd.f32 %v2260_v41, %v2242_v0  ;;  %2528 = vmatmul.bf16.gmra.mxu1 %v5251_v46  ;;  %v3715_v46 = vor.u32 %v4224_v23, %v3712_v18 }
 0x117   :  { %2633 = vmatpush.bf16.msra.mxu3 %v3931_v11  ;;  %v2225_v43 = vpop.f32.mrf.mxu1  ;;  %2547 = vmatmul.bf16.gmra.mxu2 %v5512_v55 }
 0x118   :  { %2577 = vmatpush.bf16.msra.mxu0 %v3731_v35  ;;  %v2226_v7 = vadd.f32 %v2225_v43, %v2207_v47  ;;  %2566 = vmatmul.bf16.gmra.mxu3 %v5514_v58 }
 0x119   :  { %2596 = vmatpush.bf16.msra.mxu1 %v3795_v14  ;;  %2509 = vmatmul.bf16.gmra.mxu0 %v5249_v45  ;;  %v3843_v45 = vor.u32 %v4256_v60, %v3840_v27 }
 0x11a   :  { %2615 = vmatpush.bf16.msra.mxu2 %v3859_v34  ;;  %v2263_v20 = vpop.f32.mrf.mxu3 }
 0x11b   :  { %2634 = vmatpush.bf16.msra.mxu3 %v3923_v9  ;;  %v2244_v19 = vpop.f32.mrf.mxu2 }
 0x11c   :  { %2578 = vmatpush.bf16.msra.mxu0 %v3723_v29  ;;  %v2245_v24 = vadd.f32 %v2244_v19, %v2226_v7  ;;  %v2208_v50 = vpop.f32.mrf.mxu0 }
 0x11d   :  { %2597 = vmatpush.bf16.msra.mxu1 %v3787_v4  ;;  %v2209_v30 = vadd.f32 %v2208_v50, %v6307_v40  ;;  %v4288_v40 = vld [vmem:[%s6474_s2] sm:$0x3] }
 0x11e   :  { %2616 = vmatpush.bf16.msra.mxu2 %v3851_v28  ;;  %v2264_v55 = vadd.f32 %v2263_v20, %v2245_v24  ;;  %v341_v51 = vperm.slane %v4288_v40, 1 }
 0x11f   :  { %2635 = vmatpush.bf16.msra.mxu3 %v3915_v17  ;;  %v2227_v26 = vpop.f32.mrf.mxu1 }
 0x120   :  { %2579 = vmatpush.bf16.msra.mxu0 %v3715_v46  ;;  %v2228_v58 = vadd.f32 %v2227_v26, %v2209_v30 }
 0x121   :  { %2598 = vmatpush.bf16.msra.mxu1 %v3779_v12 }
 0x122   :  { %2617 = vmatpush.bf16.msra.mxu2 %v3843_v45  ;;  %v2265_v31 = vpop.f32.mrf.mxu3 }
 0x123   :  { %2636 = vmatpush.bf16.msra.mxu3 %v3907_v15  ;;  %v2246_v16 = vpop.f32.mrf.mxu2 }
 0x124   :  { %v2247_v11 = vadd.f32 %v2246_v16, %v2228_v58  ;;  %v2277_v49 = vpop.f32.mrf.mxu0 }
 0x125   :  { %v2278_v53 = vadd.f32 %v2277_v49, %v6362_v10 }
 0x126   :  { %v2266_v32 = vadd.f32 %v2265_v31, %v2247_v11  ;;  %2599 = vmatmul.bf16.vlgmr.msra.gmra.mxu1 %v5395_v25 }
 0x127   :  { %v2296_v48 = vpop.f32.mrf.mxu1  ;;  %2618 = vmatmul.bf16.vlgmr.msra.gmra.mxu2 %v5637_v36 }
 0x128   :  { %v6437_v33 = vadd.f32 %v2296_v48, %v2278_v53  ;;  %2637 = vmatmul.bf16.vlgmr.msra.gmra.mxu3 %v5639_v37 }
 0x129   :  { %2580 = vmatmul.bf16.vlgmr.msra.gmra.mxu0 %v5393_v22 }
 0x12a   :  { %v2334_v34 = vpop.f32.mrf.mxu3 }
 0x12b   :  { %v2315_v56 = vpop.f32.mrf.mxu2 }
 0x12c   :  { %v2316_v35 = vadd.f32 %v2315_v56, %v341_v51  ;;  %v2279_v10 = vpop.f32.mrf.mxu0 }
 0x12d   :  { %v2280_v13 = vadd.f32 %v2279_v10, %v2261_v61 }
 0x12e   :  { %v2335_v14 = vadd.f32 %v2334_v34, %v2316_v35 }
 0x12f   :  { %v2298_v8 = vpop.f32.mrf.mxu1 }
 0x130   :  { %v6446_v9 = vadd.f32 %v2298_v8, %v2280_v13 }
 0x132   :  { %v2336_v25 = vpop.f32.mrf.mxu3 }
 0x133   :  { %v2317_v22 = vpop.f32.mrf.mxu2 }
 0x134   :  { %v2318_v21 = vadd.f32 %v2317_v22, %v341_v51 }
 0x136   :  { %v2282_v36 = vpop.f32.mrf.mxu0  ;;  %v2337_v39 = vadd.f32 %v2336_v25, %v2318_v21  ;;  %2604 = vmatmul.bf16.gmra.mxu1 %v5527_v63 }
 0x137   :  { %v2301_v57 = vpop.f32.mrf.mxu1  ;;  %v2283_v37 = vadd.f32 %v2282_v36, %v2264_v55  ;;  %2623 = vmatmul.bf16.gmra.mxu2 %v5757_v52 }
 0x138   :  { %2642 = vmatmul.bf16.gmra.mxu3 %v5759_v59 }
 0x139   :  { %v6448_v38 = vadd.f32 %v2301_v57, %v2283_v37  ;;  %2585 = vmatmul.bf16.gmra.mxu0 %v5525_v62 }
 0x13b   :  { %v2320_v41 = vpop.f32.mrf.mxu2  ;;  %v2339_v42 = vpop.f32.mrf.mxu3 }
 0x13c   :  { %v2321_v54 = vadd.f32 %v2320_v41, %v341_v51 }
 0x13e   :  { %v2284_v44 = vpop.f32.mrf.mxu0  ;;  %v2340_v43 = vadd.f32 %v2339_v42, %v2321_v54 }
 0x13f   :  { %v2303_v0 = vpop.f32.mrf.mxu1  ;;  %v2285_v1 = vadd.f32 %v2284_v44, %v2266_v32 }
 0x141   :  { %v6454_v47 = vadd.f32 %v2303_v0, %v2285_v1 }
 0x143   :  { %v2322_v28 = vpop.f32.mrf.mxu2  ;;  %v2341_v29 = vpop.f32.mrf.mxu3 }
 0x144   :  { %v2323_v60 = vadd.f32 %v2322_v28, %v341_v51 }
 0x146   :  { %v2353_v27 = vpop.f32.mrf.mxu0  ;;  %v2342_v63 = vadd.f32 %v2341_v29, %v2323_v60 }
 0x147   :  { %v2372_v62 = vpop.f32.mrf.mxu1  ;;  %v2354_v61 = vadd.f32 %v2353_v27, %v2335_v14 }
 0x149   :  { %v2373_v4 = vadd.f32 %v2372_v62, %v2354_v61 }
 0x14b   :  { %v2391_v52 = vpop.f32.mrf.mxu2  ;;  %v2410_v17 = vpop.f32.mrf.mxu3 }
 0x14c   :  { %v2392_v59 = vadd.f32 %v2391_v52, %v2373_v4 }
 0x14e   :  { %v2355_v23 = vpop.f32.mrf.mxu0  ;;  %v2411_v7 = vadd.f32 %v2410_v17, %v2392_v59 }
 0x14f   :  { %v2374_v18 = vpop.f32.mrf.mxu1  ;;  %v2356_v2 = vadd.f32 %v2355_v23, %v2337_v39 }
 0x151   :  { %v2375_v3 = vadd.f32 %v2374_v18, %v2356_v2 }
 0x153   :  { %v2393_v5 = vpop.f32.mrf.mxu2  ;;  %v2412_v6 = vpop.f32.mrf.mxu3 }
 0x154   :  { %v2394_v45 = vadd.f32 %v2393_v5, %v2375_v3 }
 0x156   :  { %v2358_v46 = vpop.f32.mrf.mxu0  ;;  %v2413_v19 = vadd.f32 %v2412_v6, %v2394_v45 }
 0x157   :  { %v2377_v12 = vpop.f32.mrf.mxu1  ;;  %v2359_v15 = vadd.f32 %v2358_v46, %v2340_v43 }
 0x159   :  { %v2378_v20 = vadd.f32 %v2377_v12, %v2359_v15 }
 0x15b   :  { %v2396_v24 = vpop.f32.mrf.mxu2  ;;  %v2415_v50 = vpop.f32.mrf.mxu3 }
 0x15c   :  { %v2397_v26 = vadd.f32 %v2396_v24, %v2378_v20 }
 0x15e   :  { %v2360_v30 = vpop.f32.mrf.mxu0  ;;  %v2416_v16 = vadd.f32 %v2415_v50, %v2397_v26 }
 0x15f   :  { %v2379_v55 = vpop.f32.mrf.mxu1  ;;  %v2361_v58 = vadd.f32 %v2360_v30, %v2342_v63 }
 0x161   :  { %v2380_v31 = vadd.f32 %v2379_v55, %v2361_v58 }
 0x163   :  { %v2398_v11 = vpop.f32.mrf.mxu2  ;;  %v2417_v49 = vpop.f32.mrf.mxu3 }
 0x164   :  { %v2399_v48 = vadd.f32 %v2398_v11, %v2380_v31 }
 0x166   :  { %v2429_v53 = vpop.f32.mrf.mxu0  ;;  %v2418_v40 = vadd.f32 %v2417_v49, %v2399_v48 }
 0x167   :  { %v2448_v32 = vpop.f32.mrf.mxu1  ;;  %v2430_v1 = vadd.f32 %v2429_v53, %v2411_v7 }
 0x169   :  { %v2449_v43 = vadd.f32 %v2448_v32, %v2430_v1 }
 0x16b   :  { %v2467_v51 = vpop.f32.mrf.mxu2  ;;  %v2486_v56 = vpop.f32.mrf.mxu3 }
 0x16c   :  { %v2468_v60 = vadd.f32 %v2467_v51, %v2449_v43 }
 0x16e   :  { %v2431_v34 = vpop.f32.mrf.mxu0  ;;  %v2487_v63 = vadd.f32 %v2486_v56, %v2468_v60 }
 0x16f   :  { %v2450_v35 = vpop.f32.mrf.mxu1  ;;  %v2432_v61 = vadd.f32 %v2431_v34, %v2413_v19 }
 0x171   :  { %v2451_v4 = vadd.f32 %v2450_v35, %v2432_v61 }
 0x173   :  { %v2469_v10 = vpop.f32.mrf.mxu2  ;;  %v2488_v8 = vpop.f32.mrf.mxu3 }
 0x174   :  { %v2470_v23 = vadd.f32 %v2469_v10, %v2451_v4 }
 0x176   :  { %v2434_v13 = vpop.f32.mrf.mxu0  ;;  %v2489_v6 = vadd.f32 %v2488_v8, %v2470_v23  ;;  %v2652_v23 = vmax.f32 %v6448_v38, 0.0 }
 0x177   :  { %v2453_v14 = vpop.f32.mrf.mxu1  ;;  %v2435_v3 = vadd.f32 %v2434_v13, %v2416_v16 }
 0x179   :  { %v2454_v7 = vadd.f32 %v2453_v14, %v2435_v3  ;;  %v2648_v14 = vmax.f32 %v6437_v33, 0.0  ;;  %v2650_v33 = vmax.f32 %v6446_v9, 0.0 }
 0x17b   :  { %v2472_v22 = vpop.f32.mrf.mxu2  ;;  %v2491_v25 = vpop.f32.mrf.mxu3 }
 0x17c   :  { %v2473_v20 = vadd.f32 %v2472_v22, %v2454_v7 }
 0x17e   :  { %v2436_v21 = vpop.f32.mrf.mxu0  ;;  %v2492_v58 = vadd.f32 %v2491_v25, %v2473_v20 }
 0x17f   :  { %v2455_v36 = vpop.f32.mrf.mxu1  ;;  %v2437_v26 = vadd.f32 %v2436_v21, %v2418_v40 }
 0x181   :  { %v2456_v11 = vadd.f32 %v2455_v36, %v2437_v26 }
 0x183   :  { %v2474_v57 = vpop.f32.mrf.mxu2  ;;  %v2493_v37 = vpop.f32.mrf.mxu3 }
 0x184   :  { %v2475_v32 = vadd.f32 %v2474_v57, %v2456_v11 }
 0x186   :  { %v2505_v39 = vpop.f32.mrf.mxu0  ;;  %v2494_v40 = vadd.f32 %v2493_v37, %v2475_v32 }
 0x187   :  { %v2524_v41 = vpop.f32.mrf.mxu1  ;;  %v2506_v52 = vadd.f32 %v2505_v39, %v2487_v63 }
 0x189   :  { %v2525_v5 = vadd.f32 %v2524_v41, %v2506_v52 }
 0x18b   :  { %v2543_v42 = vpop.f32.mrf.mxu2  ;;  %v2562_v54 = vpop.f32.mrf.mxu3 }
 0x18c   :  { %v2544_v45 = vadd.f32 %v2543_v42, %v2525_v5 }
 0x18e   :  { %v2507_v44 = vpop.f32.mrf.mxu0  ;;  %v2563_v24 = vadd.f32 %v2562_v54, %v2544_v45 }
 0x18f   :  { %v2526_v0 = vpop.f32.mrf.mxu1  ;;  %v2508_v46 = vadd.f32 %v2507_v44, %v2489_v6 }
 0x191   :  { %v2527_v30 = vadd.f32 %v2526_v0, %v2508_v46  ;;  %v2654_v46 = vmax.f32 %v6454_v47, 0.0 }
 0x193   :  { %v2545_v28 = vpop.f32.mrf.mxu2  ;;  %v2564_v29 = vpop.f32.mrf.mxu3 }
 0x194   :  { %v2546_v31 = vadd.f32 %v2545_v28, %v2527_v30 }
 0x196   :  { %v2510_v27 = vpop.f32.mrf.mxu0  ;;  %v2565_v51 = vadd.f32 %v2564_v29, %v2546_v31 }
 0x197   :  { %v2529_v62 = vpop.f32.mrf.mxu1  ;;  %v2511_v49 = vadd.f32 %v2510_v27, %v2492_v58 }
 0x199   :  { %v2530_v10 = vadd.f32 %v2529_v62, %v2511_v49 }
 0x19b   :  { %v2548_v17 = vpop.f32.mrf.mxu2  ;;  %v2567_v59 = vpop.f32.mrf.mxu3 }
 0x19c   :  { %v2549_v22 = vadd.f32 %v2548_v17, %v2530_v10 }
 0x19e   :  { %v2512_v18 = vpop.f32.mrf.mxu0  ;;  %v2568_v54 = vadd.f32 %v2567_v59, %v2549_v22 }
 0x19f   :  { %v2531_v2 = vpop.f32.mrf.mxu1  ;;  %v2513_v25 = vadd.f32 %v2512_v18, %v2494_v40 }
 0x1a1   :  { %v2532_v0 = vadd.f32 %v2531_v2, %v2513_v25 }
 0x1a3   :  { %v2550_v12 = vpop.f32.mrf.mxu2  ;;  %v2569_v15 = vpop.f32.mrf.mxu3 }
 0x1a4   :  { %v2551_v37 = vadd.f32 %v2550_v12, %v2532_v0 }
 0x1a6   :  { %v2581_v50 = vpop.f32.mrf.mxu0  ;;  %v2570_v63 = vadd.f32 %v2569_v15, %v2551_v37 }
 0x1a7   :  { %v2600_v19 = vpop.f32.mrf.mxu1  ;;  %v2582_v55 = vadd.f32 %v2581_v50, %v2563_v24 }
 0x1a9   :  { %v2601_v48 = vadd.f32 %v2600_v19, %v2582_v55 }
 0x1ab   :  { %v2619_v16 = vpop.f32.mrf.mxu2  ;;  %v2638_v53 = vpop.f32.mrf.mxu3 }
 0x1ac   :  { %v2620_v56 = vadd.f32 %v2619_v16, %v2601_v48 }
 0x1ae   :  { %v2583_v34 = vpop.f32.mrf.mxu0  ;;  %v2639_v8 = vadd.f32 %v2638_v53, %v2620_v56 }
 0x1af   :  { %v2602_v35 = vpop.f32.mrf.mxu1  ;;  %v2584_v13 = vadd.f32 %v2583_v34, %v2565_v51 }
 0x1b0   :  { %v2649_v21 = vmax.f32 %v2639_v8, 0.0 }
 0x1b1   :  { %v2603_v36 = vadd.f32 %v2602_v35, %v2584_v13 }
 0x1b2   :  { %v2656_v39 = vpack.c.bf16 %v2649_v21, %v2648_v14 }
 0x1b3   :  { %v2621_v41 = vpop.f32.mrf.mxu2  ;;  %v2640_v42 = vpop.f32.mrf.mxu3 }
 0x1b4   :  { %2660 = vst [vmem:[%s6475_s3] sm:$0xff] %v2656_v39  ;;  %v2622_v57 = vadd.f32 %v2621_v41, %v2603_v36 }
 0x1b6   :  { %v2586_v44 = vpop.f32.mrf.mxu0  ;;  %v2641_v1 = vadd.f32 %v2640_v42, %v2622_v57 }
 0x1b7   :  { %v2587_v43 = vadd.f32 %v2586_v44, %v2568_v54  ;;  %v2605_v28 = vpop.f32.mrf.mxu1 }
 0x1b8   :  { %v2651_v29 = vmax.f32 %v2641_v1, 0.0 }
 0x1b9   :  { %v2606_v27 = vadd.f32 %v2605_v28, %v2587_v43 }
 0x1ba   :  { %v2657_v60 = vpack.c.bf16 %v2651_v29, %v2650_v33 }
 0x1bb   :  { %v2624_v62 = vpop.f32.mrf.mxu2  ;;  %v2643_v61 = vpop.f32.mrf.mxu3 }
 0x1bc   :  { %2661 = vst [vmem:[%s6475_s3 + $0x8] sm:$0xff] %v2657_v60  ;;  %v2625_v4 = vadd.f32 %v2624_v62, %v2606_v27 }
 0x1be   :  { %v2588_v52 = vpop.f32.mrf.mxu0  ;;  %v2644_v17 = vadd.f32 %v2643_v61, %v2625_v4 }
 0x1bf   :  { %v2589_v59 = vadd.f32 %v2588_v52, %v2570_v63  ;;  %v2607_v2 = vpop.f32.mrf.mxu1 }
 0x1c0   :  { %v2653_v18 = vmax.f32 %v2644_v17, 0.0 }
 0x1c1   :  { %v2608_v3 = vadd.f32 %v2607_v2, %v2589_v59 }
 0x1c2   :  { %v2658_v9 = vpack.c.bf16 %v2653_v18, %v2652_v23 }
 0x1c3   :  { %v2626_v5 = vpop.f32.mrf.mxu2  ;;  %v2645_v45 = vpop.f32.mrf.mxu3 }
 0x1c4   :  { %2662 = vst [vmem:[%s6475_s3 + $0x10] sm:$0xff] %v2658_v9  ;;  %v2627_v6 = vadd.f32 %v2626_v5, %v2608_v3 }
 0x1c6   :  { %v2646_v7 = vadd.f32 %v2645_v45, %v2627_v6 }
 0x1c8   :  { %v2655_v12 = vmax.f32 %v2646_v7, 0.0 }
 0x1ca   :  { %v2659_v15 = vpack.c.bf16 %v2655_v12, %v2654_v46 }
 0x1cc   :  { %2663 = vst [vmem:[%s6475_s3 + $0x18] sm:$0xff] %v2659_v15 }

// kernel: encoder_stn_forward.9
= control target key start
LH: loop header
LB: loop body
LE: loop exit
PB: predicated region body
PF: predicated region fallthrough
CT: control target
= control target key end

     0   :  { %s6462_s1 = inlined_call_operand.vmem [shape: bf16[4096,128], index: 1, kind: input, shape index: {}]   ;;  %s6463_s0 = inlined_call_operand.vmem [shape: bf16[16,4096], index: 0, kind: input, shape index: {}]   ;;  %s6464_s2 = inlined_call_operand.vmem [shape: f32[1,128], index: 2, kind: input, shape index: {}]   ;;  %s6465_s3 = inlined_call_operand.vmem [shape: bf16[128,256], index: 3, kind: input, shape index: {}]   ;;  %s6466_s5 = inlined_call_operand.vmem [shape: bf16[256,256], index: 5, kind: input, shape index: {}]   ;;  %s6467_s10 = inlined_call_operand.vmem [shape: f32[16,128], index: 10, kind: output, shape index: {1}]   ;;  %s6468_s7 = inlined_call_operand.vmem [shape: bf16[256,128], index: 7, kind: input, shape index: {}]   ;;  %s6469_s4 = inlined_call_operand.vmem [shape: f32[1,256], index: 4, kind: input, shape index: {}]   ;;  %s6470_s6 = inlined_call_operand.vmem [shape: f32[1,256], index: 6, kind: input, shape index: {}]   ;;  %s6471_s8 = inlined_call_operand.vmem [shape: f32[1,128], index: 8, kind: input, shape index: {}]   ;;  %s6472_s9 = inlined_call_operand.vmem [shape: f32[16,128], index: 9, kind: output, shape index: {0}]  }
   0x1   :  { %v4764_v0 = vld [vmem:[%s6462_s1 + $0x38] sm:$0xff]  ;;  %v4763_v4 = vld [vmem:[%s6462_s1 + $0x30] sm:$0xff]  ;;  %v4762_v8 = vld [vmem:[%s6462_s1 + $0x28] sm:$0xff] }
   0x2   :  { %v4772_v1 = vld [vmem:[%s6462_s1 + $0x78] sm:$0xff]  ;;  %2278 = vmatpush.bf16.msra.mxu0 %v4764_v0  ;;  %v4771_v5 = vld [vmem:[%s6462_s1 + $0x70] sm:$0xff]  ;;  %v4770_v9 = vld [vmem:[%s6462_s1 + $0x68] sm:$0xff] }
   0x3   :  { %v4780_v2 = vld [vmem:[%s6462_s1 + $0xb8] sm:$0xff]  ;;  %2292 = vmatpush.bf16.msra.mxu1 %v4772_v1  ;;  %v4779_v6 = vld [vmem:[%s6462_s1 + $0xb0] sm:$0xff]  ;;  %v4778_v10 = vld [vmem:[%s6462_s1 + $0xa8] sm:$0xff] }
   0x4   :  { %v4788_v3 = vld [vmem:[%s6462_s1 + $0xf8] sm:$0xff]  ;;  %2306 = vmatpush.bf16.msra.mxu2 %v4780_v2  ;;  %v4787_v7 = vld [vmem:[%s6462_s1 + $0xf0] sm:$0xff]  ;;  %v4786_v11 = vld [vmem:[%s6462_s1 + $0xe8] sm:$0xff] }
   0x5   :  { %2320 = vmatpush.bf16.msra.mxu3 %v4788_v3  ;;  %v4761_v12 = vld [vmem:[%s6462_s1 + $0x20] sm:$0xff]  ;;  %v4760_v16 = vld [vmem:[%s6462_s1 + $0x18] sm:$0xff]  ;;  %v4759_v20 = vld [vmem:[%s6462_s1 + $0x10] sm:$0xff] }
   0x6   :  { %2279 = vmatpush.bf16.msra.mxu0 %v4763_v4  ;;  %v4769_v13 = vld [vmem:[%s6462_s1 + $0x60] sm:$0xff]  ;;  %v4768_v17 = vld [vmem:[%s6462_s1 + $0x58] sm:$0xff]  ;;  %v4767_v21 = vld [vmem:[%s6462_s1 + $0x50] sm:$0xff] }
   0x7   :  { %2293 = vmatpush.bf16.msra.mxu1 %v4771_v5  ;;  %v4777_v14 = vld [vmem:[%s6462_s1 + $0xa0] sm:$0xff]  ;;  %v4776_v18 = vld [vmem:[%s6462_s1 + $0x98] sm:$0xff]  ;;  %v4775_v22 = vld [vmem:[%s6462_s1 + $0x90] sm:$0xff] }
   0x8   :  { %2307 = vmatpush.bf16.msra.mxu2 %v4779_v6  ;;  %v4785_v15 = vld [vmem:[%s6462_s1 + $0xe0] sm:$0xff]  ;;  %v4784_v19 = vld [vmem:[%s6462_s1 + $0xd8] sm:$0xff]  ;;  %v4783_v23 = vld [vmem:[%s6462_s1 + $0xd0] sm:$0xff] }
   0x9   :  { %2321 = vmatpush.bf16.msra.mxu3 %v4787_v7  ;;  %v4758_v24 = vld [vmem:[%s6462_s1 + $0x8] sm:$0xff]  ;;  %v4757_v28 = vld [vmem:[%s6462_s1] sm:$0xff]  ;;  %v4796_v32 = vld [vmem:[%s6462_s1 + $0x138] sm:$0xff] }
   0xa   :  { %2280 = vmatpush.bf16.msra.mxu0 %v4762_v8  ;;  %v4766_v25 = vld [vmem:[%s6462_s1 + $0x48] sm:$0xff]  ;;  %v4765_v29 = vld [vmem:[%s6462_s1 + $0x40] sm:$0xff]  ;;  %v4804_v33 = vld [vmem:[%s6462_s1 + $0x178] sm:$0xff] }
   0xb   :  { %2294 = vmatpush.bf16.msra.mxu1 %v4770_v9  ;;  %v4774_v26 = vld [vmem:[%s6462_s1 + $0x88] sm:$0xff]  ;;  %v4773_v30 = vld [vmem:[%s6462_s1 + $0x80] sm:$0xff]  ;;  %v4812_v42 = vld [vmem:[%s6462_s1 + $0x1b8] sm:$0xff] }
   0xc   :  { %2308 = vmatpush.bf16.msra.mxu2 %v4778_v10  ;;  %v4782_v27 = vld [vmem:[%s6462_s1 + $0xc8] sm:$0xff]  ;;  %v4781_v31 = vld [vmem:[%s6462_s1 + $0xc0] sm:$0xff]  ;;  %v4820_v43 = vld [vmem:[%s6462_s1 + $0x1f8] sm:$0xff] }
   0xd   :  { %2322 = vmatpush.bf16.msra.mxu3 %v4786_v11  ;;  %v3319_v34 = vld [vmem:[%s6463_s0] sm:$0xf]  ;;  %v3327_v36 = vld [vmem:[%s6463_s0 + $0x8] sm:$0xf]  ;;  %v4725_v38 = vld [vmem:[%s6463_s0 + $0x4] sm:$0xf] }
   0xe   :  { %2281 = vmatpush.bf16.msra.mxu0 %v4761_v12  ;;  %v4741_v35 = vld [vmem:[%s6463_s0 + $0x7c] sm:$0xf0]  ;;  %v4742_v37 = vld [vmem:[%s6463_s0 + $0x84] sm:$0xf0]  ;;  %v3321_v39 = vld [vmem:[%s6463_s0 + $0x80] sm:$0xf0] }
   0xf   :  { %2295 = vmatpush.bf16.msra.mxu1 %v4769_v13  ;;  %v4726_v40 = vld [vmem:[%s6463_s0 + $0xc] sm:$0xf]  ;;  %v3320_v44 = vor.u32 %v4741_v35, %v3319_v34  ;;  %v3328_v45 = vor.u32 %v4742_v37, %v3327_v36  ;;  %v3324_v46 = vor.u32 %v4725_v38, %v3321_v39  ;;  %v4795_v48 = vld [vmem:[%s6462_s1 + $0x130] sm:$0xff]  ;;  %v4793_v56 = vld [vmem:[%s6462_s1 + $0x120] sm:$0xff] }
  0x10   :  { %2309 = vmatpush.bf16.msra.mxu2 %v4777_v14  ;;  %v3329_v41 = vld [vmem:[%s6463_s0 + $0x88] sm:$0xf0]  ;;  %v4803_v49 = vld [vmem:[%s6462_s1 + $0x170] sm:$0xff]  ;;  %v4801_v57 = vld [vmem:[%s6462_s1 + $0x160] sm:$0xff] }
  0x11   :  { %2323 = vmatpush.bf16.msra.mxu3 %v4785_v15  ;;  %v3332_v47 = vor.u32 %v4726_v40, %v3329_v41  ;;  %v4811_v50 = vld [vmem:[%s6462_s1 + $0x1b0] sm:$0xff]  ;;  %v4794_v52 = vld [vmem:[%s6462_s1 + $0x128] sm:$0xff]  ;;  %v4809_v58 = vld [vmem:[%s6462_s1 + $0x1a0] sm:$0xff] }
  0x12   :  { %2282 = vmatpush.bf16.msra.mxu0 %v4760_v16  ;;  %v4819_v51 = vld [vmem:[%s6462_s1 + $0x1f0] sm:$0xff]  ;;  %v4802_v53 = vld [vmem:[%s6462_s1 + $0x168] sm:$0xff]  ;;  %v4817_v59 = vld [vmem:[%s6462_s1 + $0x1e0] sm:$0xff] }
  0x13   :  { %2296 = vmatpush.bf16.msra.mxu1 %v4768_v17  ;;  %v4810_v54 = vld [vmem:[%s6462_s1 + $0x1a8] sm:$0xff]  ;;  %v4792_v60 = vld [vmem:[%s6462_s1 + $0x118] sm:$0xff]  ;;  %v4791_v0 = vld [vmem:[%s6462_s1 + $0x110] sm:$0xff] }
  0x14   :  { %2310 = vmatpush.bf16.msra.mxu2 %v4776_v18  ;;  %v4818_v55 = vld [vmem:[%s6462_s1 + $0x1e8] sm:$0xff]  ;;  %v4800_v61 = vld [vmem:[%s6462_s1 + $0x158] sm:$0xff]  ;;  %v4799_v1 = vld [vmem:[%s6462_s1 + $0x150] sm:$0xff] }
  0x15   :  { %2324 = vmatpush.bf16.msra.mxu3 %v4784_v19  ;;  %v4808_v62 = vld [vmem:[%s6462_s1 + $0x198] sm:$0xff]  ;;  %v4807_v2 = vld [vmem:[%s6462_s1 + $0x190] sm:$0xff]  ;;  %v4790_v4 = vld [vmem:[%s6462_s1 + $0x108] sm:$0xff] }
  0x16   :  { %2283 = vmatpush.bf16.msra.mxu0 %v4759_v20  ;;  %v4816_v63 = vld [vmem:[%s6462_s1 + $0x1d8] sm:$0xff]  ;;  %v4815_v3 = vld [vmem:[%s6462_s1 + $0x1d0] sm:$0xff]  ;;  %v4798_v5 = vld [vmem:[%s6462_s1 + $0x148] sm:$0xff] }
  0x17   :  { %2297 = vmatpush.bf16.msra.mxu1 %v4767_v21  ;;  %v4806_v6 = vld [vmem:[%s6462_s1 + $0x188] sm:$0xff]  ;;  %v4789_v8 = vld [vmem:[%s6462_s1 + $0x100] sm:$0xff]  ;;  %v4828_v12 = vld [vmem:[%s6462_s1 + $0x238] sm:$0xff] }
  0x18   :  { %2311 = vmatpush.bf16.msra.mxu2 %v4775_v22  ;;  %v4814_v7 = vld [vmem:[%s6462_s1 + $0x1c8] sm:$0xff]  ;;  %v4797_v9 = vld [vmem:[%s6462_s1 + $0x140] sm:$0xff]  ;;  %v4836_v13 = vld [vmem:[%s6462_s1 + $0x278] sm:$0xff] }
  0x19   :  { %2325 = vmatpush.bf16.msra.mxu3 %v4783_v23  ;;  %v4805_v10 = vld [vmem:[%s6462_s1 + $0x180] sm:$0xff]  ;;  %v3335_v14 = vld [vmem:[%s6463_s0 + $0x10] sm:$0xf]  ;;  %v3343_v16 = vld [vmem:[%s6463_s0 + $0x18] sm:$0xf] }
  0x1a   :  { %2284 = vmatpush.bf16.msra.mxu0 %v4758_v24  ;;  %v4813_v11 = vld [vmem:[%s6462_s1 + $0x1c0] sm:$0xff]  ;;  %v4743_v15 = vld [vmem:[%s6463_s0 + $0x8c] sm:$0xf0]  ;;  %v4744_v17 = vld [vmem:[%s6463_s0 + $0x94] sm:$0xf0] }
  0x1b   :  { %2298 = vmatpush.bf16.msra.mxu1 %v4766_v25  ;;  %v4727_v18 = vld [vmem:[%s6463_s0 + $0x14] sm:$0xf]  ;;  %v4728_v20 = vld [vmem:[%s6463_s0 + $0x1c] sm:$0xf]  ;;  %v3336_v24 = vor.u32 %v4743_v15, %v3335_v14  ;;  %v3344_v25 = vor.u32 %v4744_v17, %v3343_v16  ;;  %v4842_v34 = vld [vmem:[%s6462_s1 + $0x2a8] sm:$0xff] }
  0x1c   :  { %2312 = vmatpush.bf16.msra.mxu2 %v4774_v26  ;;  %v3337_v19 = vld [vmem:[%s6463_s0 + $0x90] sm:$0xf0]  ;;  %v3345_v21 = vld [vmem:[%s6463_s0 + $0x98] sm:$0xf0]  ;;  %v4850_v35 = vld [vmem:[%s6462_s1 + $0x2e8] sm:$0xff] }
  0x1d   :  { %2326 = vmatpush.bf16.msra.mxu3 %v4782_v27  ;;  %v4844_v22 = vld [vmem:[%s6462_s1 + $0x2b8] sm:$0xff]  ;;  %v3340_v26 = vor.u32 %v4727_v18, %v3337_v19  ;;  %v3348_v27 = vor.u32 %v4728_v20, %v3345_v21  ;;  %v4825_v36 = vld [vmem:[%s6462_s1 + $0x220] sm:$0xff]  ;;  %v4874_v14 = vld [vmem:[%s6462_s1 + $0x3a8] sm:$0xff] }
  0x1e   :  { %2285 = vmatpush.bf16.msra.mxu0 %v4757_v28  ;;  %v4852_v23 = vld [vmem:[%s6462_s1 + $0x2f8] sm:$0xff]  ;;  %v4827_v28 = vld [vmem:[%s6462_s1 + $0x230] sm:$0xff]  ;;  %v4833_v37 = vld [vmem:[%s6462_s1 + $0x260] sm:$0xff] }
  0x1f   :  { %2299 = vmatpush.bf16.msra.mxu1 %v4765_v29  ;;  %v4835_v29 = vld [vmem:[%s6462_s1 + $0x270] sm:$0xff]  ;;  %v4841_v38 = vld [vmem:[%s6462_s1 + $0x2a0] sm:$0xff]  ;;  %v4824_v40 = vld [vmem:[%s6462_s1 + $0x218] sm:$0xff] }
  0x20   :  { %2313 = vmatpush.bf16.msra.mxu2 %v4773_v30  ;;  %v4843_v30 = vld [vmem:[%s6462_s1 + $0x2b0] sm:$0xff]  ;;  %v4849_v39 = vld [vmem:[%s6462_s1 + $0x2e0] sm:$0xff]  ;;  %v4832_v41 = vld [vmem:[%s6462_s1 + $0x258] sm:$0xff] }
  0x21   :  { %2327 = vmatpush.bf16.msra.mxu3 %v4781_v31  ;;  %2286 = vmatmul.bf16.vlgmr.msra.gmra.mxu0 %v3320_v44  ;;  %v4851_v31 = vld [vmem:[%s6462_s1 + $0x2f0] sm:$0xff]  ;;  %v4882_v15 = vld [vmem:[%s6462_s1 + $0x3e8] sm:$0xff]  ;;  %v4857_v16 = vld [vmem:[%s6462_s1 + $0x320] sm:$0xff] }
  0x22   :  { %2334 = vmatpush.bf16.msrb.mxu0 %v4796_v32  ;;  %2300 = vmatmul.bf16.vlgmr.msra.gmra.mxu1 %v3324_v46  ;;  %v4826_v32 = vld [vmem:[%s6462_s1 + $0x228] sm:$0xff]  ;;  %v4823_v44 = vld [vmem:[%s6462_s1 + $0x210] sm:$0xff]  ;;  %v4865_v17 = vld [vmem:[%s6462_s1 + $0x360] sm:$0xff] }
  0x23   :  { %2348 = vmatpush.bf16.msrb.mxu1 %v4804_v33  ;;  %2314 = vmatmul.bf16.vlgmr.msra.gmra.mxu2 %v3328_v45  ;;  %v4834_v33 = vld [vmem:[%s6462_s1 + $0x268] sm:$0xff]  ;;  %v4831_v45 = vld [vmem:[%s6462_s1 + $0x250] sm:$0xff]  ;;  %v4873_v18 = vld [vmem:[%s6462_s1 + $0x3a0] sm:$0xff] }
  0x24   :  { %2362 = vmatpush.bf16.msrb.mxu2 %v4812_v42  ;;  %2328 = vmatmul.bf16.vlgmr.msra.gmra.mxu3 %v3332_v47  ;;  %v4840_v42 = vld [vmem:[%s6462_s1 + $0x298] sm:$0xff]  ;;  %v4839_v46 = vld [vmem:[%s6462_s1 + $0x290] sm:$0xff]  ;;  %v4881_v19 = vld [vmem:[%s6462_s1 + $0x3e0] sm:$0xff] }
  0x25   :  { %2376 = vmatpush.bf16.msrb.mxu3 %v4820_v43  ;;  %v4848_v43 = vld [vmem:[%s6462_s1 + $0x2d8] sm:$0xff]  ;;  %v4847_v47 = vld [vmem:[%s6462_s1 + $0x2d0] sm:$0xff] }
  0x26   :  { %2335 = vmatpush.bf16.msrb.mxu0 %v4795_v48  ;;  %v4822_v48 = vld [vmem:[%s6462_s1 + $0x208] sm:$0xff]  ;;  %v4856_v20 = vld [vmem:[%s6462_s1 + $0x318] sm:$0xff] }
  0x27   :  { %2349 = vmatpush.bf16.msrb.mxu1 %v4803_v49  ;;  %v4830_v49 = vld [vmem:[%s6462_s1 + $0x248] sm:$0xff]  ;;  %v4864_v21 = vld [vmem:[%s6462_s1 + $0x358] sm:$0xff] }
  0x28   :  { %2363 = vmatpush.bf16.msrb.mxu2 %v4811_v50  ;;  %v4838_v50 = vld [vmem:[%s6462_s1 + $0x288] sm:$0xff] }
  0x29   :  { %2377 = vmatpush.bf16.msrb.mxu3 %v4819_v51  ;;  %v4846_v51 = vld [vmem:[%s6462_s1 + $0x2c8] sm:$0xff] }
  0x2a   :  { %2336 = vmatpush.bf16.msrb.mxu0 %v4794_v52  ;;  %v4821_v52 = vld [vmem:[%s6462_s1 + $0x200] sm:$0xff] }
  0x2b   :  { %2350 = vmatpush.bf16.msrb.mxu1 %v4802_v53  ;;  %v4829_v53 = vld [vmem:[%s6462_s1 + $0x240] sm:$0xff] }
  0x2c   :  { %2364 = vmatpush.bf16.msrb.mxu2 %v4810_v54  ;;  %v4837_v54 = vld [vmem:[%s6462_s1 + $0x280] sm:$0xff] }
  0x2d   :  { %2378 = vmatpush.bf16.msrb.mxu3 %v4818_v55  ;;  %v4845_v55 = vld [vmem:[%s6462_s1 + $0x2c0] sm:$0xff] }
  0x2e   :  { %2337 = vmatpush.bf16.msrb.mxu0 %v4793_v56  ;;  %v4860_v56 = vld [vmem:[%s6462_s1 + $0x338] sm:$0xff] }
  0x2f   :  { %2351 = vmatpush.bf16.msrb.mxu1 %v4801_v57  ;;  %v4868_v57 = vld [vmem:[%s6462_s1 + $0x378] sm:$0xff] }
  0x30   :  { %2365 = vmatpush.bf16.msrb.mxu2 %v4809_v58  ;;  %v3351_v58 = vld [vmem:[%s6463_s0 + $0x20] sm:$0xf] }
  0x31   :  { %2379 = vmatpush.bf16.msrb.mxu3 %v4817_v59  ;;  %v4745_v59 = vld [vmem:[%s6463_s0 + $0x9c] sm:$0xf0] }
  0x32   :  { %2338 = vmatpush.bf16.msrb.mxu0 %v4792_v60  ;;  %v3359_v60 = vld [vmem:[%s6463_s0 + $0x28] sm:$0xf] }
  0x33   :  { %2352 = vmatpush.bf16.msrb.mxu1 %v4800_v61  ;;  %v4746_v61 = vld [vmem:[%s6463_s0 + $0xa4] sm:$0xf0] }
  0x34   :  { %2366 = vmatpush.bf16.msrb.mxu2 %v4808_v62  ;;  %v4729_v62 = vld [vmem:[%s6463_s0 + $0x24] sm:$0xf] }
  0x35   :  { %2380 = vmatpush.bf16.msrb.mxu3 %v4816_v63  ;;  %v3353_v63 = vld [vmem:[%s6463_s0 + $0xa0] sm:$0xf0] }
  0x36   :  { %2339 = vmatpush.bf16.msrb.mxu0 %v4791_v0  ;;  %v4730_v0 = vld [vmem:[%s6463_s0 + $0x2c] sm:$0xf] }
  0x37   :  { %2353 = vmatpush.bf16.msrb.mxu1 %v4799_v1  ;;  %v3361_v1 = vld [vmem:[%s6463_s0 + $0xa8] sm:$0xf0] }
  0x38   :  { %2367 = vmatpush.bf16.msrb.mxu2 %v4807_v2  ;;  %v4876_v2 = vld [vmem:[%s6462_s1 + $0x3b8] sm:$0xff] }
  0x39   :  { %2381 = vmatpush.bf16.msrb.mxu3 %v4815_v3  ;;  %v4884_v3 = vld [vmem:[%s6462_s1 + $0x3f8] sm:$0xff] }
  0x3a   :  { %2340 = vmatpush.bf16.msrb.mxu0 %v4790_v4  ;;  %v3352_v4 = vor.u32 %v4745_v59, %v3351_v58  ;;  %v4906_v58 = vld [vmem:[%s6462_s1 + $0x4a8] sm:$0xff] }
  0x3b   :  { %2354 = vmatpush.bf16.msrb.mxu1 %v4798_v5  ;;  %v3360_v5 = vor.u32 %v4746_v61, %v3359_v60  ;;  %v4914_v59 = vld [vmem:[%s6462_s1 + $0x4e8] sm:$0xff]  ;;  %v4889_v60 = vld [vmem:[%s6462_s1 + $0x420] sm:$0xff] }
  0x3c   :  { %2368 = vmatpush.bf16.msrb.mxu2 %v4806_v6  ;;  %v3356_v6 = vor.u32 %v4729_v62, %v3353_v63  ;;  %v4897_v61 = vld [vmem:[%s6462_s1 + $0x460] sm:$0xff] }
  0x3d   :  { %2382 = vmatpush.bf16.msrb.mxu3 %v4814_v7  ;;  %v3364_v7 = vor.u32 %v4730_v0, %v3361_v1  ;;  %v4905_v62 = vld [vmem:[%s6462_s1 + $0x4a0] sm:$0xff]  ;;  %v4888_v0 = vld [vmem:[%s6462_s1 + $0x418] sm:$0xff] }
  0x3e   :  { %2341 = vmatpush.bf16.msrb.mxu0 %v4789_v8  ;;  %v4859_v8 = vld [vmem:[%s6462_s1 + $0x330] sm:$0xff]  ;;  %v4913_v63 = vld [vmem:[%s6462_s1 + $0x4e0] sm:$0xff]  ;;  %v4896_v1 = vld [vmem:[%s6462_s1 + $0x458] sm:$0xff] }
  0x3f   :  { %2355 = vmatpush.bf16.msrb.mxu1 %v4797_v9  ;;  %v4867_v9 = vld [vmem:[%s6462_s1 + $0x370] sm:$0xff] }
  0x40   :  { %2369 = vmatpush.bf16.msrb.mxu2 %v4805_v10  ;;  %v4875_v10 = vld [vmem:[%s6462_s1 + $0x3b0] sm:$0xff] }
  0x41   :  { %2383 = vmatpush.bf16.msrb.mxu3 %v4813_v11  ;;  %2342 = vmatmul.bf16.vlgmr.msrb.gmra.mxu0 %v3336_v24  ;;  %v4883_v11 = vld [vmem:[%s6462_s1 + $0x3f0] sm:$0xff] }
  0x42   :  { %2390 = vmatpush.bf16.msra.mxu0 %v4828_v12  ;;  %2356 = vmatmul.bf16.vlgmr.msrb.gmra.mxu1 %v3340_v26  ;;  %v4858_v12 = vld [vmem:[%s6462_s1 + $0x328] sm:$0xff]  ;;  %v4855_v24 = vld [vmem:[%s6462_s1 + $0x310] sm:$0xff] }
  0x43   :  { %2404 = vmatpush.bf16.msra.mxu1 %v4836_v13  ;;  %2370 = vmatmul.bf16.vlgmr.msrb.gmra.mxu2 %v3344_v25  ;;  %v4866_v13 = vld [vmem:[%s6462_s1 + $0x368] sm:$0xff]  ;;  %v4863_v25 = vld [vmem:[%s6462_s1 + $0x350] sm:$0xff] }
  0x44   :  { %2418 = vmatpush.bf16.msra.mxu2 %v4844_v22  ;;  %2384 = vmatmul.bf16.vlgmr.msrb.gmra.mxu3 %v3348_v27  ;;  %v4872_v22 = vld [vmem:[%s6462_s1 + $0x398] sm:$0xff]  ;;  %v4871_v26 = vld [vmem:[%s6462_s1 + $0x390] sm:$0xff] }
  0x45   :  { %2432 = vmatpush.bf16.msra.mxu3 %v4852_v23  ;;  %v4880_v23 = vld [vmem:[%s6462_s1 + $0x3d8] sm:$0xff]  ;;  %v4879_v27 = vld [vmem:[%s6462_s1 + $0x3d0] sm:$0xff] }
  0x46   :  { %2391 = vmatpush.bf16.msra.mxu0 %v4827_v28  ;;  %v4854_v28 = vld [vmem:[%s6462_s1 + $0x308] sm:$0xff] }
  0x47   :  { %2405 = vmatpush.bf16.msra.mxu1 %v4835_v29  ;;  %v4862_v29 = vld [vmem:[%s6462_s1 + $0x348] sm:$0xff] }
  0x48   :  { %2419 = vmatpush.bf16.msra.mxu2 %v4843_v30  ;;  %v4870_v30 = vld [vmem:[%s6462_s1 + $0x388] sm:$0xff] }
  0x49   :  { %2433 = vmatpush.bf16.msra.mxu3 %v4851_v31  ;;  %v4878_v31 = vld [vmem:[%s6462_s1 + $0x3c8] sm:$0xff] }
  0x4a   :  { %2392 = vmatpush.bf16.msra.mxu0 %v4826_v32  ;;  %v4853_v32 = vld [vmem:[%s6462_s1 + $0x300] sm:$0xff] }
  0x4b   :  { %2406 = vmatpush.bf16.msra.mxu1 %v4834_v33  ;;  %v4861_v33 = vld [vmem:[%s6462_s1 + $0x340] sm:$0xff] }
  0x4c   :  { %2420 = vmatpush.bf16.msra.mxu2 %v4842_v34  ;;  %v4869_v34 = vld [vmem:[%s6462_s1 + $0x380] sm:$0xff] }
  0x4d   :  { %2434 = vmatpush.bf16.msra.mxu3 %v4850_v35  ;;  %v4877_v35 = vld [vmem:[%s6462_s1 + $0x3c0] sm:$0xff] }
  0x4e   :  { %2393 = vmatpush.bf16.msra.mxu0 %v4825_v36  ;;  %v4892_v36 = vld [vmem:[%s6462_s1 + $0x438] sm:$0xff] }
  0x4f   :  { %2407 = vmatpush.bf16.msra.mxu1 %v4833_v37  ;;  %v4900_v37 = vld [vmem:[%s6462_s1 + $0x478] sm:$0xff] }
  0x50   :  { %2421 = vmatpush.bf16.msra.mxu2 %v4841_v38  ;;  %v3367_v38 = vld [vmem:[%s6463_s0 + $0x30] sm:$0xf] }
  0x51   :  { %2435 = vmatpush.bf16.msra.mxu3 %v4849_v39  ;;  %v4747_v39 = vld [vmem:[%s6463_s0 + $0xac] sm:$0xf0] }
  0x52   :  { %2394 = vmatpush.bf16.msra.mxu0 %v4824_v40  ;;  %v3375_v40 = vld [vmem:[%s6463_s0 + $0x38] sm:$0xf] }
  0x53   :  { %2408 = vmatpush.bf16.msra.mxu1 %v4832_v41  ;;  %v4748_v41 = vld [vmem:[%s6463_s0 + $0xb4] sm:$0xf0] }
  0x54   :  { %2422 = vmatpush.bf16.msra.mxu2 %v4840_v42  ;;  %v4731_v42 = vld [vmem:[%s6463_s0 + $0x34] sm:$0xf] }
  0x55   :  { %2436 = vmatpush.bf16.msra.mxu3 %v4848_v43  ;;  %v3369_v43 = vld [vmem:[%s6463_s0 + $0xb0] sm:$0xf0] }
  0x56   :  { %2395 = vmatpush.bf16.msra.mxu0 %v4823_v44  ;;  %v4732_v44 = vld [vmem:[%s6463_s0 + $0x3c] sm:$0xf] }
  0x57   :  { %2409 = vmatpush.bf16.msra.mxu1 %v4831_v45  ;;  %v3377_v45 = vld [vmem:[%s6463_s0 + $0xb8] sm:$0xf0] }
  0x58   :  { %2423 = vmatpush.bf16.msra.mxu2 %v4839_v46  ;;  %v4908_v46 = vld [vmem:[%s6462_s1 + $0x4b8] sm:$0xff] }
  0x59   :  { %2437 = vmatpush.bf16.msra.mxu3 %v4847_v47  ;;  %v4916_v47 = vld [vmem:[%s6462_s1 + $0x4f8] sm:$0xff] }
  0x5a   :  { %2396 = vmatpush.bf16.msra.mxu0 %v4822_v48  ;;  %v3368_v48 = vor.u32 %v4747_v39, %v3367_v38  ;;  %v4938_v38 = vld [vmem:[%s6462_s1 + $0x5a8] sm:$0xff] }
  0x5b   :  { %2410 = vmatpush.bf16.msra.mxu1 %v4830_v49  ;;  %v3376_v49 = vor.u32 %v4748_v41, %v3375_v40  ;;  %v4946_v39 = vld [vmem:[%s6462_s1 + $0x5e8] sm:$0xff]  ;;  %v4921_v40 = vld [vmem:[%s6462_s1 + $0x520] sm:$0xff] }
  0x5c   :  { %2424 = vmatpush.bf16.msra.mxu2 %v4838_v50  ;;  %v3372_v50 = vor.u32 %v4731_v42, %v3369_v43  ;;  %v4929_v41 = vld [vmem:[%s6462_s1 + $0x560] sm:$0xff] }
  0x5d   :  { %2438 = vmatpush.bf16.msra.mxu3 %v4846_v51  ;;  %v3380_v51 = vor.u32 %v4732_v44, %v3377_v45  ;;  %v4937_v42 = vld [vmem:[%s6462_s1 + $0x5a0] sm:$0xff]  ;;  %v4920_v44 = vld [vmem:[%s6462_s1 + $0x518] sm:$0xff] }
  0x5e   :  { %2397 = vmatpush.bf16.msra.mxu0 %v4821_v52  ;;  %v4891_v52 = vld [vmem:[%s6462_s1 + $0x430] sm:$0xff]  ;;  %v4945_v43 = vld [vmem:[%s6462_s1 + $0x5e0] sm:$0xff]  ;;  %v4928_v45 = vld [vmem:[%s6462_s1 + $0x558] sm:$0xff] }
  0x5f   :  { %2411 = vmatpush.bf16.msra.mxu1 %v4829_v53  ;;  %v4899_v53 = vld [vmem:[%s6462_s1 + $0x470] sm:$0xff] }
  0x60   :  { %2425 = vmatpush.bf16.msra.mxu2 %v4837_v54  ;;  %v4907_v54 = vld [vmem:[%s6462_s1 + $0x4b0] sm:$0xff] }
  0x61   :  { %2439 = vmatpush.bf16.msra.mxu3 %v4845_v55  ;;  %2398 = vmatmul.bf16.vlgmr.msra.gmra.mxu0 %v3352_v4  ;;  %v4915_v55 = vld [vmem:[%s6462_s1 + $0x4f0] sm:$0xff] }
  0x62   :  { %2446 = vmatpush.bf16.msrb.mxu0 %v4860_v56  ;;  %2412 = vmatmul.bf16.vlgmr.msra.gmra.mxu1 %v3356_v6  ;;  %v4890_v56 = vld [vmem:[%s6462_s1 + $0x428] sm:$0xff]  ;;  %v4887_v4 = vld [vmem:[%s6462_s1 + $0x410] sm:$0xff] }
  0x63   :  { %2460 = vmatpush.bf16.msrb.mxu1 %v4868_v57  ;;  %2426 = vmatmul.bf16.vlgmr.msra.gmra.mxu2 %v3360_v5  ;;  %v4898_v57 = vld [vmem:[%s6462_s1 + $0x468] sm:$0xff]  ;;  %v4895_v5 = vld [vmem:[%s6462_s1 + $0x450] sm:$0xff] }
  0x64   :  { %2474 = vmatpush.bf16.msrb.mxu2 %v4876_v2  ;;  %2440 = vmatmul.bf16.vlgmr.msra.gmra.mxu3 %v3364_v7  ;;  %v4904_v2 = vld [vmem:[%s6462_s1 + $0x498] sm:$0xff]  ;;  %v4903_v6 = vld [vmem:[%s6462_s1 + $0x490] sm:$0xff] }
  0x65   :  { %2488 = vmatpush.bf16.msrb.mxu3 %v4884_v3  ;;  %v4912_v3 = vld [vmem:[%s6462_s1 + $0x4d8] sm:$0xff]  ;;  %v4911_v7 = vld [vmem:[%s6462_s1 + $0x4d0] sm:$0xff] }
  0x66   :  { %2447 = vmatpush.bf16.msrb.mxu0 %v4859_v8  ;;  %v4886_v8 = vld [vmem:[%s6462_s1 + $0x408] sm:$0xff] }
  0x67   :  { %2461 = vmatpush.bf16.msrb.mxu1 %v4867_v9  ;;  %v4894_v9 = vld [vmem:[%s6462_s1 + $0x448] sm:$0xff] }
  0x68   :  { %2475 = vmatpush.bf16.msrb.mxu2 %v4875_v10  ;;  %v4902_v10 = vld [vmem:[%s6462_s1 + $0x488] sm:$0xff] }
  0x69   :  { %2489 = vmatpush.bf16.msrb.mxu3 %v4883_v11  ;;  %v4910_v11 = vld [vmem:[%s6462_s1 + $0x4c8] sm:$0xff] }
  0x6a   :  { %2448 = vmatpush.bf16.msrb.mxu0 %v4858_v12  ;;  %v4885_v12 = vld [vmem:[%s6462_s1 + $0x400] sm:$0xff] }
  0x6b   :  { %2462 = vmatpush.bf16.msrb.mxu1 %v4866_v13  ;;  %v4893_v13 = vld [vmem:[%s6462_s1 + $0x440] sm:$0xff] }
  0x6c   :  { %2476 = vmatpush.bf16.msrb.mxu2 %v4874_v14  ;;  %v4901_v14 = vld [vmem:[%s6462_s1 + $0x480] sm:$0xff] }
  0x6d   :  { %2490 = vmatpush.bf16.msrb.mxu3 %v4882_v15  ;;  %v4909_v15 = vld [vmem:[%s6462_s1 + $0x4c0] sm:$0xff] }
  0x6e   :  { %2449 = vmatpush.bf16.msrb.mxu0 %v4857_v16  ;;  %v4924_v16 = vld [vmem:[%s6462_s1 + $0x538] sm:$0xff] }
  0x6f   :  { %2463 = vmatpush.bf16.msrb.mxu1 %v4865_v17  ;;  %v4932_v17 = vld [vmem:[%s6462_s1 + $0x578] sm:$0xff] }
  0x70   :  { %2477 = vmatpush.bf16.msrb.mxu2 %v4873_v18  ;;  %v3383_v18 = vld [vmem:[%s6463_s0 + $0x40] sm:$0xf] }
  0x71   :  { %2491 = vmatpush.bf16.msrb.mxu3 %v4881_v19  ;;  %v4749_v19 = vld [vmem:[%s6463_s0 + $0xbc] sm:$0xf0] }
  0x72   :  { %2450 = vmatpush.bf16.msrb.mxu0 %v4856_v20  ;;  %v3391_v20 = vld [vmem:[%s6463_s0 + $0x48] sm:$0xf] }
  0x73   :  { %2464 = vmatpush.bf16.msrb.mxu1 %v4864_v21  ;;  %v4750_v21 = vld [vmem:[%s6463_s0 + $0xc4] sm:$0xf0] }
  0x74   :  { %2478 = vmatpush.bf16.msrb.mxu2 %v4872_v22  ;;  %v4733_v22 = vld [vmem:[%s6463_s0 + $0x44] sm:$0xf] }
  0x75   :  { %2492 = vmatpush.bf16.msrb.mxu3 %v4880_v23  ;;  %v3385_v23 = vld [vmem:[%s6463_s0 + $0xc0] sm:$0xf0] }
  0x76   :  { %2451 = vmatpush.bf16.msrb.mxu0 %v4855_v24  ;;  %v4734_v24 = vld [vmem:[%s6463_s0 + $0x4c] sm:$0xf] }
  0x77   :  { %2465 = vmatpush.bf16.msrb.mxu1 %v4863_v25  ;;  %v3393_v25 = vld [vmem:[%s6463_s0 + $0xc8] sm:$0xf0] }
  0x78   :  { %2479 = vmatpush.bf16.msrb.mxu2 %v4871_v26  ;;  %v4940_v26 = vld [vmem:[%s6462_s1 + $0x5b8] sm:$0xff] }
  0x79   :  { %2493 = vmatpush.bf16.msrb.mxu3 %v4879_v27  ;;  %v4948_v27 = vld [vmem:[%s6462_s1 + $0x5f8] sm:$0xff] }
  0x7a   :  { %2452 = vmatpush.bf16.msrb.mxu0 %v4854_v28  ;;  %v3384_v28 = vor.u32 %v4749_v19, %v3383_v18  ;;  %v4970_v18 = vld [vmem:[%s6462_s1 + $0x6a8] sm:$0xff] }
  0x7b   :  { %2466 = vmatpush.bf16.msrb.mxu1 %v4862_v29  ;;  %v3392_v29 = vor.u32 %v4750_v21, %v3391_v20  ;;  %v4978_v19 = vld [vmem:[%s6462_s1 + $0x6e8] sm:$0xff]  ;;  %v4953_v20 = vld [vmem:[%s6462_s1 + $0x620] sm:$0xff] }
  0x7c   :  { %2480 = vmatpush.bf16.msrb.mxu2 %v4870_v30  ;;  %v3388_v30 = vor.u32 %v4733_v22, %v3385_v23  ;;  %v4961_v21 = vld [vmem:[%s6462_s1 + $0x660] sm:$0xff] }
  0x7d   :  { %2494 = vmatpush.bf16.msrb.mxu3 %v4878_v31  ;;  %v3396_v31 = vor.u32 %v4734_v24, %v3393_v25  ;;  %v4969_v22 = vld [vmem:[%s6462_s1 + $0x6a0] sm:$0xff]  ;;  %v4952_v24 = vld [vmem:[%s6462_s1 + $0x618] sm:$0xff] }
  0x7e   :  { %2453 = vmatpush.bf16.msrb.mxu0 %v4853_v32  ;;  %v4923_v32 = vld [vmem:[%s6462_s1 + $0x530] sm:$0xff]  ;;  %v4977_v23 = vld [vmem:[%s6462_s1 + $0x6e0] sm:$0xff]  ;;  %v4960_v25 = vld [vmem:[%s6462_s1 + $0x658] sm:$0xff] }
  0x7f   :  { %2467 = vmatpush.bf16.msrb.mxu1 %v4861_v33  ;;  %v4931_v33 = vld [vmem:[%s6462_s1 + $0x570] sm:$0xff] }
  0x80   :  { %2481 = vmatpush.bf16.msrb.mxu2 %v4869_v34  ;;  %v4939_v34 = vld [vmem:[%s6462_s1 + $0x5b0] sm:$0xff] }
  0x81   :  { %2495 = vmatpush.bf16.msrb.mxu3 %v4877_v35  ;;  %2454 = vmatmul.bf16.vlgmr.msrb.gmra.mxu0 %v3368_v48  ;;  %v4947_v35 = vld [vmem:[%s6462_s1 + $0x5f0] sm:$0xff] }
  0x82   :  { %2502 = vmatpush.bf16.msra.mxu0 %v4892_v36  ;;  %2468 = vmatmul.bf16.vlgmr.msrb.gmra.mxu1 %v3372_v50  ;;  %v4922_v36 = vld [vmem:[%s6462_s1 + $0x528] sm:$0xff]  ;;  %v4919_v48 = vld [vmem:[%s6462_s1 + $0x510] sm:$0xff] }
  0x83   :  { %2516 = vmatpush.bf16.msra.mxu1 %v4900_v37  ;;  %2482 = vmatmul.bf16.vlgmr.msrb.gmra.mxu2 %v3376_v49  ;;  %v4930_v37 = vld [vmem:[%s6462_s1 + $0x568] sm:$0xff]  ;;  %v4927_v49 = vld [vmem:[%s6462_s1 + $0x550] sm:$0xff] }
  0x84   :  { %2530 = vmatpush.bf16.msra.mxu2 %v4908_v46  ;;  %2496 = vmatmul.bf16.vlgmr.msrb.gmra.mxu3 %v3380_v51  ;;  %v4936_v46 = vld [vmem:[%s6462_s1 + $0x598] sm:$0xff]  ;;  %v4935_v50 = vld [vmem:[%s6462_s1 + $0x590] sm:$0xff] }
  0x85   :  { %2544 = vmatpush.bf16.msra.mxu3 %v4916_v47  ;;  %v4944_v47 = vld [vmem:[%s6462_s1 + $0x5d8] sm:$0xff]  ;;  %v4943_v51 = vld [vmem:[%s6462_s1 + $0x5d0] sm:$0xff] }
  0x86   :  { %2503 = vmatpush.bf16.msra.mxu0 %v4891_v52  ;;  %v4918_v52 = vld [vmem:[%s6462_s1 + $0x508] sm:$0xff] }
  0x87   :  { %2517 = vmatpush.bf16.msra.mxu1 %v4899_v53  ;;  %v4926_v53 = vld [vmem:[%s6462_s1 + $0x548] sm:$0xff] }
  0x88   :  { %2531 = vmatpush.bf16.msra.mxu2 %v4907_v54  ;;  %v4934_v54 = vld [vmem:[%s6462_s1 + $0x588] sm:$0xff] }
  0x89   :  { %2545 = vmatpush.bf16.msra.mxu3 %v4915_v55  ;;  %v4942_v55 = vld [vmem:[%s6462_s1 + $0x5c8] sm:$0xff] }
  0x8a   :  { %2504 = vmatpush.bf16.msra.mxu0 %v4890_v56  ;;  %v4917_v56 = vld [vmem:[%s6462_s1 + $0x500] sm:$0xff] }
  0x8b   :  { %2518 = vmatpush.bf16.msra.mxu1 %v4898_v57  ;;  %v4925_v57 = vld [vmem:[%s6462_s1 + $0x540] sm:$0xff] }
  0x8c   :  { %2532 = vmatpush.bf16.msra.mxu2 %v4906_v58  ;;  %v4933_v58 = vld [vmem:[%s6462_s1 + $0x580] sm:$0xff] }
  0x8d   :  { %2546 = vmatpush.bf16.msra.mxu3 %v4914_v59  ;;  %v4941_v59 = vld [vmem:[%s6462_s1 + $0x5c0] sm:$0xff] }
  0x8e   :  { %2505 = vmatpush.bf16.msra.mxu0 %v4889_v60  ;;  %v4956_v60 = vld [vmem:[%s6462_s1 + $0x638] sm:$0xff] }
  0x8f   :  { %2519 = vmatpush.bf16.msra.mxu1 %v4897_v61  ;;  %v4964_v61 = vld [vmem:[%s6462_s1 + $0x678] sm:$0xff] }
  0x90   :  { %2533 = vmatpush.bf16.msra.mxu2 %v4905_v62  ;;  %v3399_v62 = vld [vmem:[%s6463_s0 + $0x50] sm:$0xf] }
  0x91   :  { %2547 = vmatpush.bf16.msra.mxu3 %v4913_v63  ;;  %v4751_v63 = vld [vmem:[%s6463_s0 + $0xcc] sm:$0xf0] }
  0x92   :  { %2506 = vmatpush.bf16.msra.mxu0 %v4888_v0  ;;  %v3407_v0 = vld [vmem:[%s6463_s0 + $0x58] sm:$0xf] }
  0x93   :  { %2520 = vmatpush.bf16.msra.mxu1 %v4896_v1  ;;  %v4752_v1 = vld [vmem:[%s6463_s0 + $0xd4] sm:$0xf0] }
  0x94   :  { %2534 = vmatpush.bf16.msra.mxu2 %v4904_v2  ;;  %v4735_v2 = vld [vmem:[%s6463_s0 + $0x54] sm:$0xf] }
  0x95   :  { %2548 = vmatpush.bf16.msra.mxu3 %v4912_v3  ;;  %v3401_v3 = vld [vmem:[%s6463_s0 + $0xd0] sm:$0xf0] }
  0x96   :  { %2507 = vmatpush.bf16.msra.mxu0 %v4887_v4  ;;  %v4736_v4 = vld [vmem:[%s6463_s0 + $0x5c] sm:$0xf] }
  0x97   :  { %2521 = vmatpush.bf16.msra.mxu1 %v4895_v5  ;;  %v3409_v5 = vld [vmem:[%s6463_s0 + $0xd8] sm:$0xf0] }
  0x98   :  { %2535 = vmatpush.bf16.msra.mxu2 %v4903_v6  ;;  %v4972_v6 = vld [vmem:[%s6462_s1 + $0x6b8] sm:$0xff] }
  0x99   :  { %2549 = vmatpush.bf16.msra.mxu3 %v4911_v7  ;;  %v4980_v7 = vld [vmem:[%s6462_s1 + $0x6f8] sm:$0xff] }
  0x9a   :  { %2508 = vmatpush.bf16.msra.mxu0 %v4886_v8  ;;  %v3400_v8 = vor.u32 %v4751_v63, %v3399_v62  ;;  %v5002_v62 = vld [vmem:[%s6462_s1 + $0x7a8] sm:$0xff] }
  0x9b   :  { %2522 = vmatpush.bf16.msra.mxu1 %v4894_v9  ;;  %v3408_v9 = vor.u32 %v4752_v1, %v3407_v0  ;;  %v5010_v63 = vld [vmem:[%s6462_s1 + $0x7e8] sm:$0xff]  ;;  %v4985_v0 = vld [vmem:[%s6462_s1 + $0x720] sm:$0xff] }
  0x9c   :  { %2536 = vmatpush.bf16.msra.mxu2 %v4902_v10  ;;  %v3404_v10 = vor.u32 %v4735_v2, %v3401_v3  ;;  %v4993_v1 = vld [vmem:[%s6462_s1 + $0x760] sm:$0xff] }
  0x9d   :  { %2550 = vmatpush.bf16.msra.mxu3 %v4910_v11  ;;  %v3412_v11 = vor.u32 %v4736_v4, %v3409_v5  ;;  %v5001_v2 = vld [vmem:[%s6462_s1 + $0x7a0] sm:$0xff]  ;;  %v4984_v4 = vld [vmem:[%s6462_s1 + $0x718] sm:$0xff] }
  0x9e   :  { %2509 = vmatpush.bf16.msra.mxu0 %v4885_v12  ;;  %v4955_v12 = vld [vmem:[%s6462_s1 + $0x630] sm:$0xff]  ;;  %v5009_v3 = vld [vmem:[%s6462_s1 + $0x7e0] sm:$0xff]  ;;  %v4992_v5 = vld [vmem:[%s6462_s1 + $0x758] sm:$0xff] }
  0x9f   :  { %2523 = vmatpush.bf16.msra.mxu1 %v4893_v13  ;;  %v4963_v13 = vld [vmem:[%s6462_s1 + $0x670] sm:$0xff] }
  0xa0   :  { %2537 = vmatpush.bf16.msra.mxu2 %v4901_v14  ;;  %v4971_v14 = vld [vmem:[%s6462_s1 + $0x6b0] sm:$0xff] }
  0xa1   :  { %2551 = vmatpush.bf16.msra.mxu3 %v4909_v15  ;;  %2510 = vmatmul.bf16.vlgmr.msra.gmra.mxu0 %v3384_v28  ;;  %v4979_v15 = vld [vmem:[%s6462_s1 + $0x6f0] sm:$0xff] }
  0xa2   :  { %2558 = vmatpush.bf16.msrb.mxu0 %v4924_v16  ;;  %2524 = vmatmul.bf16.vlgmr.msra.gmra.mxu1 %v3388_v30  ;;  %v4954_v16 = vld [vmem:[%s6462_s1 + $0x628] sm:$0xff]  ;;  %v4951_v28 = vld [vmem:[%s6462_s1 + $0x610] sm:$0xff] }
  0xa3   :  { %2572 = vmatpush.bf16.msrb.mxu1 %v4932_v17  ;;  %2538 = vmatmul.bf16.vlgmr.msra.gmra.mxu2 %v3392_v29  ;;  %v4962_v17 = vld [vmem:[%s6462_s1 + $0x668] sm:$0xff]  ;;  %v4959_v29 = vld [vmem:[%s6462_s1 + $0x650] sm:$0xff] }
  0xa4   :  { %2586 = vmatpush.bf16.msrb.mxu2 %v4940_v26  ;;  %2552 = vmatmul.bf16.vlgmr.msra.gmra.mxu3 %v3396_v31  ;;  %v4968_v26 = vld [vmem:[%s6462_s1 + $0x698] sm:$0xff]  ;;  %v4967_v30 = vld [vmem:[%s6462_s1 + $0x690] sm:$0xff] }
  0xa5   :  { %2600 = vmatpush.bf16.msrb.mxu3 %v4948_v27  ;;  %v4976_v27 = vld [vmem:[%s6462_s1 + $0x6d8] sm:$0xff]  ;;  %v4975_v31 = vld [vmem:[%s6462_s1 + $0x6d0] sm:$0xff] }
  0xa6   :  { %2559 = vmatpush.bf16.msrb.mxu0 %v4923_v32  ;;  %v4950_v32 = vld [vmem:[%s6462_s1 + $0x608] sm:$0xff] }
  0xa7   :  { %2573 = vmatpush.bf16.msrb.mxu1 %v4931_v33  ;;  %v4958_v33 = vld [vmem:[%s6462_s1 + $0x648] sm:$0xff] }
  0xa8   :  { %2587 = vmatpush.bf16.msrb.mxu2 %v4939_v34  ;;  %v4966_v34 = vld [vmem:[%s6462_s1 + $0x688] sm:$0xff] }
  0xa9   :  { %2601 = vmatpush.bf16.msrb.mxu3 %v4947_v35  ;;  %v4974_v35 = vld [vmem:[%s6462_s1 + $0x6c8] sm:$0xff] }
  0xaa   :  { %2560 = vmatpush.bf16.msrb.mxu0 %v4922_v36  ;;  %v4949_v36 = vld [vmem:[%s6462_s1 + $0x600] sm:$0xff] }
  0xab   :  { %2574 = vmatpush.bf16.msrb.mxu1 %v4930_v37  ;;  %v4957_v37 = vld [vmem:[%s6462_s1 + $0x640] sm:$0xff] }
  0xac   :  { %2588 = vmatpush.bf16.msrb.mxu2 %v4938_v38  ;;  %v4965_v38 = vld [vmem:[%s6462_s1 + $0x680] sm:$0xff] }
  0xad   :  { %2602 = vmatpush.bf16.msrb.mxu3 %v4946_v39  ;;  %v4973_v39 = vld [vmem:[%s6462_s1 + $0x6c0] sm:$0xff] }
  0xae   :  { %2561 = vmatpush.bf16.msrb.mxu0 %v4921_v40  ;;  %v4988_v40 = vld [vmem:[%s6462_s1 + $0x738] sm:$0xff] }
  0xaf   :  { %2575 = vmatpush.bf16.msrb.mxu1 %v4929_v41  ;;  %v4996_v41 = vld [vmem:[%s6462_s1 + $0x778] sm:$0xff] }
  0xb0   :  { %2589 = vmatpush.bf16.msrb.mxu2 %v4937_v42  ;;  %v3415_v42 = vld [vmem:[%s6463_s0 + $0x60] sm:$0xf] }
  0xb1   :  { %2603 = vmatpush.bf16.msrb.mxu3 %v4945_v43  ;;  %v4753_v43 = vld [vmem:[%s6463_s0 + $0xdc] sm:$0xf0] }
  0xb2   :  { %2562 = vmatpush.bf16.msrb.mxu0 %v4920_v44  ;;  %v3423_v44 = vld [vmem:[%s6463_s0 + $0x68] sm:$0xf] }
  0xb3   :  { %2576 = vmatpush.bf16.msrb.mxu1 %v4928_v45  ;;  %v4754_v45 = vld [vmem:[%s6463_s0 + $0xe4] sm:$0xf0] }
  0xb4   :  { %2590 = vmatpush.bf16.msrb.mxu2 %v4936_v46  ;;  %v4737_v46 = vld [vmem:[%s6463_s0 + $0x64] sm:$0xf] }
  0xb5   :  { %2604 = vmatpush.bf16.msrb.mxu3 %v4944_v47  ;;  %v3417_v47 = vld [vmem:[%s6463_s0 + $0xe0] sm:$0xf0] }
  0xb6   :  { %2563 = vmatpush.bf16.msrb.mxu0 %v4919_v48  ;;  %v4738_v48 = vld [vmem:[%s6463_s0 + $0x6c] sm:$0xf] }
  0xb7   :  { %2577 = vmatpush.bf16.msrb.mxu1 %v4927_v49  ;;  %v3425_v49 = vld [vmem:[%s6463_s0 + $0xe8] sm:$0xf0] }
  0xb8   :  { %2591 = vmatpush.bf16.msrb.mxu2 %v4935_v50  ;;  %v5004_v50 = vld [vmem:[%s6462_s1 + $0x7b8] sm:$0xff] }
  0xb9   :  { %2605 = vmatpush.bf16.msrb.mxu3 %v4943_v51  ;;  %v5012_v51 = vld [vmem:[%s6462_s1 + $0x7f8] sm:$0xff] }
  0xba   :  { %2564 = vmatpush.bf16.msrb.mxu0 %v4918_v52  ;;  %v3416_v52 = vor.u32 %v4753_v43, %v3415_v42 }
  0xbb   :  { %2578 = vmatpush.bf16.msrb.mxu1 %v4926_v53  ;;  %v3424_v53 = vor.u32 %v4754_v45, %v3423_v44 }
  0xbc   :  { %2592 = vmatpush.bf16.msrb.mxu2 %v4934_v54  ;;  %v3420_v54 = vor.u32 %v4737_v46, %v3417_v47  ;;  %v5077_v46 = vld [vmem:[%s6464_s2] ss:$0 sm:$0xff] }
  0xbd   :  { %2606 = vmatpush.bf16.msrb.mxu3 %v4942_v55  ;;  %v3428_v55 = vor.u32 %v4738_v48, %v3425_v49 }
  0xbe   :  { %2565 = vmatpush.bf16.msrb.mxu0 %v4917_v56  ;;  %v4987_v56 = vld [vmem:[%s6462_s1 + $0x730] sm:$0xff] }
  0xbf   :  { %2579 = vmatpush.bf16.msrb.mxu1 %v4925_v57  ;;  %v4995_v57 = vld [vmem:[%s6462_s1 + $0x770] sm:$0xff] }
  0xc0   :  { %2593 = vmatpush.bf16.msrb.mxu2 %v4933_v58  ;;  %v5003_v58 = vld [vmem:[%s6462_s1 + $0x7b0] sm:$0xff] }
  0xc1   :  { %2607 = vmatpush.bf16.msrb.mxu3 %v4941_v59  ;;  %2566 = vmatmul.bf16.vlgmr.msrb.gmra.mxu0 %v3400_v8  ;;  %v5011_v59 = vld [vmem:[%s6462_s1 + $0x7f0] sm:$0xff] }
  0xc2   :  { %2614 = vmatpush.bf16.msra.mxu0 %v4956_v60  ;;  %2580 = vmatmul.bf16.vlgmr.msrb.gmra.mxu1 %v3404_v10  ;;  %v4986_v60 = vld [vmem:[%s6462_s1 + $0x728] sm:$0xff]  ;;  %v4983_v8 = vld [vmem:[%s6462_s1 + $0x710] sm:$0xff] }
  0xc3   :  { %2628 = vmatpush.bf16.msra.mxu1 %v4964_v61  ;;  %2594 = vmatmul.bf16.vlgmr.msrb.gmra.mxu2 %v3408_v9  ;;  %v4994_v61 = vld [vmem:[%s6462_s1 + $0x768] sm:$0xff]  ;;  %v4991_v9 = vld [vmem:[%s6462_s1 + $0x750] sm:$0xff] }
  0xc4   :  { %2642 = vmatpush.bf16.msra.mxu2 %v4972_v6  ;;  %2608 = vmatmul.bf16.vlgmr.msrb.gmra.mxu3 %v3412_v11  ;;  %v5000_v6 = vld [vmem:[%s6462_s1 + $0x798] sm:$0xff]  ;;  %v4999_v10 = vld [vmem:[%s6462_s1 + $0x790] sm:$0xff] }
  0xc5   :  { %2656 = vmatpush.bf16.msra.mxu3 %v4980_v7  ;;  %v5008_v7 = vld [vmem:[%s6462_s1 + $0x7d8] sm:$0xff]  ;;  %v5007_v11 = vld [vmem:[%s6462_s1 + $0x7d0] sm:$0xff] }
  0xc6   :  { %2615 = vmatpush.bf16.msra.mxu0 %v4955_v12  ;;  %v4982_v12 = vld [vmem:[%s6462_s1 + $0x708] sm:$0xff] }
  0xc7   :  { %2629 = vmatpush.bf16.msra.mxu1 %v4963_v13  ;;  %v4990_v13 = vld [vmem:[%s6462_s1 + $0x748] sm:$0xff] }
  0xc8   :  { %2643 = vmatpush.bf16.msra.mxu2 %v4971_v14  ;;  %v4998_v14 = vld [vmem:[%s6462_s1 + $0x788] sm:$0xff] }
  0xc9   :  { %2657 = vmatpush.bf16.msra.mxu3 %v4979_v15  ;;  %v5006_v15 = vld [vmem:[%s6462_s1 + $0x7c8] sm:$0xff] }
  0xca   :  { %2616 = vmatpush.bf16.msra.mxu0 %v4954_v16  ;;  %v4981_v16 = vld [vmem:[%s6462_s1 + $0x700] sm:$0xff] }
  0xcb   :  { %2630 = vmatpush.bf16.msra.mxu1 %v4962_v17  ;;  %v4989_v17 = vld [vmem:[%s6462_s1 + $0x740] sm:$0xff] }
  0xcc   :  { %2644 = vmatpush.bf16.msra.mxu2 %v4970_v18  ;;  %v4997_v18 = vld [vmem:[%s6462_s1 + $0x780] sm:$0xff] }
  0xcd   :  { %2658 = vmatpush.bf16.msra.mxu3 %v4978_v19  ;;  %v5005_v19 = vld [vmem:[%s6462_s1 + $0x7c0] sm:$0xff] }
  0xce   :  { %2617 = vmatpush.bf16.msra.mxu0 %v4953_v20  ;;  %v3431_v20 = vld [vmem:[%s6463_s0 + $0x70] sm:$0xf] }
  0xcf   :  { %2631 = vmatpush.bf16.msra.mxu1 %v4961_v21  ;;  %v4755_v21 = vld [vmem:[%s6463_s0 + $0xec] sm:$0xf0] }
  0xd0   :  { %2645 = vmatpush.bf16.msra.mxu2 %v4969_v22  ;;  %v4739_v22 = vld [vmem:[%s6463_s0 + $0x74] sm:$0xf] }
  0xd1   :  { %2659 = vmatpush.bf16.msra.mxu3 %v4977_v23  ;;  %v3433_v23 = vld [vmem:[%s6463_s0 + $0xf0] sm:$0xf0] }
  0xd2   :  { %2618 = vmatpush.bf16.msra.mxu0 %v4952_v24  ;;  %v3439_v24 = vld [vmem:[%s6463_s0 + $0x78] sm:$0xf] }
  0xd3   :  { %2632 = vmatpush.bf16.msra.mxu1 %v4960_v25  ;;  %v4756_v25 = vld [vmem:[%s6463_s0 + $0xf4] sm:$0xf0] }
  0xd4   :  { %2646 = vmatpush.bf16.msra.mxu2 %v4968_v26  ;;  %v4740_v26 = vld [vmem:[%s6463_s0 + $0x7c] sm:$0xf] }
  0xd5   :  { %2660 = vmatpush.bf16.msra.mxu3 %v4976_v27  ;;  %v3441_v27 = vld [vmem:[%s6463_s0 + $0xf8] sm:$0xf0] }
  0xd6   :  { %2619 = vmatpush.bf16.msra.mxu0 %v4951_v28  ;;  %v3432_v28 = vor.u32 %v4755_v21, %v3431_v20 }
  0xd7   :  { %2633 = vmatpush.bf16.msra.mxu1 %v4959_v29  ;;  %v3436_v29 = vor.u32 %v4739_v22, %v3433_v23 }
  0xd8   :  { %2647 = vmatpush.bf16.msra.mxu2 %v4967_v30  ;;  %v2287_v30 = vpop.f32.mrf.mxu0 }
  0xd9   :  { %2661 = vmatpush.bf16.msra.mxu3 %v4975_v31  ;;  %v3440_v31 = vor.u32 %v4756_v25, %v3439_v24 }
  0xda   :  { %2620 = vmatpush.bf16.msra.mxu0 %v4950_v32  ;;  %v3444_v32 = vor.u32 %v4740_v26, %v3441_v27 }
  0xdb   :  { %2634 = vmatpush.bf16.msra.mxu1 %v4958_v33  ;;  %v2301_v33 = vpop.f32.mrf.mxu1 }
  0xdc   :  { %2648 = vmatpush.bf16.msra.mxu2 %v4966_v34  ;;  %v2315_v34 = vpop.f32.mrf.mxu2 }
  0xdd   :  { %2662 = vmatpush.bf16.msra.mxu3 %v4974_v35  ;;  %v2329_v35 = vpop.f32.mrf.mxu3 }
  0xde   :  { %2621 = vmatpush.bf16.msra.mxu0 %v4949_v36 }
  0xdf   :  { %2635 = vmatpush.bf16.msra.mxu1 %v4957_v37 }
  0xe0   :  { %2649 = vmatpush.bf16.msra.mxu2 %v4965_v38  ;;  %v2289_v36 = vpop.f32.mrf.mxu0 }
  0xe1   :  { %2663 = vmatpush.bf16.msra.mxu3 %v4973_v39  ;;  %2622 = vmatmul.bf16.vlgmr.msra.gmra.mxu0 %v3416_v52 }
  0xe2   :  { %2670 = vmatpush.bf16.msrb.mxu0 %v4988_v40  ;;  %2636 = vmatmul.bf16.vlgmr.msra.gmra.mxu1 %v3420_v54 }
  0xe3   :  { %2684 = vmatpush.bf16.msrb.mxu1 %v4996_v41  ;;  %2650 = vmatmul.bf16.vlgmr.msra.gmra.mxu2 %v3424_v53  ;;  %v2303_v37 = vpop.f32.mrf.mxu1 }
  0xe4   :  { %2698 = vmatpush.bf16.msrb.mxu2 %v5004_v50  ;;  %2664 = vmatmul.bf16.vlgmr.msra.gmra.mxu3 %v3428_v55  ;;  %v2317_v38 = vpop.f32.mrf.mxu2  ;;  %v2288_v50 = vadd.f32 %v5077_v46, %v2287_v30  ;;  %v4527_v30 = vld [vmem:[%s6465_s3 + $0x70] sm:$0xf] }
  0xe5   :  { %2712 = vmatpush.bf16.msrb.mxu3 %v5012_v51  ;;  %v2331_v39 = vpop.f32.mrf.mxu3 }
  0xe6   :  { %2671 = vmatpush.bf16.msrb.mxu0 %v4987_v56  ;;  %v2302_v52 = vadd.f32 %v2301_v33, %v2288_v50 }
  0xe7   :  { %2685 = vmatpush.bf16.msrb.mxu1 %v4995_v57  ;;  %v2290_v57 = vadd.f32 %v5077_v46, %v2289_v36  ;;  %v5026_v36 = vld [vmem:[%s6465_s3 + $0x64] sm:$0xf0] }
  0xe8   :  { %2699 = vmatpush.bf16.msrb.mxu2 %v5003_v58  ;;  %v2343_v40 = vpop.f32.mrf.mxu0  ;;  %v2316_v55 = vadd.f32 %v2315_v34, %v2302_v52  ;;  %v4529_v34 = vld [vmem:[%s6465_s3 + $0x78] sm:$0xf0] }
  0xe9   :  { %2713 = vmatpush.bf16.msrb.mxu3 %v5011_v59 }
  0xea   :  { %2672 = vmatpush.bf16.msrb.mxu0 %v4986_v60  ;;  %v2330_v59 = vadd.f32 %v2329_v35, %v2316_v55  ;;  %v2304_v60 = vadd.f32 %v2303_v37, %v2290_v57  ;;  %v4519_v35 = vld [vmem:[%s6465_s3 + $0x60] sm:$0xf]  ;;  %v5023_v55 = vld [vmem:[%s6465_s3 + $0x54] sm:$0xf] }
  0xeb   :  { %2686 = vmatpush.bf16.msrb.mxu1 %v4994_v61  ;;  %v2357_v41 = vpop.f32.mrf.mxu1 }
  0xec   :  { %2700 = vmatpush.bf16.msrb.mxu2 %v5002_v62  ;;  %v2371_v42 = vpop.f32.mrf.mxu2 }
  0xed   :  { %2714 = vmatpush.bf16.msrb.mxu3 %v5010_v63  ;;  %v2385_v43 = vpop.f32.mrf.mxu3  ;;  %v2344_v63 = vadd.f32 %v2343_v40, %v2330_v59  ;;  %v4521_v40 = vld [vmem:[%s6465_s3 + $0x68] sm:$0xf0]  ;;  %v4513_v59 = vld [vmem:[%s6465_s3 + $0x58] sm:$0xf0] }
  0xee   :  { %2673 = vmatpush.bf16.msrb.mxu0 %v4985_v0 }
  0xef   :  { %2687 = vmatpush.bf16.msrb.mxu1 %v4993_v1  ;;  %v2318_v1 = vadd.f32 %v2317_v38, %v2304_v60  ;;  %v4516_v60 = vor.u32 %v5023_v55, %v4513_v59  ;;  %v5044_v55 = vld [vmem:[%s6466_s5 + $0x74] sm:$0xf0]  ;;  %v5043_v59 = vld [vmem:[%s6466_s5 + $0x74] sm:$0xf] }
  0xf0   :  { %2701 = vmatpush.bf16.msrb.mxu2 %v5001_v2  ;;  %v2345_v44 = vpop.f32.mrf.mxu0 }
  0xf1   :  { %2715 = vmatpush.bf16.msrb.mxu3 %v5009_v3  ;;  %v2358_v3 = vadd.f32 %v2357_v41, %v2344_v63  ;;  %v5022_v63 = vld [vmem:[%s6465_s3 + $0x44] sm:$0xf0] }
  0xf2   :  { %2674 = vmatpush.bf16.msrb.mxu0 %v4984_v4  ;;  %v2332_v4 = vadd.f32 %v2331_v39, %v2318_v1  ;;  %v5025_v39 = vld [vmem:[%s6465_s3 + $0x64] sm:$0xf] }
  0xf3   :  { %2688 = vmatpush.bf16.msrb.mxu1 %v4992_v5  ;;  %v2359_v45 = vpop.f32.mrf.mxu1 }
  0xf4   :  { %2702 = vmatpush.bf16.msrb.mxu2 %v5000_v6  ;;  %v2373_v47 = vpop.f32.mrf.mxu2 }
  0xf5   :  { %2716 = vmatpush.bf16.msrb.mxu3 %v5008_v7  ;;  %v2387_v48 = vpop.f32.mrf.mxu3  ;;  %v2372_v7 = vadd.f32 %v2371_v42, %v2358_v3 }
  0xf6   :  { %2675 = vmatpush.bf16.msrb.mxu0 %v4983_v8  ;;  %v2346_v8 = vadd.f32 %v2345_v44, %v2332_v4 }
  0xf7   :  { %2689 = vmatpush.bf16.msrb.mxu1 %v4991_v9 }
  0xf8   :  { %2703 = vmatpush.bf16.msrb.mxu2 %v4999_v10  ;;  %v2399_v49 = vpop.f32.mrf.mxu0  ;;  %v2386_v10 = vadd.f32 %v2385_v43, %v2372_v7  ;;  %v4520_v43 = vor.u32 %v5026_v36, %v4519_v35  ;;  %v4481_v36 = vld [vmem:[%s6465_s3 + $0x18] sm:$0xf0] }
  0xf9   :  { %2717 = vmatpush.bf16.msrb.mxu3 %v5007_v11  ;;  %v2360_v11 = vadd.f32 %v2359_v45, %v2346_v8  ;;  %v4524_v45 = vor.u32 %v5025_v39, %v4521_v40 }
  0xfa   :  { %2676 = vmatpush.bf16.msrb.mxu0 %v4982_v12 }
  0xfb   :  { %2690 = vmatpush.bf16.msrb.mxu1 %v4990_v13  ;;  %v2413_v51 = vpop.f32.mrf.mxu1  ;;  %v2400_v13 = vadd.f32 %v2399_v49, %v2386_v10  ;;  %v4495_v10 = vld [vmem:[%s6465_s3 + $0x30] sm:$0xf] }
  0xfc   :  { %2704 = vmatpush.bf16.msrb.mxu2 %v4998_v14  ;;  %v2427_v53 = vpop.f32.mrf.mxu2  ;;  %v2374_v14 = vadd.f32 %v2373_v47, %v2360_v11  ;;  %v5020_v11 = vld [vmem:[%s6465_s3 + $0x34] sm:$0xf0] }
  0xfd   :  { %2718 = vmatpush.bf16.msrb.mxu3 %v5006_v15  ;;  %v2441_v54 = vpop.f32.mrf.mxu3 }
  0xfe   :  { %2677 = vmatpush.bf16.msrb.mxu0 %v4981_v16 }
  0xff   :  { %2691 = vmatpush.bf16.msrb.mxu1 %v4989_v17  ;;  %v2414_v17 = vadd.f32 %v2413_v51, %v2400_v13  ;;  %v4496_v13 = vor.u32 %v5020_v11, %v4495_v10 }
 0x100   :  { %2705 = vmatpush.bf16.msrb.mxu2 %v4997_v18  ;;  %v2401_v56 = vpop.f32.mrf.mxu0 }
 0x101   :  { %2719 = vmatpush.bf16.msrb.mxu3 %v5005_v19  ;;  %2678 = vmatmul.bf16.vlgmr.msrb.gmra.mxu0 %v3432_v28  ;;  %v2388_v19 = vadd.f32 %v2387_v48, %v2374_v14  ;;  %v2428_v20 = vadd.f32 %v2427_v53, %v2414_v17  ;;  %v4511_v53 = vld [vmem:[%s6465_s3 + $0x50] sm:$0xf]  ;;  %v4497_v14 = vld [vmem:[%s6465_s3 + $0x38] sm:$0xf0] }
 0x102   :  { %2692 = vmatmul.bf16.vlgmr.msrb.gmra.mxu1 %v3436_v29 }
 0x103   :  { %2706 = vmatmul.bf16.vlgmr.msrb.gmra.mxu2 %v3440_v31  ;;  %v2415_v58 = vpop.f32.mrf.mxu1  ;;  %v2402_v21 = vadd.f32 %v2401_v56, %v2388_v19  ;;  %v2442_v23 = vadd.f32 %v2441_v54, %v2428_v20  ;;  %v5028_v31 = vld [vmem:[%s6465_s3 + $0x74] sm:$0xf0]  ;;  %v4487_v20 = vld [vmem:[%s6465_s3 + $0x20] sm:$0xf] }
 0x104   :  { %2720 = vmatmul.bf16.vlgmr.msrb.gmra.mxu3 %v3444_v32  ;;  %v2429_v61 = vpop.f32.mrf.mxu2  ;;  %v5027_v32 = vld [vmem:[%s6465_s3 + $0x74] sm:$0xf]  ;;  %v4528_v33 = vor.u32 %v5028_v31, %v4527_v30  ;;  %v5024_v54 = vld [vmem:[%s6465_s3 + $0x54] sm:$0xf0]  ;;  %v4479_v31 = vld [vmem:[%s6465_s3 + $0x10] sm:$0xf] }
 0x105   :  { %v2443_v62 = vpop.f32.mrf.mxu3  ;;  %v2416_v24 = vadd.f32 %v2415_v58, %v2402_v21  ;;  %v4532_v38 = vor.u32 %v5027_v32, %v4529_v34  ;;  %v4512_v58 = vor.u32 %v5024_v54, %v4511_v53  ;;  %v5018_v21 = vld [vmem:[%s6465_s3 + $0x24] sm:$0xf0]  ;;  %v5016_v32 = vld [vmem:[%s6465_s3 + $0x14] sm:$0xf0]  ;;  %v4591_v54 = vld [vmem:[%s6466_s5 + $0x70] sm:$0xf] }
 0x106   :  { %2833 = vmatpush.bf16.msra.mxu0 %v4528_v33  ;;  %v5015_v33 = vld [vmem:[%s6465_s3 + $0x14] sm:$0xf]  ;;  %v4480_v35 = vor.u32 %v5016_v32, %v4479_v31 }
 0x107   :  { %v2430_v28 = vadd.f32 %v2429_v61, %v2416_v24  ;;  %2847 = vmatpush.bf16.msra.mxu1 %v4532_v38  ;;  %v4488_v24 = vor.u32 %v5018_v21, %v4487_v20  ;;  %v4484_v38 = vor.u32 %v5015_v33, %v4481_v36  ;;  %v4639_v21 = vld [vmem:[%s6466_s5 + $0xd0] sm:$0xf]  ;;  %v4631_v36 = vld [vmem:[%s6466_s5 + $0xc0] sm:$0xf] }
 0x108   :  { %v2455_v0 = vpop.f32.mrf.mxu0 }
 0x109   :  { %v2456_v27 = vadd.f32 %v2455_v0, %v2442_v23  ;;  %v2444_v41 = vadd.f32 %v2443_v62, %v2430_v28  ;;  %v4503_v62 = vld [vmem:[%s6465_s3 + $0x40] sm:$0xf]  ;;  %v5021_v0 = vld [vmem:[%s6465_s3 + $0x44] sm:$0xf] }
 0x10a   :  { %2834 = vmatpush.bf16.msra.mxu0 %v4520_v43  ;;  %v4504_v4 = vor.u32 %v5022_v63, %v4503_v62  ;;  %v5013_v43 = vld [vmem:[%s6465_s3 + $0x4] sm:$0xf] }
 0x10b   :  { %v2469_v2 = vpop.f32.mrf.mxu1  ;;  %2848 = vmatpush.bf16.msra.mxu1 %v4524_v45  ;;  %v4473_v45 = vld [vmem:[%s6465_s3 + $0x8] sm:$0xf0] }
 0x10c   :  { %v2483_v5 = vpop.f32.mrf.mxu2  ;;  %v2470_v37 = vadd.f32 %v2469_v2, %v2456_v27 }
 0x10d   :  { %v2497_v6 = vpop.f32.mrf.mxu3 }
 0x10e   :  { %v2484_v44 = vadd.f32 %v2483_v5, %v2470_v37  ;;  %2835 = vmatpush.bf16.msra.mxu0 %v4512_v58  ;;  %v4505_v5 = vld [vmem:[%s6465_s3 + $0x48] sm:$0xf0]  ;;  %v5060_v58 = vld [vmem:[%s6466_s5 + $0xf4] sm:$0xf0] }
 0x10f   :  { %2849 = vmatpush.bf16.msra.mxu1 %v4516_v60  ;;  %v4508_v7 = vor.u32 %v5021_v0, %v4505_v5  ;;  %v4593_v60 = vld [vmem:[%s6466_s5 + $0x78] sm:$0xf0]  ;;  %v5059_v0 = vld [vmem:[%s6466_s5 + $0xf4] sm:$0xf] }
 0x110   :  { %v2457_v9 = vpop.f32.mrf.mxu0  ;;  %v2498_v49 = vadd.f32 %v2497_v6, %v2484_v44  ;;  %v4596_v63 = vor.u32 %v5043_v59, %v4593_v60 }
 0x111   :  { %v2458_v46 = vadd.f32 %v2457_v9, %v2444_v41  ;;  %v4471_v41 = vld [vmem:[%s6465_s3] sm:$0xf] }
 0x112   :  { %2836 = vmatpush.bf16.msra.mxu0 %v4504_v4 }
 0x113   :  { %v2471_v12 = vpop.f32.mrf.mxu1  ;;  %2850 = vmatpush.bf16.msra.mxu1 %v4508_v7  ;;  %v4647_v7 = vld [vmem:[%s6466_s5 + $0xe0] sm:$0xf] }
 0x114   :  { %v2485_v15 = vpop.f32.mrf.mxu2  ;;  %v2472_v51 = vadd.f32 %v2471_v12, %v2458_v46  ;;  %v5019_v12 = vld [vmem:[%s6465_s3 + $0x34] sm:$0xf] }
 0x115   :  { %v2499_v16 = vpop.f32.mrf.mxu3 }
 0x116   :  { %v2486_v56 = vadd.f32 %v2485_v15, %v2472_v51  ;;  %2837 = vmatpush.bf16.msra.mxu0 %v4496_v13  ;;  %v4585_v13 = vld [vmem:[%s6466_s5 + $0x68] sm:$0xf0] }
 0x118   :  { %v2500_v1 = vadd.f32 %v2499_v16, %v2486_v56  ;;  %v4500_v16 = vor.u32 %v5019_v12, %v4497_v14  ;;  %v4655_v56 = vld [vmem:[%s6466_s5 + $0xf0] sm:$0xf]  ;;  %v5041_v12 = vld [vmem:[%s6466_s5 + $0x64] sm:$0xf] }
 0x119   :  { %v4656_v62 = vor.u32 %v5060_v58, %v4655_v56  ;;  %v5057_v14 = vld [vmem:[%s6466_s5 + $0xe4] sm:$0xf] }
 0x11a   :  { %2851 = vmatpush.bf16.msra.mxu1 %v4500_v16  ;;  %2838 = vmatpush.bf16.msra.mxu0 %v4488_v24  ;;  %v4649_v16 = vld [vmem:[%s6466_s5 + $0xe8] sm:$0xf0] }
 0x11b   :  { %3079 = vmatpush.bf16.msra.mxu3 %v4656_v62  ;;  %v4652_v20 = vor.u32 %v5057_v14, %v4649_v16  ;;  %v4625_v14 = vld [vmem:[%s6466_s5 + $0xb8] sm:$0xf0]  ;;  %v4551_v16 = vld [vmem:[%s6466_s5 + $0x20] sm:$0xf] }
 0x11e   :  { %v2511_v18 = vpop.f32.mrf.mxu0  ;;  %2839 = vmatpush.bf16.msra.mxu0 %v4480_v35  ;;  %v5038_v35 = vld [vmem:[%s6466_s5 + $0x44] sm:$0xf0] }
 0x11f   :  { %v2525_v22 = vpop.f32.mrf.mxu1  ;;  %v2512_v52 = vadd.f32 %v2511_v18, %v2498_v49 }
 0x121   :  { %v2526_v61 = vadd.f32 %v2525_v22, %v2512_v52  ;;  %v5017_v22 = vld [vmem:[%s6465_s3 + $0x24] sm:$0xf] }
 0x126   :  { %v2539_v25 = vpop.f32.mrf.mxu2  ;;  %v2513_v29 = vpop.f32.mrf.mxu0 }
 0x127   :  { %v2553_v26 = vpop.f32.mrf.mxu3  ;;  %v2527_v42 = vpop.f32.mrf.mxu1  ;;  %v2540_v6 = vadd.f32 %v2539_v25, %v2526_v61  ;;  %v2514_v8 = vadd.f32 %v2513_v29, %v2500_v1  ;;  %v4489_v25 = vld [vmem:[%s6465_s3 + $0x28] sm:$0xf0]  ;;  %v4657_v1 = vld [vmem:[%s6466_s5 + $0xf8] sm:$0xf0] }
 0x128   :  { %v4660_v5 = vor.u32 %v5059_v0, %v4657_v1 }
 0x129   :  { %v2554_v15 = vadd.f32 %v2553_v26, %v2540_v6  ;;  %v2528_v17 = vadd.f32 %v2527_v42, %v2514_v8  ;;  %v4492_v26 = vor.u32 %v5017_v22, %v4489_v25  ;;  %v5014_v42 = vld [vmem:[%s6465_s3 + $0x4] sm:$0xf0]  ;;  %v5056_v22 = vld [vmem:[%s6466_s5 + $0xd4] sm:$0xf0] }
 0x12a   :  { %v4472_v44 = vor.u32 %v5014_v42, %v4471_v41  ;;  %v5042_v6 = vld [vmem:[%s6466_s5 + $0x64] sm:$0xf0]  ;;  %v4640_v32 = vor.u32 %v5056_v22, %v4639_v21  ;;  %v5033_v21 = vld [vmem:[%s6466_s5 + $0x24] sm:$0xf]  ;;  %v4553_v22 = vld [vmem:[%s6466_s5 + $0x28] sm:$0xf0] }
 0x12b   :  { %2852 = vmatpush.bf16.msra.mxu1 %v4492_v26  ;;  %v5058_v8 = vld [vmem:[%s6466_s5 + $0xe4] sm:$0xf0] }
 0x12c   :  { %2840 = vmatpush.bf16.msra.mxu0 %v4472_v44  ;;  %v4648_v11 = vor.u32 %v5058_v8, %v4647_v7  ;;  %v4633_v44 = vld [vmem:[%s6466_s5 + $0xc8] sm:$0xf0]  ;;  %v5052_v8 = vld [vmem:[%s6466_s5 + $0xb4] sm:$0xf0] }
 0x12e   :  { %v2541_v47 = vpop.f32.mrf.mxu2  ;;  %3080 = vmatpush.bf16.msra.mxu3 %v4648_v11 }
 0x12f   :  { %v2555_v48 = vpop.f32.mrf.mxu3  ;;  %v2542_v23 = vadd.f32 %v2541_v47, %v2528_v17  ;;  %2853 = vmatpush.bf16.msra.mxu1 %v4484_v38  ;;  %v4476_v47 = vor.u32 %v5013_v43, %v4473_v45  ;;  %v4575_v17 = vld [vmem:[%s6466_s5 + $0x50] sm:$0xf]  ;;  %v5054_v38 = vld [vmem:[%s6466_s5 + $0xc4] sm:$0xf0]  ;;  %v5053_v43 = vld [vmem:[%s6466_s5 + $0xc4] sm:$0xf] }
 0x130   :  { %3093 = vmatpush.bf16.msrb.mxu0 %v4596_v63 }
 0x131   :  { %v2556_v34 = vadd.f32 %v2555_v48, %v2542_v23  ;;  %v5039_v23 = vld [vmem:[%s6466_s5 + $0x54] sm:$0xf] }
 0x132   :  { %3081 = vmatpush.bf16.msra.mxu3 %v4640_v32  ;;  %v5048_v32 = vld [vmem:[%s6466_s5 + $0x94] sm:$0xf0] }
 0x133   :  { %2854 = vmatpush.bf16.msra.mxu1 %v4476_v47 }
 0x137   :  { %3107 = vmatpush.bf16.msrb.mxu1 %v4660_v5  ;;  %v5036_v5 = vld [vmem:[%s6466_s5 + $0x34] sm:$0xf0] }
 0x13b   :  { %3108 = vmatpush.bf16.msrb.mxu1 %v4652_v20  ;;  %v5050_v20 = vld [vmem:[%s6466_s5 + $0xa4] sm:$0xf0] }
 0x13e   :  { %v2567_v50 = vpop.f32.mrf.mxu0 }
 0x13f   :  { %v2581_v57 = vpop.f32.mrf.mxu1  ;;  %v2568_v19 = vadd.f32 %v2567_v50, %v2554_v15  ;;  %v4588_v15 = vor.u32 %v5041_v12, %v4585_v13  ;;  %v5051_v13 = vld [vmem:[%s6466_s5 + $0xb4] sm:$0xf] }
 0x141   :  { %v2582_v29 = vadd.f32 %v2581_v57, %v2568_v19  ;;  %v4592_v57 = vor.u32 %v5044_v55, %v4591_v54  ;;  %3094 = vmatpush.bf16.msrb.mxu0 %v4588_v15  ;;  %v4628_v15 = vor.u32 %v5051_v13, %v4625_v14  ;;  %v5065_v13 = vld [vmem:[%s6468_s7 + $0x20] sm:$0xff]  ;;  %v5071_v14 = vld [vmem:[%s6468_s7 + $0x50] sm:$0xff] }
 0x143   :  { %3065 = vmatpush.bf16.msra.mxu2 %v4592_v57 }
 0x146   :  { %v2595_v2 = vpop.f32.mrf.mxu2  ;;  %v2569_v9 = vpop.f32.mrf.mxu0 }
 0x147   :  { %v2609_v3 = vpop.f32.mrf.mxu3  ;;  %v2583_v18 = vpop.f32.mrf.mxu1  ;;  %v2596_v37 = vadd.f32 %v2595_v2, %v2582_v29  ;;  %v2570_v39 = vadd.f32 %v2569_v9, %v2556_v34  ;;  %v4583_v2 = vld [vmem:[%s6466_s5 + $0x60] sm:$0xf]  ;;  %v4641_v29 = vld [vmem:[%s6466_s5 + $0xd8] sm:$0xf0] }
 0x148   :  { %v4584_v10 = vor.u32 %v5042_v6, %v4583_v2  ;;  %v4567_v34 = vld [vmem:[%s6466_s5 + $0x40] sm:$0xf]  ;;  %v4623_v6 = vld [vmem:[%s6466_s5 + $0xb0] sm:$0xf] }
 0x149   :  { %v2610_v46 = vadd.f32 %v2609_v3, %v2596_v37  ;;  %v2584_v48 = vadd.f32 %v2583_v18, %v2570_v39  ;;  %v5040_v18 = vld [vmem:[%s6466_s5 + $0x54] sm:$0xf0]  ;;  %v5037_v39 = vld [vmem:[%s6466_s5 + $0x44] sm:$0xf]  ;;  %v4624_v11 = vor.u32 %v5052_v8, %v4623_v6 }
 0x14a   :  { %3066 = vmatpush.bf16.msra.mxu2 %v4584_v10  ;;  %v4576_v26 = vor.u32 %v5040_v18, %v4575_v17  ;;  %v4561_v10 = vld [vmem:[%s6466_s5 + $0x38] sm:$0xf0]  ;;  %v5034_v17 = vld [vmem:[%s6466_s5 + $0x24] sm:$0xf0]  ;;  %v4615_v18 = vld [vmem:[%s6466_s5 + $0xa0] sm:$0xf] }
 0x14e   :  { %v2597_v27 = vpop.f32.mrf.mxu2  ;;  %3067 = vmatpush.bf16.msra.mxu2 %v4576_v26  ;;  %v4617_v26 = vld [vmem:[%s6466_s5 + $0xa8] sm:$0xf0] }
 0x14f   :  { %v2611_v28 = vpop.f32.mrf.mxu3  ;;  %v2598_v52 = vadd.f32 %v2597_v27, %v2584_v48  ;;  %v4577_v27 = vld [vmem:[%s6466_s5 + $0x58] sm:$0xf0]  ;;  %v4632_v48 = vor.u32 %v5054_v38, %v4631_v36 }
 0x150   :  { %v4580_v33 = vor.u32 %v5039_v23, %v4577_v27  ;;  %v4616_v23 = vor.u32 %v5050_v20, %v4615_v18  ;;  %v4609_v38 = vld [vmem:[%s6466_s5 + $0x98] sm:$0xf0]  ;;  %v5069_v18 = vld [vmem:[%s6468_s7 + $0x40] sm:$0xff] }
 0x151   :  { %v2612_v3 = vadd.f32 %v2611_v28, %v2598_v52  ;;  %v5055_v28 = vld [vmem:[%s6466_s5 + $0xd4] sm:$0xf]  ;;  %3082 = vmatpush.bf16.msra.mxu3 %v4632_v48  ;;  %v5061_v20 = vld [vmem:[%s6468_s7] sm:$0xff] }
 0x152   :  { %v4644_v37 = vor.u32 %v5055_v28, %v4641_v29  ;;  %3095 = vmatpush.bf16.msrb.mxu0 %v4580_v33  ;;  %v4543_v28 = vld [vmem:[%s6466_s5 + $0x10] sm:$0xf]  ;;  %v5032_v29 = vld [vmem:[%s6466_s5 + $0x14] sm:$0xf0]  ;;  %v5031_v33 = vld [vmem:[%s6466_s5 + $0x14] sm:$0xf] }
 0x154   :  { %3109 = vmatpush.bf16.msrb.mxu1 %v4644_v37  ;;  %v5047_v37 = vld [vmem:[%s6466_s5 + $0x94] sm:$0xf] }
 0x155   :  { %3083 = vmatpush.bf16.msra.mxu3 %v4624_v11  ;;  %v5066_v11 = vld [vmem:[%s6468_s7 + $0x28] sm:$0xff] }
 0x159   :  { %3084 = vmatpush.bf16.msra.mxu3 %v4616_v23 }
 0x15e   :  { %v2623_v30 = vpop.f32.mrf.mxu0 }
 0x15f   :  { %v2637_v40 = vpop.f32.mrf.mxu1  ;;  %v2624_v51 = vadd.f32 %v2623_v30, %v2610_v46  ;;  %v4568_v46 = vor.u32 %v5038_v35, %v4567_v34  ;;  %v4545_v34 = vld [vmem:[%s6466_s5 + $0x18] sm:$0xf0] }
 0x160   :  { %v4548_v36 = vor.u32 %v5031_v33, %v4545_v34 }
 0x161   :  { %v2638_v61 = vadd.f32 %v2637_v40, %v2624_v51  ;;  %v4569_v40 = vld [vmem:[%s6466_s5 + $0x48] sm:$0xf0]  ;;  %3068 = vmatpush.bf16.msra.mxu2 %v4568_v46 }
 0x162   :  { %v4537_v46 = vld [vmem:[%s6466_s5 + $0x8] sm:$0xf0] }
 0x166   :  { %v2651_v49 = vpop.f32.mrf.mxu2  ;;  %v2625_v53 = vpop.f32.mrf.mxu0 }
 0x167   :  { %v2665_v50 = vpop.f32.mrf.mxu3  ;;  %v2639_v4 = vpop.f32.mrf.mxu1  ;;  %v2652_v9 = vadd.f32 %v2651_v49, %v2638_v61  ;;  %v2626_v19 = vadd.f32 %v2625_v53, %v2612_v3  ;;  %v4572_v49 = vor.u32 %v5037_v39, %v4569_v40  ;;  %v4612_v39 = vor.u32 %v5047_v37, %v4609_v38  ;;  %v4535_v40 = vld [vmem:[%s6466_s5] sm:$0xf] }
 0x169   :  { %v2666_v30 = vadd.f32 %v2665_v50, %v2652_v9  ;;  %v2640_v41 = vadd.f32 %v2639_v4, %v2626_v19  ;;  %v4636_v50 = vor.u32 %v5053_v43, %v4633_v44  ;;  %3096 = vmatpush.bf16.msrb.mxu0 %v4572_v49  ;;  %v4559_v4 = vld [vmem:[%s6466_s5 + $0x30] sm:$0xf]  ;;  %v5035_v9 = vld [vmem:[%s6466_s5 + $0x34] sm:$0xf]  ;;  %v4552_v19 = vor.u32 %v5034_v17, %v4551_v16  ;;  %v5046_v44 = vld [vmem:[%s6466_s5 + $0x84] sm:$0xf0] }
 0x16a   :  { %v4560_v7 = vor.u32 %v5036_v5, %v4559_v4  ;;  %v4564_v12 = vor.u32 %v5035_v9, %v4561_v10  ;;  %v5045_v49 = vld [vmem:[%s6466_s5 + $0x84] sm:$0xf]  ;;  %v5070_v16 = vld [vmem:[%s6468_s7 + $0x48] sm:$0xff]  ;;  %v5063_v17 = vld [vmem:[%s6468_s7 + $0x10] sm:$0xff] }
 0x16b   :  { %3110 = vmatpush.bf16.msrb.mxu1 %v4636_v50  ;;  %v4601_v50 = vld [vmem:[%s6466_s5 + $0x88] sm:$0xf0] }
 0x16c   :  { %3069 = vmatpush.bf16.msra.mxu2 %v4560_v7 }
 0x16d   :  { %3097 = vmatpush.bf16.msrb.mxu0 %v4564_v12  ;;  %v5072_v12 = vld [vmem:[%s6468_s7 + $0x58] sm:$0xff] }
 0x16e   :  { %v2653_v24 = vpop.f32.mrf.mxu2 }
 0x16f   :  { %v2667_v25 = vpop.f32.mrf.mxu3  ;;  %v2654_v47 = vadd.f32 %v2653_v24, %v2640_v41  ;;  %3111 = vmatpush.bf16.msrb.mxu1 %v4628_v15  ;;  %v4556_v24 = vor.u32 %v5033_v21, %v4553_v22  ;;  %v5030_v41 = vld [vmem:[%s6466_s5 + $0x4] sm:$0xf0]  ;;  %v5064_v15 = vld [vmem:[%s6468_s7 + $0x18] sm:$0xff]  ;;  %v2899_v21 = vld [vmem:[%s6470_s6] sm:$0x3] }
 0x170   :  { %3070 = vmatpush.bf16.msra.mxu2 %v4552_v19  ;;  %v4536_v43 = vor.u32 %v5030_v41, %v4535_v40  ;;  %v5062_v19 = vld [vmem:[%s6468_s7 + $0x8] sm:$0xff] }
 0x171   :  { %v2668_v54 = vadd.f32 %v2667_v25, %v2654_v47  ;;  %v5049_v25 = vld [vmem:[%s6466_s5 + $0xa4] sm:$0xf]  ;;  %3098 = vmatpush.bf16.msrb.mxu0 %v4556_v24  ;;  %v2902_v24 = vperm.slane %v2899_v21, 1 }
 0x172   :  { %v4620_v27 = vor.u32 %v5049_v25, %v4617_v26 }
 0x174   :  { %3112 = vmatpush.bf16.msrb.mxu1 %v4620_v27 }
 0x175   :  { %3099 = vmatpush.bf16.msrb.mxu0 %v4548_v36 }
 0x178   :  { %3113 = vmatpush.bf16.msrb.mxu1 %v4612_v39 }
 0x17e   :  { %v2679_v31 = vpop.f32.mrf.mxu0 }
 0x17f   :  { %v2680_v42 = vadd.f32 %v2679_v31, %v2666_v30  ;;  %v2693_v45 = vpop.f32.mrf.mxu1  ;;  %v4607_v30 = vld [vmem:[%s6466_s5 + $0x90] sm:$0xf]  ;;  %v4544_v31 = vor.u32 %v5032_v29, %v4543_v28  ;;  %v2901_v28 = vperm.slane %v2899_v21, 0 }
 0x180   :  { %v4608_v35 = vor.u32 %v5048_v32, %v4607_v30 }
 0x181   :  { %v2694_v51 = vadd.f32 %v2693_v45, %v2680_v42  ;;  %3071 = vmatpush.bf16.msra.mxu2 %v4544_v31  ;;  %v4599_v42 = vld [vmem:[%s6466_s5 + $0x80] sm:$0xf]  ;;  %v5029_v45 = vld [vmem:[%s6466_s5 + $0x4] sm:$0xf] }
 0x182   :  { %3085 = vmatpush.bf16.msra.mxu3 %v4608_v35  ;;  %v4600_v47 = vor.u32 %v5046_v44, %v4599_v42  ;;  %v4540_v48 = vor.u32 %v5029_v45, %v4537_v46  ;;  %v5078_v46 = vld [vmem:[%s6471_s8] ss:$0 sm:$0xff] }
 0x184   :  { %3100 = vmatpush.bf16.msrb.mxu0 %v4540_v48 }
 0x185   :  { %3072 = vmatpush.bf16.msra.mxu2 %v4536_v43 }
 0x186   :  { %v2707_v52 = vpop.f32.mrf.mxu2  ;;  %v2681_v56 = vpop.f32.mrf.mxu0  ;;  %3086 = vmatpush.bf16.msra.mxu3 %v4600_v47 }
 0x187   :  { %v2721_v53 = vpop.f32.mrf.mxu3  ;;  %v2708_v55 = vadd.f32 %v2707_v52, %v2694_v51  ;;  %v2682_v58 = vadd.f32 %v2681_v56, %v2668_v54  ;;  %v2695_v60 = vpop.f32.mrf.mxu1  ;;  %v4604_v51 = vor.u32 %v5045_v49, %v4601_v50  ;;  %v5076_v52 = vld [vmem:[%s6468_s7 + $0x78] sm:$0xff]  ;;  %v5075_v54 = vld [vmem:[%s6468_s7 + $0x70] sm:$0xff]  ;;  %v5074_v56 = vld [vmem:[%s6468_s7 + $0x68] sm:$0xff] }
 0x189   :  { %v2722_v57 = vadd.f32 %v2721_v53, %v2708_v55  ;;  %v2696_v61 = vadd.f32 %v2695_v60, %v2682_v58  ;;  %3114 = vmatpush.bf16.msrb.mxu1 %v4604_v51  ;;  %v5068_v53 = vld [vmem:[%s6468_s7 + $0x38] sm:$0xff]  ;;  %v5067_v55 = vld [vmem:[%s6468_s7 + $0x30] sm:$0xff]  ;;  %v2747_v58 = vld [vmem:[%s6469_s4] sm:$0x3] }
 0x18a   :  { %3273 = vmatpush.bf16.msrb.mxu3 %v5076_v52  ;;  %3259 = vmatpush.bf16.msrb.mxu2 %v5068_v53 }
 0x18b   :  { %v2726_v59 = vmax.f32 %v2722_v57, 0.0  ;;  %v5073_v57 = vld [vmem:[%s6468_s7 + $0x60] sm:$0xff] }
 0x18d   :  { %2728 = vst [vmem:[%s6467_s10] sm:$0xff] %v2726_v59 }
 0x18e   :  { %v2709_v62 = vpop.f32.mrf.mxu2  ;;  %3274 = vmatpush.bf16.msrb.mxu3 %v5075_v54  ;;  %3260 = vmatpush.bf16.msrb.mxu2 %v5067_v55 }
 0x18f   :  { %v2710_v63 = vadd.f32 %v2709_v62, %v2696_v61  ;;  %v2723_v0 = vpop.f32.mrf.mxu3  ;;  %v2749_v61 = vperm.slane %v2747_v58, 0  ;;  %v2750_v62 = vperm.slane %v2747_v58, 1 }
 0x191   :  { %v2724_v1 = vadd.f32 %v2723_v0, %v2710_v63 }
 0x192   :  { %3275 = vmatpush.bf16.msrb.mxu3 %v5074_v56  ;;  %3261 = vmatpush.bf16.msrb.mxu2 %v5066_v11 }
 0x193   :  { %v2727_v2 = vmax.f32 %v2724_v1, 0.0 }
 0x195   :  { %2729 = vst [vmem:[%s6467_s10 + $0x8] sm:$0xff] %v2727_v2  ;;  %v2730_v3 = vpack.c.bf16 %v2727_v2, %v2726_v59 }
 0x196   :  { %3276 = vmatpush.bf16.msrb.mxu3 %v5073_v57  ;;  %3262 = vmatpush.bf16.msrb.mxu2 %v5065_v13 }
 0x197   :  { %2841 = vmatmul.bf16.vlgmr.msra.gmra.mxu0 %v2730_v3  ;;  %2855 = vmatmul.bf16.vlgmr.msra.gmra.mxu1 %v2730_v3 }
 0x19a   :  { %3277 = vmatpush.bf16.msrb.mxu3 %v5072_v12  ;;  %3263 = vmatpush.bf16.msrb.mxu2 %v5064_v15 }
 0x19e   :  { %3278 = vmatpush.bf16.msrb.mxu3 %v5071_v14  ;;  %3264 = vmatpush.bf16.msrb.mxu2 %v5063_v17 }
 0x1a2   :  { %3279 = vmatpush.bf16.msrb.mxu3 %v5070_v16  ;;  %3265 = vmatpush.bf16.msrb.mxu2 %v5062_v19 }
 0x1a6   :  { %3280 = vmatpush.bf16.msrb.mxu3 %v5069_v18  ;;  %3266 = vmatpush.bf16.msrb.mxu2 %v5061_v20 }
 0x214   :  { %v2842_v59 = vpop.f32.mrf.mxu0  ;;  %v2856_v60 = vpop.f32.mrf.mxu1 }
 0x215   :  { %v2843_v63 = vadd.f32 %v2842_v59, %v2749_v61  ;;  %v2857_v0 = vadd.f32 %v2856_v60, %v2750_v62 }
 0x217   :  { %v2861_v5 = vmax.f32 %v2843_v63, 0.0  ;;  %v2862_v6 = vmax.f32 %v2857_v0, 0.0 }
 0x21c   :  { %v2844_v1 = vpop.f32.mrf.mxu0  ;;  %v2858_v2 = vpop.f32.mrf.mxu1 }
 0x21d   :  { %v2845_v3 = vadd.f32 %v2844_v1, %v2749_v61  ;;  %v2859_v4 = vadd.f32 %v2858_v2, %v2750_v62 }
 0x21f   :  { %v2863_v7 = vmax.f32 %v2845_v3, 0.0  ;;  %v2864_v8 = vmax.f32 %v2859_v4, 0.0 }
 0x221   :  { %v2865_v9 = vpack.c.bf16 %v2863_v7, %v2861_v5  ;;  %v2866_v10 = vpack.c.bf16 %v2864_v8, %v2862_v6 }
 0x223   :  { %3073 = vmatmul.bf16.vlgmr.msra.gmra.mxu2 %v2865_v9  ;;  %3087 = vmatmul.bf16.vlgmr.msra.gmra.mxu3 %v2866_v10 }
 0x224   :  { %3101 = vmatmul.bf16.vlgmr.msrb.gmra.mxu0 %v2865_v9  ;;  %3115 = vmatmul.bf16.vlgmr.msrb.gmra.mxu1 %v2866_v10 }
 0x2a1   :  { %v3102_v22 = vpop.f32.mrf.mxu0  ;;  %v3116_v23 = vpop.f32.mrf.mxu1 }
 0x2a2   :  { %v3103_v25 = vadd.f32 %v3102_v22, %v2902_v24 }
 0x2a4   :  { %v3117_v30 = vadd.f32 %v3116_v23, %v3103_v25 }
 0x2a6   :  { %v3074_v26 = vpop.f32.mrf.mxu2  ;;  %v3088_v27 = vpop.f32.mrf.mxu3  ;;  %v3122_v35 = vmax.f32 %v3117_v30, 0.0 }
 0x2a7   :  { %v3075_v32 = vadd.f32 %v3074_v26, %v2901_v28 }
 0x2a9   :  { %v3104_v29 = vpop.f32.mrf.mxu0  ;;  %v3118_v33 = vpop.f32.mrf.mxu1  ;;  %v3089_v38 = vadd.f32 %v3088_v27, %v3075_v32 }
 0x2aa   :  { %v3105_v31 = vadd.f32 %v3104_v29, %v2902_v24 }
 0x2ab   :  { %v3121_v43 = vmax.f32 %v3089_v38, 0.0 }
 0x2ac   :  { %v3119_v34 = vadd.f32 %v3118_v33, %v3105_v31 }
 0x2ae   :  { %v3124_v36 = vmax.f32 %v3119_v34, 0.0  ;;  %v3076_v37 = vpop.f32.mrf.mxu2  ;;  %v3090_v41 = vpop.f32.mrf.mxu3 }
 0x2af   :  { %v3077_v39 = vadd.f32 %v3076_v37, %v2901_v28 }
 0x2b0   :  { %v3126_v40 = vpack.c.bf16 %v3124_v36, %v3122_v35 }
 0x2b1   :  { %v3091_v42 = vadd.f32 %v3090_v41, %v3077_v39 }
 0x2b2   :  { %3281 = vmatmul.bf16.vlgmr.msrb.gmra.mxu3 %v3126_v40 }
 0x2b3   :  { %v3123_v44 = vmax.f32 %v3091_v42, 0.0 }
 0x2b5   :  { %v3125_v45 = vpack.c.bf16 %v3123_v44, %v3121_v43 }
 0x2b7   :  { %3267 = vmatmul.bf16.vlgmr.msrb.gmra.mxu2 %v3125_v45 }
 0x335   :  { %v3282_v47 = vpop.f32.mrf.mxu3 }
 0x33a   :  { %v3268_v48 = vpop.f32.mrf.mxu2 }
 0x33b   :  { %v3269_v49 = vadd.f32 %v5078_v46, %v3268_v48 }
 0x33d   :  { %v3283_v50 = vadd.f32 %v3282_v47, %v3269_v49  ;;  %v3284_v53 = vpop.f32.mrf.mxu3 }
 0x33f   :  { %3287 = vmax.xlane.f32.xlu0 %v3283_v50 }
 0x342   :  { %v3270_v51 = vpop.f32.mrf.mxu2 }
 0x343   :  { %v3271_v52 = vadd.f32 %v5078_v46, %v3270_v51 }
 0x345   :  { %v3285_v54 = vadd.f32 %v3284_v53, %v3271_v52 }
 0x347   :  { %3289 = vmax.xlane.f32.xlu0 %v3285_v54 }
 0x3b2   :  { %v3288_v55 = vpop.xlane.xlu0 %3287 }
 0x3b3   :  { %v3291_v56 = vsub.f32 %v3283_v50, %v3288_v55 }
 0x3b5   :  { %v3293_v57 = vmul.f32 1.442695, %v3291_v56 }
 0x3b7   :  { %5079 = vpow2.f32 %v3293_v57 }
 0x3ba   :  { %v3290_v58 = vpop.xlane.xlu0 %3289 }
 0x3bb   :  { %v3292_v59 = vsub.f32 %v3285_v54, %v3290_v58 }
 0x3bd   :  { %v5080_v60 = vpop.eup %5079  ;;  %v3295_v61 = vmul.f32 1.442695, %v3292_v59 }
 0x3be   :  { %3297 = vadd.xlane.f32.xlu1 %v5080_v60 }
 0x3bf   :  { %5081 = vpow2.f32 %v3295_v61 }
 0x3c5   :  { %v5082_v62 = vpop.eup %5081 }
 0x3c6   :  { %3299 = vadd.xlane.f32.xlu1 %v5082_v62 }
 0x431   :  { %v3298_v63 = vpop.xlane.xlu1 %3297 }
 0x432   :  { %5083 = vlog2.f32 %v3298_v63 }
 0x438   :  { %v5084_v0 = vpop.eup %5083 }
 0x439   :  { %v3302_v1 = vmul.f32 0.6931472, %v5084_v0  ;;  %v3300_v2 = vpop.xlane.xlu1 %3299 }
 0x43a   :  { %5085 = vlog2.f32 %v3300_v2 }
 0x43b   :  { %v3305_v3 = vsub.f32 %v3291_v56, %v3302_v1 }
 0x43d   :  { %3307 = vst [vmem:[%s6472_s9] sm:$0xff] %v3305_v3 }
 0x440   :  { %v5086_v4 = vpop.eup %5085 }
 0x441   :  { %v3304_v5 = vmul.f32 0.6931472, %v5086_v4 }
 0x443   :  { %v3306_v6 = vsub.f32 %v3292_v59, %v3304_v5 }
 0x445   :  { %3308 = vst [vmem:[%s6472_s9 + $0x8] sm:$0xff] %v3306_v6 }

</bundles_post_ra>
